<compile_context>
chip_gen: v5e
topology: v5e:2x2
jax: 0.10.0
libtpu: 0.0.40
codegen_flags: <defaults>
</compile_context>

<pallas_src>
import functools
import math

import jax
import jax.numpy as jnp
from jax.experimental import pallas as pl
from jax.experimental.pallas import tpu as pltpu


def _sq_sdpa_kernel(scale, h_ref, enc_ref, wq_ref, bq_ref, wkT_ref, bk_ref,
                    out_ref, alpha_ref):
    # h:    (B, H)      decoder hidden state
    # enc:  (B, S, E)   encoder outputs, batch-major (transposed in wrapper)
    # wq:   (H, KQ)   bq:  (1, KQ)
    # wkT:  (KQ, E)   bk:  (1, KQ)   (K-projection weight, (out,in) orientation)
    h = h_ref[...]
    enc = enc_ref[...]

    # q = linearQ(hidden)                                   (B, KQ)   [MXU]
    q = jnp.dot(h, wq_ref[...], preferred_element_type=jnp.float32) + bq_ref[...]

    # Fold linearK into the score computation (K never materialized):
    #   score[b, s] = q[b] . (enc[b, s] @ Wk + bk)
    #               = enc[b, s] . (q[b] @ Wk^T) + q[b] . bk
    g = jnp.dot(q, wkT_ref[...], preferred_element_type=jnp.float32)   # (B, E) [MXU]
    c = jnp.sum(q * bk_ref[...], axis=-1, keepdims=True)               # (B, 1)

    scores = (jnp.sum(enc * g[:, None, :], axis=-1) + c) * scale       # (B, S)

    # softmax over the key axis S (numerically stable)
    m = jnp.max(scores, axis=-1, keepdims=True)
    p = jnp.exp(scores - m)
    alpha = p / jnp.sum(p, axis=-1, keepdims=True)                     # (B, S)
    alpha_ref[...] = alpha

    # attended[b, e] = sum_s alpha[b, s] * enc[b, s, e]
    out_ref[...] = jnp.sum(enc * alpha[:, :, None], axis=1)            # (B, E)


def single_query_sdpa(hidden, encoder_outputs, wq, bq, wk, bk, *, kq_dim):
    """Replicates SingleQueryScaledDotProductAttention.forward.

    hidden:          (B, H)    f32
    encoder_outputs: (S, B, E) f32
    wq: (H, KQ), bq: (KQ,)     -- linearQ params (input-major weight)
    wk: (E, KQ), bk: (KQ,)     -- linearK params (input-major weight)
    returns (attended (B, E) f32, alpha (B, S) f32)
    """
    B, _ = hidden.shape
    S, _, E = encoder_outputs.shape
    KQ = kq_dim

    # Layout plumbing in the wrapper (not compute): batch-major encoder
    # outputs and (out, in)-oriented K weight so the kernel uses plain
    # row-major MXU matmuls with no in-kernel transposes.
    enc_bse = jnp.transpose(encoder_outputs, (1, 0, 2))    # (B, S, E)
    wkT = jnp.transpose(wk)                                # (KQ, E)
    bq2 = bq.reshape(1, KQ)
    bk2 = bk.reshape(1, KQ)

    scale = 1.0 / math.sqrt(KQ)
    kernel = functools.partial(_sq_sdpa_kernel, scale)

    vmem = pltpu.MemorySpace.VMEM
    attended, alpha = pl.pallas_call(
        kernel,
        out_shape=(
            jax.ShapeDtypeStruct((B, E), jnp.float32),
            jax.ShapeDtypeStruct((B, S), jnp.float32),
        ),
        in_specs=[pl.BlockSpec(memory_space=vmem)] * 6,
        out_specs=(
            pl.BlockSpec(memory_space=vmem),
            pl.BlockSpec(memory_space=vmem),
        ),
    )(hidden, enc_bse, wq, bq2, wkT, bk2)
    return attended, alpha


def _reference(hidden, encoder_outputs, wq, bq, wk, bk, kq_dim):
    """Pure-JAX mirror of the PyTorch forward."""
    q = hidden @ wq + bq                                              # (B, KQ)
    k = jnp.einsum('sbe,ek->sbk', encoder_outputs, wk) + bk           # (S, B, KQ)
    scores = jnp.einsum('bk,sbk->bs', q, k) / math.sqrt(kq_dim)       # (B, S)
    alpha = jax.nn.softmax(scores, axis=-1)
    attended = jnp.einsum('bs,sbe->be', alpha, encoder_outputs)       # (B, E)
    return attended, alpha


if __name__ == "__main__":
    key = jax.random.PRNGKey(0)
    kh, ke, kwq, kbq, kwk, kbk = jax.random.split(key, 6)

    # Small but lane-dense shapes: all trailing dims are multiples of 128,
    # B = 8 fills the sublanes of a vreg.
    B = 8            # batch
    DEC_HID = 128    # hidden.shape[1]
    ENC_HID = 64     # enc_hid_dim; encoder feature dim E = 2 * enc_hid_dim
    S = 128          # source sequence length
    KQ = 256         # kq_dim
    E = 2 * ENC_HID

    hidden = jax.random.normal(kh, (B, DEC_HID), dtype=jnp.float32)
    encoder_outputs = jax.random.normal(ke, (S, B, E), dtype=jnp.float32)
    wq = 0.1 * jax.random.normal(kwq, (DEC_HID, KQ), dtype=jnp.float32)
    bq = 0.1 * jax.random.normal(kbq, (KQ,), dtype=jnp.float32)
    wk = 0.1 * jax.random.normal(kwk, (E, KQ), dtype=jnp.float32)
    bk = 0.1 * jax.random.normal(kbk, (KQ,), dtype=jnp.float32)

    attended, alpha = single_query_sdpa(
        hidden, encoder_outputs, wq, bq, wk, bk, kq_dim=KQ)
    jax.block_until_ready((attended, alpha))

    # Same shape contract as the PyTorch asserts.
    assert attended.shape == (hidden.shape[0], encoder_outputs.shape[2])
    assert alpha.shape == (hidden.shape[0], encoder_outputs.shape[0])
    assert attended.dtype == jnp.float32 and alpha.dtype == jnp.float32

    ref_out, ref_alpha = _reference(
        hidden, encoder_outputs, wq, bq, wk, bk, KQ)

    err_out = float(jnp.max(jnp.abs(attended - ref_out)))
    err_alpha = float(jnp.max(jnp.abs(alpha - ref_alpha)))
    row_sum_err = float(jnp.max(jnp.abs(jnp.sum(alpha, axis=-1) - 1.0)))
    assert err_out < 1e-4, f"attended mismatch: {err_out}"
    assert err_alpha < 1e-4, f"alpha mismatch: {err_alpha}"
    assert row_sum_err < 1e-4, f"alpha rows not normalized: {row_sum_err}"

    print("KERNEL_OK")
</pallas_src>

<mosaic_0001>
module attributes {stable_mosaic.version = 11 : i64} {
  func.func @_sq_sdpa_kernel(%arg0: memref<8x128xf32, #tpu.memory_space<vmem>>, %arg1: memref<8x128x128xf32, #tpu.memory_space<vmem>>, %arg2: memref<128x256xf32, #tpu.memory_space<vmem>>, %arg3: memref<1x256xf32, #tpu.memory_space<vmem>>, %arg4: memref<256x128xf32, #tpu.memory_space<vmem>>, %arg5: memref<1x256xf32, #tpu.memory_space<vmem>>, %arg6: memref<8x128xf32, #tpu.memory_space<vmem>>, %arg7: memref<8x128xf32, #tpu.memory_space<vmem>>) attributes {dimension_semantics = [], scalar_prefetch = 0 : i64, scratch_operands = 0 : i64, tpu.core_type = #tpu.core_type<tc>} {
    %c0 = arith.constant 0 : index
    %c0_0 = arith.constant 0 : index
    %0 = vector.load %arg0[%c0, %c0_0] : memref<8x128xf32, #tpu.memory_space<vmem>>, vector<8x128xf32>
    %c0_1 = arith.constant 0 : index
    %c0_2 = arith.constant 0 : index
    %c0_3 = arith.constant 0 : index
    %1 = vector.load %arg1[%c0_1, %c0_2, %c0_3] : memref<8x128x128xf32, #tpu.memory_space<vmem>>, vector<8x128x128xf32>
    %c0_4 = arith.constant 0 : index
    %c0_5 = arith.constant 0 : index
    %2 = vector.load %arg2[%c0_4, %c0_5] : memref<128x256xf32, #tpu.memory_space<vmem>>, vector<128x256xf32>
    %cst = arith.constant dense<0.000000e+00> : vector<8x256xf32>
    %3 = tpu.matmul %0, %2, %cst {dimension_numbers = #tpu.dot_dimension_numbers<[1], [0], [0], [1], [0, 0, 1, 1], [], []>} : vector<8x128xf32>, vector<128x256xf32>, vector<8x256xf32> -> vector<8x256xf32>
    %c0_6 = arith.constant 0 : index
    %c0_7 = arith.constant 0 : index
    %4 = vector.load %arg3[%c0_6, %c0_7] : memref<1x256xf32, #tpu.memory_space<vmem>>, vector<1x256xf32>
    %5 = vector.broadcast %4 : vector<1x256xf32> to vector<8x256xf32>
    %6 = arith.addf %3, %5 : vector<8x256xf32>
    %c0_8 = arith.constant 0 : index
    %c0_9 = arith.constant 0 : index
    %7 = vector.load %arg4[%c0_8, %c0_9] : memref<256x128xf32, #tpu.memory_space<vmem>>, vector<256x128xf32>
    %cst_10 = arith.constant dense<0.000000e+00> : vector<8x128xf32>
    %8 = tpu.matmul %6, %7, %cst_10 {dimension_numbers = #tpu.dot_dimension_numbers<[1], [0], [0], [1], [0, 0, 1, 1], [], []>} : vector<8x256xf32>, vector<256x128xf32>, vector<8x128xf32> -> vector<8x128xf32>
    %c0_11 = arith.constant 0 : index
    %c0_12 = arith.constant 0 : index
    %9 = vector.load %arg5[%c0_11, %c0_12] : memref<1x256xf32, #tpu.memory_space<vmem>>, vector<1x256xf32>
    %10 = vector.broadcast %9 : vector<1x256xf32> to vector<8x256xf32>
    %11 = arith.mulf %6, %10 : vector<8x256xf32>
    %cst_13 = arith.constant dense<0.000000e+00> : vector<8xf32>
    %12 = vector.multi_reduction <add>, %11, %cst_13 [1] : vector<8x256xf32> to vector<8xf32>
    %13 = vector.shape_cast %12 : vector<8xf32> to vector<8x1xf32>
    %14 = vector.shape_cast %8 : vector<8x128xf32> to vector<8x1x128xf32>
    %15 = vector.broadcast %14 : vector<8x1x128xf32> to vector<8x128x128xf32>
    %16 = arith.mulf %1, %15 : vector<8x128x128xf32>
    %cst_14 = arith.constant dense<0.000000e+00> : vector<8x128xf32>
    %17 = vector.multi_reduction <add>, %16, %cst_14 [2] : vector<8x128x128xf32> to vector<8x128xf32>
    %18 = vector.broadcast %13 : vector<8x1xf32> to vector<8x128xf32>
    %19 = arith.addf %17, %18 : vector<8x128xf32>
    %cst_15 = arith.constant 6.250000e-02 : f32
    %20 = vector.broadcast %cst_15 : f32 to vector<8x128xf32>
    %21 = arith.mulf %19, %20 : vector<8x128xf32>
    %cst_16 = arith.constant dense<0xFF800000> : vector<8xf32>
    %22 = vector.multi_reduction <maximumf>, %21, %cst_16 [1] : vector<8x128xf32> to vector<8xf32>
    %23 = vector.shape_cast %22 : vector<8xf32> to vector<8x1xf32>
    %24 = vector.broadcast %23 : vector<8x1xf32> to vector<8x128xf32>
    %25 = arith.subf %21, %24 : vector<8x128xf32>
    %26 = math.exp %25 : vector<8x128xf32>
    %cst_17 = arith.constant dense<0.000000e+00> : vector<8xf32>
    %27 = vector.multi_reduction <add>, %26, %cst_17 [1] : vector<8x128xf32> to vector<8xf32>
    %28 = vector.shape_cast %27 : vector<8xf32> to vector<8x1xf32>
    %29 = vector.broadcast %28 : vector<8x1xf32> to vector<8x128xf32>
    %30 = arith.divf %26, %29 : vector<8x128xf32>
    %c0_18 = arith.constant 0 : index
    %c0_19 = arith.constant 0 : index
    %31 = vector.load %arg7[%c0_18, %c0_19] : memref<8x128xf32, #tpu.memory_space<vmem>>, vector<8x128xf32>
    tpu.vector_store %arg7[%c0_18, %c0_19], %30 {strides = array<i32>} : memref<8x128xf32, #tpu.memory_space<vmem>>, vector<8x128xf32>,
    %32 = vector.shape_cast %30 : vector<8x128xf32> to vector<8x128x1xf32>
    %33 = vector.broadcast %32 : vector<8x128x1xf32> to vector<8x128x128xf32>
    %34 = arith.mulf %1, %33 : vector<8x128x128xf32>
    %cst_20 = arith.constant dense<0.000000e+00> : vector<8x128xf32>
    %35 = vector.multi_reduction <add>, %34, %cst_20 [1] : vector<8x128x128xf32> to vector<8x128xf32>
    %c0_21 = arith.constant 0 : index
    %c0_22 = arith.constant 0 : index
    %36 = vector.load %arg6[%c0_21, %c0_22] : memref<8x128xf32, #tpu.memory_space<vmem>>, vector<8x128xf32>
    tpu.vector_store %arg6[%c0_21, %c0_22], %35 {strides = array<i32>} : memref<8x128xf32, #tpu.memory_space<vmem>>, vector<8x128xf32>,
    return
  }
}

</mosaic_0001>

<bundles_post_ra>
// kernel: tpu_custom_call.1
= control target key start
LH: loop header
LB: loop body
LE: loop exit
PB: predicated region body
PF: predicated region fallthrough
CT: control target
= control target key end

     0   :  { %13 = vsyncpa [#allocation3], 0  ;;  %s9073_s0 = inlined_call_operand.hbm [shape: f32[8,128], index: 0, kind: input, shape index: {}]   ;;  %s9074_s1 = inlined_call_operand.hbm [shape: f32[8,128,128], index: 1, kind: input, shape index: {}]   ;;  %s9075_s2 = inlined_call_operand.hbm [shape: f32[128,256], index: 2, kind: input, shape index: {}]   ;;  %s9076_s3 = inlined_call_operand.vmem [shape: f32[1,256], index: 3, kind: input, shape index: {}]   ;;  %s9077_s4 = inlined_call_operand.hbm [shape: f32[256,128], index: 4, kind: input, shape index: {}]   ;;  %s9078_s5 = inlined_call_operand.vmem [shape: f32[1,256], index: 5, kind: input, shape index: {}]   ;;  %s9079_s6 = inlined_call_operand.hbm [shape: f32[8,128], index: 6, kind: output, shape index: {0}]   ;;  %s9080_s7 = inlined_call_operand.hbm [shape: f32[8,128], index: 7, kind: output, shape index: {1}]  }
   0x1   :  { %14 = vsyncpa [#allocation6], 0 }
   0x2   :  { %15 = vsyncpa [#allocation9], 0 }
   0x3   :  { %16 = vsyncpa [#allocation4], 0  ;;  %s33_s26 = sshll.u32 %s9074_s1, 4  ;;  %s34_s26 = int_to_ptr.hbm [resolvable:$true] %s33_s26 }
   0x4   :  { %17 = vsyncpa [#allocation12], 0  ;;  %s5109_s27 = smov [#allocation5]   ;;  %s23_s8 = sshll.u32 %s9073_s0, 4  ;;  %s24_s8 = int_to_ptr.hbm [resolvable:$true] %s23_s8 }
   0x5   :  { %s35_s28 = sshll.u32 %s5109_s27, 4  ;;  %s5110_s9 = smov 128   ;;  %s36_s28 = int_to_ptr.vmem [resolvable:$true] %s35_s28 }
   0x6   :  { %s5111_s10 = smov 8   ;;  %s5112_s11 = smov [#allocation2]  }
   0x7   :  { %41 = dma.hbm_to_vmem [thread:$0]  %s34_s26, 16384, %s36_s28, [#allocation6], %s5110_s9, %s5110_s9, %s5111_s10  }
   0x8   :  { %s25_s12 = sshll.u32 %s5112_s11, 4  ;;  %s46_s15 = sshll.u32 %s9075_s2, 4  ;;  %s26_s12 = int_to_ptr.vmem [resolvable:$true] %s25_s12  ;;  %s47_s15 = int_to_ptr.hbm [resolvable:$true] %s46_s15 }
   0x9   :  { %28 = dma.hbm_to_vmem [thread:$0]  %s24_s8, 128, %s26_s12, [#allocation3]  }
   0xa   :  { %s5113_s1 = smov [#allocation7]   ;;  %s61_s0 = sshll.u32 %s9077_s4, 4  ;;  %s62_s0 = int_to_ptr.hbm [resolvable:$true] %s61_s0 }
   0xb   :  { %s48_s16 = sshll.u32 %s5113_s1, 4  ;;  %s5114_s19 = smov 256   ;;  %s49_s16 = int_to_ptr.vmem [resolvable:$true] %s48_s16 }
   0xc   :  { %s5115_s20 = smov 16   ;;  %s5116_s21 = smov [#allocation8]  }
   0xd   :  { %54 = dma.hbm_to_vmem [thread:$0]  %s47_s15, 4096, %s49_s16, [#allocation6], %s5114_s19, %s5114_s19, %s5115_s20  }
   0xe   :  { %s63_s22 = sshll.u32 %s5116_s21, 4  ;;  %s64_s22 = int_to_ptr.vmem [resolvable:$true] %s63_s22 }
   0xf   :  { %69 = dma.hbm_to_vmem [thread:$0]  %s62_s0, 4096, %s64_s22, [#allocation9], %s5110_s9, %s5110_s9, %s5111_s10  }
  0x10   :  { %5099 = dma.done.wait [#allocation3], 128  }
  0x11   :  { %5100 = vsyncadd [#allocation3], 4294967168 }
  0x12   :  { %5101 = dma.done.wait [#allocation6], 20480  }
  0x13   :  { %5102 = vsyncadd [#allocation6], 4294946816 }
  0x14   :  { %5103 = dma.done.wait [#allocation9], 4096  }
  0x15   :  { %5104 = vsyncadd [#allocation9], 4294963200  ;;  %v247_v0 = vld [vmem:[#allocation7 + $0xf0] sm:$0xff]  ;;  %v248_v1 = vld [vmem:[#allocation7 + $0xf8] sm:$0xff]  ;;  %vm1576_vm0 = vcmask 130112   ;;  %vm1580_vm1 = vcmask 195712  }
  0x16   :  { %v245_v2 = vld [vmem:[#allocation7 + $0xe0] sm:$0xff]  ;;  %255 = vmatpush.msra.mxu0 %v247_v0  ;;  %275 = vmatpush.msra.mxu1 %v248_v1  ;;  %v246_v3 = vld [vmem:[#allocation7 + $0xe8] sm:$0xff]  ;;  %v243_v4 = vld [vmem:[#allocation7 + $0xd0] sm:$0xff]  ;;  %vm1584_vm2 = vcmask 261312   ;;  %vm9359_vm3 = vcmask 326912   ;;  %vm9358_vm4 = vcmask 392512  }
  0x17   :  { %v244_v5 = vld [vmem:[#allocation7 + $0xd8] sm:$0xff]  ;;  %v241_v6 = vld [vmem:[#allocation7 + $0xc0] sm:$0xff]  ;;  %v242_v7 = vld [vmem:[#allocation7 + $0xc8] sm:$0xff]  ;;  %vm1596_vm5 = vcmask 458112   ;;  %vm1600_vm6 = vcmask 523712   ;;  %vm1604_vm7 = vcmask 589312  }
  0x18   :  { %256 = vmatpush.msra.mxu0 %v245_v2  ;;  %276 = vmatpush.msra.mxu1 %v246_v3  ;;  %v239_v8 = vld [vmem:[#allocation7 + $0xb0] sm:$0xff]  ;;  %v240_v9 = vld [vmem:[#allocation7 + $0xb8] sm:$0xff]  ;;  %v237_v10 = vld [vmem:[#allocation7 + $0xa0] sm:$0xff]  ;;  %vm9213_vm8 = vcmask 654912   ;;  %vm9211_vm9 = vcmask 720512   ;;  %vm9212_vm10 = vcmask 786112  }
  0x19   :  { %v238_v11 = vld [vmem:[#allocation7 + $0xa8] sm:$0xff]  ;;  %v235_v12 = vld [vmem:[#allocation7 + $0x90] sm:$0xff]  ;;  %v236_v13 = vld [vmem:[#allocation7 + $0x98] sm:$0xff]  ;;  %vm9215_vm11 = vcmask 851712   ;;  %vm1624_vm12 = vcmask 917312   ;;  %vm1628_vm13 = vcmask 982912  }
  0x1a   :  { %257 = vmatpush.msra.mxu0 %v243_v4  ;;  %277 = vmatpush.msra.mxu1 %v244_v5  ;;  %v310_v14 = vld [vmem:[#allocation8 + $0x78] sm:$0xff]  ;;  %v309_v16 = vld [vmem:[#allocation8 + $0x70] sm:$0xff]  ;;  %v233_v17 = vld [vmem:[#allocation7 + $0x80] sm:$0xff]  ;;  %vm1632_vm14 = vcmask 1048512   ;;  %vm9210_vm15 = vcmask 1041409   ;;  %s4524_s27 = sshll.u32 %s9080_s7, 4  ;;  %s4525_s27 = int_to_ptr.hbm [resolvable:$true] %s4524_s27 }
  0x1b   :  { %v326_v15 = vld [vmem:[#allocation8 + $0xf8] sm:$0xff]  ;;  %v234_v18 = vld [vmem:[#allocation7 + $0x88] sm:$0xff]  ;;  %327 = vmatpush.msra.mxu2 %v310_v14  ;;  %v325_v19 = vld [vmem:[#allocation8 + $0xf0] sm:$0xff]  ;;  %s5119_s7 = smov [#allocation10]   ;;  %s4513_s8 = sshll.u32 %s9079_s6, 4  ;;  %s4514_s8 = int_to_ptr.hbm [resolvable:$true] %s4513_s8 }
  0x1c   :  { %258 = vmatpush.msra.mxu0 %v241_v6  ;;  %278 = vmatpush.msra.mxu1 %v242_v7  ;;  %v308_v20 = vld [vmem:[#allocation8 + $0x68] sm:$0xff]  ;;  %v231_v22 = vld [vmem:[#allocation7 + $0x70] sm:$0xff]  ;;  %v232_v23 = vld [vmem:[#allocation7 + $0x78] sm:$0xff]  ;;  %s4511_s28 = sshll.u32 %s5119_s7, 4  ;;  %s4512_s28 = int_to_ptr.vmem [resolvable:$true] %s4511_s28 }
  0x1d   :  { %347 = vmatpush.msra.mxu3 %v326_v15  ;;  %v324_v21 = vld [vmem:[#allocation8 + $0xe8] sm:$0xff]  ;;  %328 = vmatpush.msra.mxu2 %v309_v16  ;;  %v307_v24 = vld [vmem:[#allocation8 + $0x60] sm:$0xff]  ;;  %v306_v28 = vld [vmem:[#allocation8 + $0x58] sm:$0xff] }
  0x1e   :  { %259 = vmatpush.msra.mxu0 %v239_v8  ;;  %279 = vmatpush.msra.mxu1 %v240_v9  ;;  %v323_v25 = vld [vmem:[#allocation8 + $0xe0] sm:$0xff]  ;;  %v230_v27 = vld [vmem:[#allocation7 + $0x68] sm:$0xff]  ;;  %v322_v29 = vld [vmem:[#allocation8 + $0xd8] sm:$0xff] }
  0x1f   :  { %348 = vmatpush.msra.mxu3 %v325_v19  ;;  %v229_v26 = vld [vmem:[#allocation7 + $0x60] sm:$0xff]  ;;  %329 = vmatpush.msra.mxu2 %v308_v20  ;;  %v227_v30 = vld [vmem:[#allocation7 + $0x50] sm:$0xff]  ;;  %v228_v31 = vld [vmem:[#allocation7 + $0x58] sm:$0xff] }
  0x20   :  { %260 = vmatpush.msra.mxu0 %v237_v10  ;;  %280 = vmatpush.msra.mxu1 %v238_v11  ;;  %v305_v32 = vld [vmem:[#allocation8 + $0x50] sm:$0xff]  ;;  %v225_v34 = vld [vmem:[#allocation7 + $0x40] sm:$0xff]  ;;  %v226_v35 = vld [vmem:[#allocation7 + $0x48] sm:$0xff] }
  0x21   :  { %349 = vmatpush.msra.mxu3 %v324_v21  ;;  %330 = vmatpush.msra.mxu2 %v307_v24  ;;  %v321_v33 = vld [vmem:[#allocation8 + $0xd0] sm:$0xff]  ;;  %v304_v36 = vld [vmem:[#allocation8 + $0x48] sm:$0xff]  ;;  %v224_v39 = vld [vmem:[#allocation7 + $0x38] sm:$0xff] }
  0x22   :  { %261 = vmatpush.msra.mxu0 %v235_v12  ;;  %281 = vmatpush.msra.mxu1 %v236_v13  ;;  %v320_v37 = vld [vmem:[#allocation8 + $0xc8] sm:$0xff]  ;;  %v223_v38 = vld [vmem:[#allocation7 + $0x30] sm:$0xff]  ;;  %v303_v40 = vld [vmem:[#allocation8 + $0x40] sm:$0xff] }
  0x23   :  { %350 = vmatpush.msra.mxu3 %v323_v25  ;;  %331 = vmatpush.msra.mxu2 %v306_v28  ;;  %v319_v41 = vld [vmem:[#allocation8 + $0xc0] sm:$0xff]  ;;  %v222_v43 = vld [vmem:[#allocation7 + $0x28] sm:$0xff]  ;;  %v302_v44 = vld [vmem:[#allocation8 + $0x38] sm:$0xff] }
  0x24   :  { %262 = vmatpush.msra.mxu0 %v233_v17  ;;  %282 = vmatpush.msra.mxu1 %v234_v18  ;;  %v221_v42 = vld [vmem:[#allocation7 + $0x20] sm:$0xff]  ;;  %v318_v45 = vld [vmem:[#allocation8 + $0xb8] sm:$0xff]  ;;  %v219_v46 = vld [vmem:[#allocation7 + $0x10] sm:$0xff] }
  0x25   :  { %351 = vmatpush.msra.mxu3 %v322_v29  ;;  %332 = vmatpush.msra.mxu2 %v305_v32  ;;  %v220_v47 = vld [vmem:[#allocation7 + $0x18] sm:$0xff]  ;;  %v301_v48 = vld [vmem:[#allocation8 + $0x30] sm:$0xff]  ;;  %v217_v50 = vld [vmem:[#allocation7] sm:$0xff] }
  0x26   :  { %263 = vmatpush.msra.mxu0 %v231_v22  ;;  %283 = vmatpush.msra.mxu1 %v232_v23  ;;  %v317_v49 = vld [vmem:[#allocation8 + $0xb0] sm:$0xff]  ;;  %v218_v51 = vld [vmem:[#allocation7 + $0x8] sm:$0xff]  ;;  %v88_v52 = vld [vmem:[#allocation2] sm:$0xff] }
  0x27   :  { %352 = vmatpush.msra.mxu3 %v321_v33  ;;  %333 = vmatpush.msra.mxu2 %v304_v36  ;;  %v300_v53 = vld [vmem:[#allocation8 + $0x28] sm:$0xff]  ;;  %v299_v55 = vld [vmem:[#allocation8 + $0x20] sm:$0xff]  ;;  %v298_v57 = vld [vmem:[#allocation8 + $0x18] sm:$0xff] }
  0x28   :  { %264 = vmatpush.msra.mxu0 %v229_v26  ;;  %284 = vmatpush.msra.mxu1 %v230_v27  ;;  %v316_v54 = vld [vmem:[#allocation8 + $0xa8] sm:$0xff]  ;;  %v315_v56 = vld [vmem:[#allocation8 + $0xa0] sm:$0xff]  ;;  %v314_v58 = vld [vmem:[#allocation8 + $0x98] sm:$0xff] }
  0x29   :  { %353 = vmatpush.msra.mxu3 %v320_v37  ;;  %334 = vmatpush.msra.mxu2 %v303_v40  ;;  %v297_v59 = vld [vmem:[#allocation8 + $0x10] sm:$0xff]  ;;  %v296_v61 = vld [vmem:[#allocation8 + $0x8] sm:$0xff]  ;;  %v295_v63 = vld [vmem:[#allocation8] sm:$0xff] }
  0x2a   :  { %265 = vmatpush.msra.mxu0 %v227_v30  ;;  %285 = vmatpush.msra.mxu1 %v228_v31  ;;  %v313_v60 = vld [vmem:[#allocation8 + $0x90] sm:$0xff]  ;;  %v312_v62 = vld [vmem:[#allocation8 + $0x88] sm:$0xff]  ;;  %v311_v0 = vld [vmem:[#allocation8 + $0x80] sm:$0xff] }
  0x2b   :  { %354 = vmatpush.msra.mxu3 %v319_v41  ;;  %335 = vmatpush.msra.mxu2 %v302_v44  ;;  %v249_v1 = vld [vmem:[%s9076_s3] sm:$0x3]  ;;  %v90_v19 = vld [vmem:[#allocation5 + $0x8] sm:$0xff]  ;;  %v89_v20 = vld [vmem:[#allocation5] sm:$0xff]  ;;  %s5118_s3 = smov [#allocation11]  }
  0x2c   :  { %266 = vmatpush.msra.mxu0 %v225_v34  ;;  %286 = vmatpush.msra.mxu1 %v226_v35  ;;  %v367_v2 = vld [vmem:[%s9078_s5] sm:$0x3]  ;;  %v251_v3 = vperm.slane %v249_v1, 0  ;;  %v252_v4 = vperm.slane %v249_v1, 1  ;;  %v93_v24 = vld [vmem:[#allocation5 + $0x20] sm:$0xff]  ;;  %v91_v25 = vld [vmem:[#allocation5 + $0x10] sm:$0xff] }
  0x2d   :  { %355 = vmatpush.msra.mxu3 %v318_v45  ;;  %336 = vmatpush.msra.mxu2 %v301_v48  ;;  %v369_v5 = vperm.slane %v367_v2, 0  ;;  %v370_v6 = vperm.slane %v367_v2, 1  ;;  %v92_v17 = vld [vmem:[#allocation5 + $0x18] sm:$0xff]  ;;  %v94_v26 = vld [vmem:[#allocation5 + $0x28] sm:$0xff]  ;;  %v95_v31 = vld [vmem:[#allocation5 + $0x30] sm:$0xff]  ;;  %s4522_s5 = sshll.u32 %s5118_s3, 4  ;;  %s4523_s5 = int_to_ptr.vmem [resolvable:$true] %s4522_s5 }
  0x2e   :  { %267 = vmatpush.msra.mxu0 %v223_v38  ;;  %287 = vmatpush.msra.mxu1 %v224_v39  ;;  %v96_v30 = vld [vmem:[#allocation5 + $0x38] sm:$0xff]  ;;  %v97_v32 = vld [vmem:[#allocation5 + $0x40] sm:$0xff]  ;;  %v99_v36 = vld [vmem:[#allocation5 + $0x50] sm:$0xff] }
  0x2f   :  { %356 = vmatpush.msra.mxu3 %v317_v49  ;;  %337 = vmatpush.msra.mxu2 %v300_v53  ;;  %v98_v37 = vld [vmem:[#allocation5 + $0x48] sm:$0xff]  ;;  %v100_v38 = vld [vmem:[#allocation5 + $0x58] sm:$0xff]  ;;  %v103_v44 = vld [vmem:[#allocation5 + $0x70] sm:$0xff] }
  0x30   :  { %268 = vmatpush.msra.mxu0 %v221_v42  ;;  %288 = vmatpush.msra.mxu1 %v222_v43  ;;  %v102_v42 = vld [vmem:[#allocation5 + $0x68] sm:$0xff]  ;;  %v101_v43 = vld [vmem:[#allocation5 + $0x60] sm:$0xff] }
  0x31   :  { %357 = vmatpush.msra.mxu3 %v316_v54  ;;  %338 = vmatpush.msra.mxu2 %v299_v55 }
  0x32   :  { %269 = vmatpush.msra.mxu0 %v219_v46  ;;  %289 = vmatpush.msra.mxu1 %v220_v47 }
  0x33   :  { %358 = vmatpush.msra.mxu3 %v315_v56  ;;  %339 = vmatpush.msra.mxu2 %v298_v57  ;;  %v108_v56 = vld [vmem:[#allocation5 + $0x98] sm:$0xff]  ;;  %v107_v57 = vld [vmem:[#allocation5 + $0x90] sm:$0xff] }
  0x34   :  { %270 = vmatpush.msra.mxu0 %v217_v50  ;;  %290 = vmatpush.msra.mxu1 %v218_v51  ;;  %v105_v50 = vld [vmem:[#allocation5 + $0x80] sm:$0xff]  ;;  %v104_v51 = vld [vmem:[#allocation5 + $0x78] sm:$0xff] }
  0x35   :  { %271 = vmatmul.f32.vlgmr.msra.gmra.mxu0 %v88_v52  ;;  %291 = vmatmul.f32.vlgmr.msra.gmra.mxu1 %v88_v52  ;;  %v106_v52 = vld [vmem:[#allocation5 + $0x88] sm:$0xff] }
  0x36   :  { %359 = vmatpush.msra.mxu3 %v314_v58  ;;  %340 = vmatpush.msra.mxu2 %v297_v59  ;;  %v109_v58 = vld [vmem:[#allocation5 + $0xa0] sm:$0xff] }
  0x38   :  { %360 = vmatpush.msra.mxu3 %v313_v60  ;;  %341 = vmatpush.msra.mxu2 %v296_v61 }
  0x3a   :  { %361 = vmatpush.msra.mxu3 %v312_v62  ;;  %342 = vmatpush.msra.mxu2 %v295_v63  ;;  %v111_v62 = vld [vmem:[#allocation5 + $0xb0] sm:$0xff]  ;;  %v110_v63 = vld [vmem:[#allocation5 + $0xa8] sm:$0xff] }
  0x3c   :  { %362 = vmatpush.msra.mxu3 %v311_v0  ;;  %v112_v0 = vld [vmem:[#allocation5 + $0xb8] sm:$0xff] }
  0xb2   :  { %v272_v7 = vpop.f32.mrf.mxu0  ;;  %v292_v8 = vpop.f32.mrf.mxu1 }
  0xb3   :  { %v273_v9 = vadd.f32 %v272_v7, %v251_v3  ;;  %v293_v10 = vadd.f32 %v292_v8, %v252_v4  ;;  %v114_v4 = vld [vmem:[#allocation5 + $0xc8] sm:$0xff] }
  0xb5   :  { %343 = vmatmul.f32.vlgmr.msra.gmra.mxu2 %v273_v9  ;;  %363 = vmatmul.f32.vlgmr.msra.gmra.mxu3 %v293_v10  ;;  %v373_v11 = vmul.f32 %v369_v5, %v273_v9  ;;  %v374_v12 = vmul.f32 %v370_v6, %v293_v10  ;;  %v113_v5 = vld [vmem:[#allocation5 + $0xc0] sm:$0xff]  ;;  %v115_v6 = vld [vmem:[#allocation5 + $0xd0] sm:$0xff] }
  0xb6   :  { %v117_v10 = vld [vmem:[#allocation5 + $0xe0] sm:$0xff] }
  0xb7   :  { %v375_v13 = vadd.f32 %v374_v12, %v373_v11  ;;  %v116_v11 = vld [vmem:[#allocation5 + $0xd8] sm:$0xff]  ;;  %v118_v12 = vld [vmem:[#allocation5 + $0xe8] sm:$0xff] }
  0xb9   :  { %376 = vadd.xlane.f32.xlu0 %v375_v13 }
 0x138   :  { %v344_v14 = vpop.f32.mrf.mxu2  ;;  %v364_v15 = vpop.f32.mrf.mxu3 }
 0x139   :  { %v5178_v16 = vadd.f32 %v364_v15, %v344_v14 }
 0x13b   :  { %v386_v18 = vperm.slane %v5178_v16, 0  ;;  %v379_v45 = vrot.slane %v5178_v16, 1  ;;  %v380_v14 = vrot.slane %v5178_v16, 2 }
 0x13d   :  { %v405_v21 = vmul.f32 %v386_v18, %v92_v17  ;;  %v403_v22 = vmul.f32 %v386_v18, %v90_v19  ;;  %v402_v23 = vmul.f32 %v386_v18, %v89_v20  ;;  %v406_v27 = vmul.f32 %v386_v18, %v93_v24  ;;  %v120_v19 = vld [vmem:[#allocation5 + $0xf8] sm:$0xff]  ;;  %v119_v20 = vld [vmem:[#allocation5 + $0xf0] sm:$0xff] }
 0x13e   :  { %v404_v28 = vmul.f32 %v386_v18, %v91_v25  ;;  %v407_v29 = vmul.f32 %v386_v18, %v94_v26  ;;  %v409_v33 = vmul.f32 %v386_v18, %v96_v30  ;;  %v408_v34 = vmul.f32 %v386_v18, %v95_v31  ;;  %v123_v25 = vld [vmem:[#allocation5 + $0x110] sm:$0xff]  ;;  %v122_v26 = vld [vmem:[#allocation5 + $0x108] sm:$0xff] }
 0x13f   :  { %536 = vadd.xlane.f32.xlu2 %v405_v21  ;;  %532 = vadd.xlane.f32.xlu1 %v403_v22  ;;  %v410_v35 = vmul.f32 %v386_v18, %v97_v32  ;;  %v412_v39 = vmul.f32 %v386_v18, %v99_v36  ;;  %v411_v40 = vmul.f32 %v386_v18, %v98_v37  ;;  %v387_v49 = vperm.slane %v379_v45, 0  ;;  %v121_v21 = vld [vmem:[#allocation5 + $0x100] sm:$0xff]  ;;  %v126_v31 = vld [vmem:[#allocation5 + $0x128] sm:$0xff]  ;;  %v131_v45 = vld [vmem:[#allocation5 + $0x150] sm:$0xff] }
 0x140   :  { %530 = vadd.xlane.f32.xlu0 %v402_v23  ;;  %v413_v41 = vmul.f32 %v386_v18, %v100_v38  ;;  %v415_v46 = vmul.f32 %v386_v18, %v102_v42  ;;  %v414_v47 = vmul.f32 %v386_v18, %v101_v43  ;;  %v416_v48 = vmul.f32 %v386_v18, %v103_v44  ;;  %v125_v32 = vld [vmem:[#allocation5 + $0x120] sm:$0xff]  ;;  %v128_v38 = vld [vmem:[#allocation5 + $0x138] sm:$0xff]  ;;  %v5183_v44 = vpop.xlane.xlu0 %376 }
 0x141   :  { %v418_v53 = vmul.f32 %v387_v49, %v105_v50  ;;  %v417_v54 = vmul.f32 %v386_v18, %v104_v51  ;;  %v419_v55 = vmul.f32 %v387_v49, %v106_v52  ;;  %v421_v59 = vmul.f32 %v387_v49, %v108_v56  ;;  %v129_v37 = vld [vmem:[#allocation5 + $0x140] sm:$0xff]  ;;  %v132_v43 = vld [vmem:[#allocation5 + $0x158] sm:$0xff]  ;;  %v135_v51 = vld [vmem:[#allocation5 + $0x170] sm:$0xff] }
 0x142   :  { %v420_v60 = vmul.f32 %v387_v49, %v107_v57  ;;  %v422_v61 = vmul.f32 %v387_v49, %v109_v58  ;;  %v424_v1 = vmul.f32 %v387_v49, %v111_v62  ;;  %v423_v2 = vmul.f32 %v387_v49, %v110_v63  ;;  %v138_v62 = vld [vmem:[#allocation5 + $0x188] sm:$0xff] }
 0x143   :  { %v425_v3 = vmul.f32 %v387_v49, %v112_v0  ;;  %v427_v7 = vmul.f32 %v387_v49, %v114_v4  ;;  %v426_v8 = vmul.f32 %v387_v49, %v113_v5  ;;  %v428_v9 = vmul.f32 %v387_v49, %v115_v6 }
 0x144   :  { %v430_v13 = vmul.f32 %v387_v49, %v117_v10  ;;  %v429_v15 = vmul.f32 %v387_v49, %v116_v11  ;;  %v431_v17 = vmul.f32 %v387_v49, %v118_v12  ;;  %v388_v18 = vperm.slane %v380_v14, 0  ;;  %v140_v10 = vld [vmem:[#allocation5 + $0x198] sm:$0xff]  ;;  %v142_v11 = vld [vmem:[#allocation5 + $0x1a8] sm:$0xff] }
 0x145   :  { %v433_v22 = vmul.f32 %v387_v49, %v120_v19  ;;  %v432_v23 = vmul.f32 %v387_v49, %v119_v20  ;;  %v381_v56 = vrot.slane %v5178_v16, 3  ;;  %v143_v20 = vld [vmem:[#allocation5 + $0x1b0] sm:$0xff] }
 0x146   :  { %v434_v24 = vmul.f32 %v388_v18, %v121_v21  ;;  %v448_v57 = vmul.f32 %v388_v18, %v135_v51  ;;  %v145_v21 = vld [vmem:[#allocation5 + $0x1c0] sm:$0xff]  ;;  %v152_v51 = vld [vmem:[#allocation5 + $0x1f8] sm:$0xff] }
 0x147   :  { %538 = vadd.xlane.f32.xlu2 %v406_v27  ;;  %534 = vadd.xlane.f32.xlu1 %v404_v28  ;;  %v124_v27 = vld [vmem:[#allocation5 + $0x118] sm:$0xff]  ;;  %v436_v28 = vmul.f32 %v388_v18, %v123_v25 }
 0x148   :  { %540 = vadd.xlane.f32.xlu0 %v407_v29  ;;  %v435_v29 = vmul.f32 %v388_v18, %v122_v26  ;;  %v437_v30 = vmul.f32 %v388_v18, %v124_v27  ;;  %v147_v26 = vld [vmem:[#allocation5 + $0x1d0] sm:$0xff] }
 0x14f   :  { %544 = vadd.xlane.f32.xlu2 %v409_v33  ;;  %542 = vadd.xlane.f32.xlu1 %v408_v34  ;;  %v127_v33 = vld [vmem:[#allocation5 + $0x130] sm:$0xff]  ;;  %v439_v34 = vmul.f32 %v388_v18, %v126_v31 }
 0x150   :  { %546 = vadd.xlane.f32.xlu0 %v410_v35  ;;  %v438_v35 = vmul.f32 %v388_v18, %v125_v32  ;;  %v440_v36 = vmul.f32 %v388_v18, %v127_v33 }
 0x157   :  { %550 = vadd.xlane.f32.xlu2 %v412_v39  ;;  %548 = vadd.xlane.f32.xlu1 %v411_v40  ;;  %v130_v39 = vld [vmem:[#allocation5 + $0x148] sm:$0xff]  ;;  %v442_v40 = vmul.f32 %v388_v18, %v129_v37 }
 0x158   :  { %552 = vadd.xlane.f32.xlu0 %v413_v41  ;;  %v441_v41 = vmul.f32 %v388_v18, %v128_v38  ;;  %v443_v42 = vmul.f32 %v388_v18, %v130_v39  ;;  %v149_v38 = vld [vmem:[#allocation5 + $0x1e0] sm:$0xff]  ;;  %v151_v39 = vld [vmem:[#allocation5 + $0x1f0] sm:$0xff] }
 0x15f   :  { %556 = vadd.xlane.f32.xlu2 %v415_v46  ;;  %554 = vadd.xlane.f32.xlu1 %v414_v47  ;;  %v133_v46 = vld [vmem:[#allocation5 + $0x160] sm:$0xff]  ;;  %v445_v47 = vmul.f32 %v388_v18, %v132_v43 }
 0x160   :  { %558 = vadd.xlane.f32.xlu0 %v416_v48  ;;  %v444_v48 = vmul.f32 %v388_v18, %v131_v45  ;;  %v446_v49 = vmul.f32 %v388_v18, %v133_v46 }
 0x167   :  { %562 = vadd.xlane.f32.xlu2 %v418_v53  ;;  %560 = vadd.xlane.f32.xlu1 %v417_v54  ;;  %v134_v54 = vld [vmem:[#allocation5 + $0x168] sm:$0xff] }
 0x168   :  { %564 = vadd.xlane.f32.xlu0 %v419_v55  ;;  %v136_v55 = vld [vmem:[#allocation5 + $0x178] sm:$0xff]  ;;  %v447_v58 = vmul.f32 %v388_v18, %v134_v54  ;;  %v154_v54 = vld [vmem:[#allocation5 + $0x208] sm:$0xff] }
 0x16f   :  { %568 = vadd.xlane.f32.xlu2 %v421_v59  ;;  %566 = vadd.xlane.f32.xlu1 %v420_v60  ;;  %v449_v59 = vmul.f32 %v388_v18, %v136_v55  ;;  %v5192_v60 = vperm.slane %v381_v56, 0 }
 0x170   :  { %570 = vadd.xlane.f32.xlu0 %v422_v61 }
 0x171   :  { %v455_v14 = vmul.f32 %v5192_v60, %v142_v11  ;;  %v460_v31 = vmul.f32 %v5192_v60, %v147_v26  ;;  %v464_v43 = vmul.f32 %v5192_v60, %v151_v39  ;;  %v465_v56 = vmul.f32 %v5192_v60, %v152_v51 }
 0x177   :  { %574 = vadd.xlane.f32.xlu2 %v424_v1  ;;  %572 = vadd.xlane.f32.xlu1 %v423_v2  ;;  %v137_v1 = vld [vmem:[#allocation5 + $0x180] sm:$0xff]  ;;  %v139_v2 = vld [vmem:[#allocation5 + $0x190] sm:$0xff] }
 0x178   :  { %576 = vadd.xlane.f32.xlu0 %v425_v3  ;;  %v451_v3 = vmul.f32 %v5192_v60, %v138_v62  ;;  %v450_v4 = vmul.f32 %v5192_v60, %v137_v1  ;;  %v452_v5 = vmul.f32 %v5192_v60, %v139_v2  ;;  %v155_v2 = vld [vmem:[#allocation5 + $0x210] sm:$0xff] }
 0x17f   :  { %580 = vadd.xlane.f32.xlu2 %v427_v7  ;;  %578 = vadd.xlane.f32.xlu1 %v426_v8  ;;  %v141_v7 = vld [vmem:[#allocation5 + $0x1a0] sm:$0xff] }
 0x180   :  { %582 = vadd.xlane.f32.xlu0 %v428_v9  ;;  %v454_v12 = vmul.f32 %v5192_v60, %v141_v7 }
 0x187   :  { %586 = vadd.xlane.f32.xlu2 %v430_v13  ;;  %584 = vadd.xlane.f32.xlu1 %v429_v15  ;;  %v453_v13 = vmul.f32 %v5192_v60, %v140_v10  ;;  %v159_v10 = vld [vmem:[#allocation5 + $0x230] sm:$0xff] }
 0x188   :  { %588 = vadd.xlane.f32.xlu0 %v431_v17  ;;  %v144_v17 = vld [vmem:[#allocation5 + $0x1b8] sm:$0xff] }
 0x18f   :  { %592 = vadd.xlane.f32.xlu2 %v433_v22  ;;  %590 = vadd.xlane.f32.xlu1 %v432_v23  ;;  %v457_v22 = vmul.f32 %v5192_v60, %v144_v17  ;;  %v456_v23 = vmul.f32 %v5192_v60, %v143_v20 }
 0x190   :  { %594 = vadd.xlane.f32.xlu0 %v434_v24  ;;  %v458_v24 = vmul.f32 %v5192_v60, %v145_v21 }
 0x197   :  { %598 = vadd.xlane.f32.xlu2 %v436_v28  ;;  %596 = vadd.xlane.f32.xlu1 %v435_v29  ;;  %v146_v29 = vld [vmem:[#allocation5 + $0x1c8] sm:$0xff] }
 0x198   :  { %600 = vadd.xlane.f32.xlu0 %v437_v30  ;;  %v148_v30 = vld [vmem:[#allocation5 + $0x1d8] sm:$0xff]  ;;  %v459_v32 = vmul.f32 %v5192_v60, %v146_v29  ;;  %v161_v29 = vld [vmem:[#allocation5 + $0x240] sm:$0xff] }
 0x199   :  { %v461_v33 = vmul.f32 %v5192_v60, %v148_v30  ;;  %v163_v30 = vld [vmem:[#allocation5 + $0x250] sm:$0xff] }
 0x19f   :  { %604 = vadd.xlane.f32.xlu2 %v439_v34  ;;  %602 = vadd.xlane.f32.xlu1 %v438_v35  ;;  %v150_v35 = vld [vmem:[#allocation5 + $0x1e8] sm:$0xff] }
 0x1a0   :  { %606 = vadd.xlane.f32.xlu0 %v440_v36 }
 0x1a7   :  { %610 = vadd.xlane.f32.xlu2 %v442_v40  ;;  %608 = vadd.xlane.f32.xlu1 %v441_v41  ;;  %v382_v40 = vrot.slane %v5178_v16, 4  ;;  %v463_v41 = vmul.f32 %v5192_v60, %v150_v35 }
 0x1a8   :  { %612 = vadd.xlane.f32.xlu0 %v443_v42  ;;  %v462_v42 = vmul.f32 %v5192_v60, %v149_v38  ;;  %v165_v38 = vld [vmem:[#allocation5 + $0x260] sm:$0xff] }
 0x1a9   :  { %v5240_v45 = vperm.slane %v382_v40, 0 }
 0x1ab   :  { %v472_v17 = vmul.f32 %v5240_v45, %v159_v10 }
 0x1af   :  { %616 = vadd.xlane.f32.xlu2 %v445_v47  ;;  %614 = vadd.xlane.f32.xlu1 %v444_v48  ;;  %v153_v47 = vld [vmem:[#allocation5 + $0x200] sm:$0xff] }
 0x1b0   :  { %618 = vadd.xlane.f32.xlu0 %v446_v49  ;;  %v466_v55 = vmul.f32 %v5240_v45, %v153_v47  ;;  %v383_v47 = vrot.slane %v5178_v16, 5 }
 0x1b2   :  { %v5185_v50 = vpop.xlane.xlu2 %536  ;;  %v5187_v52 = vpop.xlane.xlu1 %532 }
 0x1b3   :  { %v5189_v53 = vpop.xlane.xlu0 %530 }
 0x1b7   :  { %622 = vadd.xlane.f32.xlu2 %v448_v57  ;;  %620 = vadd.xlane.f32.xlu1 %v447_v58  ;;  %v467_v57 = vmul.f32 %v5240_v45, %v154_v54 }
 0x1b8   :  { %624 = vadd.xlane.f32.xlu0 %v449_v59  ;;  %v156_v59 = vld [vmem:[#allocation5 + $0x218] sm:$0xff] }
 0x1ba   :  { %v5194_v61 = vpop.xlane.xlu2 %538  ;;  %v5196_v63 = vpop.xlane.xlu1 %534 }
 0x1bb   :  { %v5198_v0 = vpop.xlane.xlu0 %540 }
 0x1bf   :  { %628 = vadd.xlane.f32.xlu2 %v451_v3  ;;  %626 = vadd.xlane.f32.xlu1 %v450_v4  ;;  %v157_v3 = vld [vmem:[#allocation5 + $0x220] sm:$0xff]  ;;  %v469_v4 = vmul.f32 %v5240_v45, %v156_v59 }
 0x1c0   :  { %630 = vadd.xlane.f32.xlu0 %v452_v5  ;;  %v468_v5 = vmul.f32 %v5240_v45, %v155_v2  ;;  %v470_v60 = vmul.f32 %v5240_v45, %v157_v3  ;;  %v167_v3 = vld [vmem:[#allocation5 + $0x270] sm:$0xff] }
 0x1c2   :  { %v5203_v6 = vpop.xlane.xlu2 %544  ;;  %v5205_v8 = vpop.xlane.xlu1 %542 }
 0x1c3   :  { %v5207_v9 = vpop.xlane.xlu0 %546 }
 0x1c7   :  { %634 = vadd.xlane.f32.xlu2 %v454_v12  ;;  %632 = vadd.xlane.f32.xlu1 %v453_v13  ;;  %v158_v13 = vld [vmem:[#allocation5 + $0x228] sm:$0xff] }
 0x1c8   :  { %636 = vadd.xlane.f32.xlu0 %v455_v14  ;;  %v160_v14 = vld [vmem:[#allocation5 + $0x238] sm:$0xff]  ;;  %v471_v20 = vmul.f32 %v5240_v45, %v158_v13 }
 0x1c9   :  { %v473_v21 = vmul.f32 %v5240_v45, %v160_v14  ;;  %v171_v14 = vld [vmem:[#allocation5 + $0x290] sm:$0xff] }
 0x1ca   :  { %v5212_v15 = vpop.xlane.xlu2 %550  ;;  %v5214_v18 = vpop.xlane.xlu1 %548 }
 0x1cb   :  { %v5216_v19 = vpop.xlane.xlu0 %552 }
 0x1cf   :  { %640 = vadd.xlane.f32.xlu2 %v457_v22  ;;  %638 = vadd.xlane.f32.xlu1 %v456_v23  ;;  %v162_v23 = vld [vmem:[#allocation5 + $0x248] sm:$0xff] }
 0x1d0   :  { %642 = vadd.xlane.f32.xlu0 %v458_v24 }
 0x1d2   :  { %v5221_v25 = vpop.xlane.xlu2 %556  ;;  %v5223_v27 = vpop.xlane.xlu1 %554 }
 0x1d3   :  { %v5225_v28 = vpop.xlane.xlu0 %558 }
 0x1d7   :  { %646 = vadd.xlane.f32.xlu2 %v460_v31  ;;  %644 = vadd.xlane.f32.xlu1 %v459_v32  ;;  %v475_v31 = vmul.f32 %v5240_v45, %v162_v23  ;;  %v474_v32 = vmul.f32 %v5240_v45, %v161_v29  ;;  %v172_v23 = vld [vmem:[#allocation5 + $0x298] sm:$0xff] }
 0x1d8   :  { %648 = vadd.xlane.f32.xlu0 %v461_v33  ;;  %v476_v33 = vmul.f32 %v5240_v45, %v163_v30 }
 0x1da   :  { %v5230_v34 = vpop.xlane.xlu2 %562  ;;  %v5232_v36 = vpop.xlane.xlu1 %560 }
 0x1db   :  { %v5234_v37 = vpop.xlane.xlu0 %564 }
 0x1df   :  { %652 = vadd.xlane.f32.xlu2 %v463_v41  ;;  %650 = vadd.xlane.f32.xlu1 %v462_v42  ;;  %v164_v41 = vld [vmem:[#allocation5 + $0x258] sm:$0xff]  ;;  %v166_v42 = vld [vmem:[#allocation5 + $0x268] sm:$0xff] }
 0x1e0   :  { %654 = vadd.xlane.f32.xlu0 %v464_v43  ;;  %v478_v43 = vmul.f32 %v5240_v45, %v165_v38  ;;  %v477_v51 = vmul.f32 %v5240_v45, %v164_v41  ;;  %v479_v54 = vmul.f32 %v5240_v45, %v166_v42  ;;  %v173_v41 = vld [vmem:[#allocation5 + $0x2a0] sm:$0xff]  ;;  %v175_v42 = vld [vmem:[#allocation5 + $0x2b0] sm:$0xff] }
 0x1e2   :  { %v5242_v46 = vpop.xlane.xlu2 %568  ;;  %v5244_v48 = vpop.xlane.xlu1 %566 }
 0x1e3   :  { %v5246_v49 = vpop.xlane.xlu0 %570 }
 0x1e7   :  { %658 = vadd.xlane.f32.xlu2 %v466_v55  ;;  %656 = vadd.xlane.f32.xlu1 %v465_v56  ;;  %v5288_v55 = vperm.slane %v383_v47, 0 }
 0x1e8   :  { %660 = vadd.xlane.f32.xlu0 %v467_v57  ;;  %v168_v57 = vld [vmem:[#allocation5 + $0x278] sm:$0xff] }
 0x1e9   :  { %v484_v29 = vmul.f32 %v5288_v55, %v171_v14  ;;  %v486_v47 = vmul.f32 %v5288_v55, %v173_v41  ;;  %v181_v41 = vld [vmem:[#allocation5 + $0x2e0] sm:$0xff] }
 0x1ea   :  { %v5251_v58 = vpop.xlane.xlu2 %574  ;;  %v5253_v62 = vpop.xlane.xlu1 %572 }
 0x1eb   :  { %v5255_v1 = vpop.xlane.xlu0 %576 }
 0x1ef   :  { %664 = vadd.xlane.f32.xlu2 %v469_v4  ;;  %662 = vadd.xlane.f32.xlu1 %v468_v5  ;;  %v169_v4 = vld [vmem:[#allocation5 + $0x280] sm:$0xff]  ;;  %v481_v5 = vmul.f32 %v5240_v45, %v168_v57 }
 0x1f0   :  { %666 = vadd.xlane.f32.xlu0 %v470_v60  ;;  %v480_v60 = vmul.f32 %v5240_v45, %v167_v3  ;;  %v482_v10 = vmul.f32 %v5288_v55, %v169_v4  ;;  %v485_v45 = vmul.f32 %v5288_v55, %v172_v23  ;;  %v177_v57 = vld [vmem:[#allocation5 + $0x2c0] sm:$0xff] }
 0x1f2   :  { %v5260_v7 = vpop.xlane.xlu2 %580  ;;  %v5262_v11 = vpop.xlane.xlu1 %578 }
 0x1f3   :  { %v5264_v12 = vpop.xlane.xlu0 %582 }
 0x1f7   :  { %670 = vadd.xlane.f32.xlu2 %v472_v17  ;;  %668 = vadd.xlane.f32.xlu1 %v471_v20 }
 0x1f8   :  { %672 = vadd.xlane.f32.xlu0 %v473_v21  ;;  %v170_v21 = vld [vmem:[#allocation5 + $0x288] sm:$0xff] }
 0x1f9   :  { %v483_v30 = vmul.f32 %v5288_v55, %v170_v21 }
 0x1fa   :  { %v5269_v22 = vpop.xlane.xlu2 %586  ;;  %v5271_v24 = vpop.xlane.xlu1 %584 }
 0x1fb   :  { %v5273_v26 = vpop.xlane.xlu0 %588 }
 0x1ff   :  { %676 = vadd.xlane.f32.xlu2 %v475_v31  ;;  %674 = vadd.xlane.f32.xlu1 %v474_v32  ;;  %v174_v32 = vld [vmem:[#allocation5 + $0x2a8] sm:$0xff] }
 0x200   :  { %678 = vadd.xlane.f32.xlu0 %v476_v33 }
 0x202   :  { %v5278_v35 = vpop.xlane.xlu2 %592  ;;  %v5280_v39 = vpop.xlane.xlu1 %590 }
 0x203   :  { %v5282_v40 = vpop.xlane.xlu0 %594 }
 0x207   :  { %682 = vadd.xlane.f32.xlu2 %v478_v43  ;;  %680 = vadd.xlane.f32.xlu1 %v477_v51  ;;  %v487_v43 = vmul.f32 %v5288_v55, %v174_v32  ;;  %v488_v51 = vmul.f32 %v5288_v55, %v175_v42  ;;  %v179_v32 = vld [vmem:[#allocation5 + $0x2d0] sm:$0xff] }
 0x208   :  { %684 = vadd.xlane.f32.xlu0 %v479_v54 }
 0x20a   :  { %v5290_v56 = vpop.xlane.xlu2 %598  ;;  %v5292_v59 = vpop.xlane.xlu1 %596 }
 0x20b   :  { %v5294_v2 = vpop.xlane.xlu0 %600 }
 0x20f   :  { %688 = vadd.xlane.f32.xlu2 %v481_v5  ;;  %686 = vadd.xlane.f32.xlu1 %v480_v60  ;;  %v176_v5 = vld [vmem:[#allocation5 + $0x2b8] sm:$0xff]  ;;  %v178_v60 = vld [vmem:[#allocation5 + $0x2c8] sm:$0xff] }
 0x210   :  { %690 = vadd.xlane.f32.xlu0 %v482_v10  ;;  %v490_v10 = vmul.f32 %v5288_v55, %v177_v57  ;;  %v489_v14 = vmul.f32 %v5288_v55, %v176_v5  ;;  %v491_v21 = vmul.f32 %v5288_v55, %v178_v60  ;;  %v183_v57 = vld [vmem:[#allocation5 + $0x2f0] sm:$0xff] }
 0x212   :  { %v5299_v13 = vpop.xlane.xlu2 %604  ;;  %v5301_v17 = vpop.xlane.xlu1 %602 }
 0x213   :  { %v5303_v20 = vpop.xlane.xlu0 %606 }
 0x217   :  { %694 = vadd.xlane.f32.xlu2 %v484_v29  ;;  %692 = vadd.xlane.f32.xlu1 %v483_v30  ;;  %v180_v29 = vld [vmem:[#allocation5 + $0x2d8] sm:$0xff] }
 0x218   :  { %696 = vadd.xlane.f32.xlu0 %v485_v45  ;;  %v493_v42 = vmul.f32 %v5288_v55, %v180_v29  ;;  %v496_v29 = vmul.f32 %v5288_v55, %v183_v57 }
 0x21a   :  { %v5308_v31 = vpop.xlane.xlu2 %610  ;;  %v5310_v33 = vpop.xlane.xlu1 %608 }
 0x21b   :  { %v5312_v38 = vpop.xlane.xlu0 %612 }
 0x21f   :  { %700 = vadd.xlane.f32.xlu2 %v487_v43  ;;  %698 = vadd.xlane.f32.xlu1 %v486_v47  ;;  %v492_v43 = vmul.f32 %v5288_v55, %v179_v32  ;;  %v494_v47 = vmul.f32 %v5288_v55, %v181_v41 }
 0x220   :  { %702 = vadd.xlane.f32.xlu0 %v488_v51 }
 0x222   :  { %v5317_v54 = vpop.xlane.xlu2 %616  ;;  %v5319_v3 = vpop.xlane.xlu1 %614 }
 0x223   :  { %v5321_v4 = vpop.xlane.xlu0 %618 }
 0x227   :  { %706 = vadd.xlane.f32.xlu2 %v490_v10  ;;  %704 = vadd.xlane.f32.xlu1 %v489_v14  ;;  %v182_v10 = vld [vmem:[#allocation5 + $0x2e8] sm:$0xff]  ;;  %v184_v14 = vld [vmem:[#allocation5 + $0x2f8] sm:$0xff] }
 0x228   :  { %708 = vadd.xlane.f32.xlu0 %v491_v21  ;;  %v384_v21 = vrot.slane %v5178_v16, 6  ;;  %v495_v32 = vmul.f32 %v5288_v55, %v182_v10  ;;  %v497_v41 = vmul.f32 %v5288_v55, %v184_v14 }
 0x22a   :  { %v5326_v23 = vpop.xlane.xlu2 %622  ;;  %v5328_v30 = vpop.xlane.xlu1 %620 }
 0x22b   :  { %9362 = vst [vmem:[#allocation18_spill] sm:$0xff] %v5328_v30  ;;  %v5330_v45 = vpop.xlane.xlu0 %624  ;;  %v187_v30 = vld [vmem:[#allocation5 + $0x310] sm:$0xff] }
 0x22c   :  { %9363 = vst [vmem:[#allocation19_spill] sm:$0xff] %v5330_v45  ;;  %v185_v45 = vld [vmem:[#allocation5 + $0x300] sm:$0xff] }
 0x22f   :  { %712 = vadd.xlane.f32.xlu2 %v493_v42  ;;  %710 = vadd.xlane.f32.xlu1 %v492_v43  ;;  %v5345_v42 = vperm.slane %v384_v21, 0  ;;  %v189_v21 = vld [vmem:[#allocation5 + $0x320] sm:$0xff] }
 0x230   :  { %714 = vadd.xlane.f32.xlu0 %v494_v47  ;;  %v186_v47 = vld [vmem:[#allocation5 + $0x308] sm:$0xff] }
 0x231   :  { %v499_v57 = vmul.f32 %v5345_v42, %v186_v47  ;;  %v498_v10 = vmul.f32 %v5345_v42, %v185_v45  ;;  %v500_v55 = vmul.f32 %v5345_v42, %v187_v30 }
 0x232   :  { %v5335_v51 = vpop.xlane.xlu2 %628  ;;  %v5337_v5 = vpop.xlane.xlu1 %626 }
 0x233   :  { %9364 = vst [vmem:[#allocation20_spill] sm:$0xff] %v5337_v5  ;;  %v5339_v60 = vpop.xlane.xlu0 %630 }
 0x234   :  { %9365 = vst [vmem:[#allocation21_spill] sm:$0xff] %v5339_v60 }
 0x237   :  { %718 = vadd.xlane.f32.xlu2 %v496_v29  ;;  %716 = vadd.xlane.f32.xlu1 %v495_v32 }
 0x238   :  { %720 = vadd.xlane.f32.xlu0 %v497_v41  ;;  %v188_v41 = vld [vmem:[#allocation5 + $0x318] sm:$0xff] }
 0x239   :  { %v501_v47 = vmul.f32 %v5345_v42, %v188_v41 }
 0x23a   :  { %v5347_v43 = vpop.xlane.xlu2 %634  ;;  %v5349_v5 = vpop.xlane.xlu1 %632 }
 0x23b   :  { %9366 = vst [vmem:[#allocation22_spill] sm:$0xff] %v5349_v5  ;;  %v5351_v60 = vpop.xlane.xlu0 %636  ;;  %v502_v5 = vmul.f32 %v5345_v42, %v189_v21 }
 0x23c   :  { %9367 = vst [vmem:[#allocation23_spill] sm:$0xff] %v5351_v60  ;;  %v190_v60 = vld [vmem:[#allocation5 + $0x328] sm:$0xff] }
 0x23d   :  { %v503_v45 = vmul.f32 %v5345_v42, %v190_v60  ;;  %v195_v60 = vld [vmem:[#allocation5 + $0x350] sm:$0xff] }
 0x23f   :  { %724 = vadd.xlane.f32.xlu2 %v499_v57  ;;  %722 = vadd.xlane.f32.xlu1 %v498_v10  ;;  %v192_v57 = vld [vmem:[#allocation5 + $0x338] sm:$0xff] }
 0x240   :  { %726 = vadd.xlane.f32.xlu0 %v500_v55 }
 0x242   :  { %v5356_v14 = vpop.xlane.xlu2 %640  ;;  %v5358_v29 = vpop.xlane.xlu1 %638 }
 0x243   :  { %9368 = vst [vmem:[#allocation24_spill] sm:$0xff] %v5356_v14  ;;  %v5360_v32 = vpop.xlane.xlu0 %642  ;;  %v505_v14 = vmul.f32 %v5345_v42, %v192_v57 }
 0x244   :  { %9369 = vst [vmem:[#allocation25_spill] sm:$0xff] %v5358_v29  ;;  %v191_v29 = vld [vmem:[#allocation5 + $0x330] sm:$0xff] }
 0x245   :  { %9370 = vst [vmem:[#allocation26_spill] sm:$0xff] %v5360_v32  ;;  %v193_v32 = vld [vmem:[#allocation5 + $0x340] sm:$0xff]  ;;  %v504_v21 = vmul.f32 %v5345_v42, %v191_v29 }
 0x246   :  { %v506_v41 = vmul.f32 %v5345_v42, %v193_v32  ;;  %v198_v32 = vld [vmem:[#allocation5 + $0x368] sm:$0xff] }
 0x247   :  { %730 = vadd.xlane.f32.xlu2 %v502_v5  ;;  %728 = vadd.xlane.f32.xlu1 %v501_v47 }
 0x248   :  { %732 = vadd.xlane.f32.xlu0 %v503_v45 }
 0x24a   :  { %v5365_v30 = vpop.xlane.xlu2 %646  ;;  %v5367_v10 = vpop.xlane.xlu1 %644 }
 0x24b   :  { %9371 = vst [vmem:[#allocation27_spill] sm:$0xff] %v5365_v30  ;;  %v5369_v55 = vpop.xlane.xlu0 %648  ;;  %v508_v30 = vmul.f32 %v5345_v42, %v195_v60  ;;  %v511_v60 = vmul.f32 %v5345_v42, %v198_v32 }
 0x24c   :  { %9372 = vst [vmem:[#allocation28_spill] sm:$0xff] %v5367_v10  ;;  %v194_v10 = vld [vmem:[#allocation5 + $0x348] sm:$0xff] }
 0x24d   :  { %9373 = vst [vmem:[#allocation29_spill] sm:$0xff] %v5369_v55  ;;  %v196_v55 = vld [vmem:[#allocation5 + $0x358] sm:$0xff]  ;;  %v507_v57 = vmul.f32 %v5345_v42, %v194_v10 }
 0x24e   :  { %v509_v29 = vmul.f32 %v5345_v42, %v196_v55 }
 0x24f   :  { %736 = vadd.xlane.f32.xlu2 %v505_v14  ;;  %734 = vadd.xlane.f32.xlu1 %v504_v21 }
 0x250   :  { %738 = vadd.xlane.f32.xlu0 %v506_v41 }
 0x252   :  { %v5374_v5 = vpop.xlane.xlu2 %652  ;;  %v5376_v47 = vpop.xlane.xlu1 %650 }
 0x253   :  { %9374 = vst [vmem:[#allocation30_spill] sm:$0xff] %v5374_v5  ;;  %v5378_v45 = vpop.xlane.xlu0 %654  ;;  %v385_v5 = vrot.slane %v5178_v16, 7  ;;  %v202_v16 = vld [vmem:[#allocation5 + $0x388] sm:$0xff] }
 0x254   :  { %9375 = vst [vmem:[#allocation31_spill] sm:$0xff] %v5376_v47  ;;  %v197_v47 = vld [vmem:[#allocation5 + $0x360] sm:$0xff] }
 0x255   :  { %9376 = vst [vmem:[#allocation32_spill] sm:$0xff] %v5378_v45  ;;  %v199_v45 = vld [vmem:[#allocation5 + $0x370] sm:$0xff]  ;;  %v510_v10 = vmul.f32 %v5345_v42, %v197_v47 }
 0x256   :  { %v512_v55 = vmul.f32 %v5345_v42, %v199_v45 }
 0x257   :  { %742 = vadd.xlane.f32.xlu2 %v508_v30  ;;  %740 = vadd.xlane.f32.xlu1 %v507_v57  ;;  %v5393_v30 = vperm.slane %v385_v5, 0 }
 0x258   :  { %744 = vadd.xlane.f32.xlu0 %v509_v29  ;;  %v201_v29 = vld [vmem:[#allocation5 + $0x380] sm:$0xff] }
 0x259   :  { %v514_v32 = vmul.f32 %v5393_v30, %v201_v29  ;;  %v515_v45 = vmul.f32 %v5393_v30, %v202_v16  ;;  %v207_v16 = vld [vmem:[#allocation5 + $0x3b0] sm:$0xff] }
 0x25a   :  { %v5383_v14 = vpop.xlane.xlu2 %658  ;;  %v5385_v21 = vpop.xlane.xlu1 %656 }
 0x25b   :  { %9377 = vst [vmem:[#allocation33_spill] sm:$0xff] %v5383_v14  ;;  %v5387_v41 = vpop.xlane.xlu0 %660  ;;  %v200_v14 = vld [vmem:[#allocation5 + $0x378] sm:$0xff] }
 0x25c   :  { %9378 = vst [vmem:[#allocation34_spill] sm:$0xff] %v5385_v21  ;;  %v513_v47 = vmul.f32 %v5345_v42, %v200_v14 }
 0x25d   :  { %9379 = vst [vmem:[#allocation35_spill] sm:$0xff] %v5387_v41 }
 0x25f   :  { %748 = vadd.xlane.f32.xlu2 %v511_v60  ;;  %746 = vadd.xlane.f32.xlu1 %v510_v10  ;;  %v204_v60 = vld [vmem:[#allocation5 + $0x398] sm:$0xff] }
 0x260   :  { %750 = vadd.xlane.f32.xlu0 %v512_v55 }
 0x262   :  { %v5395_v57 = vpop.xlane.xlu2 %664  ;;  %v5397_v21 = vpop.xlane.xlu1 %662 }
 0x263   :  { %9380 = vst [vmem:[#allocation36_spill] sm:$0xff] %v5395_v57  ;;  %v5399_v41 = vpop.xlane.xlu0 %666  ;;  %v517_v57 = vmul.f32 %v5393_v30, %v204_v60 }
 0x264   :  { %9381 = vst [vmem:[#allocation37_spill] sm:$0xff] %v5397_v21  ;;  %v203_v21 = vld [vmem:[#allocation5 + $0x390] sm:$0xff] }
 0x265   :  { %9382 = vst [vmem:[#allocation38_spill] sm:$0xff] %v5399_v41  ;;  %v205_v41 = vld [vmem:[#allocation5 + $0x3a0] sm:$0xff]  ;;  %v516_v29 = vmul.f32 %v5393_v30, %v203_v21 }
 0x266   :  { %v518_v42 = vmul.f32 %v5393_v30, %v205_v41  ;;  %v5117_v41 = vmov 0  }
 0x267   :  { %754 = vadd.xlane.f32.xlu2 %v514_v32  ;;  %752 = vadd.xlane.f32.xlu1 %v513_v47 }
 0x268   :  { %756 = vadd.xlane.f32.xlu0 %v515_v45  ;;  %v206_v45 = vld [vmem:[#allocation5 + $0x3a8] sm:$0xff]  ;;  %4554 = vset.pattern.permute.xlu2 %v5117_v41 }
 0x269   :  { %v519_v60 = vmul.f32 %v5393_v30, %v206_v45  ;;  %4552 = vset.pattern.permute.xlu0 %v5117_v41  ;;  %4553 = vset.pattern.permute.xlu1 %v5117_v41 }
 0x26a   :  { %v5404_v5 = vpop.xlane.xlu2 %670  ;;  %v5406_v10 = vpop.xlane.xlu1 %668 }
 0x26b   :  { %9383 = vst [vmem:[#allocation39_spill] sm:$0xff] %v5406_v10  ;;  %v5408_v55 = vpop.xlane.xlu0 %672  ;;  %v520_v10 = vmul.f32 %v5393_v30, %v207_v16  ;;  %v211_v16 = vld [vmem:[#allocation5 + $0x3d0] sm:$0xff] }
 0x26c   :  { %9384 = vst [vmem:[#allocation40_spill] sm:$0xff] %v5408_v55  ;;  %v208_v55 = vld [vmem:[#allocation5 + $0x3b8] sm:$0xff] }
 0x26d   :  { %v521_v21 = vmul.f32 %v5393_v30, %v208_v55 }
 0x26f   :  { %760 = vadd.xlane.f32.xlu2 %v517_v57  ;;  %758 = vadd.xlane.f32.xlu1 %v516_v29  ;;  %v210_v29 = vld [vmem:[#allocation5 + $0x3c8] sm:$0xff] }
 0x270   :  { %762 = vadd.xlane.f32.xlu0 %v518_v42  ;;  %v523_v45 = vmul.f32 %v5393_v30, %v210_v29 }
 0x272   :  { %v5413_v14 = vpop.xlane.xlu2 %676  ;;  %v5415_v32 = vpop.xlane.xlu1 %674 }
 0x273   :  { %9385 = vst [vmem:[#allocation41_spill] sm:$0xff] %v5413_v14  ;;  %v5417_v47 = vpop.xlane.xlu0 %678 }
 0x274   :  { %9386 = vst [vmem:[#allocation42_spill] sm:$0xff] %v5415_v32  ;;  %v209_v32 = vld [vmem:[#allocation5 + $0x3c0] sm:$0xff] }
 0x275   :  { %9387 = vst [vmem:[#allocation43_spill] sm:$0xff] %v5417_v47  ;;  %v522_v55 = vmul.f32 %v5393_v30, %v209_v32 }
 0x277   :  { %766 = vadd.xlane.f32.xlu2 %v520_v10  ;;  %764 = vadd.xlane.f32.xlu1 %v519_v60  ;;  %v524_v10 = vmul.f32 %v5393_v30, %v211_v16 }
 0x278   :  { %768 = vadd.xlane.f32.xlu0 %v521_v21  ;;  %v213_v21 = vld [vmem:[#allocation5 + $0x3e0] sm:$0xff] }
 0x279   :  { %v526_v14 = vmul.f32 %v5393_v30, %v213_v21  ;;  %v5455_v21 = vperm.slane %v5183_v44, 0 }
 0x27a   :  { %v5422_v57 = vpop.xlane.xlu2 %682  ;;  %v5424_v42 = vpop.xlane.xlu1 %680 }
 0x27b   :  { %9388 = vst [vmem:[#allocation44_spill] sm:$0xff] %v5422_v57  ;;  %v5426_v47 = vpop.xlane.xlu0 %684 }
 0x27c   :  { %9389 = vst [vmem:[#allocation45_spill] sm:$0xff] %v5424_v42  ;;  %v212_v42 = vld [vmem:[#allocation5 + $0x3d8] sm:$0xff] }
 0x27d   :  { %9390 = vst [vmem:[#allocation46_spill] sm:$0xff] %v5426_v47  ;;  %v214_v47 = vld [vmem:[#allocation5 + $0x3e8] sm:$0xff]  ;;  %v525_v29 = vmul.f32 %v5393_v30, %v212_v42 }
 0x27e   :  { %v527_v32 = vmul.f32 %v5393_v30, %v214_v47 }
 0x27f   :  { %772 = vadd.xlane.f32.xlu2 %v523_v45  ;;  %770 = vadd.xlane.f32.xlu1 %v522_v55  ;;  %v216_v45 = vld [vmem:[#allocation5 + $0x3f8] sm:$0xff] }
 0x280   :  { %774 = vadd.xlane.f32.xlu0 %v524_v10 }
 0x282   :  { %v5431_v60 = vpop.xlane.xlu2 %688  ;;  %v5433_v41 = vpop.xlane.xlu1 %686 }
 0x283   :  { %9391 = vst [vmem:[#allocation47_spill] sm:$0xff] %v5431_v60  ;;  %v5435_v57 = vpop.xlane.xlu0 %690 }
 0x284   :  { %9392 = vst [vmem:[#allocation48_spill] sm:$0xff] %v5433_v41  ;;  %v215_v41 = vld [vmem:[#allocation5 + $0x3f0] sm:$0xff] }
 0x285   :  { %9393 = vst [vmem:[#allocation49_spill] sm:$0xff] %v5435_v57  ;;  %v529_v57 = vmul.f32 %v5393_v30, %v216_v45  ;;  %v528_v60 = vmul.f32 %v5393_v30, %v215_v41 }
 0x287   :  { %778 = vadd.xlane.f32.xlu2 %v526_v14  ;;  %776 = vadd.xlane.f32.xlu1 %v525_v29  ;;  %v803_v29 = vadd.f32 %v5455_v21, %v5189_v53  ;;  %v804_v53 = vadd.f32 %v5455_v21, %v5187_v52 }
 0x288   :  { %780 = vadd.xlane.f32.xlu0 %v527_v32 }
 0x289   :  { %v5459_v32 = vmul.f32 0.0625, %v803_v29 }
 0x28a   :  { %v5440_v16 = vpop.xlane.xlu2 %694  ;;  %v5442_v55 = vpop.xlane.xlu1 %692 }
 0x28b   :  { %v5444_v10 = vpop.xlane.xlu0 %696  ;;  %9396 = vst [vmem:[#allocation52_spill] sm:$0xff] %v5459_v32 }
 0x28c   :  { %9394 = vst [vmem:[#allocation50_spill] sm:$0xff] %v5444_v10 }
 0x28f   :  { %784 = vadd.xlane.f32.xlu2 %v529_v57  ;;  %782 = vadd.xlane.f32.xlu1 %v528_v60  ;;  %v810_v57 = vadd.f32 %v5455_v21, %v5203_v6  ;;  %v805_v60 = vadd.f32 %v5455_v21, %v5196_v63  ;;  %v813_v6 = vadd.f32 %v5455_v21, %v5212_v15 }
 0x290   :  { %v806_v63 = vadd.f32 %v5455_v21, %v5185_v50  ;;  %v816_v50 = vadd.f32 %v5455_v21, %v5221_v25  ;;  %v5525_v25 = vperm.slane %v5183_v44, 1 }
 0x291   :  { %v5472_v41 = vmul.f32 0.0625, %v810_v57  ;;  %v5493_v52 = vmul.f32 0.0625, %v813_v6  ;;  %v808_v6 = vadd.f32 %v5455_v21, %v5198_v0 }
 0x292   :  { %v5448_v42 = vpop.xlane.xlu2 %700  ;;  %v5450_v47 = vpop.xlane.xlu1 %698  ;;  %v5504_v15 = vmul.f32 0.0625, %v806_v63  ;;  %v809_v63 = vadd.f32 %v5455_v21, %v5205_v8  ;;  %v819_v0 = vadd.f32 %v5525_v25, %v5230_v34  ;;  %v811_v8 = vadd.f32 %v5455_v21, %v5207_v9 }
 0x293   :  { %v5452_v14 = vpop.xlane.xlu0 %702  ;;  %9399 = vst [vmem:[#allocation55_spill] sm:$0xff] %v5472_v41  ;;  %v822_v9 = vadd.f32 %v5525_v25, %v5242_v46 }
 0x294   :  { %9395 = vst [vmem:[#allocation51_spill] sm:$0xff] %v5452_v14  ;;  %v5549_v34 = vmul.f32 0.0625, %v811_v8  ;;  %v815_v8 = vadd.f32 %v5455_v21, %v5223_v27 }
 0x295   :  { %9403 = vst [vmem:[#allocation59_spill] sm:$0xff] %v5493_v52 }
 0x296   :  { %9404 = vst [vmem:[#allocation60_spill] sm:$0xff] %v5504_v15 }
 0x297   :  { %9411 = vst [vmem:[#allocation67_spill] sm:$0xff] %v5549_v34 }
 0x29a   :  { %v5461_v10 = vpop.xlane.xlu2 %706  ;;  %v5463_v45 = vpop.xlane.xlu1 %704 }
 0x29b   :  { %9397 = vst [vmem:[#allocation53_spill] sm:$0xff] %v5463_v45  ;;  %v5465_v30 = vpop.xlane.xlu0 %708 }
 0x29c   :  { %9398 = vst [vmem:[#allocation54_spill] sm:$0xff] %v5465_v30  ;;  %1188 = vperm.xlu0 %4552, %v5459_v32   ;;  %v5483_v32 = vmul.f32 0.0625, %v805_v60  ;;  %v5487_v30 = vmul.f32 0.0625, %v804_v53  ;;  %v807_v60 = vadd.f32 %v5455_v21, %v5194_v61  ;;  %v5514_v61 = vmul.f32 0.0625, %v816_v50 }
 0x29d   :  { %v5532_v50 = vmul.f32 0.0625, %v809_v63 }
 0x29e   :  { %9401 = vst [vmem:[#allocation57_spill] sm:$0xff] %v5483_v32  ;;  %v5508_v53 = vmul.f32 0.0625, %v807_v60  ;;  %v5528_v60 = vmul.f32 0.0625, %v808_v6  ;;  %v812_v6 = vadd.f32 %v5455_v21, %v5214_v18  ;;  %v5559_v18 = vmul.f32 0.0625, %v822_v9 }
 0x29f   :  { %9402 = vst [vmem:[#allocation58_spill] sm:$0xff] %v5487_v30  ;;  %v817_v9 = vadd.f32 %v5455_v21, %v5225_v28  ;;  %v828_v28 = vadd.f32 %v5525_v25, %v5260_v7 }
 0x2a0   :  { %9405 = vst [vmem:[#allocation61_spill] sm:$0xff] %v5508_v53  ;;  %v5553_v63 = vmul.f32 0.0625, %v812_v6  ;;  %v5574_v6 = vmul.f32 0.0625, %v815_v8 }
 0x2a1   :  { %9406 = vst [vmem:[#allocation62_spill] sm:$0xff] %v5514_v61 }
 0x2a2   :  { %v5474_v14 = vpop.xlane.xlu2 %712  ;;  %v5478_v29 = vpop.xlane.xlu1 %710  ;;  %9408 = vst [vmem:[#allocation64_spill] sm:$0xff] %v5528_v60 }
 0x2a3   :  { %v5480_v45 = vpop.xlane.xlu0 %714  ;;  %9409 = vst [vmem:[#allocation65_spill] sm:$0xff] %v5532_v50 }
 0x2a4   :  { %9400 = vst [vmem:[#allocation56_spill] sm:$0xff] %v5480_v45  ;;  %1209 = vperm.xlu0 %4552, %v5472_v41  }
 0x2a5   :  { %9412 = vst [vmem:[#allocation68_spill] sm:$0xff] %v5553_v63 }
 0x2a6   :  { %9413 = vst [vmem:[#allocation69_spill] sm:$0xff] %v5559_v18 }
 0x2a7   :  { %1194 = vperm.xlu2 %4554, %v5483_v32   ;;  %9415 = vst [vmem:[#allocation71_spill] sm:$0xff] %v5574_v6 }
 0x2a8   :  { %1191 = vperm.xlu1 %4553, %v5487_v30  }
 0x2aa   :  { %v5495_v57 = vpop.xlane.xlu2 %718  ;;  %v5499_v41 = vpop.xlane.xlu1 %716 }
 0x2ab   :  { %v5501_v45 = vpop.xlane.xlu0 %720 }
 0x2ac   :  { %1218 = vperm.xlu0 %4552, %v5493_v52  }
 0x2af   :  { %1197 = vperm.xlu2 %4554, %v5504_v15  }
 0x2b0   :  { %1200 = vperm.xlu1 %4553, %v5508_v53   ;;  %v5538_v53 = vmul.f32 0.0625, %v819_v0  ;;  %v814_v0 = vadd.f32 %v5455_v21, %v5216_v19  ;;  %v825_v19 = vadd.f32 %v5525_v25, %v5251_v58  ;;  %v5589_v58 = vmul.f32 0.0625, %v817_v9 }
 0x2b1   :  { %v821_v9 = vadd.f32 %v5525_v25, %v5244_v48 }
 0x2b2   :  { %v5516_v32 = vpop.xlane.xlu2 %724  ;;  %v5520_v52 = vpop.xlane.xlu1 %722  ;;  %9410 = vst [vmem:[#allocation66_spill] sm:$0xff] %v5538_v53  ;;  %v5570_v46 = vmul.f32 0.0625, %v814_v0  ;;  %v5580_v27 = vmul.f32 0.0625, %v825_v19  ;;  %v818_v0 = vadd.f32 %v5455_v21, %v5232_v36  ;;  %v820_v19 = vadd.f32 %v5525_v25, %v5234_v37 }
 0x2b3   :  { %v5522_v30 = vpop.xlane.xlu0 %726  ;;  %9417 = vst [vmem:[#allocation73_spill] sm:$0xff] %v5589_v58  ;;  %v5601_v36 = vmul.f32 0.0625, %v828_v28  ;;  %v823_v28 = vadd.f32 %v5525_v25, %v5246_v49  ;;  %v826_v49 = vadd.f32 %v5525_v25, %v5255_v1 }
 0x2b4   :  { %9407 = vst [vmem:[#allocation63_spill] sm:$0xff] %v5522_v30  ;;  %1227 = vperm.xlu0 %4552, %v5514_v61   ;;  %v5610_v7 = vmul.f32 0.0625, %v820_v19  ;;  %v824_v19 = vadd.f32 %v5525_v25, %v5253_v62 }
 0x2b5   :  { %9414 = vst [vmem:[#allocation70_spill] sm:$0xff] %v5570_v46 }
 0x2b6   :  { %9416 = vst [vmem:[#allocation72_spill] sm:$0xff] %v5580_v27 }
 0x2b7   :  { %1203 = vperm.xlu2 %4554, %v5528_v60   ;;  %9419 = vst [vmem:[#allocation75_spill] sm:$0xff] %v5601_v36 }
 0x2b8   :  { %1206 = vperm.xlu1 %4553, %v5532_v50   ;;  %9420 = vst [vmem:[#allocation76_spill] sm:$0xff] %v5610_v7 }
 0x2ba   :  { %v5540_v15 = vpop.xlane.xlu2 %730  ;;  %v5544_v61 = vpop.xlane.xlu1 %728 }
 0x2bb   :  { %v5546_v30 = vpop.xlane.xlu0 %732 }
 0x2bc   :  { %1236 = vperm.xlu0 %4552, %v5538_v53  }
 0x2bf   :  { %1212 = vperm.xlu2 %4554, %v5549_v34  }
 0x2c0   :  { %1215 = vperm.xlu1 %4553, %v5553_v63   ;;  %v5595_v63 = vmul.f32 0.0625, %v818_v0  ;;  %v831_v0 = vadd.f32 %v5525_v25, %v5269_v22  ;;  %v5629_v22 = vmul.f32 0.0625, %v823_v28 }
 0x2c2   :  { %v5561_v50 = vpop.xlane.xlu2 %736  ;;  %v5565_v53 = vpop.xlane.xlu1 %734  ;;  %9418 = vst [vmem:[#allocation74_spill] sm:$0xff] %v5595_v63  ;;  %v5622_v48 = vmul.f32 0.0625, %v831_v0 }
 0x2c3   :  { %v5567_v60 = vpop.xlane.xlu0 %738  ;;  %9423 = vst [vmem:[#allocation79_spill] sm:$0xff] %v5629_v22 }
 0x2c4   :  { %1245 = vperm.xlu0 %4552, %v5559_v18   ;;  %9422 = vst [vmem:[#allocation78_spill] sm:$0xff] %v5622_v48 }
 0x2c7   :  { %1221 = vperm.xlu2 %4554, %v5570_v46  }
 0x2c8   :  { %1224 = vperm.xlu1 %4553, %v5574_v6   ;;  %v829_v6 = vadd.f32 %v5525_v25, %v5264_v12  ;;  %v832_v12 = vadd.f32 %v5525_v25, %v5273_v26 }
 0x2ca   :  { %v5582_v34 = vpop.xlane.xlu2 %742  ;;  %v5591_v8 = vpop.xlane.xlu1 %740 }
 0x2cb   :  { %v5586_v18 = vpop.xlane.xlu0 %744 }
 0x2cc   :  { %1254 = vperm.xlu0 %4552, %v5580_v27  }
 0x2cf   :  { %1230 = vperm.xlu2 %4554, %v5589_v58   ;;  %v5614_v58 = vmul.f32 0.0625, %v821_v9  ;;  %v834_v9 = vadd.f32 %v5525_v25, %v5278_v35  ;;  %v827_v35 = vadd.f32 %v5525_v25, %v5262_v11 }
 0x2d0   :  { %1233 = vperm.xlu1 %4553, %v5595_v63  }
 0x2d1   :  { %9421 = vst [vmem:[#allocation77_spill] sm:$0xff] %v5614_v58  ;;  %v5643_v62 = vmul.f32 0.0625, %v834_v9 }
 0x2d2   :  { %v5603_v21 = vpop.xlane.xlu2 %748  ;;  %v5616_v37 = vpop.xlane.xlu1 %746 }
 0x2d3   :  { %v5607_v27 = vpop.xlane.xlu0 %750  ;;  %9425 = vst [vmem:[#allocation81_spill] sm:$0xff] %v5643_v62 }
 0x2d4   :  { %1263 = vperm.xlu0 %4552, %v5601_v36  }
 0x2d7   :  { %1239 = vperm.xlu2 %4554, %v5610_v7   ;;  %v5635_v7 = vmul.f32 0.0625, %v824_v19  ;;  %v5653_v19 = vmul.f32 0.0625, %v826_v49  ;;  %v830_v49 = vadd.f32 %v5525_v25, %v5271_v24 }
 0x2d8   :  { %1242 = vperm.xlu1 %4553, %v5614_v58  }
 0x2d9   :  { %9424 = vst [vmem:[#allocation80_spill] sm:$0xff] %v5635_v7 }
 0x2da   :  { %v5624_v63 = vpop.xlane.xlu2 %754  ;;  %v5640_v0 = vpop.xlane.xlu1 %752  ;;  %9426 = vst [vmem:[#allocation82_spill] sm:$0xff] %v5653_v19 }
 0x2db   :  { %v5633_v36 = vpop.xlane.xlu0 %756 }
 0x2dc   :  { %1272 = vperm.xlu0 %4552, %v5622_v48   ;;  %v5650_v48 = vperm.slane %v5183_v44, 2 }
 0x2de   :  { %v837_v1 = vadd.f32 %v5650_v48, %v5290_v56  ;;  %v5674_v56 = vmul.f32 0.0625, %v829_v6  ;;  %v833_v6 = vadd.f32 %v5525_v25, %v5280_v39  ;;  %v843_v26 = vadd.f32 %v5650_v48, %v5308_v31 }
 0x2df   :  { %1248 = vperm.xlu2 %4554, %v5629_v22   ;;  %v5657_v22 = vmul.f32 0.0625, %v827_v35  ;;  %v840_v35 = vadd.f32 %v5650_v48, %v5299_v13  ;;  %v5693_v13 = vmul.f32 0.0625, %v832_v12  ;;  %v836_v25 = vadd.f32 %v5650_v48, %v5292_v59 }
 0x2e0   :  { %1251 = vperm.xlu1 %4553, %v5635_v7   ;;  %v5665_v11 = vmul.f32 0.0625, %v837_v1  ;;  %9429 = vst [vmem:[#allocation85_spill] sm:$0xff] %v5674_v56 }
 0x2e1   :  { %9427 = vst [vmem:[#allocation83_spill] sm:$0xff] %v5657_v22  ;;  %v5684_v1 = vmul.f32 0.0625, %v840_v35  ;;  %v835_v35 = vadd.f32 %v5650_v48, %v5282_v40 }
 0x2e2   :  { %v5645_v28 = vpop.xlane.xlu2 %760  ;;  %9428 = vst [vmem:[#allocation84_spill] sm:$0xff] %v5665_v11 }
 0x2e3   :  { %v5660_v9 = vpop.xlane.xlu0 %762  ;;  %9431 = vst [vmem:[#allocation87_spill] sm:$0xff] %v5684_v1  ;;  %v5714_v31 = vmul.f32 0.0625, %v835_v35  ;;  %v839_v35 = vadd.f32 %v5650_v48, %v5301_v17 }
 0x2e4   :  { %1281 = vperm.xlu0 %4552, %v5643_v62   ;;  %v5671_v62 = vpop.xlane.xlu1 %758  ;;  %9432 = vst [vmem:[#allocation88_spill] sm:$0xff] %v5693_v13 }
 0x2e5   :  { %9435 = vst [vmem:[#allocation91_spill] sm:$0xff] %v5714_v31 }
 0x2e7   :  { %1257 = vperm.xlu2 %4554, %v5653_v19   ;;  %v5678_v19 = vmul.f32 0.0625, %v830_v49 }
 0x2e8   :  { %1260 = vperm.xlu1 %4553, %v5657_v22  }
 0x2e9   :  { %9430 = vst [vmem:[#allocation86_spill] sm:$0xff] %v5678_v19 }
 0x2ea   :  { %v5667_v7 = vpop.xlane.xlu2 %766 }
 0x2eb   :  { %v5686_v24 = vpop.xlane.xlu0 %768 }
 0x2ec   :  { %1290 = vperm.xlu0 %4552, %v5665_v11   ;;  %v5695_v49 = vpop.xlane.xlu1 %764  ;;  %v5699_v11 = vmul.f32 0.0625, %v833_v6  ;;  %v846_v6 = vadd.f32 %v5650_v48, %v5317_v54 }
 0x2ee   :  { %9433 = vst [vmem:[#allocation89_spill] sm:$0xff] %v5699_v11  ;;  %v5726_v59 = vmul.f32 0.0625, %v846_v6 }
 0x2ef   :  { %1266 = vperm.xlu2 %4554, %v5674_v56   ;;  %v5705_v56 = vmul.f32 0.0625, %v843_v26  ;;  %v838_v26 = vadd.f32 %v5650_v48, %v5294_v2  ;;  %v841_v2 = vadd.f32 %v5650_v48, %v5303_v20 }
 0x2f0   :  { %1269 = vperm.xlu1 %4553, %v5678_v19   ;;  %9437 = vst [vmem:[#allocation93_spill] sm:$0xff] %v5726_v59 }
 0x2f1   :  { %9434 = vst [vmem:[#allocation90_spill] sm:$0xff] %v5705_v56  ;;  %v5733_v54 = vmul.f32 0.0625, %v838_v26 }
 0x2f2   :  { %v5688_v22 = vpop.xlane.xlu2 %772 }
 0x2f3   :  { %v5711_v12 = vpop.xlane.xlu0 %774  ;;  %9438 = vst [vmem:[#allocation94_spill] sm:$0xff] %v5733_v54 }
 0x2f4   :  { %1299 = vperm.xlu0 %4552, %v5684_v1   ;;  %v5718_v1 = vmul.f32 0.0625, %v836_v25  ;;  %v5720_v40 = vpop.xlane.xlu1 %770  ;;  %v849_v25 = vadd.f32 %v5650_v48, %v5326_v23  ;;  %v842_v23 = vadd.f32 %v5650_v48, %v5310_v33 }
 0x2f6   :  { %9436 = vst [vmem:[#allocation92_spill] sm:$0xff] %v5718_v1  ;;  %v5747_v17 = vmul.f32 0.0625, %v849_v25  ;;  %v844_v25 = vadd.f32 %v5650_v48, %v5312_v38 }
 0x2f7   :  { %1275 = vperm.xlu2 %4554, %v5693_v13  }
 0x2f8   :  { %1278 = vperm.xlu1 %4553, %v5699_v11   ;;  %9440 = vst [vmem:[#allocation96_spill] sm:$0xff] %v5747_v17 }
 0x2fa   :  { %v5707_v39 = vpop.xlane.xlu2 %778 }
 0x2fc   :  { %1308 = vperm.xlu0 %4552, %v5705_v56   ;;  %v5737_v56 = vpop.xlane.xlu0 %780  ;;  %v5744_v6 = vpop.xlane.xlu1 %776 }
 0x2ff   :  { %1284 = vperm.xlu2 %4554, %v5714_v31   ;;  %v5739_v31 = vmul.f32 0.0625, %v839_v35  ;;  %v5757_v35 = vmul.f32 0.0625, %v841_v2  ;;  %v845_v2 = vadd.f32 %v5650_v48, %v5319_v3 }
 0x300   :  { %1287 = vperm.xlu1 %4553, %v5718_v1  }
 0x301   :  { %9439 = vst [vmem:[#allocation95_spill] sm:$0xff] %v5739_v31  ;;  %v5784_v38 = vmul.f32 0.0625, %v845_v2  ;;  %v9452_v2 = vld [vmem:[#allocation24_spill] sm:$0xff] }
 0x302   :  { %v5728_v13 = vpop.xlane.xlu2 %784  ;;  %9441 = vst [vmem:[#allocation97_spill] sm:$0xff] %v5757_v35 }
 0x303   :  { %9447 = vst [vmem:[#allocation103_spill] sm:$0xff] %v5784_v38 }
 0x304   :  { %1317 = vperm.xlu0 %4552, %v5726_v59   ;;  %v5754_v59 = vperm.slane %v5183_v44, 3 }
 0x306   :  { %v852_v20 = vadd.f32 %v5754_v59, %v5335_v51  ;;  %v5778_v51 = vmul.f32 0.0625, %v844_v25  ;;  %v9450_v25 = vld [vmem:[#allocation18_spill] sm:$0xff] }
 0x307   :  { %1293 = vperm.xlu2 %4554, %v5733_v54  }
 0x308   :  { %1296 = vperm.xlu1 %4553, %v5739_v31   ;;  %v5763_v31 = vmul.f32 0.0625, %v842_v23  ;;  %v5769_v33 = vmul.f32 0.0625, %v852_v20  ;;  %9445 = vst [vmem:[#allocation101_spill] sm:$0xff] %v5778_v51  ;;  %v855_v23 = vadd.f32 %v5754_v59, %v5347_v43  ;;  %v847_v20 = vadd.f32 %v5650_v48, %v5321_v4 }
 0x30a   :  { %v5749_v26 = vpop.permute.xlu2 %1194  ;;  %9442 = vst [vmem:[#allocation98_spill] sm:$0xff] %v5763_v31  ;;  %v5790_v3 = vmul.f32 0.0625, %v855_v23  ;;  %v5799_v43 = vmul.f32 0.0625, %v847_v20  ;;  %v9455_v23 = vld [vmem:[#allocation19_spill] sm:$0xff]  ;;  %v9458_v20 = vld [vmem:[#allocation20_spill] sm:$0xff] }
 0x30b   :  { %9443 = vst [vmem:[#allocation99_spill] sm:$0xff] %v5769_v33 }
 0x30c   :  { %1326 = vperm.xlu0 %4552, %v5747_v17   ;;  %v5775_v17 = vpop.xlane.xlu1 %782  ;;  %9448 = vst [vmem:[#allocation104_spill] sm:$0xff] %v5790_v3 }
 0x30d   :  { %9451 = vst [vmem:[#allocation18_spill] sm:$0xff] %v5799_v43 }
 0x30e   :  { %v5761_v54 = vpop.permute.xlu0 %1188 }
 0x30f   :  { %1302 = vperm.xlu2 %4554, %v5757_v35  }
 0x310   :  { %1305 = vperm.xlu1 %4553, %v5763_v31  }
 0x312   :  { %v5771_v1 = vpop.permute.xlu2 %1197 }
 0x313   :  { %9444 = vst [vmem:[#allocation100_spill] sm:$0xff] %v5771_v1 }
 0x314   :  { %1335 = vperm.xlu0 %4552, %v5769_v33   ;;  %v848_v33 = vadd.f32 %v5650_v48, %v9450_v25 }
 0x316   :  { %v5782_v35 = vpop.permute.xlu0 %1209  ;;  %v5805_v4 = vmul.f32 0.0625, %v848_v33 }
 0x317   :  { %9446 = vst [vmem:[#allocation102_spill] sm:$0xff] %v5782_v35  ;;  %1311 = vperm.xlu2 %4554, %v5778_v51   ;;  %v858_v51 = vadd.f32 %v5754_v59, %v9452_v2  ;;  %v9461_v2 = vld [vmem:[#allocation27_spill] sm:$0xff] }
 0x318   :  { %1314 = vperm.xlu1 %4553, %v5784_v38   ;;  %9454 = vst [vmem:[#allocation106_spill] sm:$0xff] %v5805_v4  ;;  %v850_v38 = vadd.f32 %v5650_v48, %v9455_v23 }
 0x319   :  { %v5811_v25 = vmul.f32 0.0625, %v858_v51  ;;  %v9464_v51 = vld [vmem:[#allocation21_spill] sm:$0xff] }
 0x31a   :  { %v5792_v31 = vpop.permute.xlu2 %1203  ;;  %v5796_v11 = vpop.permute.xlu1 %1191  ;;  %v5820_v33 = vmul.f32 0.0625, %v850_v38  ;;  %v853_v23 = vadd.f32 %v5754_v59, %v9464_v51  ;;  %v9467_v38 = vld [vmem:[#allocation22_spill] sm:$0xff] }
 0x31b   :  { %9449 = vst [vmem:[#allocation105_spill] sm:$0xff] %v5792_v31 }
 0x31c   :  { %1344 = vperm.xlu0 %4552, %v5790_v3   ;;  %9456 = vst [vmem:[#allocation19_spill] sm:$0xff] %v5811_v25  ;;  %v851_v3 = vadd.f32 %v5754_v59, %v9458_v20 }
 0x31d   :  { %9460 = vst [vmem:[#allocation108_spill] sm:$0xff] %v5820_v33 }
 0x31e   :  { %v5803_v19 = vpop.permute.xlu0 %1218  ;;  %v5826_v48 = vmul.f32 0.0625, %v851_v3  ;;  %v5841_v3 = vmul.f32 0.0625, %v853_v23  ;;  %v9475_v23 = vld [vmem:[#allocation25_spill] sm:$0xff] }
 0x31f   :  { %9453 = vst [vmem:[#allocation24_spill] sm:$0xff] %v5803_v19  ;;  %1320 = vperm.xlu2 %4554, %v5799_v43   ;;  %v861_v43 = vadd.f32 %v5754_v59, %v9461_v2  ;;  %v9470_v2 = vld [vmem:[#allocation30_spill] sm:$0xff] }
 0x320   :  { %1323 = vperm.xlu1 %4553, %v5805_v4   ;;  %9463 = vst [vmem:[#allocation109_spill] sm:$0xff] %v5826_v48 }
 0x321   :  { %v5832_v20 = vmul.f32 0.0625, %v861_v43  ;;  %9469 = vst [vmem:[#allocation111_spill] sm:$0xff] %v5841_v3  ;;  %v9472_v43 = vld [vmem:[#allocation23_spill] sm:$0xff] }
 0x322   :  { %v5813_v58 = vpop.permute.xlu2 %1212  ;;  %v5817_v46 = vpop.permute.xlu1 %1200 }
 0x323   :  { %9457 = vst [vmem:[#allocation107_spill] sm:$0xff] %v5813_v58 }
 0x324   :  { %9459 = vst [vmem:[#allocation20_spill] sm:$0xff] %v5817_v46  ;;  %1353 = vperm.xlu0 %4552, %v5811_v25   ;;  %v854_v25 = vadd.f32 %v5754_v59, %v9467_v38 }
 0x325   :  { %9465 = vst [vmem:[#allocation21_spill] sm:$0xff] %v5832_v20 }
 0x326   :  { %v5824_v19 = vpop.permute.xlu0 %1227  ;;  %v5847_v51 = vmul.f32 0.0625, %v854_v25 }
 0x327   :  { %9462 = vst [vmem:[#allocation27_spill] sm:$0xff] %v5824_v19  ;;  %1329 = vperm.xlu2 %4554, %v5820_v33   ;;  %v864_v33 = vadd.f32 %v5754_v59, %v9470_v2  ;;  %v5862_v2 = vperm.slane %v5183_v44, 4 }
 0x328   :  { %1332 = vperm.xlu1 %4553, %v5826_v48   ;;  %9471 = vst [vmem:[#allocation30_spill] sm:$0xff] %v5847_v51  ;;  %v856_v48 = vadd.f32 %v5754_v59, %v9472_v43 }
 0x329   :  { %v5853_v38 = vmul.f32 0.0625, %v864_v33 }
 0x32a   :  { %v5834_v4 = vpop.permute.xlu2 %1221  ;;  %v5838_v58 = vpop.permute.xlu1 %1206  ;;  %v5865_v25 = vmul.f32 0.0625, %v856_v48  ;;  %v9482_v48 = vld [vmem:[#allocation28_spill] sm:$0xff] }
 0x32b   :  { %9466 = vst [vmem:[#allocation110_spill] sm:$0xff] %v5834_v4 }
 0x32c   :  { %9468 = vst [vmem:[#allocation22_spill] sm:$0xff] %v5838_v58  ;;  %1362 = vperm.xlu0 %4552, %v5832_v20   ;;  %v857_v20 = vadd.f32 %v5754_v59, %v9475_v23 }
 0x32d   :  { %9473 = vst [vmem:[#allocation23_spill] sm:$0xff] %v5853_v38 }
 0x32e   :  { %v5845_v19 = vpop.permute.xlu0 %1236  ;;  %9477 = vst [vmem:[#allocation113_spill] sm:$0xff] %v5865_v25  ;;  %v5871_v33 = vmul.f32 0.0625, %v857_v20 }
 0x32f   :  { %1338 = vperm.xlu2 %4554, %v5841_v3   ;;  %v9478_v3 = vld [vmem:[#allocation33_spill] sm:$0xff] }
 0x330   :  { %1341 = vperm.xlu1 %4553, %v5847_v51   ;;  %v867_v43 = vadd.f32 %v5862_v2, %v9478_v3  ;;  %9479 = vst [vmem:[#allocation33_spill] sm:$0xff] %v5871_v33  ;;  %v9485_v3 = vld [vmem:[#allocation36_spill] sm:$0xff] }
 0x332   :  { %v5855_v4 = vpop.permute.xlu2 %1230  ;;  %v5859_v35 = vpop.permute.xlu1 %1215 }
 0x333   :  { %9474 = vst [vmem:[#allocation112_spill] sm:$0xff] %v5855_v4  ;;  %v9480_v4 = vld [vmem:[#allocation26_spill] sm:$0xff] }
 0x334   :  { %9476 = vst [vmem:[#allocation25_spill] sm:$0xff] %v5859_v35  ;;  %1371 = vperm.xlu0 %4552, %v5853_v38   ;;  %v859_v23 = vadd.f32 %v5754_v59, %v9480_v4  ;;  %v5877_v35 = vmul.f32 0.0625, %v867_v43  ;;  %v860_v38 = vadd.f32 %v5754_v59, %v9482_v48  ;;  %v9488_v43 = vld [vmem:[#allocation29_spill] sm:$0xff] }
 0x336   :  { %v5869_v51 = vpop.permute.xlu0 %1245  ;;  %9481 = vst [vmem:[#allocation26_spill] sm:$0xff] %v5877_v35  ;;  %v5886_v20 = vmul.f32 0.0625, %v859_v23  ;;  %v5892_v4 = vmul.f32 0.0625, %v860_v38  ;;  %v9491_v23 = vld [vmem:[#allocation31_spill] sm:$0xff] }
 0x337   :  { %1347 = vperm.xlu2 %4554, %v5865_v25   ;;  %v870_v25 = vadd.f32 %v5862_v2, %v9485_v3  ;;  %v873_v3 = vadd.f32 %v5862_v2, %v5404_v5 }
 0x338   :  { %1350 = vperm.xlu1 %4553, %v5871_v33   ;;  %9484 = vst [vmem:[#allocation114_spill] sm:$0xff] %v5886_v20  ;;  %v862_v33 = vadd.f32 %v5754_v59, %v9488_v43 }
 0x339   :  { %9487 = vst [vmem:[#allocation115_spill] sm:$0xff] %v5892_v4  ;;  %v5898_v48 = vmul.f32 0.0625, %v870_v25  ;;  %v9496_v25 = vld [vmem:[#allocation32_spill] sm:$0xff] }
 0x33a   :  { %v5879_v31 = vpop.permute.xlu2 %1239  ;;  %v5883_v58 = vpop.permute.xlu1 %1224  ;;  %v5907_v38 = vmul.f32 0.0625, %v862_v33  ;;  %v9499_v33 = vld [vmem:[#allocation34_spill] sm:$0xff] }
 0x33b   :  { %9483 = vst [vmem:[#allocation28_spill] sm:$0xff] %v5883_v58 }
 0x33c   :  { %1380 = vperm.xlu0 %4552, %v5877_v35   ;;  %9489 = vst [vmem:[#allocation29_spill] sm:$0xff] %v5898_v48  ;;  %v863_v35 = vadd.f32 %v5754_v59, %v9491_v23  ;;  %v5919_v23 = vmul.f32 0.0625, %v873_v3  ;;  %v9504_v3 = vld [vmem:[#allocation35_spill] sm:$0xff] }
 0x33d   :  { %9493 = vst [vmem:[#allocation117_spill] sm:$0xff] %v5907_v38 }
 0x33e   :  { %v5890_v1 = vpop.permute.xlu0 %1254  ;;  %v5913_v43 = vmul.f32 0.0625, %v863_v35  ;;  %9497 = vst [vmem:[#allocation32_spill] sm:$0xff] %v5919_v23  ;;  %v9501_v35 = vld [vmem:[#allocation41_spill] sm:$0xff] }
 0x33f   :  { %9486 = vst [vmem:[#allocation36_spill] sm:$0xff] %v5890_v1  ;;  %1356 = vperm.xlu2 %4554, %v5886_v20  }
 0x340   :  { %1359 = vperm.xlu1 %4553, %v5892_v4   ;;  %9495 = vst [vmem:[#allocation119_spill] sm:$0xff] %v5913_v43  ;;  %v865_v4 = vadd.f32 %v5754_v59, %v9496_v25 }
 0x342   :  { %v5900_v58 = vpop.permute.xlu2 %1248  ;;  %v5904_v46 = vpop.permute.xlu1 %1233  ;;  %v5928_v5 = vmul.f32 0.0625, %v865_v4  ;;  %v9507_v4 = vld [vmem:[#allocation37_spill] sm:$0xff] }
 0x343   :  { %9490 = vst [vmem:[#allocation116_spill] sm:$0xff] %v5900_v58 }
 0x344   :  { %9492 = vst [vmem:[#allocation31_spill] sm:$0xff] %v5904_v46  ;;  %1389 = vperm.xlu0 %4552, %v5898_v48   ;;  %v866_v48 = vadd.f32 %v5754_v59, %v9499_v33 }
 0x345   :  { %9500 = vst [vmem:[#allocation34_spill] sm:$0xff] %v5928_v5 }
 0x346   :  { %v5911_v20 = vpop.permute.xlu0 %1263  ;;  %v5934_v25 = vmul.f32 0.0625, %v866_v48 }
 0x347   :  { %9494 = vst [vmem:[#allocation118_spill] sm:$0xff] %v5911_v20  ;;  %1365 = vperm.xlu2 %4554, %v5907_v38   ;;  %v876_v38 = vadd.f32 %v5862_v2, %v9501_v35  ;;  %v9509_v35 = vld [vmem:[#allocation44_spill] sm:$0xff] }
 0x348   :  { %1368 = vperm.xlu1 %4553, %v5913_v43   ;;  %9503 = vst [vmem:[#allocation121_spill] sm:$0xff] %v5934_v25  ;;  %v868_v43 = vadd.f32 %v5862_v2, %v9504_v3 }
 0x349   :  { %v5940_v59 = vmul.f32 0.0625, %v876_v38  ;;  %v9512_v38 = vld [vmem:[#allocation38_spill] sm:$0xff] }
 0x34a   :  { %v5921_v46 = vpop.permute.xlu2 %1257  ;;  %v5925_v1 = vpop.permute.xlu1 %1242  ;;  %v5949_v48 = vmul.f32 0.0625, %v868_v43  ;;  %v9515_v43 = vld [vmem:[#allocation39_spill] sm:$0xff] }
 0x34b   :  { %9498 = vst [vmem:[#allocation120_spill] sm:$0xff] %v5921_v46 }
 0x34c   :  { %1398 = vperm.xlu0 %4552, %v5919_v23   ;;  %9505 = vst [vmem:[#allocation35_spill] sm:$0xff] %v5940_v59  ;;  %v869_v23 = vadd.f32 %v5862_v2, %v9507_v4 }
 0x34d   :  { %9508 = vst [vmem:[#allocation37_spill] sm:$0xff] %v5949_v48 }
 0x34e   :  { %v5932_v20 = vpop.permute.xlu0 %1272  ;;  %v5955_v3 = vmul.f32 0.0625, %v869_v23 }
 0x34f   :  { %9502 = vst [vmem:[#allocation41_spill] sm:$0xff] %v5932_v20  ;;  %1374 = vperm.xlu2 %4554, %v5928_v5   ;;  %v879_v5 = vadd.f32 %v5862_v2, %v9509_v35  ;;  %v9518_v35 = vld [vmem:[#allocation47_spill] sm:$0xff] }
 0x350   :  { %1377 = vperm.xlu1 %4553, %v5934_v25   ;;  %9511 = vst [vmem:[#allocation123_spill] sm:$0xff] %v5955_v3  ;;  %v871_v25 = vadd.f32 %v5862_v2, %v9512_v38 }
 0x351   :  { %v5961_v4 = vmul.f32 0.0625, %v879_v5  ;;  %v9521_v5 = vld [vmem:[#allocation40_spill] sm:$0xff] }
 0x352   :  { %v5942_v33 = vpop.permute.xlu2 %1266  ;;  %v5946_v46 = vpop.permute.xlu1 %1251  ;;  %v5970_v23 = vmul.f32 0.0625, %v871_v25  ;;  %v9524_v25 = vld [vmem:[#allocation42_spill] sm:$0xff] }
 0x353   :  { %9506 = vst [vmem:[#allocation122_spill] sm:$0xff] %v5942_v33 }
 0x354   :  { %1407 = vperm.xlu0 %4552, %v5940_v59   ;;  %9513 = vst [vmem:[#allocation38_spill] sm:$0xff] %v5961_v4  ;;  %v872_v59 = vadd.f32 %v5862_v2, %v9515_v43 }
 0x355   :  { %9517 = vst [vmem:[#allocation125_spill] sm:$0xff] %v5970_v23 }
 0x356   :  { %v5953_v20 = vpop.permute.xlu0 %1281  ;;  %v5976_v38 = vmul.f32 0.0625, %v872_v59 }
 0x357   :  { %9510 = vst [vmem:[#allocation44_spill] sm:$0xff] %v5953_v20  ;;  %1383 = vperm.xlu2 %4554, %v5949_v48   ;;  %v882_v48 = vadd.f32 %v5862_v2, %v9518_v35  ;;  %v5991_v35 = vperm.slane %v5183_v44, 5 }
 0x358   :  { %1386 = vperm.xlu1 %4553, %v5955_v3   ;;  %9520 = vst [vmem:[#allocation126_spill] sm:$0xff] %v5976_v38  ;;  %v874_v3 = vadd.f32 %v5862_v2, %v9521_v5 }
 0x359   :  { %v5982_v43 = vmul.f32 0.0625, %v882_v48  ;;  %v885_v5 = vadd.f32 %v5991_v35, %v5440_v16 }
 0x35a   :  { %v5963_v33 = vpop.permute.xlu2 %1275  ;;  %v5967_v58 = vpop.permute.xlu1 %1260  ;;  %v5994_v59 = vmul.f32 0.0625, %v874_v3  ;;  %v9531_v3 = vld [vmem:[#allocation45_spill] sm:$0xff] }
 0x35b   :  { %9514 = vst [vmem:[#allocation124_spill] sm:$0xff] %v5963_v33 }
 0x35c   :  { %9516 = vst [vmem:[#allocation39_spill] sm:$0xff] %v5967_v58  ;;  %1416 = vperm.xlu0 %4552, %v5961_v4   ;;  %v875_v4 = vadd.f32 %v5862_v2, %v9524_v25 }
 0x35d   :  { %9522 = vst [vmem:[#allocation40_spill] sm:$0xff] %v5982_v43 }
 0x35e   :  { %v5974_v20 = vpop.permute.xlu0 %1290  ;;  %9526 = vst [vmem:[#allocation128_spill] sm:$0xff] %v5994_v59  ;;  %v6000_v48 = vmul.f32 0.0625, %v875_v4  ;;  %v888_v4 = vadd.f32 %v5991_v35, %v5448_v42 }
 0x35f   :  { %9519 = vst [vmem:[#allocation47_spill] sm:$0xff] %v5974_v20  ;;  %1392 = vperm.xlu2 %4554, %v5970_v23  }
 0x360   :  { %1395 = vperm.xlu1 %4553, %v5976_v38   ;;  %9528 = vst [vmem:[#allocation130_spill] sm:$0xff] %v6000_v48  ;;  %v9529_v38 = vld [vmem:[#allocation43_spill] sm:$0xff] }
 0x361   :  { %v877_v25 = vadd.f32 %v5862_v2, %v9529_v38 }
 0x362   :  { %v5984_v33 = vpop.permute.xlu2 %1284  ;;  %v5988_v58 = vpop.permute.xlu1 %1269 }
 0x363   :  { %9523 = vst [vmem:[#allocation127_spill] sm:$0xff] %v5984_v33  ;;  %v6015_v16 = vmul.f32 0.0625, %v877_v25  ;;  %v9537_v25 = vld [vmem:[#allocation48_spill] sm:$0xff] }
 0x364   :  { %9525 = vst [vmem:[#allocation42_spill] sm:$0xff] %v5988_v58  ;;  %1425 = vperm.xlu0 %4552, %v5982_v43   ;;  %v6006_v58 = vmul.f32 0.0625, %v885_v5  ;;  %v878_v43 = vadd.f32 %v5862_v2, %v9531_v3  ;;  %v9535_v5 = vld [vmem:[#allocation46_spill] sm:$0xff]  ;;  %v6027_v3 = vmul.f32 0.0625, %v888_v4  ;;  %v9541_v4 = vld [vmem:[#allocation49_spill] sm:$0xff] }
 0x365   :  { %9533 = vst [vmem:[#allocation131_spill] sm:$0xff] %v6015_v16 }
 0x366   :  { %v5998_v23 = vpop.permute.xlu0 %1299  ;;  %9530 = vst [vmem:[#allocation43_spill] sm:$0xff] %v6006_v58  ;;  %v6021_v38 = vmul.f32 0.0625, %v878_v43  ;;  %v891_v43 = vadd.f32 %v5991_v35, %v5461_v10 }
 0x367   :  { %9527 = vst [vmem:[#allocation129_spill] sm:$0xff] %v5998_v23  ;;  %1401 = vperm.xlu2 %4554, %v5994_v59  }
 0x368   :  { %1404 = vperm.xlu1 %4553, %v6000_v48   ;;  %9534 = vst [vmem:[#allocation132_spill] sm:$0xff] %v6021_v38  ;;  %v880_v48 = vadd.f32 %v5862_v2, %v9535_v5 }
 0x369   :  { %9536 = vst [vmem:[#allocation46_spill] sm:$0xff] %v6027_v3 }
 0x36a   :  { %v6008_v20 = vpop.permute.xlu2 %1293  ;;  %v6012_v33 = vpop.permute.xlu1 %1278  ;;  %v6036_v42 = vmul.f32 0.0625, %v880_v48  ;;  %v884_v48 = vadd.f32 %v5991_v35, %v5442_v55 }
 0x36b   :  { %9532 = vst [vmem:[#allocation45_spill] sm:$0xff] %v6012_v33 }
 0x36c   :  { %1434 = vperm.xlu0 %4552, %v6006_v58   ;;  %v881_v58 = vadd.f32 %v5862_v2, %v9537_v25  ;;  %9538 = vst [vmem:[#allocation48_spill] sm:$0xff] %v6036_v42  ;;  %v6048_v2 = vmul.f32 0.0625, %v891_v43  ;;  %v9546_v43 = vld [vmem:[#allocation50_spill] sm:$0xff] }
 0x36e   :  { %v6019_v59 = vpop.permute.xlu0 %1308  ;;  %v6042_v5 = vmul.f32 0.0625, %v881_v58  ;;  %9542 = vst [vmem:[#allocation49_spill] sm:$0xff] %v6048_v2  ;;  %v894_v58 = vadd.f32 %v5991_v35, %v5474_v14 }
 0x36f   :  { %1410 = vperm.xlu2 %4554, %v6015_v16  }
 0x370   :  { %1413 = vperm.xlu1 %4553, %v6021_v38   ;;  %9540 = vst [vmem:[#allocation134_spill] sm:$0xff] %v6042_v5  ;;  %v883_v38 = vadd.f32 %v5991_v35, %v9541_v4  ;;  %v6063_v4 = vmul.f32 0.0625, %v884_v48  ;;  %v6069_v55 = vmul.f32 0.0625, %v894_v58  ;;  %v897_v48 = vadd.f32 %v5991_v35, %v5495_v57  ;;  %v9552_v58 = vld [vmem:[#allocation51_spill] sm:$0xff] }
 0x371   :  { %v6099_v57 = vperm.slane %v5183_v44, 6 }
 0x372   :  { %v6029_v33 = vpop.permute.xlu2 %1302  ;;  %v6033_v23 = vpop.permute.xlu1 %1287  ;;  %v6057_v10 = vmul.f32 0.0625, %v883_v38  ;;  %9545 = vst [vmem:[#allocation137_spill] sm:$0xff] %v6063_v4  ;;  %v887_v38 = vadd.f32 %v5991_v35, %v5450_v47  ;;  %v6090_v47 = vmul.f32 0.0625, %v897_v48 }
 0x373   :  { %9547 = vst [vmem:[#allocation50_spill] sm:$0xff] %v6069_v55 }
 0x374   :  { %1443 = vperm.xlu0 %4552, %v6027_v3   ;;  %9543 = vst [vmem:[#allocation135_spill] sm:$0xff] %v6057_v10 }
 0x375   :  { %9553 = vst [vmem:[#allocation51_spill] sm:$0xff] %v6090_v47 }
 0x376   :  { %v6040_v16 = vpop.permute.xlu0 %1317 }
 0x377   :  { %9539 = vst [vmem:[#allocation133_spill] sm:$0xff] %v6040_v16  ;;  %1419 = vperm.xlu2 %4554, %v6036_v42  }
 0x378   :  { %1422 = vperm.xlu1 %4553, %v6042_v5   ;;  %v886_v5 = vadd.f32 %v5991_v35, %v9546_v43  ;;  %v6084_v43 = vmul.f32 0.0625, %v887_v38 }
 0x37a   :  { %v6050_v25 = vpop.permute.xlu2 %1311  ;;  %v6054_v3 = vpop.permute.xlu1 %1296  ;;  %v6078_v14 = vmul.f32 0.0625, %v886_v5  ;;  %9551 = vst [vmem:[#allocation141_spill] sm:$0xff] %v6084_v43  ;;  %v9555_v5 = vld [vmem:[#allocation53_spill] sm:$0xff] }
 0x37c   :  { %1452 = vperm.xlu0 %4552, %v6048_v2   ;;  %9549 = vst [vmem:[#allocation139_spill] sm:$0xff] %v6078_v14 }
 0x37e   :  { %v6061_v42 = vpop.permute.xlu0 %1326 }
 0x37f   :  { %9544 = vst [vmem:[#allocation136_spill] sm:$0xff] %v6061_v42  ;;  %1428 = vperm.xlu2 %4554, %v6057_v10  }
 0x380   :  { %1431 = vperm.xlu1 %4553, %v6063_v4   ;;  %v889_v4 = vadd.f32 %v5991_v35, %v9552_v58  ;;  %v900_v58 = vadd.f32 %v6099_v57, %v5516_v32 }
 0x382   :  { %v6071_v16 = vpop.permute.xlu2 %1320  ;;  %v6075_v2 = vpop.permute.xlu1 %1305  ;;  %v6102_v38 = vmul.f32 0.0625, %v889_v4  ;;  %v893_v4 = vadd.f32 %v5991_v35, %v5478_v29 }
 0x383   :  { %9548 = vst [vmem:[#allocation138_spill] sm:$0xff] %v6071_v16 }
 0x384   :  { %1461 = vperm.xlu0 %4552, %v6069_v55   ;;  %v890_v55 = vadd.f32 %v5991_v35, %v9555_v5  ;;  %9556 = vst [vmem:[#allocation53_spill] sm:$0xff] %v6102_v38 }
 0x386   :  { %v6082_v10 = vpop.permute.xlu0 %1335  ;;  %v6108_v48 = vmul.f32 0.0625, %v890_v55  ;;  %v903_v55 = vadd.f32 %v6099_v57, %v5540_v15 }
 0x387   :  { %9550 = vst [vmem:[#allocation140_spill] sm:$0xff] %v6082_v10  ;;  %1437 = vperm.xlu2 %4554, %v6078_v14  }
 0x388   :  { %1440 = vperm.xlu1 %4553, %v6084_v43   ;;  %9558 = vst [vmem:[#allocation144_spill] sm:$0xff] %v6108_v48  ;;  %v9559_v43 = vld [vmem:[#allocation54_spill] sm:$0xff]  ;;  %v6135_v29 = vmul.f32 0.0625, %v903_v55  ;;  %v898_v55 = vadd.f32 %v5991_v35, %v5501_v45 }
 0x389   :  { %v892_v5 = vadd.f32 %v5991_v35, %v9559_v43  ;;  %v6129_v43 = vmul.f32 0.0625, %v893_v4  ;;  %v906_v4 = vadd.f32 %v6099_v57, %v5561_v50 }
 0x38a   :  { %v6092_v42 = vpop.permute.xlu2 %1329  ;;  %v6096_v16 = vpop.permute.xlu1 %1314  ;;  %v6165_v50 = vmul.f32 0.0625, %v898_v55  ;;  %v902_v55 = vadd.f32 %v6099_v57, %v5544_v61 }
 0x38b   :  { %9554 = vst [vmem:[#allocation142_spill] sm:$0xff] %v6092_v42  ;;  %v6114_v42 = vmul.f32 0.0625, %v900_v58  ;;  %v6123_v32 = vmul.f32 0.0625, %v892_v5  ;;  %v9563_v58 = vld [vmem:[#allocation56_spill] sm:$0xff]  ;;  %v896_v5 = vadd.f32 %v5991_v35, %v5499_v41  ;;  %v6156_v41 = vmul.f32 0.0625, %v906_v4 }
 0x38c   :  { %1470 = vperm.xlu0 %4552, %v6090_v47   ;;  %9562 = vst [vmem:[#allocation146_spill] sm:$0xff] %v6129_v43 }
 0x38d   :  { %9560 = vst [vmem:[#allocation54_spill] sm:$0xff] %v6114_v42 }
 0x38e   :  { %v6106_v14 = vpop.permute.xlu0 %1344  ;;  %9561 = vst [vmem:[#allocation145_spill] sm:$0xff] %v6123_v32 }
 0x38f   :  { %9557 = vst [vmem:[#allocation143_spill] sm:$0xff] %v6106_v14  ;;  %1446 = vperm.xlu2 %4554, %v6102_v38  }
 0x390   :  { %1449 = vperm.xlu1 %4553, %v6108_v48   ;;  %v895_v48 = vadd.f32 %v5991_v35, %v9563_v58  ;;  %9564 = vst [vmem:[#allocation56_spill] sm:$0xff] %v6135_v29  ;;  %v6150_v58 = vmul.f32 0.0625, %v896_v5  ;;  %v909_v5 = vadd.f32 %v6099_v57, %v5582_v34  ;;  %v9571_v35 = vld [vmem:[#allocation63_spill] sm:$0xff] }
 0x391   :  { %9567 = vst [vmem:[#allocation149_spill] sm:$0xff] %v6156_v41  ;;  %v901_v4 = vadd.f32 %v6099_v57, %v9571_v35  ;;  %v6192_v35 = vmul.f32 0.0625, %v902_v55 }
 0x392   :  { %v6116_v10 = vpop.permute.xlu2 %1338  ;;  %v6120_v47 = vpop.permute.xlu1 %1323  ;;  %v6144_v15 = vmul.f32 0.0625, %v895_v48  ;;  %9566 = vst [vmem:[#allocation148_spill] sm:$0xff] %v6150_v58  ;;  %v899_v48 = vadd.f32 %v6099_v57, %v5520_v52  ;;  %v6177_v52 = vmul.f32 0.0625, %v909_v5  ;;  %v904_v5 = vadd.f32 %v6099_v57, %v5546_v30 }
 0x393   :  { %9568 = vst [vmem:[#allocation150_spill] sm:$0xff] %v6165_v50  ;;  %v6186_v34 = vmul.f32 0.0625, %v901_v4  ;;  %v905_v4 = vadd.f32 %v6099_v57, %v5565_v53  ;;  %v907_v53 = vadd.f32 %v6099_v57, %v5567_v60 }
 0x394   :  { %1479 = vperm.xlu0 %4552, %v6114_v42   ;;  %9565 = vst [vmem:[#allocation147_spill] sm:$0xff] %v6144_v15  ;;  %v6171_v45 = vmul.f32 0.0625, %v899_v48  ;;  %v912_v48 = vadd.f32 %v6099_v57, %v5603_v21  ;;  %v6207_v21 = vperm.slane %v5183_v44, 7  ;;  %v6210_v55 = vmul.f32 0.0625, %v904_v5 }
 0x395   :  { %9572 = vst [vmem:[#allocation63_spill] sm:$0xff] %v6177_v52  ;;  %v908_v5 = vadd.f32 %v6099_v57, %v5591_v8 }
 0x396   :  { %v6127_v38 = vpop.permute.xlu0 %1353  ;;  %9570 = vst [vmem:[#allocation152_spill] sm:$0xff] %v6171_v45  ;;  %v6198_v61 = vmul.f32 0.0625, %v912_v48  ;;  %v915_v30 = vadd.f32 %v6207_v21, %v5624_v63  ;;  %v6216_v48 = vmul.f32 0.0625, %v905_v4  ;;  %v6231_v63 = vmul.f32 0.0625, %v907_v53 }
 0x397   :  { %1455 = vperm.xlu2 %4554, %v6123_v32   ;;  %9574 = vst [vmem:[#allocation154_spill] sm:$0xff] %v6186_v34  ;;  %v918_v4 = vadd.f32 %v6207_v21, %v5645_v28  ;;  %v6237_v60 = vmul.f32 0.0625, %v908_v5  ;;  %v911_v53 = vadd.f32 %v6099_v57, %v5616_v37  ;;  %v921_v5 = vadd.f32 %v6207_v21, %v5667_v7 }
 0x398   :  { %1458 = vperm.xlu1 %4553, %v6129_v43   ;;  %9575 = vst [vmem:[#allocation155_spill] sm:$0xff] %v6192_v35  ;;  %v6222_v44 = vmul.f32 0.0625, %v915_v30  ;;  %v910_v30 = vadd.f32 %v6099_v57, %v5586_v18 }
 0x399   :  { %9576 = vst [vmem:[#allocation156_spill] sm:$0xff] %v6198_v61  ;;  %v6243_v8 = vmul.f32 0.0625, %v918_v4  ;;  %v6258_v18 = vmul.f32 0.0625, %v911_v53  ;;  %v913_v4 = vadd.f32 %v6099_v57, %v5607_v27  ;;  %v6264_v37 = vmul.f32 0.0625, %v921_v5 }
 0x39a   :  { %v6137_v14 = vpop.permute.xlu2 %1347  ;;  %v6141_v42 = vpop.permute.xlu1 %1332  ;;  %9579 = vst [vmem:[#allocation159_spill] sm:$0xff] %v6210_v55  ;;  %v6252_v28 = vmul.f32 0.0625, %v910_v30  ;;  %v914_v30 = vadd.f32 %v6099_v57, %v5640_v0  ;;  %v924_v53 = vadd.f32 %v6207_v21, %v5688_v22  ;;  %v916_v5 = vadd.f32 %v6207_v21, %v5633_v36 }
 0x39b   :  { %9580 = vst [vmem:[#allocation160_spill] sm:$0xff] %v6216_v48  ;;  %v6273_v7 = vmul.f32 0.0625, %v913_v4  ;;  %v917_v4 = vadd.f32 %v6207_v21, %v5671_v62 }
 0x39c   :  { %1488 = vperm.xlu0 %4552, %v6135_v29   ;;  %9581 = vst [vmem:[#allocation161_spill] sm:$0xff] %v6222_v44  ;;  %v6279_v27 = vmul.f32 0.0625, %v914_v30  ;;  %v6285_v0 = vmul.f32 0.0625, %v924_v53  ;;  %v6294_v22 = vmul.f32 0.0625, %v916_v5  ;;  %v927_v30 = vadd.f32 %v6207_v21, %v5707_v39 }
 0x39d   :  { %9583 = vst [vmem:[#allocation163_spill] sm:$0xff] %v6231_v63  ;;  %v6300_v36 = vmul.f32 0.0625, %v917_v4  ;;  %v919_v53 = vadd.f32 %v6207_v21, %v5660_v9  ;;  %v920_v5 = vadd.f32 %v6207_v21, %v5695_v49  ;;  %v930_v4 = vadd.f32 %v6207_v21, %v5728_v13 }
 0x39e   :  { %v6148_v32 = vpop.permute.xlu0 %1362  ;;  %9584 = vst [vmem:[#allocation164_spill] sm:$0xff] %v6237_v60  ;;  %v6306_v62 = vmul.f32 0.0625, %v927_v30  ;;  %v922_v30 = vadd.f32 %v6207_v21, %v5686_v24  ;;  %v925_v24 = vadd.f32 %v6207_v21, %v5711_v12  ;;  %v928_v12 = vadd.f32 %v6207_v21, %v5737_v56 }
 0x39f   :  { %1464 = vperm.xlu2 %4554, %v6144_v15   ;;  %9585 = vst [vmem:[#allocation165_spill] sm:$0xff] %v6243_v8  ;;  %v6315_v39 = vmul.f32 0.0625, %v919_v53  ;;  %v6321_v9 = vmul.f32 0.0625, %v920_v5  ;;  %v6327_v49 = vmul.f32 0.0625, %v930_v4  ;;  %v923_v53 = vadd.f32 %v6207_v21, %v5720_v40 }
 0x3a0   :  { %1467 = vperm.xlu1 %4553, %v6150_v58   ;;  %9587 = vst [vmem:[#allocation167_spill] sm:$0xff] %v6252_v28  ;;  %v6336_v13 = vmul.f32 0.0625, %v922_v30  ;;  %v926_v40 = vadd.f32 %v6207_v21, %v5744_v6  ;;  %v6352_v30 = vmul.f32 0.0625, %v925_v24  ;;  %v929_v6 = vadd.f32 %v6207_v21, %v5775_v17 }
 0x3a1   :  { %9589 = vst [vmem:[#allocation169_spill] sm:$0xff] %v6258_v18  ;;  %v6368_v24 = vmul.f32 0.0625, %v928_v12 }
 0x3a2   :  { %v6158_v43 = vpop.permute.xlu2 %1356  ;;  %v6162_v29 = vpop.permute.xlu1 %1341  ;;  %9590 = vst [vmem:[#allocation170_spill] sm:$0xff] %v6264_v37 }
 0x3a3   :  { %9592 = vst [vmem:[#allocation172_spill] sm:$0xff] %v6273_v7 }
 0x3a4   :  { %1497 = vperm.xlu0 %4552, %v6156_v41   ;;  %9594 = vst [vmem:[#allocation174_spill] sm:$0xff] %v6279_v27 }
 0x3a5   :  { %9595 = vst [vmem:[#allocation175_spill] sm:$0xff] %v6285_v0 }
 0x3a6   :  { %v6169_v15 = vpop.permute.xlu0 %1371  ;;  %9597 = vst [vmem:[#allocation177_spill] sm:$0xff] %v6294_v22 }
 0x3a7   :  { %9569 = vst [vmem:[#allocation151_spill] sm:$0xff] %v6169_v15  ;;  %1473 = vperm.xlu2 %4554, %v6165_v50  }
 0x3a8   :  { %1476 = vperm.xlu1 %4553, %v6171_v45   ;;  %9599 = vst [vmem:[#allocation179_spill] sm:$0xff] %v6300_v36 }
 0x3a9   :  { %9600 = vst [vmem:[#allocation180_spill] sm:$0xff] %v6306_v62 }
 0x3aa   :  { %v6179_v58 = vpop.permute.xlu2 %1365  ;;  %v6183_v41 = vpop.permute.xlu1 %1350  ;;  %9603 = vst [vmem:[#allocation183_spill] sm:$0xff] %v6315_v39 }
 0x3ab   :  { %9573 = vst [vmem:[#allocation153_spill] sm:$0xff] %v6179_v58 }
 0x3ac   :  { %1506 = vperm.xlu0 %4552, %v6177_v52   ;;  %9604 = vst [vmem:[#allocation184_spill] sm:$0xff] %v6321_v9 }
 0x3ad   :  { %9605 = vst [vmem:[#allocation185_spill] sm:$0xff] %v6327_v49 }
 0x3ae   :  { %v6190_v50 = vpop.permute.xlu0 %1380  ;;  %9607 = vst [vmem:[#allocation187_spill] sm:$0xff] %v6336_v13 }
 0x3af   :  { %1482 = vperm.xlu2 %4554, %v6186_v34   ;;  %9610 = vst [vmem:[#allocation190_spill] sm:$0xff] %v6352_v30 }
 0x3b0   :  { %1485 = vperm.xlu1 %4553, %v6192_v35   ;;  %9614 = vst [vmem:[#allocation194_spill] sm:$0xff] %v6368_v24 }
 0x3b2   :  { %v6200_v45 = vpop.permute.xlu2 %1374  ;;  %v6204_v52 = vpop.permute.xlu1 %1359 }
 0x3b3   :  { %9577 = vst [vmem:[#allocation157_spill] sm:$0xff] %v6200_v45  ;;  %v1571_v45 = vlaneseq }
 0x3b4   :  { %9578 = vst [vmem:[#allocation158_spill] sm:$0xff] %v6204_v52  ;;  %1515 = vperm.xlu0 %4552, %v6198_v61  }
 0x3b6   :  { %v6214_v34 = vpop.permute.xlu0 %1389 }
 0x3b7   :  { %1491 = vperm.xlu2 %4554, %v6210_v55  }
 0x3b8   :  { %1494 = vperm.xlu1 %4553, %v6216_v48  }
 0x3ba   :  { %v6224_v35 = vpop.permute.xlu2 %1383  ;;  %v6228_v61 = vpop.permute.xlu1 %1368 }
 0x3bb   :  { %9582 = vst [vmem:[#allocation162_spill] sm:$0xff] %v6228_v61 }
 0x3bc   :  { %1524 = vperm.xlu0 %4552, %v6222_v44  }
 0x3be   :  { %v6235_v55 = vpop.permute.xlu0 %1398 }
 0x3bf   :  { %1500 = vperm.xlu2 %4554, %v6231_v63  }
 0x3c0   :  { %1503 = vperm.xlu1 %4553, %v6237_v60  }
 0x3c2   :  { %v6245_v48 = vpop.permute.xlu2 %1392  ;;  %v6249_v44 = vpop.permute.xlu1 %1377 }
 0x3c3   :  { %9586 = vst [vmem:[#allocation166_spill] sm:$0xff] %v6249_v44 }
 0x3c4   :  { %1533 = vperm.xlu0 %4552, %v6243_v8  }
 0x3c6   :  { %v6256_v63 = vpop.permute.xlu0 %1407 }
 0x3c7   :  { %9588 = vst [vmem:[#allocation168_spill] sm:$0xff] %v6256_v63  ;;  %1509 = vperm.xlu2 %4554, %v6252_v28  }
 0x3c8   :  { %1512 = vperm.xlu1 %4553, %v6258_v18  }
 0x3ca   :  { %v6266_v60 = vpop.permute.xlu2 %1401  ;;  %v6270_v8 = vpop.permute.xlu1 %1386 }
 0x3cb   :  { %9591 = vst [vmem:[#allocation171_spill] sm:$0xff] %v6266_v60  ;;  %v9633_v60 = vld [vmem:[#allocation22_spill] sm:$0xff] }
 0x3cc   :  { %1542 = vperm.xlu0 %4552, %v6264_v37  }
 0x3ce   :  { %v6277_v28 = vpop.permute.xlu0 %1416 }
 0x3cf   :  { %9593 = vst [vmem:[#allocation173_spill] sm:$0xff] %v6277_v28  ;;  %1518 = vperm.xlu2 %4554, %v6273_v7  }
 0x3d0   :  { %1521 = vperm.xlu1 %4553, %v6279_v27  }
 0x3d2   :  { %v6287_v57 = vpop.permute.xlu2 %1410  ;;  %v6291_v37 = vpop.permute.xlu1 %1395 }
 0x3d3   :  { %9596 = vst [vmem:[#allocation176_spill] sm:$0xff] %v6287_v57 }
 0x3d4   :  { %1551 = vperm.xlu0 %4552, %v6285_v0  }
 0x3d6   :  { %v6298_v7 = vpop.permute.xlu0 %1425 }
 0x3d7   :  { %9598 = vst [vmem:[#allocation178_spill] sm:$0xff] %v6298_v7  ;;  %1527 = vperm.xlu2 %4554, %v6294_v22  }
 0x3d8   :  { %1530 = vperm.xlu1 %4553, %v6300_v36  }
 0x3da   :  { %v6308_v27 = vpop.permute.xlu2 %1419  ;;  %v6312_v0 = vpop.permute.xlu1 %1404 }
 0x3db   :  { %9601 = vst [vmem:[#allocation181_spill] sm:$0xff] %v6308_v27 }
 0x3dc   :  { %9602 = vst [vmem:[#allocation182_spill] sm:$0xff] %v6312_v0  ;;  %1560 = vperm.xlu0 %4552, %v6306_v62  }
 0x3de   :  { %v6319_v22 = vpop.permute.xlu0 %1434 }
 0x3df   :  { %1536 = vperm.xlu2 %4554, %v6315_v39   ;;  %v6340_v39 = vmul.f32 0.0625, %v923_v53  ;;  %v6356_v53 = vmul.f32 0.0625, %v926_v40  ;;  %v6372_v40 = vmul.f32 0.0625, %v929_v6 }
 0x3e0   :  { %1539 = vperm.xlu1 %4553, %v6321_v9  }
 0x3e1   :  { %9608 = vst [vmem:[#allocation188_spill] sm:$0xff] %v6340_v39 }
 0x3e2   :  { %v6329_v36 = vpop.permute.xlu2 %1428  ;;  %v6333_v62 = vpop.permute.xlu1 %1413  ;;  %9612 = vst [vmem:[#allocation192_spill] sm:$0xff] %v6356_v53 }
 0x3e3   :  { %9606 = vst [vmem:[#allocation186_spill] sm:$0xff] %v6333_v62 }
 0x3e4   :  { %1569 = vperm.xlu0 %4552, %v6327_v49   ;;  %9616 = vst [vmem:[#allocation196_spill] sm:$0xff] %v6372_v40 }
 0x3e6   :  { %v6338_v5 = vpop.permute.xlu0 %1443 }
 0x3e7   :  { %1545 = vperm.xlu2 %4554, %v6336_v13  }
 0x3e8   :  { %1548 = vperm.xlu1 %4553, %v6340_v39  }
 0x3ea   :  { %v6346_v4 = vpop.permute.xlu2 %1437  ;;  %v6350_v9 = vpop.permute.xlu1 %1422 }
 0x3eb   :  { %9609 = vst [vmem:[#allocation189_spill] sm:$0xff] %v6350_v9  ;;  %v6398_v9 = vand.u32 127, %v1571_v45 }
 0x3ed   :  { %v6407_v28 = vadd.s32 4294967288, %v6398_v9  ;;  %v1573_v15 = vperm.slane %v5761_v54, %v6398_v9  ;;  %v1634_v57 = vperm.slane %v5845_v19, %v6398_v9  ;;  %v6425_v61 = vadd.s32 4294967272, %v6398_v9 }
 0x3ee   :  { %v6354_v49 = vpop.permute.xlu0 %1452 }
 0x3ef   :  { %9611 = vst [vmem:[#allocation191_spill] sm:$0xff] %v6354_v49  ;;  %1554 = vperm.xlu2 %4554, %v6352_v30   ;;  %v1639_v63 = vperm.slane %v5869_v51, %v6425_v61  ;;  %v6462_v49 = vadd.s32 4294967240, %v6398_v9 }
 0x3f0   :  { %1557 = vperm.xlu1 %4553, %v6356_v53  }
 0x3f2   :  { %v6362_v13 = vpop.permute.xlu2 %1446  ;;  %v6366_v39 = vpop.permute.xlu1 %1431 }
 0x3f3   :  { %9613 = vst [vmem:[#allocation193_spill] sm:$0xff] %v6362_v13 }
 0x3f6   :  { %v6370_v18 = vpop.permute.xlu0 %1461 }
 0x3f7   :  { %9615 = vst [vmem:[#allocation195_spill] sm:$0xff] %v6370_v18  ;;  %1563 = vperm.xlu2 %4554, %v6368_v24   ;;  %v1575_v18 = vperm.slane %v5796_v11, %v6407_v28 }
 0x3f8   :  { %1566 = vperm.xlu1 %4553, %v6372_v40  }
 0x3f9   :  { %v1577_v11 = vsel %vm1576_vm0, %v1575_v18, %v1573_v15  ;;  %v1666_v15 = vperm.slane %v6033_v23, %v6407_v28 }
 0x3fa   :  { %v6376_v56 = vpop.permute.xlu2 %1455  ;;  %v6378_v30 = vpop.permute.xlu1 %1440 }
 0x3fb   :  { %9617 = vst [vmem:[#allocation197_spill] sm:$0xff] %v6376_v56 }
 0x3fe   :  { %v6380_v53 = vpop.permute.xlu0 %1470 }
 0x3ff   :  { %9618 = vst [vmem:[#allocation198_spill] sm:$0xff] %v6380_v53 }
 0x402   :  { %v6382_v7 = vpop.permute.xlu2 %1464  ;;  %v6384_v17 = vpop.permute.xlu1 %1449 }
 0x403   :  { %9619 = vst [vmem:[#allocation199_spill] sm:$0xff] %v6382_v7 }
 0x406   :  { %v6386_v21 = vpop.permute.xlu0 %1479 }
 0x40a   :  { %v6388_v12 = vpop.permute.xlu2 %1473  ;;  %v6390_v6 = vpop.permute.xlu1 %1458 }
 0x40b   :  { %9620 = vst [vmem:[#allocation200_spill] sm:$0xff] %v6388_v12  ;;  %v6410_v12 = vadd.s32 4294967280, %v6398_v9 }
 0x40c   :  { %9621 = vst [vmem:[#allocation201_spill] sm:$0xff] %v6390_v6 }
 0x40d   :  { %v1637_v45 = vperm.slane %v5925_v1, %v6410_v12  ;;  %v1579_v19 = vperm.slane %v5749_v26, %v6410_v12 }
 0x40e   :  { %v6392_v44 = vpop.permute.xlu0 %1488 }
 0x40f   :  { %v1581_v18 = vsel %vm1580_vm1, %v1579_v19, %v1577_v11  ;;  %v9630_v11 = vld [vmem:[#allocation116_spill] sm:$0xff] }
 0x412   :  { %v6394_v24 = vpop.permute.xlu2 %1482  ;;  %v6396_v40 = vpop.permute.xlu1 %1467 }
 0x413   :  { %9622 = vst [vmem:[#allocation202_spill] sm:$0xff] %v6396_v40  ;;  %v1635_v40 = vperm.slane %v5879_v31, %v6407_v28  ;;  %v6431_v31 = vadd.s32 4294967264, %v6398_v9 }
 0x415   :  { %v1636_v1 = vsel %vm1576_vm0, %v1635_v40, %v1634_v57  ;;  %v6448_v57 = vadd.s32 4294967248, %v6398_v9  ;;  %v9627_v40 = vld [vmem:[#allocation20_spill] sm:$0xff]  ;;  %v1641_v19 = vperm.slane %v9630_v11, %v6431_v31 }
 0x416   :  { %v6400_v53 = vpop.permute.xlu0 %1497  ;;  %v1638_v54 = vsel %vm1580_vm1, %v1637_v45, %v1636_v1  ;;  %v1587_v26 = vperm.slane %v9627_v40, %v6431_v31  ;;  %v6465_v40 = vadd.s32 4294967232, %v6398_v9 }
 0x417   :  { %9623 = vst [vmem:[#allocation203_spill] sm:$0xff] %v6400_v53  ;;  %v1640_v45 = vsel %vm1584_vm2, %v1639_v63, %v1638_v54  ;;  %v9629_v53 = vld [vmem:[#allocation100_spill] sm:$0xff]  ;;  %v9631_v54 = vld [vmem:[#allocation47_spill] sm:$0xff] }
 0x418   :  { %v1583_v23 = vperm.slane %v9629_v53, %v6425_v61  ;;  %v1668_v53 = vperm.slane %v9631_v54, %v6410_v12  ;;  %v9638_v54 = vld [vmem:[#allocation39_spill] sm:$0xff] }
 0x41a   :  { %v6402_v27 = vpop.permute.xlu2 %1491  ;;  %v6404_v7 = vpop.permute.xlu1 %1476 }
 0x41b   :  { %9624 = vst [vmem:[#allocation204_spill] sm:$0xff] %v6402_v27  ;;  %v1595_v27 = vperm.slane %v9633_v60, %v6448_v57 }
 0x41e   :  { %v6434_v6 = vpop.permute.xlu0 %1506 }
 0x41f   :  { %9626 = vst [vmem:[#allocation206_spill] sm:$0xff] %v6434_v6  ;;  %v9628_v6 = vld [vmem:[#allocation127_spill] sm:$0xff] }
 0x420   :  { %v1665_v51 = vperm.slane %v9628_v6, %v6398_v9  ;;  %v1642_v6 = vsel %vm9359_vm3, %v1641_v19, %v1640_v45  ;;  %v9636_v45 = vld [vmem:[#allocation36_spill] sm:$0xff]  ;;  %v1672_v19 = vperm.slane %v6054_v3, %v6431_v31 }
 0x421   :  { %v9639_v3 = vld [vmem:[#allocation120_spill] sm:$0xff] }
 0x422   :  { %v6422_v62 = vpop.permute.xlu2 %1500  ;;  %v6427_v56 = vpop.permute.xlu1 %1485  ;;  %v1667_v63 = vsel %vm1576_vm0, %v1666_v15, %v1665_v51  ;;  %v9635_v15 = vld [vmem:[#allocation105_spill] sm:$0xff]  ;;  %v1645_v51 = vperm.slane %v9636_v45, %v6448_v57  ;;  %v9640_v45 = vld [vmem:[#allocation102_spill] sm:$0xff] }
 0x423   :  { %9625 = vst [vmem:[#allocation205_spill] sm:$0xff] %v6422_v62  ;;  %v6440_v62 = vadd.s32 4294967256, %v6398_v9 }
 0x425   :  { %v1643_v1 = vperm.slane %v5946_v46, %v6440_v62  ;;  %v1585_v46 = vsel %vm1584_vm2, %v1583_v23, %v1581_v18  ;;  %v1591_v18 = vperm.slane %v9635_v15, %v6440_v62  ;;  %v1669_v23 = vsel %vm1580_vm1, %v1668_v53, %v1667_v63 }
 0x426   :  { %v1589_v11 = vsel %vm9359_vm3, %v1587_v26, %v1585_v46  ;;  %v1670_v26 = vperm.slane %v6008_v20, %v6425_v61  ;;  %v6489_v46 = vpop.permute.xlu0 %1515  ;;  %v1649_v15 = vperm.slane %v9638_v54, %v6465_v40  ;;  %v1647_v53 = vperm.slane %v9639_v3, %v6462_v49 }
 0x427   :  { %v1644_v0 = vsel %vm9358_vm4, %v1643_v1, %v1642_v6  ;;  %9637 = vst [vmem:[#allocation100_spill] sm:$0xff] %v6489_v46  ;;  %v1593_v60 = vsel %vm9358_vm4, %v1591_v18, %v1589_v11  ;;  %v6493_v1 = vadd.s32 4294967224, %v6398_v9  ;;  %v1599_v46 = vperm.slane %v9640_v45, %v6462_v49 }
 0x428   :  { %v1646_v6 = vsel %vm1596_vm5, %v1645_v51, %v1644_v0  ;;  %v1597_v63 = vsel %vm1596_vm5, %v1595_v27, %v1593_v60  ;;  %v1671_v20 = vsel %vm1584_vm2, %v1670_v26, %v1669_v23  ;;  %v6505_v11 = vadd.s32 4294967216, %v6398_v9  ;;  %v9641_v27 = vld [vmem:[#allocation129_spill] sm:$0xff] }
 0x429   :  { %v1673_v18 = vsel %vm9359_vm3, %v1672_v19, %v1671_v20  ;;  %v6509_v0 = vadd.s32 4294967208, %v6398_v9  ;;  %v1648_v51 = vsel %vm1600_vm6, %v1647_v53, %v1646_v6  ;;  %v1674_v60 = vperm.slane %v9641_v27, %v6440_v62  ;;  %v9642_v23 = vld [vmem:[#allocation25_spill] sm:$0xff]  ;;  %v9644_v19 = vld [vmem:[#allocation107_spill] sm:$0xff]  ;;  %v9646_v27 = vld [vmem:[#allocation42_spill] sm:$0xff] }
 0x42a   :  { %v6472_v58 = vpop.permute.xlu1 %1494  ;;  %v6478_v52 = vpop.permute.xlu2 %1509  ;;  %v1601_v54 = vsel %vm1600_vm6, %v1599_v46, %v1597_v63  ;;  %v1607_v26 = vperm.slane %v9642_v23, %v6493_v1  ;;  %v1650_v3 = vsel %vm1604_vm7, %v1649_v15, %v1648_v51  ;;  %v1603_v20 = vperm.slane %v9644_v19, %v6465_v40 }
 0x42b   :  { %9632 = vst [vmem:[#allocation20_spill] sm:$0xff] %v6472_v58  ;;  %v1675_v6 = vsel %vm9358_vm4, %v1674_v60, %v1673_v18  ;;  %v1678_v53 = vperm.slane %v6075_v2, %v6462_v49  ;;  %v1676_v46 = vperm.slane %v6029_v33, %v6448_v57  ;;  %v6531_v15 = vadd.s32 4294967200, %v6398_v9  ;;  %v9648_v2 = vld [vmem:[#allocation122_spill] sm:$0xff]  ;;  %v9649_v60 = vld [vmem:[#allocation24_spill] sm:$0xff] }
 0x42c   :  { %9634 = vst [vmem:[#allocation127_spill] sm:$0xff] %v6478_v52  ;;  %v9645_v52 = vld [vmem:[#allocation118_spill] sm:$0xff]  ;;  %v1605_v63 = vsel %vm1604_vm7, %v1603_v20, %v1601_v54  ;;  %v1655_v23 = vperm.slane %v9646_v27, %v6509_v0  ;;  %v1653_v18 = vperm.slane %v9648_v2, %v6505_v11  ;;  %v1611_v54 = vperm.slane %v9649_v60, %v6505_v11 }
 0x42d   :  { %v1651_v58 = vperm.slane %v9645_v52, %v6493_v1  ;;  %v1609_v52 = vsel %vm9213_vm8, %v1607_v26, %v1605_v63  ;;  %v1677_v33 = vsel %vm1596_vm5, %v1676_v46, %v1675_v6  ;;  %v6545_v20 = vadd.s32 4294967192, %v6398_v9  ;;  %v9651_v46 = vld [vmem:[#allocation28_spill] sm:$0xff] }
 0x42e   :  { %v6551_v27 = vadd.s32 4294967184, %v6398_v9  ;;  %v1680_v63 = vperm.slane %v6019_v59, %v6465_v40  ;;  %v1613_v6 = vsel %vm9211_vm9, %v1611_v54, %v1609_v52  ;;  %v1619_v2 = vperm.slane %v9651_v46, %v6531_v15  ;;  %v9655_v54 = vld [vmem:[#allocation45_spill] sm:$0xff] }
 0x42f   :  { %v1652_v51 = vsel %vm9213_vm8, %v1651_v58, %v1650_v3  ;;  %v1679_v58 = vsel %vm1600_vm6, %v1678_v53, %v1677_v33  ;;  %v6548_v3 = vpop.permute.xlu0 %1524  ;;  %v9652_v53 = vld [vmem:[#allocation110_spill] sm:$0xff]  ;;  %v1682_v52 = vperm.slane %v6050_v25, %v6493_v1  ;;  %v1696_v46 = vperm.slane %v6141_v42, %v6398_v9  ;;  %v9657_v25 = vld [vmem:[#allocation27_spill] sm:$0xff]  ;;  %v9661_v42 = vld [vmem:[#allocation112_spill] sm:$0xff] }
 0x430   :  { %9650 = vst [vmem:[#allocation22_spill] sm:$0xff] %v6551_v27  ;;  %v1654_v26 = vsel %vm9211_vm9, %v1653_v18, %v1652_v51  ;;  %v1615_v33 = vperm.slane %v9652_v53, %v6509_v0  ;;  %v1681_v13 = vsel %vm1604_vm7, %v1680_v63, %v1679_v58  ;;  %v1684_v51 = vperm.slane %v6096_v16, %v6505_v11  ;;  %v9656_v58 = vld [vmem:[#allocation124_spill] sm:$0xff] }
 0x431   :  { %v1656_v60 = vsel %vm9212_vm10, %v1655_v23, %v1654_v26  ;;  %v1661_v26 = vperm.slane %v9655_v54, %v6551_v27  ;;  %v1659_v63 = vperm.slane %v9656_v58, %v6545_v20  ;;  %v1683_v16 = vsel %vm9213_vm8, %v1682_v52, %v1681_v13 }
 0x432   :  { %v6518_v45 = vpop.permute.xlu1 %1503  ;;  %v6536_v19 = vpop.permute.xlu2 %1518  ;;  %v1617_v18 = vsel %vm9212_vm10, %v1615_v33, %v1613_v6  ;;  %v1623_v53 = vperm.slane %v9657_v25, %v6545_v20  ;;  %v6584_v6 = vadd.s32 4294967176, %v6398_v9  ;;  %v1627_v54 = vperm.slane %v9661_v42, %v6551_v27  ;;  %v9663_v42 = vld [vmem:[#allocation44_spill] sm:$0xff] }
 0x433   :  { %9643 = vst [vmem:[#allocation116_spill] sm:$0xff] %v6518_v45 }
 0x434   :  { %9647 = vst [vmem:[#allocation47_spill] sm:$0xff] %v6536_v19  ;;  %v9653_v19 = vld [vmem:[#allocation41_spill] sm:$0xff] }
 0x435   :  { %v1657_v45 = vperm.slane %v9653_v19, %v6531_v15  ;;  %v1621_v19 = vsel %vm9215_vm11, %v1619_v2, %v1617_v18  ;;  %9658 = vst [vmem:[#allocation36_spill] sm:$0xff] %v6584_v6  ;;  %v9659_v2 = vld [vmem:[#allocation133_spill] sm:$0xff]  ;;  %v9660_v18 = vld [vmem:[#allocation140_spill] sm:$0xff] }
 0x436   :  { %v1686_v33 = vperm.slane %v9659_v2, %v6509_v0  ;;  %v1697_v13 = vperm.slane %v9660_v18, %v6407_v28  ;;  %v1625_v58 = vsel %vm1624_vm12, %v1623_v53, %v1621_v19  ;;  %v9662_v18 = vld [vmem:[#allocation31_spill] sm:$0xff]  ;;  %v1663_v19 = vperm.slane %v9663_v42, %v6584_v6 }
 0x437   :  { %v1658_v23 = vsel %vm9215_vm11, %v1657_v45, %v1656_v60  ;;  %v1685_v45 = vsel %vm9211_vm9, %v1684_v51, %v1683_v16  ;;  %v1701_v16 = vperm.slane %v6162_v29, %v6425_v61  ;;  %v6604_v2 = vpop.permute.xlu0 %1533  ;;  %v1759_v29 = vperm.slane %v6366_v39, %v6407_v28 }
 0x438   :  { %v1660_v60 = vsel %vm1624_vm12, %v1659_v63, %v1658_v23  ;;  %v1687_v51 = vsel %vm9212_vm10, %v1686_v33, %v1685_v45  ;;  %v1690_v23 = vperm.slane %v6120_v47, %v6545_v20  ;;  %v1698_v63 = vsel %vm1576_vm0, %v1697_v13, %v1696_v46 }
 0x439   :  { %v1662_v25 = vsel %vm1628_vm13, %v1661_v26, %v1660_v60  ;;  %v9664_v26 = vld [vmem:[#allocation138_spill] sm:$0xff]  ;;  %v1699_v45 = vperm.slane %v6116_v10, %v6410_v12  ;;  %v1629_v46 = vsel %vm1628_vm13, %v1627_v54, %v1625_v58  ;;  %v1730_v54 = vperm.slane %v6270_v8, %v6410_v12 }
 0x43a   :  { %v6567_v59 = vpop.permute.xlu1 %1512  ;;  %v6592_v52 = vpop.permute.xlu2 %1527  ;;  %v1688_v53 = vperm.slane %v9664_v26, %v6531_v15  ;;  %v1664_v60 = vsel %vm1632_vm14, %v1663_v19, %v1662_v25  ;;  %v1758_v58 = vperm.slane %v6329_v36, %v6398_v9  ;;  %v9665_v25 = vld [vmem:[#allocation136_spill] sm:$0xff]  ;;  %v1789_v36 = vperm.slane %v6404_v7, %v6398_v9 }
 0x43b   :  { %9654 = vst [vmem:[#allocation105_spill] sm:$0xff] %v6567_v59  ;;  %v1631_v59 = vperm.slane %v9662_v18, %v6584_v6  ;;  %v1700_v13 = vsel %vm1580_vm1, %v1699_v45, %v1698_v63  ;;  %v1728_v18 = vperm.slane %v6224_v35, %v6407_v28  ;;  %v9666_v63 = vld [vmem:[#allocation143_spill] sm:$0xff]  ;;  %v1727_v35 = vperm.slane %v6190_v50, %v6398_v9 }
 0x43c   :  { %v1689_v33 = vsel %vm9215_vm11, %v1688_v53, %v1687_v51  ;;  %v1702_v42 = vsel %vm1584_vm2, %v1701_v16, %v1700_v13  ;;  %v1692_v51 = vperm.slane %v9665_v25, %v6551_v27  ;;  %v1703_v19 = vperm.slane %v9666_v63, %v6431_v31  ;;  %v9667_v16 = vld [vmem:[#allocation142_spill] sm:$0xff] }
 0x43d   :  { %v1691_v10 = vsel %vm1624_vm12, %v1690_v23, %v1689_v33  ;;  %v1633_v39 = vsel %vm1632_vm14, %v1631_v59, %v1629_v46  ;;  %v1694_v8 = vperm.slane %v9667_v16, %v6584_v6  ;;  %v1760_v26 = vsel %vm1576_vm0, %v1759_v29, %v1758_v58 }
 0x43e   :  { %v6638_v23 = vsel %vm9210_vm15, %v1664_v60, %v1633_v39  ;;  %v6646_v59 = vsel %vm1628_vm13, %v1692_v51, %v1691_v10  ;;  %v1704_v53 = vsel %vm9359_vm3, %v1703_v19, %v1702_v42  ;;  %v1729_v45 = vsel %vm1576_vm0, %v1728_v18, %v1727_v35 }
 0x43f   :  { %v1761_v50 = vperm.slane %v6319_v22, %v6410_v12  ;;  %v1705_v46 = vperm.slane %v6137_v14, %v6440_v62  ;;  %v1707_v60 = vperm.slane %v6183_v41, %v6448_v57  ;;  %v1731_v29 = vsel %vm1580_vm1, %v1730_v54, %v1729_v45 }
 0x440   :  { %v1790_v7 = vperm.slane %v6386_v21, %v6407_v28  ;;  %v1709_v13 = vperm.slane %v6127_v38, %v6462_v49  ;;  %v1732_v18 = vperm.slane %v6214_v34, %v6425_v61  ;;  %v1765_v14 = vperm.slane %v6378_v30, %v6431_v31  ;;  %v6674_v38 = vpop.permute.xlu0 %1542 }
 0x441   :  { %v1762_v22 = vsel %vm1580_vm1, %v1761_v50, %v1760_v26  ;;  %v1706_v41 = vsel %vm9358_vm4, %v1705_v46, %v1704_v53  ;;  %v1763_v42 = vperm.slane %v6346_v4, %v6425_v61  ;;  %v1794_v54 = vperm.slane %v6427_v56, %v6425_v61  ;;  %v9668_v46 = vld [vmem:[#allocation193_spill] sm:$0xff] }
 0x442   :  { %v6614_v47 = vpop.permute.xlu1 %1521  ;;  %v6659_v33 = vpop.permute.xlu2 %1536  ;;  %v1791_v21 = vsel %vm1576_vm0, %v1790_v7, %v1789_v36  ;;  %v1733_v34 = vsel %vm1584_vm2, %v1732_v18, %v1731_v29  ;;  %v1736_v58 = vperm.slane %v6291_v37, %v6440_v62  ;;  %v1792_v30 = vperm.slane %v6394_v24, %v6410_v12  ;;  %v9669_v7 = vld [vmem:[#allocation20_spill] sm:$0xff] }
 0x443   :  { %v1821_v39 = vperm.slane %v6592_v52, %v6407_v28  ;;  %v1708_v4 = vsel %vm1596_vm5, %v1707_v60, %v1706_v41  ;;  %v1734_v25 = vperm.slane %v6245_v48, %v6431_v31  ;;  %v1764_v56 = vsel %vm1584_vm2, %v1763_v42, %v1762_v22  ;;  %v9672_v41 = vld [vmem:[#allocation204_spill] sm:$0xff] }
 0x444   :  { %v1715_v63 = vperm.slane %v6148_v32, %v6505_v11  ;;  %v1766_v37 = vsel %vm9359_vm3, %v1765_v14, %v1764_v56  ;;  %v1793_v19 = vsel %vm1580_vm1, %v1792_v30, %v1791_v21  ;;  %v1820_v24 = vperm.slane %v6548_v3, %v6398_v9 }
 0x445   :  { %v1711_v52 = vperm.slane %v6158_v43, %v6465_v40  ;;  %v1735_v35 = vsel %vm9359_vm3, %v1734_v25, %v1733_v34  ;;  %v1767_v48 = vperm.slane %v6338_v5, %v6440_v62  ;;  %v1795_v26 = vsel %vm1584_vm2, %v1794_v54, %v1793_v19  ;;  %v9673_v54 = vld [vmem:[#allocation171_spill] sm:$0xff] }
 0x446   :  { %v1710_v36 = vsel %vm1600_vm6, %v1709_v13, %v1708_v4  ;;  %v1737_v32 = vsel %vm9358_vm4, %v1736_v58, %v1735_v35  ;;  %v1796_v53 = vperm.slane %v6392_v44, %v6431_v31  ;;  %v1822_v45 = vsel %vm1576_vm0, %v1821_v39, %v1820_v24  ;;  %v9674_v39 = vld [vmem:[#allocation153_spill] sm:$0xff]  ;;  %v9675_v35 = vld [vmem:[#allocation191_spill] sm:$0xff] }
 0x447   :  { %v1738_v3 = vperm.slane %v6235_v55, %v6448_v57  ;;  %v1768_v43 = vsel %vm9358_vm4, %v1767_v48, %v1766_v37  ;;  %v1771_v50 = vperm.slane %v6384_v17, %v6462_v49  ;;  %v1769_v60 = vperm.slane %v9668_v46, %v6448_v57  ;;  %v9670_v55 = vld [vmem:[#allocation158_spill] sm:$0xff] }
 0x448   :  { %v1797_v29 = vsel %vm9359_vm3, %v1796_v53, %v1795_v26  ;;  %v1800_v44 = vperm.slane %v9669_v7, %v6448_v57  ;;  %v1825_v13 = vperm.slane %v6604_v2, %v6425_v61  ;;  %v1713_v22 = vperm.slane %v9670_v55, %v6493_v1  ;;  %v9671_v17 = vld [vmem:[#allocation182_spill] sm:$0xff]  ;;  %v1552_v37 = vpop.permute.xlu0 %1551 }
 0x449   :  { %v1739_v14 = vsel %vm1596_vm5, %v1738_v3, %v1737_v32  ;;  %v1798_v42 = vperm.slane %v9672_v41, %v6440_v62  ;;  %v1740_v34 = vperm.slane %v9673_v54, %v6462_v49  ;;  %v1770_v58 = vsel %vm1596_vm5, %v1769_v60, %v1768_v43  ;;  %v9679_v60 = vld [vmem:[#allocation197_spill] sm:$0xff]  ;;  %v9683_v54 = vld [vmem:[#allocation186_spill] sm:$0xff] }
 0x44a   :  { %v1531_v10 = vpop.permute.xlu1 %1530  ;;  %v1546_v21 = vpop.permute.xlu2 %1545  ;;  %v1717_v4 = vperm.slane %v9674_v39, %v6509_v0  ;;  %v1772_v25 = vsel %vm1600_vm6, %v1771_v50, %v1770_v58  ;;  %v1712_v19 = vsel %vm1604_vm7, %v1711_v52, %v1710_v36  ;;  %v1773_v48 = vperm.slane %v9675_v35, %v6465_v40  ;;  %v9678_v36 = vld [vmem:[#allocation201_spill] sm:$0xff]  ;;  %v9686_v35 = vld [vmem:[#allocation195_spill] sm:$0xff] }
 0x44b   :  { %v1823_v51 = vperm.slane %v1531_v10, %v6410_v12  ;;  %v1742_v10 = vperm.slane %v9671_v17, %v6465_v40  ;;  %v1799_v56 = vsel %vm9358_vm4, %v1798_v42, %v1797_v29  ;;  %v1741_v24 = vsel %vm1600_vm6, %v1740_v34, %v1739_v14 }
 0x44c   :  { %v1801_v26 = vsel %vm1596_vm5, %v1800_v44, %v1799_v56  ;;  %v1714_v32 = vsel %vm9213_vm8, %v1713_v22, %v1712_v19  ;;  %v1774_v52 = vsel %vm1604_vm7, %v1773_v48, %v1772_v25  ;;  %v1775_v29 = vperm.slane %v9679_v60, %v6493_v1  ;;  %v9680_v44 = vld [vmem:[#allocation116_spill] sm:$0xff]  ;;  %v9681_v22 = vld [vmem:[#allocation162_spill] sm:$0xff] }
 0x44d   :  { %v1824_v5 = vsel %vm1580_vm1, %v1823_v51, %v1822_v45  ;;  %v1827_v51 = vperm.slane %v6659_v33, %v6431_v31  ;;  %v1743_v53 = vsel %vm1604_vm7, %v1742_v10, %v1741_v24  ;;  %v9676_v45 = vld [vmem:[#allocation203_spill] sm:$0xff]  ;;  %v9677_v33 = vld [vmem:[#allocation168_spill] sm:$0xff]  ;;  %v1716_v55 = vsel %vm9211_vm9, %v1715_v63, %v1714_v32  ;;  %v9682_v10 = vld [vmem:[#allocation205_spill] sm:$0xff] }
 0x44e   :  { %v1826_v2 = vsel %vm1584_vm2, %v1825_v13, %v1824_v5  ;;  %v1802_v3 = vperm.slane %v9676_v45, %v6462_v49  ;;  %v1744_v50 = vperm.slane %v9677_v33, %v6493_v1  ;;  %v1777_v5 = vperm.slane %v9678_v36, %v6505_v11  ;;  %v9684_v63 = vld [vmem:[#allocation176_spill] sm:$0xff]  ;;  %v9688_v33 = vld [vmem:[#allocation173_spill] sm:$0xff] }
 0x44f   :  { %v1828_v43 = vsel %vm9359_vm3, %v1827_v51, %v1826_v2  ;;  %v1806_v13 = vperm.slane %v9680_v44, %v6493_v1  ;;  %v1719_v14 = vperm.slane %v9681_v22, %v6531_v15  ;;  %v1804_v41 = vperm.slane %v9682_v10, %v6465_v40  ;;  %v9685_v51 = vld [vmem:[#allocation151_spill] sm:$0xff] }
 0x450   :  { %v1803_v7 = vsel %vm1600_vm6, %v1802_v3, %v1801_v26  ;;  %v1745_v17 = vsel %vm9213_vm8, %v1744_v50, %v1743_v53  ;;  %v1748_v34 = vperm.slane %v9683_v54, %v6509_v0  ;;  %v1776_v58 = vsel %vm9213_vm8, %v1775_v29, %v1774_v52  ;;  %v9687_v3 = vld [vmem:[#allocation206_spill] sm:$0xff]  ;;  %v1561_v36 = vpop.permute.xlu0 %1560  ;;  %v9691_v22 = vld [vmem:[#allocation199_spill] sm:$0xff] }
 0x451   :  { %v1778_v39 = vsel %vm9211_vm9, %v1777_v5, %v1776_v58  ;;  %v1805_v25 = vsel %vm1604_vm7, %v1804_v41, %v1803_v7  ;;  %v1833_v56 = vperm.slane %v1546_v21, %v6462_v49  ;;  %v1721_v19 = vperm.slane %v9685_v51, %v6545_v20  ;;  %v9690_v7 = vld [vmem:[#allocation105_spill] sm:$0xff] }
 0x452   :  { %v1540_v18 = vpop.permute.xlu1 %1539  ;;  %v1718_v24 = vsel %vm9212_vm10, %v1717_v4, %v1716_v55  ;;  %v1779_v48 = vperm.slane %v9686_v35, %v6509_v0  ;;  %v1807_v26 = vsel %vm9213_vm8, %v1806_v13, %v1805_v25  ;;  %v1555_v32 = vpop.permute.xlu2 %1554  ;;  %vm9214_vm15 = vcmask 1042434   ;;  %v9693_v41 = vld [vmem:[#allocation181_spill] sm:$0xff] }
 0x453   :  { %v1829_v30 = vperm.slane %v1540_v18, %v6440_v62  ;;  %v1831_v18 = vperm.slane %v6674_v38, %v6448_v57  ;;  %v1720_v53 = vsel %vm9215_vm11, %v1719_v14, %v1718_v24  ;;  %v1750_v50 = vperm.slane %v9688_v33, %v6531_v15  ;;  %v9697_v24 = vld [vmem:[#allocation198_spill] sm:$0xff] }
 0x454   :  { %v1780_v52 = vsel %vm9212_vm10, %v1779_v48, %v1778_v39  ;;  %v1812_v44 = vperm.slane %v9690_v7, %v6531_v15  ;;  %v1837_v13 = vperm.slane %v1552_v37, %v6493_v1  ;;  %v1722_v55 = vsel %vm1624_vm12, %v1721_v19, %v1720_v53  ;;  %v9694_v37 = vld [vmem:[#allocation189_spill] sm:$0xff]  ;;  %v9696_v39 = vld [vmem:[#allocation166_spill] sm:$0xff]  ;;  %v9698_v48 = vld [vmem:[#allocation100_spill] sm:$0xff] }
 0x455   :  { %v1830_v46 = vsel %vm9358_vm4, %v1829_v30, %v1828_v43  ;;  %v1746_v30 = vperm.slane %v9684_v63, %v6505_v11  ;;  %v1808_v43 = vperm.slane %v9687_v3, %v6505_v11  ;;  %v1781_v14 = vperm.slane %v9691_v22, %v6531_v15  ;;  %v9695_v63 = vld [vmem:[#allocation157_spill] sm:$0xff]  ;;  %v9701_v7 = vld [vmem:[#allocation47_spill] sm:$0xff] }
 0x456   :  { %v1832_v2 = vsel %vm1596_vm5, %v1831_v18, %v1830_v46  ;;  %v9689_v46 = vld [vmem:[#allocation202_spill] sm:$0xff]  ;;  %v1695_v18 = vsel %vm1632_vm14, %v1694_v8, %v6646_v59  ;;  %v1725_v25 = vperm.slane %v9696_v39, %v6584_v6  ;;  %v1785_v35 = vperm.slane %v9697_v24, %v6551_v27 }
 0x457   :  { %v1747_v45 = vsel %vm9211_vm9, %v1746_v30, %v1745_v17  ;;  %v1834_v21 = vsel %vm1600_vm6, %v1833_v56, %v1832_v2  ;;  %v1783_v60 = vperm.slane %v9689_v46, %v6545_v20  ;;  %v1809_v29 = vsel %vm9211_vm9, %v1808_v43, %v1807_v26  ;;  %v9692_v17 = vld [vmem:[#allocation127_spill] sm:$0xff] }
 0x458   :  { %v1749_v4 = vsel %vm9212_vm10, %v1748_v34, %v1747_v45  ;;  %v1810_v10 = vperm.slane %v9692_v17, %v6509_v0  ;;  %v1754_v34 = vperm.slane %v9694_v37, %v6551_v27  ;;  %v1782_v8 = vsel %vm9215_vm11, %v1781_v14, %v1780_v52  ;;  %v9699_v45 = vld [vmem:[#allocation178_spill] sm:$0xff]  ;;  %v1570_v22 = vpop.permute.xlu0 %1569 }
 0x459   :  { %v1751_v54 = vsel %vm9215_vm11, %v1750_v50, %v1749_v4  ;;  %v1839_v2 = vperm.slane %v1555_v32, %v6505_v11  ;;  %v1723_v30 = vperm.slane %v9695_v63, %v6551_v27  ;;  %v1784_v56 = vsel %vm1624_vm12, %v1783_v60, %v1782_v8  ;;  %v9700_v60 = vld [vmem:[#allocation200_spill] sm:$0xff] }
 0x45a   :  { %v1549_v42 = vpop.permute.xlu1 %1548  ;;  %v1811_v59 = vsel %vm9212_vm10, %v1810_v10, %v1809_v29  ;;  %v1814_v26 = vperm.slane %v9698_v48, %v6545_v20  ;;  %v1756_v3 = vperm.slane %v9699_v45, %v6584_v6  ;;  %v1786_v33 = vsel %vm1628_vm13, %v1785_v35, %v1784_v56 }
 0x45b   :  { %v1835_v38 = vperm.slane %v1549_v42, %v6465_v40  ;;  %v1752_v42 = vperm.slane %v9693_v41, %v6545_v20  ;;  %v1813_v51 = vsel %vm9215_vm11, %v1812_v44, %v1811_v59  ;;  %v1724_v53 = vsel %vm1628_vm13, %v1723_v30, %v1722_v55  ;;  %v9702_v30 = vld [vmem:[#allocation70_spill] sm:$0xff] }
 0x45c   :  { %v1815_v50 = vsel %vm1624_vm12, %v1814_v26, %v1813_v51  ;;  %v1818_v4 = vperm.slane %v6614_v47, %v6584_v6  ;;  %v1843_v52 = vperm.slane %v1561_v36, %v6531_v15  ;;  %v1726_v46 = vsel %vm1632_vm14, %v1725_v25, %v1724_v53  ;;  %v9703_v25 = vld [vmem:[#allocation58_spill] sm:$0xff]  ;;  %v9704_v51 = vld [vmem:[#allocation52_spill] sm:$0xff]  ;;  %v9705_v26 = vld [vmem:[#allocation77_spill] sm:$0xff] }
 0x45d   :  { %v1836_v5 = vsel %vm1604_vm7, %v1835_v38, %v1834_v21  ;;  %v1753_v19 = vsel %vm1624_vm12, %v1752_v42, %v1751_v54  ;;  %v1787_v29 = vperm.slane %v9700_v60, %v6584_v6  ;;  %v1816_v44 = vperm.slane %v9701_v7, %v6551_v27  ;;  %v9706_v53 = vld [vmem:[#allocation60_spill] sm:$0xff] }
 0x45e   :  { %v1838_v16 = vsel %vm9213_vm8, %v1837_v13, %v1836_v5  ;;  %v1755_v43 = vsel %vm1628_vm13, %v1754_v34, %v1753_v19  ;;  %v1564_v5 = vpop.permute.xlu2 %1563  ;;  %v1854_v13 = vsel %vm9214_vm15, %v1695_v18, %v6638_v23  ;;  %vm9357_vm8 = vcmask 1045509  }
 0x45f   :  { %v1840_v32 = vsel %vm9211_vm9, %v1839_v2, %v1838_v16  ;;  %vm9361_vm9 = vcmask 1043459   ;;  %v1757_v55 = vsel %vm1632_vm14, %v1756_v3, %v1755_v43  ;;  %v1845_v36 = vperm.slane %v1564_v5, %v6545_v20  ;;  %v9707_v3 = vld [vmem:[#allocation57_spill] sm:$0xff] }
 0x460   :  { %v1788_v17 = vsel %vm1632_vm14, %v1787_v29, %v1786_v33  ;;  %v1817_v10 = vsel %vm1628_vm13, %v1816_v44, %v1815_v50  ;;  %v1856_v41 = vsel %vm9361_vm9, %v1726_v46, %v1854_v13  ;;  %vm9356_vm15 = vcmask 1046534   ;;  %v9711_v46 = vld [vmem:[#allocation80_spill] sm:$0xff]  ;;  %v9713_v44 = vld [vmem:[#allocation61_spill] sm:$0xff] }
 0x461   :  { %v1819_v23 = vsel %vm1632_vm14, %v1818_v4, %v1817_v10  ;;  %v1849_v18 = vperm.slane %v1570_v22, %v6584_v6  ;;  %v9712_v29 = vld [vmem:[#allocation64_spill] sm:$0xff]  ;;  %v9717_v10 = vld [vmem:[#allocation83_spill] sm:$0xff] }
 0x462   :  { %v1558_v58 = vpop.permute.xlu1 %1557 }
 0x463   :  { %v1841_v38 = vperm.slane %v1558_v58, %v6509_v0 }
 0x465   :  { %v1842_v21 = vsel %vm9212_vm10, %v1841_v38, %v1840_v32  ;;  %vm9360_vm10 = vcmask 1044484  }
 0x466   :  { %v1844_v47 = vsel %vm9215_vm11, %v1843_v52, %v1842_v21  ;;  %v1858_v37 = vsel %vm9360_vm10, %v1757_v55, %v1856_v41  ;;  %vm9355_vm11 = vcmask 1047559  }
 0x467   :  { %v1846_v54 = vsel %vm1624_vm12, %v1845_v36, %v1844_v47  ;;  %v1860_v16 = vsel %vm9357_vm8, %v1788_v17, %v1858_v37 }
 0x468   :  { %v1862_v8 = vsel %vm9356_vm15, %v1819_v23, %v1860_v16  ;;  %vm10020_vm15 = vcmask 720512  }
 0x46a   :  { %v1567_v14 = vpop.permute.xlu1 %1566 }
 0x46b   :  { %v1847_v42 = vperm.slane %v1567_v14, %v6551_v27 }
 0x46d   :  { %v1848_v34 = vsel %vm1628_vm13, %v1847_v42, %v1846_v54  ;;  %v9718_v42 = vld [vmem:[#allocation55_spill] sm:$0xff] }
 0x46e   :  { %v1850_v58 = vsel %vm1632_vm14, %v1849_v18, %v1848_v34  ;;  %v9719_v18 = vld [vmem:[#allocation65_spill] sm:$0xff] }
 0x46f   :  { %v1864_v59 = vsel %vm9355_vm11, %v1850_v58, %v1862_v8  ;;  %vm10019_vm11 = vcmask 654912  }
 0x470   :  { %1866 = vmax.xlane.f32.xlu2 %v1864_v59  ;;  %vm10022_vm8 = vmmov %vm10019_vm11 }
 0x4e3   :  { %v6862_v2 = vpop.xlane.xlu2 %1866 }
 0x4e4   :  { %v6865_v38 = vperm.slane %v6862_v2, 0  ;;  %v6868_v63 = vperm.slane %v6862_v2, 1 }
 0x4e6   :  { %v1896_v39 = vsub.f32 %v9702_v30, %v6865_v38  ;;  %v1886_v56 = vsub.f32 %v9703_v25, %v6865_v38  ;;  %v1885_v19 = vsub.f32 %v9704_v51, %v6865_v38  ;;  %v1903_v32 = vsub.f32 %v9705_v26, %v6868_v63  ;;  %v9723_v30 = vld [vmem:[#allocation86_spill] sm:$0xff]  ;;  %v9724_v25 = vld [vmem:[#allocation68_spill] sm:$0xff]  ;;  %v9725_v51 = vld [vmem:[#allocation67_spill] sm:$0xff] }
 0x4e7   :  { %v1888_v45 = vsub.f32 %v9706_v53, %v6865_v38  ;;  %v1887_v43 = vsub.f32 %v9707_v3, %v6865_v38  ;;  %v1906_v60 = vsub.f32 %v9711_v46, %v6868_v63  ;;  %v1890_v7 = vsub.f32 %v9712_v29, %v6865_v38 }
 0x4e8   :  { %v2035_v24 = vmul.f32 1.442695, %v1896_v39  ;;  %v2015_v35 = vmul.f32 1.442695, %v1886_v56  ;;  %v2013_v48 = vmul.f32 1.442695, %v1885_v19  ;;  %v1889_v13 = vsub.f32 %v9713_v44, %v6865_v38 }
 0x4e9   :  { %v2049_v21 = vmul.f32 1.442695, %v1903_v32  ;;  %v2019_v33 = vmul.f32 1.442695, %v1888_v45  ;;  %v2017_v4 = vmul.f32 1.442695, %v1887_v43  ;;  %v1909_v41 = vsub.f32 %v9717_v10, %v6868_v63 }
 0x4ea   :  { %4555 = vpow2.f32 %v2035_v24  ;;  %v2055_v55 = vmul.f32 1.442695, %v1906_v60  ;;  %v2023_v22 = vmul.f32 1.442695, %v1890_v7  ;;  %v2021_v36 = vmul.f32 1.442695, %v1889_v13 }
 0x4eb   :  { %4557 = vpow2.f32 %v2015_v35  ;;  %v1892_v23 = vsub.f32 %v9718_v42, %v6865_v38  ;;  %v1891_v54 = vsub.f32 %v9719_v18, %v6865_v38  ;;  %v2061_v37 = vmul.f32 1.442695, %v1909_v41  ;;  %v9729_v45 = vld [vmem:[#allocation89_spill] sm:$0xff]  ;;  %v9730_v43 = vld [vmem:[#allocation71_spill] sm:$0xff]  ;;  %v9737_v42 = vld [vmem:[#allocation62_spill] sm:$0xff] }
 0x4ec   :  { %4559 = vpow2.f32 %v2013_v48  ;;  %v1912_v39 = vsub.f32 %v9723_v30, %v6868_v63  ;;  %v1894_v56 = vsub.f32 %v9724_v25, %v6865_v38  ;;  %v1893_v19 = vsub.f32 %v9725_v51, %v6865_v38  ;;  %v9736_v10 = vld [vmem:[#allocation73_spill] sm:$0xff] }
 0x4ed   :  { %4561 = vpow2.f32 %v2049_v21  ;;  %v2027_v34 = vmul.f32 1.442695, %v1892_v23  ;;  %v2025_v58 = vmul.f32 1.442695, %v1891_v54  ;;  %v1915_v3 = vsub.f32 %v9729_v45, %v6868_v63 }
 0x4ee   :  { %4563 = vpow2.f32 %v2019_v33  ;;  %v2067_v24 = vmul.f32 1.442695, %v1912_v39  ;;  %v2031_v35 = vmul.f32 1.442695, %v1894_v56  ;;  %v2029_v26 = vmul.f32 1.442695, %v1893_v19 }
 0x4ef   :  { %4565 = vpow2.f32 %v2017_v4  ;;  %v1897_v21 = vsub.f32 %v9730_v43, %v6865_v38  ;;  %v9731_v33 = vld [vmem:[#allocation59_spill] sm:$0xff]  ;;  %v6943_v46 = vperm.slane %v6862_v2, 2  ;;  %v2073_v60 = vmul.f32 1.442695, %v1915_v3  ;;  %v9742_v56 = vld [vmem:[#allocation66_spill] sm:$0xff] }
 0x4f0   :  { %v6882_v50 = vpop.eup %4555  ;;  %4567 = vpow2.f32 %v2055_v55  ;;  %v1895_v4 = vsub.f32 %v9731_v33, %v6865_v38  ;;  %v1899_v41 = vsub.f32 %v9736_v10, %v6865_v38  ;;  %v1898_v23 = vsub.f32 %v9737_v42, %v6865_v38  ;;  %v9741_v39 = vld [vmem:[#allocation95_spill] sm:$0xff]  ;;  %v9743_v19 = vld [vmem:[#allocation74_spill] sm:$0xff] }
 0x4f1   :  { %9708 = vst [vmem:[#allocation39_spill] sm:$0xff] %v6882_v50  ;;  %v6884_v52 = vpop.eup %4557  ;;  %2431 = vperm.xlu2 %4554, %v6882_v50   ;;  %4569 = vpow2.f32 %v2023_v22  ;;  %v2037_v29 = vmul.f32 1.442695, %v1897_v21  ;;  %v9735_v22 = vld [vmem:[#allocation92_spill] sm:$0xff]  ;;  %v1921_v25 = vsub.f32 %v9741_v39, %v6943_v46  ;;  %v1901_v51 = vsub.f32 %v9742_v56, %v6868_v63  ;;  %v9747_v33 = vld [vmem:[#allocation98_spill] sm:$0xff] }
 0x4f2   :  { %9709 = vst [vmem:[#allocation120_spill] sm:$0xff] %v6884_v52  ;;  %v6887_v5 = vpop.eup %4559  ;;  %2401 = vperm.xlu0 %4552, %v6884_v52   ;;  %4571 = vpow2.f32 %v2021_v36  ;;  %v2033_v44 = vmul.f32 1.442695, %v1895_v4  ;;  %v1918_v36 = vsub.f32 %v9735_v22, %v6943_v46  ;;  %v2041_v54 = vmul.f32 1.442695, %v1899_v41 }
 0x4f3   :  { %9710 = vst [vmem:[#allocation102_spill] sm:$0xff] %v6887_v5  ;;  %2398 = vperm.xlu1 %4553, %v6887_v5   ;;  %v6897_v47 = vpop.eup %4561  ;;  %4573 = vpow2.f32 %v2061_v37  ;;  %v1924_v4 = vsub.f32 %v9747_v33, %v6943_v46  ;;  %v9759_v33 = vld [vmem:[#allocation106_spill] sm:$0xff] }
 0x4f4   :  { %9714 = vst [vmem:[#allocation129_spill] sm:$0xff] %v6897_v47  ;;  %v6899_v14 = vpop.eup %4563  ;;  %4575 = vpow2.f32 %v2027_v34  ;;  %v2079_v18 = vmul.f32 1.442695, %v1918_v36  ;;  %v2039_v34 = vmul.f32 1.442695, %v1898_v23 }
 0x4f5   :  { %9715 = vst [vmem:[#allocation25_spill] sm:$0xff] %v6899_v14  ;;  %v6902_v17 = vpop.eup %4565  ;;  %4577 = vpow2.f32 %v2025_v58  ;;  %v2091_v22 = vmul.f32 1.442695, %v1924_v4  ;;  %v1930_v4 = vsub.f32 %v9759_v33, %v6943_v46 }
 0x4f6   :  { %9716 = vst [vmem:[#allocation107_spill] sm:$0xff] %v6902_v17  ;;  %v6912_v16 = vpop.eup %4567  ;;  %4579 = vpow2.f32 %v2067_v24  ;;  %v1900_v24 = vsub.f32 %v9743_v19, %v6865_v38  ;;  %v9748_v38 = vld [vmem:[#allocation69_spill] sm:$0xff] }
 0x4f7   :  { %9720 = vst [vmem:[#allocation118_spill] sm:$0xff] %v6912_v16  ;;  %v6914_v8 = vpop.eup %4569  ;;  %4581 = vpow2.f32 %v2031_v35  ;;  %v2085_v35 = vmul.f32 1.442695, %v1921_v25  ;;  %v9755_v25 = vld [vmem:[#allocation79_spill] sm:$0xff] }
 0x4f8   :  { %9721 = vst [vmem:[#allocation42_spill] sm:$0xff] %v6914_v8  ;;  %v6917_v59 = vpop.eup %4571  ;;  %4583 = vpow2.f32 %v2029_v26  ;;  %v2045_v26 = vmul.f32 1.442695, %v1901_v51  ;;  %v2043_v3 = vmul.f32 1.442695, %v1900_v24  ;;  %v1905_v56 = vsub.f32 %v9755_v25, %v6868_v63  ;;  %v9765_v25 = vld [vmem:[#allocation109_spill] sm:$0xff] }
 0x4f9   :  { %2452 = vperm.xlu2 %4554, %v6897_v47   ;;  %9722 = vst [vmem:[#allocation122_spill] sm:$0xff] %v6917_v59  ;;  %v6927_v48 = vpop.eup %4573  ;;  %4585 = vpow2.f32 %v2073_v60  ;;  %v1904_v60 = vsub.f32 %v9748_v38, %v6868_v63  ;;  %v9760_v38 = vld [vmem:[#allocation75_spill] sm:$0xff] }
 0x4fa   :  { %2407 = vperm.xlu0 %4552, %v6899_v14   ;;  %9726 = vst [vmem:[#allocation24_spill] sm:$0xff] %v6927_v48  ;;  %v6929_v32 = vpop.eup %4575  ;;  %4587 = vpow2.f32 %v2037_v29  ;;  %v9749_v29 = vld [vmem:[#allocation76_spill] sm:$0xff] }
 0x4fb   :  { %2404 = vperm.xlu1 %4553, %v6902_v17   ;;  %9727 = vst [vmem:[#allocation28_spill] sm:$0xff] %v6929_v32  ;;  %v6932_v53 = vpop.eup %4577  ;;  %4589 = vpow2.f32 %v2033_v44  ;;  %v1902_v44 = vsub.f32 %v9749_v29, %v6868_v63  ;;  %v2051_v36 = vmul.f32 1.442695, %v1904_v60  ;;  %v1910_v60 = vsub.f32 %v9760_v38, %v6868_v63  ;;  %v9761_v29 = vld [vmem:[#allocation82_spill] sm:$0xff] }
 0x4fc   :  { %9728 = vst [vmem:[#allocation110_spill] sm:$0xff] %v6932_v53  ;;  %v6945_v7 = vpop.eup %4579  ;;  %4591 = vpow2.f32 %v2079_v18  ;;  %v9753_v18 = vld [vmem:[#allocation103_spill] sm:$0xff] }
 0x4fd   :  { %9732 = vst [vmem:[#allocation41_spill] sm:$0xff] %v6945_v7  ;;  %v6947_v13 = vpop.eup %4581  ;;  %4593 = vpow2.f32 %v2041_v54  ;;  %v2047_v41 = vmul.f32 1.442695, %v1902_v44  ;;  %v1927_v54 = vsub.f32 %v9753_v18, %v6943_v46  ;;  %v1908_v44 = vsub.f32 %v9761_v29, %v6868_v63 }
 0x4fe   :  { %9733 = vst [vmem:[#allocation45_spill] sm:$0xff] %v6947_v13  ;;  %v6950_v55 = vpop.eup %4583  ;;  %4595 = vpow2.f32 %v2039_v34  ;;  %v9754_v34 = vld [vmem:[#allocation72_spill] sm:$0xff] }
 0x4ff   :  { %9734 = vst [vmem:[#allocation124_spill] sm:$0xff] %v6950_v55  ;;  %v6960_v37 = vpop.eup %4585  ;;  %4597 = vpow2.f32 %v2085_v35  ;;  %v1907_v39 = vsub.f32 %v9754_v34, %v6868_v63  ;;  %v2097_v51 = vmul.f32 1.442695, %v1927_v54  ;;  %v2053_v35 = vmul.f32 1.442695, %v1905_v56 }
 0x500   :  { %9738 = vst [vmem:[#allocation27_spill] sm:$0xff] %v6960_v37  ;;  %v6962_v58 = vpop.eup %4587  ;;  %4599 = vpow2.f32 %v2045_v26  ;;  %v2059_v54 = vmul.f32 1.442695, %v1908_v44 }
 0x501   :  { %2461 = vperm.xlu2 %4554, %v6912_v16   ;;  %9739 = vst [vmem:[#allocation133_spill] sm:$0xff] %v6962_v58  ;;  %v6965_v30 = vpop.eup %4589  ;;  %4601 = vpow2.f32 %v2043_v3  ;;  %v2057_v19 = vmul.f32 1.442695, %v1907_v39 }
 0x502   :  { %2413 = vperm.xlu0 %4552, %v6914_v8   ;;  %9740 = vst [vmem:[#allocation140_spill] sm:$0xff] %v6965_v30  ;;  %v6975_v45 = vpop.eup %4591  ;;  %4603 = vpow2.f32 %v2091_v22  ;;  %v7021_v22 = vperm.slane %v6862_v2, 3 }
 0x503   :  { %2410 = vperm.xlu1 %4553, %v6917_v59   ;;  %9744 = vst [vmem:[#allocation112_spill] sm:$0xff] %v6975_v45  ;;  %v6977_v43 = vpop.eup %4593  ;;  %4605 = vpow2.f32 %v2051_v36  ;;  %v2103_v36 = vmul.f32 1.442695, %v1930_v4 }
 0x504   :  { %9745 = vst [vmem:[#allocation31_spill] sm:$0xff] %v6977_v43  ;;  %v6980_v21 = vpop.eup %4595  ;;  %4607 = vpow2.f32 %v2047_v41  ;;  %v2063_v41 = vmul.f32 1.442695, %v1910_v60  ;;  %v1933_v56 = vsub.f32 %v9765_v25, %v7021_v22  ;;  %v9772_v25 = vld [vmem:[#allocation81_spill] sm:$0xff] }
 0x505   :  { %9746 = vst [vmem:[#allocation44_spill] sm:$0xff] %v6980_v21  ;;  %v6990_v10 = vpop.eup %4597  ;;  %4609 = vpow2.f32 %v2097_v51  ;;  %v9766_v51 = vld [vmem:[#allocation78_spill] sm:$0xff] }
 0x506   :  { %9750 = vst [vmem:[#allocation138_spill] sm:$0xff] %v6990_v10  ;;  %v6992_v42 = vpop.eup %4599  ;;  %4611 = vpow2.f32 %v2057_v19  ;;  %v1913_v19 = vsub.f32 %v9766_v51, %v6868_v63  ;;  %v2109_v4 = vmul.f32 1.442695, %v1933_v56  ;;  %v1916_v56 = vsub.f32 %v9772_v25, %v6868_v63  ;;  %v9773_v51 = vld [vmem:[#allocation88_spill] sm:$0xff] }
 0x507   :  { %9751 = vst [vmem:[#allocation136_spill] sm:$0xff] %v6992_v42  ;;  %v6995_v23 = vpop.eup %4601  ;;  %4613 = vpow2.f32 %v2053_v35  ;;  %v9767_v35 = vld [vmem:[#allocation85_spill] sm:$0xff] }
 0x508   :  { %9752 = vst [vmem:[#allocation143_spill] sm:$0xff] %v6995_v23  ;;  %v7005_v24 = vpop.eup %4603  ;;  %4615 = vpow2.f32 %v2103_v36  ;;  %v1911_v33 = vsub.f32 %v9767_v35, %v6868_v63  ;;  %v2069_v38 = vmul.f32 1.442695, %v1913_v19  ;;  %v1914_v19 = vsub.f32 %v9773_v51, %v6868_v63  ;;  %v9778_v63 = vld [vmem:[#allocation84_spill] sm:$0xff] }
 0x509   :  { %2470 = vperm.xlu2 %4554, %v6927_v48   ;;  %9756 = vst [vmem:[#allocation142_spill] sm:$0xff] %v7005_v24  ;;  %v7007_v26 = vpop.eup %4605  ;;  %4617 = vpow2.f32 %v2063_v41  ;;  %v9771_v41 = vld [vmem:[#allocation30_spill] sm:$0xff] }
 0x50a   :  { %2419 = vperm.xlu0 %4552, %v6929_v32   ;;  %9757 = vst [vmem:[#allocation193_spill] sm:$0xff] %v7007_v26  ;;  %v7010_v3 = vpop.eup %4607  ;;  %4619 = vpow2.f32 %v2059_v54  ;;  %v2065_v29 = vmul.f32 1.442695, %v1911_v33  ;;  %v1936_v54 = vsub.f32 %v9771_v41, %v7021_v22  ;;  %v2075_v33 = vmul.f32 1.442695, %v1916_v56 }
 0x50b   :  { %2416 = vperm.xlu1 %4553, %v6932_v53   ;;  %9758 = vst [vmem:[#allocation20_spill] sm:$0xff] %v7010_v3  ;;  %v7023_v18 = vpop.eup %4609  ;;  %4621 = vpow2.f32 %v2109_v4  ;;  %v1919_v41 = vsub.f32 %v9778_v63, %v6943_v46 }
 0x50c   :  { %9762 = vst [vmem:[#allocation158_spill] sm:$0xff] %v7023_v18  ;;  %v7025_v34 = vpop.eup %4611  ;;  %4623 = vpow2.f32 %v2069_v38  ;;  %v2115_v35 = vmul.f32 1.442695, %v1936_v54  ;;  %v9777_v38 = vld [vmem:[#allocation33_spill] sm:$0xff]  ;;  %v9779_v54 = vld [vmem:[#allocation91_spill] sm:$0xff] }
 0x50d   :  { %9763 = vst [vmem:[#allocation182_spill] sm:$0xff] %v7025_v34  ;;  %v7028_v39 = vpop.eup %4613  ;;  %4625 = vpow2.f32 %v2065_v29  ;;  %v1939_v29 = vsub.f32 %v9777_v38, %v7021_v22  ;;  %v1917_v25 = vsub.f32 %v9779_v54, %v6943_v46  ;;  %v2081_v51 = vmul.f32 1.442695, %v1919_v41  ;;  %v9785_v41 = vld [vmem:[#allocation94_spill] sm:$0xff] }
 0x50e   :  { %9764 = vst [vmem:[#allocation204_spill] sm:$0xff] %v7028_v39  ;;  %v7038_v60 = vpop.eup %4615  ;;  %4627 = vpow2.f32 %v2115_v35  ;;  %v1920_v54 = vsub.f32 %v9785_v41, %v6943_v46 }
 0x50f   :  { %9768 = vst [vmem:[#allocation171_spill] sm:$0xff] %v7038_v60  ;;  %v7040_v44 = vpop.eup %4617  ;;  %4629 = vpow2.f32 %v2075_v33  ;;  %v2121_v56 = vmul.f32 1.442695, %v1939_v29  ;;  %v9784_v29 = vld [vmem:[#allocation87_spill] sm:$0xff] }
 0x510   :  { %9769 = vst [vmem:[#allocation153_spill] sm:$0xff] %v7040_v44  ;;  %v7043_v36 = vpop.eup %4619  ;;  %v1922_v63 = vsub.f32 %v9784_v29, %v6943_v46 }
 0x511   :  { %2479 = vperm.xlu2 %4554, %v6945_v7   ;;  %9770 = vst [vmem:[#allocation191_spill] sm:$0xff] %v7043_v36 }
 0x512   :  { %2425 = vperm.xlu0 %4552, %v6947_v13  }
 0x513   :  { %2422 = vperm.xlu1 %4553, %v6950_v55  }
 0x519   :  { %2488 = vperm.xlu2 %4554, %v6960_v37  }
 0x51a   :  { %2434 = vperm.xlu0 %4552, %v6962_v58  }
 0x51b   :  { %2428 = vperm.xlu1 %4553, %v6965_v30  }
 0x521   :  { %2497 = vperm.xlu2 %4554, %v6975_v45  }
 0x522   :  { %2440 = vperm.xlu0 %4552, %v6977_v43  }
 0x523   :  { %2437 = vperm.xlu1 %4553, %v6980_v21  }
 0x529   :  { %2506 = vperm.xlu2 %4554, %v6990_v10  }
 0x52a   :  { %2446 = vperm.xlu0 %4552, %v6992_v42  }
 0x52b   :  { %2443 = vperm.xlu1 %4553, %v6995_v23  }
 0x531   :  { %2515 = vperm.xlu2 %4554, %v7005_v24  }
 0x532   :  { %2455 = vperm.xlu0 %4552, %v7007_v26  }
 0x533   :  { %2449 = vperm.xlu1 %4553, %v7010_v3  }
 0x539   :  { %2524 = vperm.xlu2 %4554, %v7023_v18  }
 0x53a   :  { %2464 = vperm.xlu0 %4552, %v7025_v34  }
 0x53b   :  { %2458 = vperm.xlu1 %4553, %v7028_v39   ;;  %v2071_v39 = vmul.f32 1.442695, %v1914_v19 }
 0x53d   :  { %4631 = vpow2.f32 %v2071_v39  ;;  %v9783_v39 = vld [vmem:[#allocation115_spill] sm:$0xff] }
 0x53e   :  { %4633 = vpow2.f32 %v2121_v56  ;;  %v1942_v33 = vsub.f32 %v9783_v39, %v7021_v22  ;;  %v9790_v39 = vld [vmem:[#allocation90_spill] sm:$0xff] }
 0x53f   :  { %4635 = vpow2.f32 %v2081_v51  ;;  %v9789_v51 = vld [vmem:[#allocation119_spill] sm:$0xff] }
 0x541   :  { %2533 = vperm.xlu2 %4554, %v7038_v60   ;;  %v7053_v60 = vpop.eup %4621 }
 0x542   :  { %2473 = vperm.xlu0 %4552, %v7040_v44   ;;  %9774 = vst [vmem:[#allocation203_spill] sm:$0xff] %v7053_v60  ;;  %v7055_v44 = vpop.eup %4623 }
 0x543   :  { %2467 = vperm.xlu1 %4553, %v7043_v36   ;;  %9775 = vst [vmem:[#allocation168_spill] sm:$0xff] %v7055_v44  ;;  %v7058_v4 = vpop.eup %4625  ;;  %v2083_v36 = vmul.f32 1.442695, %v1920_v54 }
 0x544   :  { %9776 = vst [vmem:[#allocation201_spill] sm:$0xff] %v7058_v4  ;;  %v7068_v19 = vpop.eup %4627 }
 0x545   :  { %9780 = vst [vmem:[#allocation197_spill] sm:$0xff] %v7068_v19 }
 0x549   :  { %2542 = vperm.xlu2 %4554, %v7053_v60   ;;  %v2077_v60 = vmul.f32 1.442695, %v1917_v25  ;;  %v2127_v25 = vmul.f32 1.442695, %v1942_v33  ;;  %v1925_v33 = vsub.f32 %v9790_v39, %v6943_v46 }
 0x54a   :  { %2482 = vperm.xlu0 %4552, %v7055_v44   ;;  %v7070_v44 = vpop.eup %4629 }
 0x54b   :  { %2476 = vperm.xlu1 %4553, %v7058_v4   ;;  %9781 = vst [vmem:[#allocation116_spill] sm:$0xff] %v7070_v44  ;;  %v7073_v35 = vpop.eup %4631  ;;  %v7075_v38 = vpop.permute.xlu2 %2431  ;;  %4637 = vpow2.f32 %v2077_v60  ;;  %v1945_v60 = vsub.f32 %v9789_v51, %v7021_v22 }
 0x54c   :  { %9782 = vst [vmem:[#allocation162_spill] sm:$0xff] %v7073_v35  ;;  %v7085_v4 = vpop.eup %4633  ;;  %4639 = vpow2.f32 %v2127_v25 }
 0x54d   :  { %9786 = vst [vmem:[#allocation205_spill] sm:$0xff] %v7085_v4  ;;  %v2133_v54 = vmul.f32 1.442695, %v1945_v60  ;;  %v9796_v60 = vld [vmem:[#allocation93_spill] sm:$0xff] }
 0x54e   :  { %v1928_v39 = vsub.f32 %v9796_v60, %v6943_v46  ;;  %v9801_v60 = vld [vmem:[#allocation123_spill] sm:$0xff] }
 0x551   :  { %2551 = vperm.xlu2 %4554, %v7068_v19   ;;  %v2087_v19 = vmul.f32 1.442695, %v1922_v63  ;;  %v9791_v63 = vld [vmem:[#allocation97_spill] sm:$0xff] }
 0x552   :  { %2491 = vperm.xlu0 %4552, %v7070_v44   ;;  %v7087_v44 = vpop.eup %4635  ;;  %v1923_v41 = vsub.f32 %v9791_v63, %v6943_v46  ;;  %v9797_v63 = vld [vmem:[#allocation101_spill] sm:$0xff] }
 0x553   :  { %2485 = vperm.xlu1 %4553, %v7073_v35   ;;  %9787 = vst [vmem:[#allocation186_spill] sm:$0xff] %v7087_v44  ;;  %v7090_v56 = vpop.eup %4637  ;;  %4641 = vpow2.f32 %v2087_v19  ;;  %v7098_v29 = vpop.permute.xlu2 %2452  ;;  %v9795_v19 = vld [vmem:[#allocation121_spill] sm:$0xff] }
 0x554   :  { %9788 = vst [vmem:[#allocation176_spill] sm:$0xff] %v7090_v56  ;;  %4643 = vpow2.f32 %v2083_v36  ;;  %v7102_v35 = vpop.eup %4639  ;;  %v2089_v25 = vmul.f32 1.442695, %v1923_v41  ;;  %v1948_v36 = vsub.f32 %v9795_v19, %v7021_v22  ;;  %v1926_v41 = vsub.f32 %v9797_v63, %v6943_v46 }
 0x555   :  { %9792 = vst [vmem:[#allocation151_spill] sm:$0xff] %v7102_v35  ;;  %4645 = vpow2.f32 %v2133_v54 }
 0x556   :  { %v2139_v19 = vmul.f32 1.442695, %v1948_v36  ;;  %v9802_v36 = vld [vmem:[#allocation96_spill] sm:$0xff] }
 0x559   :  { %2560 = vperm.xlu2 %4554, %v7085_v4   ;;  %v2093_v4 = vmul.f32 1.442695, %v1925_v33 }
 0x55a   :  { %2500 = vperm.xlu0 %4552, %v7087_v44   ;;  %v7104_v44 = vpop.eup %4641 }
 0x55b   :  { %2494 = vperm.xlu1 %4553, %v7090_v56   ;;  %9793 = vst [vmem:[#allocation195_spill] sm:$0xff] %v7104_v44  ;;  %v7107_v51 = vpop.eup %4643  ;;  %4647 = vpow2.f32 %v2093_v4  ;;  %v7124_v54 = vpop.permute.xlu2 %2461  ;;  %v2099_v56 = vmul.f32 1.442695, %v1928_v39  ;;  %v2095_v4 = vmul.f32 1.442695, %v1926_v41  ;;  %v1931_v39 = vsub.f32 %v9802_v36, %v6943_v46  ;;  %v9803_v41 = vld [vmem:[#allocation18_spill] sm:$0xff] }
 0x55c   :  { %9794 = vst [vmem:[#allocation206_spill] sm:$0xff] %v7107_v51  ;;  %4649 = vpow2.f32 %v2089_v25 }
 0x55d   :  { %4651 = vpow2.f32 %v2139_v19 }
 0x55e   :  { %4653 = vpow2.f32 %v2099_v56 }
 0x55f   :  { %4655 = vpow2.f32 %v2095_v4  ;;  %v9807_v4 = vld [vmem:[#allocation126_spill] sm:$0xff] }
 0x561   :  { %2569 = vperm.xlu2 %4554, %v7102_v35  }
 0x562   :  { %2509 = vperm.xlu0 %4552, %v7104_v44   ;;  %v7122_v44 = vperm.slane %v6862_v2, 4 }
 0x563   :  { %2503 = vperm.xlu1 %4553, %v7107_v51   ;;  %v7126_v51 = vpop.eup %4645  ;;  %v7147_v24 = vpop.permute.xlu2 %2470 }
 0x564   :  { %v7115_v33 = vpop.permute.xlu0 %2401  ;;  %9798 = vst [vmem:[#allocation173_spill] sm:$0xff] %v7126_v51  ;;  %v7128_v34 = vpop.eup %4647  ;;  %v1951_v63 = vsub.f32 %v9801_v60, %v7122_v44  ;;  %v1954_v36 = vsub.f32 %v9807_v4, %v7122_v44 }
 0x565   :  { %v7119_v35 = vpop.permute.xlu1 %2398  ;;  %9799 = vst [vmem:[#allocation202_spill] sm:$0xff] %v7128_v34  ;;  %v7131_v25 = vpop.eup %4649 }
 0x566   :  { %9800 = vst [vmem:[#allocation105_spill] sm:$0xff] %v7131_v25  ;;  %v2145_v26 = vmul.f32 1.442695, %v1951_v63  ;;  %v7145_v19 = vpop.eup %4651  ;;  %v9808_v63 = vld [vmem:[#allocation99_spill] sm:$0xff]  ;;  %v2151_v42 = vmul.f32 1.442695, %v1954_v36 }
 0x567   :  { %9804 = vst [vmem:[#allocation199_spill] sm:$0xff] %v7145_v19  ;;  %v9814_v36 = vld [vmem:[#allocation104_spill] sm:$0xff] }
 0x568   :  { %4657 = vpow2.f32 %v2145_v26 }
 0x569   :  { %2578 = vperm.xlu2 %4554, %v7126_v51   ;;  %v1929_v51 = vsub.f32 %v9803_v41, %v6943_v46 }
 0x56a   :  { %2518 = vperm.xlu0 %4552, %v7128_v34   ;;  %v2105_v34 = vmul.f32 1.442695, %v1931_v39  ;;  %v1934_v39 = vsub.f32 %v9808_v63, %v7021_v22 }
 0x56b   :  { %2512 = vperm.xlu1 %4553, %v7131_v25   ;;  %v2101_v60 = vmul.f32 1.442695, %v1929_v51  ;;  %v7149_v25 = vpop.eup %4653  ;;  %v9809_v51 = vld [vmem:[#allocation108_spill] sm:$0xff]  ;;  %v7173_v63 = vpop.permute.xlu2 %2479 }
 0x56c   :  { %v7139_v18 = vpop.permute.xlu0 %2407  ;;  %9805 = vst [vmem:[#allocation127_spill] sm:$0xff] %v7149_v25  ;;  %v7152_v56 = vpop.eup %4655  ;;  %4659 = vpow2.f32 %v2105_v34 }
 0x56d   :  { %v7143_v3 = vpop.permute.xlu1 %2404  ;;  %9806 = vst [vmem:[#allocation181_spill] sm:$0xff] %v7152_v56  ;;  %4661 = vpow2.f32 %v2101_v60 }
 0x56e   :  { %v7166_v26 = vpop.eup %4657  ;;  %4663 = vpow2.f32 %v2151_v42 }
 0x56f   :  { %9810 = vst [vmem:[#allocation189_spill] sm:$0xff] %v7166_v26 }
 0x571   :  { %2587 = vperm.xlu2 %4554, %v7145_v19   ;;  %v1932_v19 = vsub.f32 %v9809_v51, %v6943_v46  ;;  %v9813_v46 = vld [vmem:[#allocation130_spill] sm:$0xff]  ;;  %v9815_v51 = vld [vmem:[#allocation111_spill] sm:$0xff] }
 0x572   :  { %2527 = vperm.xlu0 %4552, %v7149_v25   ;;  %v2111_v25 = vmul.f32 1.442695, %v1934_v39  ;;  %v7168_v4 = vpop.eup %4659  ;;  %v1957_v60 = vsub.f32 %v9813_v46, %v7122_v44 }
 0x573   :  { %2521 = vperm.xlu1 %4553, %v7152_v56   ;;  %v2107_v10 = vmul.f32 1.442695, %v1932_v19  ;;  %9811 = vst [vmem:[#allocation157_spill] sm:$0xff] %v7168_v4  ;;  %v7171_v34 = vpop.eup %4661  ;;  %v1937_v19 = vsub.f32 %v9814_v36, %v7021_v22 }
 0x574   :  { %v7160_v41 = vpop.permute.xlu0 %2413  ;;  %9812 = vst [vmem:[#allocation166_spill] sm:$0xff] %v7171_v34  ;;  %4665 = vpow2.f32 %v2111_v25  ;;  %v2157_v21 = vmul.f32 1.442695, %v1957_v60  ;;  %v7187_v42 = vpop.eup %4663  ;;  %v9820_v60 = vld [vmem:[#allocation19_spill] sm:$0xff] }
 0x575   :  { %v7164_v23 = vpop.permute.xlu1 %2410  ;;  %4667 = vpow2.f32 %v2107_v10  ;;  %9816 = vst [vmem:[#allocation198_spill] sm:$0xff] %v7187_v42  ;;  %v9819_v10 = vld [vmem:[#allocation132_spill] sm:$0xff] }
 0x576   :  { %4669 = vpow2.f32 %v2157_v21  ;;  %v1960_v36 = vsub.f32 %v9819_v10, %v7122_v44 }
 0x578   :  { %v2163_v21 = vmul.f32 1.442695, %v1960_v36 }
 0x579   :  { %2596 = vperm.xlu2 %4554, %v7166_v26   ;;  %v1935_v26 = vsub.f32 %v9815_v51, %v7021_v22  ;;  %v7200_v51 = vpop.permute.xlu2 %2488 }
 0x57a   :  { %2536 = vperm.xlu0 %4552, %v7168_v4   ;;  %v2117_v4 = vmul.f32 1.442695, %v1937_v19  ;;  %v7189_v46 = vpop.eup %4665  ;;  %v1940_v19 = vsub.f32 %v9820_v60, %v7021_v22  ;;  %9821 = vst [vmem:[#allocation200_spill] sm:$0xff] %v7200_v51 }
 0x57b   :  { %2530 = vperm.xlu1 %4553, %v7171_v34   ;;  %v2113_v43 = vmul.f32 1.442695, %v1935_v26  ;;  %9817 = vst [vmem:[#allocation100_spill] sm:$0xff] %v7189_v46  ;;  %v7192_v25 = vpop.eup %4667 }
 0x57c   :  { %v7181_v39 = vpop.permute.xlu0 %2419  ;;  %9818 = vst [vmem:[#allocation178_spill] sm:$0xff] %v7192_v25  ;;  %4671 = vpow2.f32 %v2117_v4  ;;  %v7208_v30 = vpop.eup %4669 }
 0x57d   :  { %v7185_v56 = vpop.permute.xlu1 %2416  ;;  %4673 = vpow2.f32 %v2113_v43  ;;  %9823 = vst [vmem:[#allocation47_spill] sm:$0xff] %v7208_v30  ;;  %v9826_v43 = vld [vmem:[#allocation134_spill] sm:$0xff] }
 0x57e   :  { %4675 = vpow2.f32 %v2163_v21  ;;  %v1963_v60 = vsub.f32 %v9826_v43, %v7122_v44 }
 0x580   :  { %v2169_v43 = vmul.f32 1.442695, %v1963_v60  ;;  %v9834_v60 = vld [vmem:[#allocation23_spill] sm:$0xff] }
 0x581   :  { %2605 = vperm.xlu2 %4554, %v7187_v42   ;;  %v9822_v42 = vld [vmem:[#allocation113_spill] sm:$0xff]  ;;  %v7230_v21 = vpop.permute.xlu2 %2497 }
 0x582   :  { %2545 = vperm.xlu0 %4552, %v7189_v46   ;;  %v1938_v34 = vsub.f32 %v9822_v42, %v7021_v22  ;;  %v2123_v46 = vmul.f32 1.442695, %v1940_v19  ;;  %v9827_v42 = vld [vmem:[#allocation21_spill] sm:$0xff] }
 0x583   :  { %2539 = vperm.xlu1 %4553, %v7192_v25   ;;  %v7210_v25 = vpop.eup %4671  ;;  %v1943_v36 = vsub.f32 %v9827_v42, %v7021_v22  ;;  %v9833_v42 = vld [vmem:[#allocation137_spill] sm:$0xff] }
 0x584   :  { %v7202_v26 = vpop.permute.xlu0 %2425  ;;  %v2119_v10 = vmul.f32 1.442695, %v1938_v34  ;;  %9824 = vst [vmem:[#allocation70_spill] sm:$0xff] %v7210_v25  ;;  %v7213_v4 = vpop.eup %4673  ;;  %4677 = vpow2.f32 %v2123_v46  ;;  %v9829_v34 = vld [vmem:[#allocation114_spill] sm:$0xff] }
 0x585   :  { %v7206_v45 = vpop.permute.xlu1 %2422  ;;  %9825 = vst [vmem:[#allocation58_spill] sm:$0xff] %v7213_v4  ;;  %v2129_v37 = vmul.f32 1.442695, %v1943_v36  ;;  %v1946_v36 = vsub.f32 %v9834_v60, %v7021_v22 }
 0x586   :  { %4679 = vpow2.f32 %v2119_v10 }
 0x587   :  { %4681 = vpow2.f32 %v2169_v43 }
 0x588   :  { %4683 = vpow2.f32 %v2129_v37 }
 0x589   :  { %2614 = vperm.xlu2 %4554, %v7208_v30   ;;  %v1941_v30 = vsub.f32 %v9829_v34, %v7021_v22  ;;  %v7253_v32 = vpop.permute.xlu2 %2506 }
 0x58a   :  { %2554 = vperm.xlu0 %4552, %v7210_v25   ;;  %v7228_v25 = vperm.slane %v6862_v2, 5 }
 0x58b   :  { %2548 = vperm.xlu1 %4553, %v7213_v4   ;;  %v7232_v4 = vpop.eup %4675  ;;  %v2125_v46 = vmul.f32 1.442695, %v1941_v30  ;;  %v9836_v30 = vld [vmem:[#allocation117_spill] sm:$0xff] }
 0x58c   :  { %v7221_v19 = vpop.permute.xlu0 %2434  ;;  %9830 = vst [vmem:[#allocation77_spill] sm:$0xff] %v7232_v4  ;;  %v7234_v55 = vpop.eup %4677  ;;  %v1966_v34 = vsub.f32 %v9833_v42, %v7228_v25 }
 0x58d   :  { %9828 = vst [vmem:[#allocation52_spill] sm:$0xff] %v7221_v19  ;;  %v7225_v58 = vpop.permute.xlu1 %2428  ;;  %v7237_v10 = vpop.eup %4679  ;;  %4685 = vpow2.f32 %v2125_v46  ;;  %v9840_v46 = vld [vmem:[#allocation141_spill] sm:$0xff] }
 0x58e   :  { %9831 = vst [vmem:[#allocation60_spill] sm:$0xff] %v7234_v55  ;;  %v2175_v53 = vmul.f32 1.442695, %v1966_v34  ;;  %v7251_v43 = vpop.eup %4681  ;;  %v1969_v60 = vsub.f32 %v9840_v46, %v7228_v25  ;;  %v9841_v34 = vld [vmem:[#allocation26_spill] sm:$0xff] }
 0x58f   :  { %9832 = vst [vmem:[#allocation57_spill] sm:$0xff] %v7237_v10 }
 0x590   :  { %9837 = vst [vmem:[#allocation64_spill] sm:$0xff] %v7251_v43  ;;  %4687 = vpow2.f32 %v2175_v53  ;;  %v2181_v59 = vmul.f32 1.442695, %v1969_v60  ;;  %v9849_v60 = vld [vmem:[#allocation29_spill] sm:$0xff] }
 0x591   :  { %2623 = vperm.xlu2 %4554, %v7232_v4   ;;  %v1944_v4 = vsub.f32 %v9836_v30, %v7021_v22 }
 0x592   :  { %2563 = vperm.xlu0 %4552, %v7234_v55   ;;  %v2135_v55 = vmul.f32 1.442695, %v1946_v36  ;;  %v1949_v36 = vsub.f32 %v9841_v34, %v7122_v44  ;;  %v7279_v34 = vpop.permute.xlu2 %2515 }
 0x593   :  { %2557 = vperm.xlu1 %4553, %v7237_v10   ;;  %v2131_v42 = vmul.f32 1.442695, %v1944_v4  ;;  %v7255_v10 = vpop.eup %4683  ;;  %v9842_v4 = vld [vmem:[#allocation34_spill] sm:$0xff]  ;;  %9847 = vst [vmem:[#allocation67_spill] sm:$0xff] %v7279_v34 }
 0x594   :  { %v7245_v13 = vpop.permute.xlu0 %2440  ;;  %9838 = vst [vmem:[#allocation61_spill] sm:$0xff] %v7255_v10  ;;  %v7258_v37 = vpop.eup %4685  ;;  %4689 = vpow2.f32 %v2135_v55 }
 0x595   :  { %9835 = vst [vmem:[#allocation80_spill] sm:$0xff] %v7245_v13  ;;  %v7249_v7 = vpop.permute.xlu1 %2437  ;;  %4691 = vpow2.f32 %v2131_v42 }
 0x596   :  { %9839 = vst [vmem:[#allocation83_spill] sm:$0xff] %v7258_v37  ;;  %v7272_v53 = vpop.eup %4687  ;;  %4693 = vpow2.f32 %v2181_v59 }
 0x597   :  { %9844 = vst [vmem:[#allocation65_spill] sm:$0xff] %v7272_v53 }
 0x599   :  { %2632 = vperm.xlu2 %4554, %v7251_v43   ;;  %v1947_v43 = vsub.f32 %v9842_v4, %v7021_v22  ;;  %v9848_v22 = vld [vmem:[#allocation144_spill] sm:$0xff]  ;;  %v9850_v4 = vld [vmem:[#allocation37_spill] sm:$0xff] }
 0x59a   :  { %2572 = vperm.xlu0 %4552, %v7255_v10   ;;  %v2141_v10 = vmul.f32 1.442695, %v1949_v36  ;;  %v7274_v46 = vpop.eup %4689  ;;  %v1972_v42 = vsub.f32 %v9848_v22, %v7228_v25 }
 0x59b   :  { %2566 = vperm.xlu1 %4553, %v7258_v37   ;;  %v2137_v8 = vmul.f32 1.442695, %v1947_v43  ;;  %9845 = vst [vmem:[#allocation86_spill] sm:$0xff] %v7274_v46  ;;  %v7277_v55 = vpop.eup %4691  ;;  %v1952_v43 = vsub.f32 %v9849_v60, %v7122_v44 }
 0x59c   :  { %v7266_v30 = vpop.permute.xlu0 %2446  ;;  %9846 = vst [vmem:[#allocation68_spill] sm:$0xff] %v7277_v55  ;;  %4695 = vpow2.f32 %v2141_v10  ;;  %v2187_v16 = vmul.f32 1.442695, %v1972_v42  ;;  %v7293_v59 = vpop.eup %4693  ;;  %v9855_v42 = vld [vmem:[#allocation32_spill] sm:$0xff] }
 0x59d   :  { %v7270_v48 = vpop.permute.xlu1 %2443  ;;  %4697 = vpow2.f32 %v2137_v8  ;;  %9851 = vst [vmem:[#allocation89_spill] sm:$0xff] %v7293_v59  ;;  %v9854_v8 = vld [vmem:[#allocation146_spill] sm:$0xff] }
 0x59e   :  { %9843 = vst [vmem:[#allocation55_spill] sm:$0xff] %v7270_v48  ;;  %4699 = vpow2.f32 %v2187_v16  ;;  %v1975_v60 = vsub.f32 %v9854_v8, %v7228_v25 }
 0x5a0   :  { %v2193_v16 = vmul.f32 1.442695, %v1975_v60 }
 0x5a1   :  { %2641 = vperm.xlu2 %4554, %v7272_v53   ;;  %v1950_v53 = vsub.f32 %v9850_v4, %v7122_v44  ;;  %v7306_v4 = vpop.permute.xlu2 %2524 }
 0x5a2   :  { %2581 = vperm.xlu0 %4552, %v7274_v46   ;;  %v2147_v46 = vmul.f32 1.442695, %v1952_v43  ;;  %v7295_v22 = vpop.eup %4695  ;;  %v1955_v43 = vsub.f32 %v9855_v42, %v7122_v44  ;;  %9856 = vst [vmem:[#allocation92_spill] sm:$0xff] %v7306_v4 }
 0x5a3   :  { %2575 = vperm.xlu1 %4553, %v7277_v55   ;;  %v2143_v17 = vmul.f32 1.442695, %v1950_v53  ;;  %9852 = vst [vmem:[#allocation71_spill] sm:$0xff] %v7295_v22  ;;  %v7298_v10 = vpop.eup %4697 }
 0x5a4   :  { %v7287_v36 = vpop.permute.xlu0 %2455  ;;  %9853 = vst [vmem:[#allocation59_spill] sm:$0xff] %v7298_v10  ;;  %4701 = vpow2.f32 %v2147_v46  ;;  %v7314_v47 = vpop.eup %4699 }
 0x5a5   :  { %v7291_v37 = vpop.permute.xlu1 %2449  ;;  %4703 = vpow2.f32 %v2143_v17  ;;  %9858 = vst [vmem:[#allocation73_spill] sm:$0xff] %v7314_v47  ;;  %v9861_v17 = vld [vmem:[#allocation148_spill] sm:$0xff] }
 0x5a6   :  { %4705 = vpow2.f32 %v2193_v16  ;;  %v1978_v42 = vsub.f32 %v9861_v17, %v7228_v25 }
 0x5a8   :  { %v2199_v17 = vmul.f32 1.442695, %v1978_v42  ;;  %v9869_v42 = vld [vmem:[#allocation38_spill] sm:$0xff] }
 0x5a9   :  { %2650 = vperm.xlu2 %4554, %v7293_v59   ;;  %v9857_v59 = vld [vmem:[#allocation125_spill] sm:$0xff]  ;;  %v7336_v16 = vpop.permute.xlu2 %2533 }
 0x5aa   :  { %2590 = vperm.xlu0 %4552, %v7295_v22   ;;  %v1953_v55 = vsub.f32 %v9857_v59, %v7122_v44  ;;  %v2153_v22 = vmul.f32 1.442695, %v1955_v43  ;;  %v9862_v59 = vld [vmem:[#allocation35_spill] sm:$0xff]  ;;  %9864 = vst [vmem:[#allocation66_spill] sm:$0xff] %v7336_v16 }
 0x5ab   :  { %2584 = vperm.xlu1 %4553, %v7298_v10   ;;  %v7316_v10 = vpop.eup %4701  ;;  %v1958_v60 = vsub.f32 %v9862_v59, %v7122_v44  ;;  %v9868_v59 = vld [vmem:[#allocation152_spill] sm:$0xff] }
 0x5ac   :  { %v7308_v53 = vpop.permute.xlu0 %2464  ;;  %v2149_v8 = vmul.f32 1.442695, %v1953_v55  ;;  %9859 = vst [vmem:[#allocation62_spill] sm:$0xff] %v7316_v10  ;;  %v7319_v46 = vpop.eup %4703  ;;  %4707 = vpow2.f32 %v2153_v22  ;;  %v9863_v55 = vld [vmem:[#allocation128_spill] sm:$0xff] }
 0x5ad   :  { %v7312_v14 = vpop.permute.xlu1 %2458  ;;  %9860 = vst [vmem:[#allocation95_spill] sm:$0xff] %v7319_v46  ;;  %v2159_v52 = vmul.f32 1.442695, %v1958_v60  ;;  %v1961_v60 = vsub.f32 %v9869_v42, %v7122_v44 }
 0x5ae   :  { %4709 = vpow2.f32 %v2149_v8 }
 0x5af   :  { %4711 = vpow2.f32 %v2199_v17 }
 0x5b0   :  { %4713 = vpow2.f32 %v2159_v52 }
 0x5b1   :  { %2659 = vperm.xlu2 %4554, %v7314_v47   ;;  %v1956_v47 = vsub.f32 %v9863_v55, %v7122_v44  ;;  %v7359_v48 = vpop.permute.xlu2 %2542 }
 0x5b2   :  { %2599 = vperm.xlu0 %4552, %v7316_v10   ;;  %v7334_v10 = vperm.slane %v6862_v2, 6  ;;  %9873 = vst [vmem:[#allocation72_spill] sm:$0xff] %v7359_v48 }
 0x5b3   :  { %2593 = vperm.xlu1 %4553, %v7319_v46   ;;  %v7338_v46 = vpop.eup %4705  ;;  %v2155_v22 = vmul.f32 1.442695, %v1956_v47  ;;  %v9871_v47 = vld [vmem:[#allocation131_spill] sm:$0xff] }
 0x5b4   :  { %v7327_v43 = vpop.permute.xlu0 %2473  ;;  %9865 = vst [vmem:[#allocation74_spill] sm:$0xff] %v7338_v46  ;;  %v7340_v50 = vpop.eup %4707  ;;  %v1981_v55 = vsub.f32 %v9868_v59, %v7334_v10 }
 0x5b5   :  { %v7331_v5 = vpop.permute.xlu1 %2467  ;;  %9866 = vst [vmem:[#allocation98_spill] sm:$0xff] %v7340_v50  ;;  %v7343_v8 = vpop.eup %4709  ;;  %4715 = vpow2.f32 %v2155_v22  ;;  %v9876_v22 = vld [vmem:[#allocation155_spill] sm:$0xff] }
 0x5b6   :  { %9867 = vst [vmem:[#allocation69_spill] sm:$0xff] %v7343_v8  ;;  %v2205_v51 = vmul.f32 1.442695, %v1981_v55  ;;  %v7357_v17 = vpop.eup %4711  ;;  %v1984_v42 = vsub.f32 %v9876_v22, %v7334_v10  ;;  %v9877_v55 = vld [vmem:[#allocation40_spill] sm:$0xff] }
 0x5b7   :  { %9872 = vst [vmem:[#allocation103_spill] sm:$0xff] %v7357_v17 }
 0x5b8   :  { %4717 = vpow2.f32 %v2205_v51  ;;  %v2211_v6 = vmul.f32 1.442695, %v1984_v42  ;;  %v9886_v42 = vld [vmem:[#allocation43_spill] sm:$0xff] }
 0x5b9   :  { %2668 = vperm.xlu2 %4554, %v7338_v46   ;;  %v1959_v46 = vsub.f32 %v9871_v47, %v7122_v44 }
 0x5ba   :  { %2608 = vperm.xlu0 %4552, %v7340_v50   ;;  %v2165_v50 = vmul.f32 1.442695, %v1961_v60  ;;  %v1964_v60 = vsub.f32 %v9877_v55, %v7122_v44  ;;  %v7385_v55 = vpop.permute.xlu2 %2551 }
 0x5bb   :  { %2602 = vperm.xlu1 %4553, %v7343_v8   ;;  %v2161_v59 = vmul.f32 1.442695, %v1959_v46  ;;  %v7361_v8 = vpop.eup %4713  ;;  %v9879_v46 = vld [vmem:[#allocation48_spill] sm:$0xff]  ;;  %9884 = vst [vmem:[#allocation30_spill] sm:$0xff] %v7385_v55 }
 0x5bc   :  { %v7351_v16 = vpop.permute.xlu0 %2482  ;;  %9874 = vst [vmem:[#allocation79_spill] sm:$0xff] %v7361_v8  ;;  %v7364_v52 = vpop.eup %4715  ;;  %4719 = vpow2.f32 %v2165_v50 }
 0x5bd   :  { %9870 = vst [vmem:[#allocation76_spill] sm:$0xff] %v7351_v16  ;;  %v7355_v4 = vpop.permute.xlu1 %2476  ;;  %4721 = vpow2.f32 %v2161_v59 }
 0x5be   :  { %9875 = vst [vmem:[#allocation106_spill] sm:$0xff] %v7364_v52  ;;  %v7378_v51 = vpop.eup %4717  ;;  %4723 = vpow2.f32 %v2211_v6 }
 0x5bf   :  { %9881 = vst [vmem:[#allocation109_spill] sm:$0xff] %v7378_v51 }
 0x5c1   :  { %2677 = vperm.xlu2 %4554, %v7357_v17   ;;  %v1962_v17 = vsub.f32 %v9879_v46, %v7122_v44  ;;  %v9885_v44 = vld [vmem:[#allocation160_spill] sm:$0xff]  ;;  %v9887_v46 = vld [vmem:[#allocation135_spill] sm:$0xff] }
 0x5c2   :  { %2617 = vperm.xlu0 %4552, %v7361_v8   ;;  %v2171_v8 = vmul.f32 1.442695, %v1964_v60  ;;  %v7380_v22 = vpop.eup %4719  ;;  %v1987_v59 = vsub.f32 %v9885_v44, %v7334_v10 }
 0x5c3   :  { %2611 = vperm.xlu1 %4553, %v7364_v52   ;;  %v2167_v16 = vmul.f32 1.442695, %v1962_v17  ;;  %9882 = vst [vmem:[#allocation78_spill] sm:$0xff] %v7380_v22  ;;  %v7383_v50 = vpop.eup %4721  ;;  %v1967_v17 = vsub.f32 %v9886_v42, %v7228_v25 }
 0x5c4   :  { %v7372_v47 = vpop.permute.xlu0 %2491  ;;  %9883 = vst [vmem:[#allocation85_spill] sm:$0xff] %v7383_v50  ;;  %4725 = vpow2.f32 %v2171_v8  ;;  %v7399_v6 = vpop.eup %4723 }
 0x5c5   :  { %9878 = vst [vmem:[#allocation75_spill] sm:$0xff] %v7372_v47  ;;  %v7376_v48 = vpop.permute.xlu1 %2485  ;;  %4727 = vpow2.f32 %v2167_v16  ;;  %v2217_v47 = vmul.f32 1.442695, %v1987_v59  ;;  %v9891_v16 = vld [vmem:[#allocation164_spill] sm:$0xff]  ;;  %v9892_v59 = vld [vmem:[#allocation46_spill] sm:$0xff] }
 0x5c6   :  { %9880 = vst [vmem:[#allocation82_spill] sm:$0xff] %v7376_v48  ;;  %v1990_v42 = vsub.f32 %v9891_v16, %v7334_v10 }
 0x5c7   :  { %9888 = vst [vmem:[#allocation81_spill] sm:$0xff] %v7399_v6  ;;  %4729 = vpow2.f32 %v2217_v47 }
 0x5c8   :  { %v2223_v47 = vmul.f32 1.442695, %v1990_v42 }
 0x5c9   :  { %2686 = vperm.xlu2 %4554, %v7378_v51   ;;  %v1965_v51 = vsub.f32 %v9887_v46, %v7228_v25  ;;  %v7412_v46 = vpop.permute.xlu2 %2560 }
 0x5ca   :  { %2626 = vperm.xlu0 %4552, %v7380_v22   ;;  %v2177_v22 = vmul.f32 1.442695, %v1967_v17  ;;  %v7401_v44 = vpop.eup %4725  ;;  %v1970_v17 = vsub.f32 %v9892_v59, %v7228_v25  ;;  %9893 = vst [vmem:[#allocation84_spill] sm:$0xff] %v7412_v46 }
 0x5cb   :  { %2620 = vperm.xlu1 %4553, %v7383_v50   ;;  %v2173_v55 = vmul.f32 1.442695, %v1965_v51  ;;  %9889 = vst [vmem:[#allocation88_spill] sm:$0xff] %v7401_v44  ;;  %v7404_v8 = vpop.eup %4727 }
 0x5cc   :  { %v7393_v60 = vpop.permute.xlu0 %2500  ;;  %9890 = vst [vmem:[#allocation33_spill] sm:$0xff] %v7404_v8  ;;  %4731 = vpow2.f32 %v2177_v22 }
 0x5cd   :  { %v7397_v52 = vpop.permute.xlu1 %2494  ;;  %4733 = vpow2.f32 %v2173_v55  ;;  %v7420_v27 = vpop.eup %4729  ;;  %v9898_v55 = vld [vmem:[#allocation169_spill] sm:$0xff] }
 0x5ce   :  { %9895 = vst [vmem:[#allocation91_spill] sm:$0xff] %v7420_v27  ;;  %4735 = vpow2.f32 %v2223_v47  ;;  %v1993_v59 = vsub.f32 %v9898_v55, %v7334_v10 }
 0x5d0   :  { %v2229_v47 = vmul.f32 1.442695, %v1993_v59  ;;  %v9907_v59 = vld [vmem:[#allocation50_spill] sm:$0xff] }
 0x5d1   :  { %2695 = vperm.xlu2 %4554, %v7399_v6   ;;  %v9894_v6 = vld [vmem:[#allocation139_spill] sm:$0xff]  ;;  %v7439_v48 = vpop.permute.xlu2 %2569 }
 0x5d2   :  { %2635 = vperm.xlu0 %4552, %v7401_v44   ;;  %v1968_v50 = vsub.f32 %v9894_v6, %v7228_v25  ;;  %v2183_v44 = vmul.f32 1.442695, %v1970_v17  ;;  %v9899_v6 = vld [vmem:[#allocation49_spill] sm:$0xff]  ;;  %9902 = vst [vmem:[#allocation119_spill] sm:$0xff] %v7439_v48 }
 0x5d3   :  { %2629 = vperm.xlu1 %4553, %v7404_v8   ;;  %v7422_v8 = vpop.eup %4731  ;;  %v1973_v42 = vsub.f32 %v9899_v6, %v7228_v25 }
 0x5d4   :  { %v7414_v51 = vpop.permute.xlu0 %2509  ;;  %v2179_v16 = vmul.f32 1.442695, %v1968_v50  ;;  %9896 = vst [vmem:[#allocation115_spill] sm:$0xff] %v7422_v8  ;;  %v7425_v22 = vpop.eup %4733  ;;  %4737 = vpow2.f32 %v2183_v44  ;;  %v9901_v50 = vld [vmem:[#allocation53_spill] sm:$0xff] }
 0x5d5   :  { %v7418_v13 = vpop.permute.xlu1 %2503  ;;  %9897 = vst [vmem:[#allocation87_spill] sm:$0xff] %v7425_v22  ;;  %v7441_v34 = vpop.eup %4735 }
 0x5d6   :  { %4739 = vpow2.f32 %v2179_v16  ;;  %9903 = vst [vmem:[#allocation90_spill] sm:$0xff] %v7441_v34  ;;  %v9906_v16 = vld [vmem:[#allocation174_spill] sm:$0xff] }
 0x5d7   :  { %4741 = vpow2.f32 %v2229_v47  ;;  %v1996_v6 = vsub.f32 %v9906_v16, %v7334_v10 }
 0x5d9   :  { %2704 = vperm.xlu2 %4554, %v7420_v27   ;;  %v1971_v27 = vsub.f32 %v9901_v50, %v7228_v25  ;;  %v2235_v47 = vmul.f32 1.442695, %v1996_v6  ;;  %v9916_v6 = vld [vmem:[#allocation51_spill] sm:$0xff] }
 0x5da   :  { %2644 = vperm.xlu0 %4552, %v7422_v8   ;;  %v2189_v8 = vmul.f32 1.442695, %v1973_v42  ;;  %v1976_v42 = vsub.f32 %v9907_v59, %v7228_v25  ;;  %v9915_v59 = vld [vmem:[#allocation179_spill] sm:$0xff] }
 0x5db   :  { %2638 = vperm.xlu1 %4553, %v7425_v22   ;;  %v2185_v55 = vmul.f32 1.442695, %v1971_v27  ;;  %v7443_v22 = vpop.eup %4737  ;;  %v9909_v27 = vld [vmem:[#allocation145_spill] sm:$0xff] }
 0x5dc   :  { %v7433_v17 = vpop.permute.xlu0 %2518  ;;  %9904 = vst [vmem:[#allocation97_spill] sm:$0xff] %v7443_v22  ;;  %v7446_v44 = vpop.eup %4739  ;;  %4743 = vpow2.f32 %v2189_v8 }
 0x5dd   :  { %9900 = vst [vmem:[#allocation94_spill] sm:$0xff] %v7433_v17  ;;  %v7437_v46 = vpop.permute.xlu1 %2512  ;;  %4745 = vpow2.f32 %v2185_v55  ;;  %v2195_v17 = vmul.f32 1.442695, %v1976_v42  ;;  %v7463_v16 = vpop.eup %4741  ;;  %v1979_v42 = vsub.f32 %v9916_v6, %v7228_v25 }
 0x5de   :  { %9905 = vst [vmem:[#allocation121_spill] sm:$0xff] %v7446_v44  ;;  %4747 = vpow2.f32 %v2235_v47 }
 0x5df   :  { %9911 = vst [vmem:[#allocation123_spill] sm:$0xff] %v7463_v16  ;;  %4749 = vpow2.f32 %v2195_v17 }
 0x5e1   :  { %2713 = vperm.xlu2 %4554, %v7441_v34   ;;  %v1974_v34 = vsub.f32 %v9909_v27, %v7228_v25 }
 0x5e2   :  { %2653 = vperm.xlu0 %4552, %v7443_v22   ;;  %v7461_v22 = vperm.slane %v6862_v2, 7  ;;  %v7467_v19 = vpop.eup %4743 }
 0x5e3   :  { %2647 = vperm.xlu1 %4553, %v7446_v44   ;;  %v7465_v44 = vpop.permute.xlu2 %2578  ;;  %v2191_v8 = vmul.f32 1.442695, %v1974_v34  ;;  %9913 = vst [vmem:[#allocation18_spill] sm:$0xff] %v7467_v19  ;;  %v7470_v55 = vpop.eup %4745  ;;  %v9918_v34 = vld [vmem:[#allocation147_spill] sm:$0xff] }
 0x5e4   :  { %v7454_v50 = vpop.permute.xlu0 %2527  ;;  %9912 = vst [vmem:[#allocation96_spill] sm:$0xff] %v7465_v44  ;;  %v1999_v2 = vsub.f32 %v9915_v59, %v7461_v22  ;;  %v7484_v47 = vpop.eup %4747 }
 0x5e5   :  { %9908 = vst [vmem:[#allocation93_spill] sm:$0xff] %v7454_v50  ;;  %v7458_v48 = vpop.permute.xlu1 %2521  ;;  %4751 = vpow2.f32 %v2191_v8  ;;  %v7486_v59 = vpop.eup %4749  ;;  %v9924_v8 = vld [vmem:[#allocation184_spill] sm:$0xff] }
 0x5e6   :  { %9910 = vst [vmem:[#allocation101_spill] sm:$0xff] %v7458_v48  ;;  %v2241_v44 = vmul.f32 1.442695, %v1999_v2  ;;  %v9925_v2 = vld [vmem:[#allocation54_spill] sm:$0xff] }
 0x5e7   :  { %9914 = vst [vmem:[#allocation126_spill] sm:$0xff] %v7470_v55 }
 0x5e8   :  { %9920 = vst [vmem:[#allocation130_spill] sm:$0xff] %v7484_v47  ;;  %4753 = vpow2.f32 %v2241_v44 }
 0x5e9   :  { %2722 = vperm.xlu2 %4554, %v7463_v16   ;;  %v1977_v16 = vsub.f32 %v9918_v34, %v7228_v25  ;;  %9921 = vst [vmem:[#allocation104_spill] sm:$0xff] %v7486_v59  ;;  %v2002_v34 = vsub.f32 %v9924_v8, %v7461_v22 }
 0x5ea   :  { %2662 = vperm.xlu0 %4552, %v7467_v19   ;;  %v2201_v19 = vmul.f32 1.442695, %v1979_v42 }
 0x5eb   :  { %2656 = vperm.xlu1 %4553, %v7470_v55   ;;  %v2197_v48 = vmul.f32 1.442695, %v1977_v16  ;;  %v7489_v17 = vpop.eup %4751  ;;  %v7491_v6 = vpop.permute.xlu2 %2587  ;;  %v1982_v16 = vsub.f32 %v9925_v2, %v7334_v10 }
 0x5ec   :  { %v7478_v27 = vpop.permute.xlu0 %2536  ;;  %9922 = vst [vmem:[#allocation111_spill] sm:$0xff] %v7489_v17  ;;  %4755 = vpow2.f32 %v2201_v19 }
 0x5ed   :  { %9917 = vst [vmem:[#allocation99_spill] sm:$0xff] %v7478_v27  ;;  %v7482_v50 = vpop.permute.xlu1 %2530  ;;  %4757 = vpow2.f32 %v2197_v48  ;;  %v9931_v48 = vld [vmem:[#allocation188_spill] sm:$0xff] }
 0x5ee   :  { %9919 = vst [vmem:[#allocation108_spill] sm:$0xff] %v7482_v50  ;;  %v2247_v50 = vmul.f32 1.442695, %v2002_v34  ;;  %v7505_v44 = vpop.eup %4753  ;;  %v2005_v2 = vsub.f32 %v9931_v48, %v7461_v22 }
 0x5ef   :  { %9923 = vst [vmem:[#allocation132_spill] sm:$0xff] %v7491_v6 }
 0x5f0   :  { %9928 = vst [vmem:[#allocation113_spill] sm:$0xff] %v7505_v44  ;;  %4759 = vpow2.f32 %v2247_v50  ;;  %v2253_v50 = vmul.f32 1.442695, %v2005_v2  ;;  %v9941_v2 = vld [vmem:[#allocation149_spill] sm:$0xff] }
 0x5f1   :  { %2731 = vperm.xlu2 %4554, %v7484_v47   ;;  %v9926_v47 = vld [vmem:[#allocation150_spill] sm:$0xff] }
 0x5f2   :  { %2671 = vperm.xlu0 %4552, %v7486_v59   ;;  %v1980_v55 = vsub.f32 %v9926_v47, %v7228_v25  ;;  %v2207_v59 = vmul.f32 1.442695, %v1982_v16  ;;  %v7507_v8 = vpop.eup %4755  ;;  %v9932_v25 = vld [vmem:[#allocation56_spill] sm:$0xff]  ;;  %v9935_v16 = vld [vmem:[#allocation154_spill] sm:$0xff] }
 0x5f3   :  { %2665 = vperm.xlu1 %4553, %v7489_v17   ;;  %9929 = vst [vmem:[#allocation134_spill] sm:$0xff] %v7507_v8  ;;  %v7510_v19 = vpop.eup %4757  ;;  %v1985_v47 = vsub.f32 %v9932_v25, %v7334_v10  ;;  %v7518_v34 = vpop.permute.xlu2 %2596 }
 0x5f4   :  { %v7499_v42 = vpop.permute.xlu0 %2545  ;;  %v2203_v6 = vmul.f32 1.442695, %v1980_v55  ;;  %9930 = vst [vmem:[#allocation21_spill] sm:$0xff] %v7510_v19  ;;  %4761 = vpow2.f32 %v2207_v59 }
 0x5f5   :  { %v7503_v27 = vpop.permute.xlu1 %2539  ;;  %9933 = vst [vmem:[#allocation114_spill] sm:$0xff] %v7518_v34 }
 0x5f6   :  { %9927 = vst [vmem:[#allocation19_spill] sm:$0xff] %v7503_v27  ;;  %4763 = vpow2.f32 %v2203_v6  ;;  %v7526_v27 = vpop.eup %4759  ;;  %v9940_v6 = vld [vmem:[#allocation192_spill] sm:$0xff] }
 0x5f7   :  { %9937 = vst [vmem:[#allocation117_spill] sm:$0xff] %v7526_v27  ;;  %4765 = vpow2.f32 %v2253_v50  ;;  %v2008_v25 = vsub.f32 %v9940_v6, %v7461_v22 }
 0x5f9   :  { %2740 = vperm.xlu2 %4554, %v7505_v44   ;;  %v1983_v44 = vsub.f32 %v9935_v16, %v7334_v10  ;;  %v2259_v50 = vmul.f32 1.442695, %v2008_v25  ;;  %v9950_v25 = vld [vmem:[#allocation63_spill] sm:$0xff] }
 0x5fa   :  { %2680 = vperm.xlu0 %4552, %v7507_v8   ;;  %v2213_v8 = vmul.f32 1.442695, %v1985_v47  ;;  %v1988_v47 = vsub.f32 %v9941_v2, %v7334_v10 }
 0x5fb   :  { %2674 = vperm.xlu1 %4553, %v7510_v19   ;;  %v2209_v48 = vmul.f32 1.442695, %v1983_v44  ;;  %v7528_v19 = vpop.eup %4761  ;;  %v9943_v44 = vld [vmem:[#allocation159_spill] sm:$0xff]  ;;  %v7545_v34 = vpop.permute.xlu2 %2605 }
 0x5fc   :  { %v7520_v55 = vpop.permute.xlu0 %2554  ;;  %9938 = vst [vmem:[#allocation141_spill] sm:$0xff] %v7528_v19  ;;  %v7531_v59 = vpop.eup %4763  ;;  %4767 = vpow2.f32 %v2213_v8 }
 0x5fd   :  { %9934 = vst [vmem:[#allocation137_spill] sm:$0xff] %v7520_v55  ;;  %v7524_v17 = vpop.permute.xlu1 %2548  ;;  %4769 = vpow2.f32 %v2209_v48  ;;  %v9949_v48 = vld [vmem:[#allocation196_spill] sm:$0xff] }
 0x5fe   :  { %9936 = vst [vmem:[#allocation23_spill] sm:$0xff] %v7524_v17  ;;  %v7547_v17 = vpop.eup %4765  ;;  %4771 = vpow2.f32 %v2259_v50  ;;  %v2011_v2 = vsub.f32 %v9949_v48, %v7461_v22 }
 0x5ff   :  { %9939 = vst [vmem:[#allocation26_spill] sm:$0xff] %v7531_v59 }
 0x600   :  { %9945 = vst [vmem:[#allocation29_spill] sm:$0xff] %v7545_v34 }
 0x601   :  { %2749 = vperm.xlu2 %4554, %v7526_v27   ;;  %v1986_v27 = vsub.f32 %v9943_v44, %v7334_v10  ;;  %9946 = vst [vmem:[#allocation37_spill] sm:$0xff] %v7547_v17 }
 0x602   :  { %2689 = vperm.xlu0 %4552, %v7528_v19   ;;  %v2219_v19 = vmul.f32 1.442695, %v1988_v47  ;;  %v1991_v47 = vsub.f32 %v9950_v25, %v7334_v10 }
 0x603   :  { %2683 = vperm.xlu1 %4553, %v7531_v59   ;;  %v2215_v6 = vmul.f32 1.442695, %v1986_v27  ;;  %v7549_v59 = vpop.eup %4767  ;;  %v9952_v27 = vld [vmem:[#allocation163_spill] sm:$0xff]  ;;  %v7568_v34 = vpop.permute.xlu2 %2614 }
 0x604   :  { %v7539_v16 = vpop.permute.xlu0 %2563  ;;  %9947 = vst [vmem:[#allocation146_spill] sm:$0xff] %v7549_v59  ;;  %v7552_v8 = vpop.eup %4769  ;;  %4773 = vpow2.f32 %v2219_v19 }
 0x605   :  { %9942 = vst [vmem:[#allocation34_spill] sm:$0xff] %v7539_v16  ;;  %v7543_v55 = vpop.permute.xlu1 %2557  ;;  %4775 = vpow2.f32 %v2215_v6  ;;  %v7566_v50 = vpop.eup %4771  ;;  %v9958_v6 = vld [vmem:[#allocation156_spill] sm:$0xff] }
 0x606   :  { %9944 = vst [vmem:[#allocation144_spill] sm:$0xff] %v7543_v55  ;;  %v2265_v55 = vmul.f32 1.442695, %v2011_v2  ;;  %v1994_v2 = vsub.f32 %v9958_v6, %v7334_v10 }
 0x607   :  { %9948 = vst [vmem:[#allocation32_spill] sm:$0xff] %v7552_v8 }
 0x608   :  { %9954 = vst [vmem:[#allocation35_spill] sm:$0xff] %v7566_v50  ;;  %4777 = vpow2.f32 %v2265_v55 }
 0x609   :  { %2758 = vperm.xlu2 %4554, %v7547_v17   ;;  %v1989_v17 = vsub.f32 %v9952_v27, %v7334_v10  ;;  %9955 = vst [vmem:[#allocation128_spill] sm:$0xff] %v7568_v34 }
 0x60a   :  { %2698 = vperm.xlu0 %4552, %v7549_v59   ;;  %v2225_v59 = vmul.f32 1.442695, %v1991_v47 }
 0x60b   :  { %2692 = vperm.xlu1 %4553, %v7552_v8   ;;  %v2221_v48 = vmul.f32 1.442695, %v1989_v17  ;;  %v7570_v8 = vpop.eup %4773  ;;  %v9960_v17 = vld [vmem:[#allocation167_spill] sm:$0xff] }
 0x60c   :  { %v7560_v44 = vpop.permute.xlu0 %2572  ;;  %9956 = vst [vmem:[#allocation152_spill] sm:$0xff] %v7570_v8  ;;  %v7573_v19 = vpop.eup %4775  ;;  %4779 = vpow2.f32 %v2225_v59  ;;  %v1992_v47 = vsub.f32 %v9960_v17, %v7334_v10  ;;  %v9967_v17 = vld [vmem:[#allocation172_spill] sm:$0xff] }
 0x60d   :  { %9951 = vst [vmem:[#allocation125_spill] sm:$0xff] %v7560_v44  ;;  %v7564_v16 = vpop.permute.xlu1 %2566  ;;  %4781 = vpow2.f32 %v2221_v48  ;;  %v7592_v59 = vpop.permute.xlu2 %2623  ;;  %v9966_v48 = vld [vmem:[#allocation161_spill] sm:$0xff] }
 0x60e   :  { %9953 = vst [vmem:[#allocation148_spill] sm:$0xff] %v7564_v16  ;;  %v7585_v44 = vpop.eup %4777  ;;  %v2227_v16 = vmul.f32 1.442695, %v1992_v47  ;;  %v1997_v6 = vsub.f32 %v9966_v48, %v7461_v22  ;;  %v1995_v47 = vsub.f32 %v9967_v17, %v7334_v10  ;;  %v9974_v10 = vld [vmem:[#allocation177_spill] sm:$0xff] }
 0x60f   :  { %9957 = vst [vmem:[#allocation38_spill] sm:$0xff] %v7573_v19 }
 0x610   :  { %9962 = vst [vmem:[#allocation40_spill] sm:$0xff] %v7585_v44 }
 0x611   :  { %2767 = vperm.xlu2 %4554, %v7566_v50   ;;  %v2231_v50 = vmul.f32 1.442695, %v1994_v2  ;;  %9965 = vst [vmem:[#allocation43_spill] sm:$0xff] %v7592_v59 }
 0x612   :  { %2707 = vperm.xlu0 %4552, %v7570_v8   ;;  %v7587_v8 = vpop.eup %4779 }
 0x613   :  { %2701 = vperm.xlu1 %4553, %v7573_v19   ;;  %9963 = vst [vmem:[#allocation48_spill] sm:$0xff] %v7587_v8  ;;  %v7590_v55 = vpop.eup %4781  ;;  %4783 = vpow2.f32 %v2231_v50  ;;  %v9971_v50 = vld [vmem:[#allocation165_spill] sm:$0xff] }
 0x614   :  { %v7579_v25 = vpop.permute.xlu0 %2581  ;;  %9964 = vst [vmem:[#allocation160_spill] sm:$0xff] %v7590_v55  ;;  %4785 = vpow2.f32 %v2227_v16  ;;  %v2000_v48 = vsub.f32 %v9971_v50, %v7461_v22 }
 0x615   :  { %9959 = vst [vmem:[#allocation131_spill] sm:$0xff] %v7579_v25  ;;  %v7583_v27 = vpop.permute.xlu1 %2575  ;;  %v2233_v25 = vmul.f32 1.442695, %v1995_v47  ;;  %v7612_v16 = vpop.permute.xlu2 %2632 }
 0x616   :  { %9961 = vst [vmem:[#allocation155_spill] sm:$0xff] %v7583_v27  ;;  %v2243_v47 = vmul.f32 1.442695, %v2000_v48 }
 0x617   :  { %9972 = vst [vmem:[#allocation139_spill] sm:$0xff] %v7612_v16 }
 0x619   :  { %2776 = vperm.xlu2 %4554, %v7585_v44   ;;  %v2237_v44 = vmul.f32 1.442695, %v1997_v6  ;;  %v7604_v27 = vpop.eup %4783  ;;  %v1998_v6 = vsub.f32 %v9974_v10, %v7461_v22  ;;  %v9979_v10 = vld [vmem:[#allocation183_spill] sm:$0xff] }
 0x61a   :  { %2716 = vperm.xlu0 %4552, %v7587_v8   ;;  %9969 = vst [vmem:[#allocation164_spill] sm:$0xff] %v7604_v27  ;;  %v7606_v59 = vpop.eup %4785 }
 0x61b   :  { %2710 = vperm.xlu1 %4553, %v7590_v55   ;;  %9970 = vst [vmem:[#allocation46_spill] sm:$0xff] %v7606_v59  ;;  %4787 = vpow2.f32 %v2237_v44  ;;  %v2239_v8 = vmul.f32 1.442695, %v1998_v6  ;;  %v9977_v44 = vld [vmem:[#allocation170_spill] sm:$0xff] }
 0x61c   :  { %v7598_v2 = vpop.permute.xlu0 %2590  ;;  %4789 = vpow2.f32 %v2233_v25  ;;  %v2003_v50 = vsub.f32 %v9977_v44, %v7461_v22 }
 0x61d   :  { %v7602_v19 = vpop.permute.xlu1 %2584  ;;  %4791 = vpow2.f32 %v2243_v47  ;;  %v7634_v6 = vpop.permute.xlu2 %2641 }
 0x61e   :  { %9968 = vst [vmem:[#allocation135_spill] sm:$0xff] %v7602_v19  ;;  %4793 = vpow2.f32 %v2239_v8  ;;  %v2249_v16 = vmul.f32 1.442695, %v2003_v50  ;;  %v9984_v8 = vld [vmem:[#allocation175_spill] sm:$0xff] }
 0x61f   :  { %9981 = vst [vmem:[#allocation145_spill] sm:$0xff] %v7634_v6  ;;  %v2006_v47 = vsub.f32 %v9984_v8, %v7461_v22 }
 0x620   :  { %4795 = vpow2.f32 %v2249_v16 }
 0x621   :  { %v7620_v19 = vpop.eup %4787 }
 0x622   :  { %2725 = vperm.xlu0 %4552, %v7604_v27   ;;  %9975 = vst [vmem:[#allocation49_spill] sm:$0xff] %v7620_v19  ;;  %v7622_v27 = vpop.eup %4789 }
 0x623   :  { %2719 = vperm.xlu1 %4553, %v7606_v59   ;;  %9976 = vst [vmem:[#allocation53_spill] sm:$0xff] %v7622_v27  ;;  %v2001_v59 = vsub.f32 %v9979_v10, %v7461_v22  ;;  %v7636_v34 = vpop.eup %4791  ;;  %v9986_v10 = vld [vmem:[#allocation187_spill] sm:$0xff] }
 0x624   :  { %v7614_v55 = vpop.permute.xlu0 %2599  ;;  %9982 = vst [vmem:[#allocation179_spill] sm:$0xff] %v7636_v34 }
 0x625   :  { %9973 = vst [vmem:[#allocation169_spill] sm:$0xff] %v7614_v55  ;;  %v7618_v17 = vpop.permute.xlu1 %2593  ;;  %v2245_v55 = vmul.f32 1.442695, %v2001_v59  ;;  %v2255_v59 = vmul.f32 1.442695, %v2006_v47  ;;  %v9993_v47 = vld [vmem:[#allocation190_spill] sm:$0xff] }
 0x627   :  { %4797 = vpow2.f32 %v2245_v55  ;;  %v9991_v55 = vld [vmem:[#allocation180_spill] sm:$0xff] }
 0x628   :  { %4799 = vpow2.f32 %v2255_v59  ;;  %v2009_v16 = vsub.f32 %v9991_v55, %v7461_v22 }
 0x62a   :  { %2734 = vperm.xlu0 %4552, %v7620_v19   ;;  %v7638_v19 = vpop.eup %4793 }
 0x62b   :  { %2728 = vperm.xlu1 %4553, %v7622_v27   ;;  %9983 = vst [vmem:[#allocation51_spill] sm:$0xff] %v7638_v19  ;;  %v2004_v27 = vsub.f32 %v9986_v10, %v7461_v22  ;;  %v7652_v6 = vpop.eup %4795  ;;  %v2007_v10 = vsub.f32 %v9993_v47, %v7461_v22 }
 0x62c   :  { %v7628_v25 = vpop.permute.xlu0 %2608  ;;  %9989 = vst [vmem:[#allocation150_spill] sm:$0xff] %v7652_v6 }
 0x62d   :  { %9978 = vst [vmem:[#allocation174_spill] sm:$0xff] %v7628_v25  ;;  %v7632_v48 = vpop.permute.xlu1 %2602  ;;  %v7650_v25 = vpop.permute.xlu2 %2650 }
 0x62e   :  { %9980 = vst [vmem:[#allocation50_spill] sm:$0xff] %v7632_v48  ;;  %v2251_v48 = vmul.f32 1.442695, %v2004_v27  ;;  %v2261_v27 = vmul.f32 1.442695, %v2009_v16  ;;  %v10000_v16 = vld [vmem:[#allocation194_spill] sm:$0xff] }
 0x62f   :  { %9988 = vst [vmem:[#allocation54_spill] sm:$0xff] %v7650_v25  ;;  %v2010_v47 = vsub.f32 %v10000_v16, %v7461_v22 }
 0x630   :  { %4801 = vpow2.f32 %v2251_v48  ;;  %v9998_v48 = vld [vmem:[#allocation185_spill] sm:$0xff] }
 0x631   :  { %4803 = vpow2.f32 %v2261_v27  ;;  %v2012_v59 = vsub.f32 %v9998_v48, %v7461_v22 }
 0x632   :  { %2743 = vperm.xlu0 %4552, %v7636_v34   ;;  %v7654_v34 = vpop.eup %4797 }
 0x633   :  { %2737 = vperm.xlu1 %4553, %v7638_v19   ;;  %9990 = vst [vmem:[#allocation188_spill] sm:$0xff] %v7654_v34 }
 0x634   :  { %v7644_v44 = vpop.permute.xlu0 %2617 }
 0x635   :  { %9985 = vst [vmem:[#allocation147_spill] sm:$0xff] %v7644_v44  ;;  %v7648_v50 = vpop.permute.xlu1 %2611  ;;  %v2257_v44 = vmul.f32 1.442695, %v2007_v10 }
 0x636   :  { %9987 = vst [vmem:[#allocation184_spill] sm:$0xff] %v7648_v50  ;;  %v7666_v50 = vpop.eup %4799 }
 0x637   :  { %9995 = vst [vmem:[#allocation192_spill] sm:$0xff] %v7666_v50  ;;  %v7668_v25 = vpop.eup %4801  ;;  %4805 = vpow2.f32 %v2257_v44 }
 0x638   :  { %9996 = vst [vmem:[#allocation149_spill] sm:$0xff] %v7668_v25 }
 0x63a   :  { %2752 = vperm.xlu0 %4552, %v7652_v6   ;;  %v7670_v6 = vpop.permute.xlu2 %2659 }
 0x63b   :  { %2746 = vperm.xlu1 %4553, %v7654_v34   ;;  %9997 = vst [vmem:[#allocation159_spill] sm:$0xff] %v7670_v6  ;;  %v2267_v34 = vmul.f32 1.442695, %v2012_v59 }
 0x63c   :  { %v7660_v8 = vpop.permute.xlu0 %2626 }
 0x63d   :  { %9992 = vst [vmem:[#allocation56_spill] sm:$0xff] %v7660_v8  ;;  %v7664_v19 = vpop.permute.xlu1 %2620  ;;  %v2263_v8 = vmul.f32 1.442695, %v2010_v47  ;;  %4807 = vpow2.f32 %v2267_v34 }
 0x63e   :  { %9994 = vst [vmem:[#allocation154_spill] sm:$0xff] %v7664_v19  ;;  %v7682_v19 = vpop.eup %4803 }
 0x63f   :  { %10002 = vst [vmem:[#allocation163_spill] sm:$0xff] %v7682_v19  ;;  %v7684_v6 = vpop.eup %4805  ;;  %4809 = vpow2.f32 %v2263_v8 }
 0x640   :  { %10003 = vst [vmem:[#allocation156_spill] sm:$0xff] %v7684_v6 }
 0x642   :  { %2761 = vperm.xlu0 %4552, %v7666_v50   ;;  %v7688_v27 = vpop.permute.xlu2 %2668 }
 0x643   :  { %2755 = vperm.xlu1 %4553, %v7668_v25   ;;  %10004 = vst [vmem:[#allocation167_spill] sm:$0xff] %v7688_v27  ;;  %v7694_v22 = vpop.eup %4807 }
 0x644   :  { %v7676_v55 = vpop.permute.xlu0 %2635  ;;  %10005 = vst [vmem:[#allocation161_spill] sm:$0xff] %v7694_v22 }
 0x645   :  { %9999 = vst [vmem:[#allocation196_spill] sm:$0xff] %v7676_v55  ;;  %v7680_v10 = vpop.permute.xlu1 %2629  ;;  %v7696_v59 = vpop.eup %4809 }
 0x646   :  { %10001 = vst [vmem:[#allocation63_spill] sm:$0xff] %v7680_v10 }
 0x647   :  { %10006 = vst [vmem:[#allocation172_spill] sm:$0xff] %v7696_v59 }
 0x64a   :  { %2770 = vperm.xlu0 %4552, %v7682_v19   ;;  %v7704_v34 = vpop.permute.xlu2 %2677 }
 0x64b   :  { %2764 = vperm.xlu1 %4553, %v7684_v6   ;;  %10008 = vst [vmem:[#allocation177_spill] sm:$0xff] %v7704_v34 }
 0x64c   :  { %v7690_v48 = vpop.permute.xlu0 %2644 }
 0x64d   :  { %v7692_v44 = vpop.permute.xlu1 %2638 }
 0x652   :  { %2779 = vperm.xlu0 %4552, %v7694_v22   ;;  %v7710_v8 = vpop.permute.xlu2 %2686 }
 0x653   :  { %2773 = vperm.xlu1 %4553, %v7696_v59  }
 0x654   :  { %v7700_v16 = vpop.permute.xlu0 %2653 }
 0x655   :  { %10007 = vst [vmem:[#allocation165_spill] sm:$0xff] %v7700_v16  ;;  %v7702_v47 = vpop.permute.xlu1 %2647 }
 0x65a   :  { %v7716_v55 = vpop.permute.xlu2 %2695 }
 0x65c   :  { %v7706_v6 = vpop.permute.xlu0 %2662 }
 0x65d   :  { %10009 = vst [vmem:[#allocation170_spill] sm:$0xff] %v7706_v6  ;;  %v7708_v19 = vpop.permute.xlu1 %2656  ;;  %v2813_v6 = vperm.slane %v7291_v37, %v6407_v28 }
 0x65e   :  { %10010 = vst [vmem:[#allocation183_spill] sm:$0xff] %v7708_v19 }
 0x662   :  { %v7722_v10 = vpop.permute.xlu2 %2704 }
 0x663   :  { %10015 = vst [vmem:[#allocation185_spill] sm:$0xff] %v7722_v10 }
 0x664   :  { %v7712_v25 = vpop.permute.xlu0 %2671 }
 0x665   :  { %10011 = vst [vmem:[#allocation175_spill] sm:$0xff] %v7712_v25  ;;  %v7714_v50 = vpop.permute.xlu1 %2665  ;;  %v2782_v25 = vperm.slane %v7115_v33, %v6407_v28  ;;  %v2815_v33 = vperm.slane %v7098_v29, %v6410_v12  ;;  %v2790_v29 = vperm.slane %v7160_v41, %v6440_v62  ;;  %v2843_v41 = vperm.slane %v7397_v52, %v6398_v9 }
 0x666   :  { %10012 = vst [vmem:[#allocation187_spill] sm:$0xff] %v7714_v50  ;;  %v2781_v50 = vperm.slane %v7119_v35, %v6398_v9  ;;  %v2786_v35 = vperm.slane %v7139_v18, %v6425_v61  ;;  %v2796_v52 = vperm.slane %v7206_v45, %v6465_v40 }
 0x668   :  { %v2783_v19 = vsel %vm1576_vm0, %v2782_v25, %v2781_v50 }
 0x66c   :  { %v7718_v22 = vpop.permute.xlu0 %2680 }
 0x66d   :  { %10013 = vst [vmem:[#allocation180_spill] sm:$0xff] %v7718_v22  ;;  %v7720_v59 = vpop.permute.xlu1 %2674  ;;  %v2784_v22 = vperm.slane %v7143_v3, %v6410_v12  ;;  %v2788_v3 = vperm.slane %v7164_v23, %v6431_v31 }
 0x66e   :  { %10014 = vst [vmem:[#allocation190_spill] sm:$0xff] %v7720_v59  ;;  %v2812_v59 = vperm.slane %v7266_v30, %v6398_v9 }
 0x670   :  { %v2814_v37 = vsel %vm1576_vm0, %v2813_v6, %v2812_v59  ;;  %v2817_v6 = vperm.slane %v7287_v36, %v6425_v61  ;;  %v2821_v36 = vperm.slane %v7124_v54, %v6440_v62 }
 0x671   :  { %v2816_v30 = vsel %vm1580_vm1, %v2815_v33, %v2814_v37  ;;  %v2844_v37 = vperm.slane %v7230_v21, %v6407_v28  ;;  %v2794_v33 = vperm.slane %v7181_v39, %v6462_v49  ;;  %v2848_v39 = vperm.slane %v7418_v13, %v6425_v61 }
 0x672   :  { %v2800_v13 = vperm.slane %v7225_v58, %v6505_v11 }
 0x673   :  { %v2845_v21 = vsel %vm1576_vm0, %v2844_v37, %v2843_v41 }
 0x674   :  { %v7724_v27 = vpop.permute.xlu0 %2689 }
 0x675   :  { %v7726_v34 = vpop.permute.xlu1 %2683 }
 0x676   :  { %10016 = vst [vmem:[#allocation194_spill] sm:$0xff] %v7726_v34  ;;  %v7742_v34 = vpop.permute.xlu2 %2713 }
 0x677   :  { %10018 = vst [vmem:[#allocation208_spill] sm:$0xff] %v7742_v34  ;;  %v2819_v34 = vperm.slane %v7312_v14, %v6431_v31 }
 0x67c   :  { %v7734_v16 = vpop.permute.xlu0 %2698 }
 0x67d   :  { %10017 = vst [vmem:[#allocation207_spill] sm:$0xff] %v7734_v16  ;;  %v7740_v10 = vpop.permute.xlu1 %2692  ;;  %v2785_v16 = vsel %vm1580_vm1, %v2784_v22, %v2783_v19  ;;  %v2818_v19 = vsel %vm1584_vm2, %v2817_v6, %v2816_v30  ;;  %v2792_v22 = vperm.slane %v7185_v56, %v6448_v57 }
 0x67e   :  { %v2787_v25 = vsel %vm1584_vm2, %v2786_v35, %v2785_v16  ;;  %v2820_v14 = vsel %vm9359_vm3, %v2819_v34, %v2818_v19  ;;  %v7775_v16 = vpop.permute.xlu2 %2722  ;;  %v2825_v34 = vperm.slane %v7331_v5, %v6462_v49  ;;  %v2823_v35 = vperm.slane %v7308_v53, %v6448_v57 }
 0x67f   :  { %v2789_v18 = vsel %vm9359_vm3, %v2788_v3, %v2787_v25  ;;  %v2822_v56 = vsel %vm9358_vm4, %v2821_v36, %v2820_v14  ;;  %v2846_v3 = vperm.slane %v7393_v60, %v6410_v12  ;;  %v2798_v5 = vperm.slane %v7202_v26, %v6493_v1 }
 0x680   :  { %v2791_v59 = vsel %vm9358_vm4, %v2790_v29, %v2789_v18  ;;  %v2824_v30 = vsel %vm1596_vm5, %v2823_v35, %v2822_v56  ;;  %v2827_v60 = vperm.slane %v7147_v24, %v6465_v40  ;;  %v2850_v26 = vperm.slane %v7253_v32, %v6431_v31  ;;  %v10025_v35 = vld [vmem:[#allocation52_spill] sm:$0xff] }
 0x681   :  { %v2793_v54 = vsel %vm1596_vm5, %v2792_v22, %v2791_v59  ;;  %v2826_v29 = vsel %vm1600_vm6, %v2825_v34, %v2824_v30  ;;  %v2847_v18 = vsel %vm1580_vm1, %v2846_v3, %v2845_v21  ;;  %v2831_v14 = vperm.slane %v7355_v4, %v6505_v11  ;;  %v10026_v21 = vld [vmem:[#allocation67_spill] sm:$0xff] }
 0x682   :  { %v2795_v45 = vsel %vm1600_vm6, %v2794_v33, %v2793_v54  ;;  %v2849_v19 = vsel %vm1584_vm2, %v2848_v39, %v2847_v18  ;;  %v2828_v22 = vsel %vm1604_vm7, %v2827_v60, %v2826_v29  ;;  %v2829_v24 = vperm.slane %v7327_v43, %v6493_v1  ;;  %v10030_v29 = vld [vmem:[#allocation80_spill] sm:$0xff] }
 0x683   :  { %v2797_v25 = vsel %vm1604_vm7, %v2796_v52, %v2795_v45  ;;  %v2851_v58 = vsel %vm9359_vm3, %v2850_v26, %v2849_v19  ;;  %v2854_v59 = vperm.slane %v7437_v46, %v6448_v57  ;;  %v2802_v32 = vperm.slane %v7075_v38, %v6509_v0  ;;  %v10029_v45 = vld [vmem:[#allocation22_spill] sm:$0xff]  ;;  %v10033_v19 = vld [vmem:[#allocation36_spill] sm:$0xff]  ;;  %v10034_v26 = vld [vmem:[#allocation55_spill] sm:$0xff] }
 0x684   :  { %v7761_v50 = vpop.permute.xlu0 %2707  ;;  %v2799_v36 = vsel %vm10019_vm11, %v2798_v5, %v2797_v25  ;;  %v2830_v33 = vsel %vm10022_vm8, %v2829_v24, %v2828_v22  ;;  %v2852_v4 = vperm.slane %v7414_v51, %v6440_v62  ;;  %vm10023_vm11 = vmmov %vm10020_vm15  ;;  %v2833_v34 = vperm.slane %v7173_v63, %v6509_v0  ;;  %v10028_v63 = vld [vmem:[#allocation82_spill] sm:$0xff]  ;;  %v10032_v25 = vld [vmem:[#allocation76_spill] sm:$0xff] }
 0x685   :  { %v7765_v23 = vpop.permute.xlu1 %2701  ;;  %v2801_v41 = vsel %vm10020_vm15, %v2800_v13, %v2799_v36  ;;  %v2832_v56 = vsel %vm10023_vm11, %v2831_v14, %v2830_v33  ;;  %vm10024_vm15 = vcmask 786112   ;;  %v2806_v46 = vperm.slane %v7249_v7, %v6545_v20  ;;  %v10035_v36 = vld [vmem:[#allocation101_spill] sm:$0xff]  ;;  %v10038_v33 = vld [vmem:[#allocation200_spill] sm:$0xff] }
 0x686   :  { %v7822_v37 = vpop.permute.xlu2 %2731  ;;  %v2803_v54 = vsel %vm10024_vm15, %v2802_v32, %v2801_v41  ;;  %v2853_v52 = vsel %vm9358_vm4, %v2852_v4, %v2851_v58  ;;  %v2804_v3 = vperm.slane %v10025_v35, %v6531_v15  ;;  %v2856_v39 = vperm.slane %v10026_v21, %v6462_v49  ;;  %vm10027_vm8 = vmmov %vm10024_vm15  ;;  %v10037_v58 = vld [vmem:[#allocation94_spill] sm:$0xff] }
 0x687   :  { %10021 = vst [vmem:[#allocation209_spill] sm:$0xff] %v7822_v37  ;;  %v2855_v51 = vsel %vm1596_vm5, %v2854_v59, %v2853_v52  ;;  %v2834_v30 = vsel %vm10027_vm8, %v2833_v34, %v2832_v56  ;;  %v2837_v5 = vperm.slane %v10028_v63, %v6545_v20  ;;  %v2808_v7 = vperm.slane %v10030_v29, %v10029_v45  ;;  %v10039_v52 = vld [vmem:[#allocation92_spill] sm:$0xff]  ;;  %v10043_v29 = vld [vmem:[#allocation30_spill] sm:$0xff] }
 0x688   :  { %vm10031_vm11 = vcmask 851712   ;;  %v2835_v13 = vperm.slane %v10032_v25, %v6531_v15  ;;  %v2810_v22 = vperm.slane %v10034_v26, %v10033_v19  ;;  %v2857_v14 = vsel %vm1600_vm6, %v2856_v39, %v2855_v51  ;;  %v10042_v63 = vld [vmem:[#allocation72_spill] sm:$0xff]  ;;  %v10045_v26 = vld [vmem:[#allocation119_spill] sm:$0xff] }
 0x689   :  { %v2805_v60 = vsel %vm10031_vm11, %v2804_v3, %v2803_v54  ;;  %v2860_v24 = vperm.slane %v10035_v36, %v6493_v1  ;;  %vm10036_vm15 = vmmov %vm10031_vm11  ;;  %v2858_v59 = vperm.slane %v10037_v58, %v6465_v40  ;;  %v2839_v4 = vperm.slane %v10038_v33, %v10029_v45  ;;  %v10040_v3 = vld [vmem:[#allocation66_spill] sm:$0xff] }
 0x68a   :  { %v2807_v18 = vsel %vm1624_vm12, %v2806_v46, %v2805_v60  ;;  %v2836_v41 = vsel %vm10036_vm15, %v2835_v13, %v2834_v30  ;;  %v2862_v35 = vperm.slane %v10039_v52, %v6505_v11  ;;  %v2868_v51 = vperm.slane %v10040_v3, %v6545_v20  ;;  %v10044_v13 = vld [vmem:[#allocation84_spill] sm:$0xff]  ;;  %v10051_v52 = vld [vmem:[#allocation114_spill] sm:$0xff]  ;;  %v10052_v3 = vld [vmem:[#allocation93_spill] sm:$0xff] }
 0x68b   :  { %v2838_v32 = vsel %vm1624_vm12, %v2837_v5, %v2836_v41  ;;  %v2809_v56 = vsel %vm1628_vm13, %v2808_v7, %v2807_v18  ;;  %v2859_v34 = vsel %vm1604_vm7, %v2858_v59, %v2857_v14  ;;  %vm10041_vm8 = vcmask 654912   ;;  %v10046_v14 = vld [vmem:[#allocation75_spill] sm:$0xff]  ;;  %v10047_v41 = vld [vmem:[#allocation96_spill] sm:$0xff] }
 0x68c   :  { %v7795_v6 = vpop.permute.xlu0 %2716  ;;  %v7876_v21 = vsel %vm1632_vm14, %v2810_v22, %v2809_v56  ;;  %v2861_v39 = vsel %vm10041_vm8, %v2860_v24, %v2859_v34  ;;  %v2874_v5 = vperm.slane %v10042_v63, %v6398_v9  ;;  %v2879_v7 = vperm.slane %v10043_v29, %v6425_v61  ;;  %v10050_v56 = vld [vmem:[#allocation132_spill] sm:$0xff] }
 0x68d   :  { %v7801_v53 = vpop.permute.xlu1 %2710  ;;  %v2840_v60 = vsel %vm1628_vm13, %v2839_v4, %v2838_v32  ;;  %v2906_v25 = vperm.slane %v7618_v17, %v6407_v28  ;;  %v2841_v36 = vperm.slane %v10046_v14, %v10033_v19  ;;  %v2875_v24 = vperm.slane %v7499_v42, %v6407_v28  ;;  %v10049_v32 = vld [vmem:[#allocation23_spill] sm:$0xff]  ;;  %v10054_v29 = vld [vmem:[#allocation108_spill] sm:$0xff] }
 0x68e   :  { %v7867_v54 = vpop.permute.xlu2 %2740  ;;  %vm10048_vm11 = vcmask 720512   ;;  %v2877_v17 = vperm.slane %v10049_v32, %v6410_v12  ;;  %v2905_v33 = vperm.slane %v7598_v2, %v6398_v9  ;;  %v2908_v42 = vperm.slane %v10051_v52, %v6410_v12 }
 0x68f   :  { %v2863_v59 = vsel %vm10048_vm11, %v2862_v35, %v2861_v39  ;;  %v7904_v4 = vsel %vm1632_vm14, %v2841_v36, %v2840_v60  ;;  %v2864_v63 = vperm.slane %v10052_v3, %v6509_v0  ;;  %v10053_v35 = vld [vmem:[#allocation29_spill] sm:$0xff]  ;;  %v2866_v14 = vperm.slane %v10054_v29, %v6531_v15  ;;  %v10055_v36 = vld [vmem:[#allocation128_spill] sm:$0xff] }
 0x690   :  { %v2914_v39 = vperm.slane %v10053_v35, %v6440_v62  ;;  %v2907_v2 = vsel %vm1576_vm0, %v2906_v25, %v2905_v33  ;;  %v2936_v60 = vperm.slane %v7692_v44, %v6398_v9  ;;  %vm10056_vm15 = vcmask 786112   ;;  %v10057_v35 = vld [vmem:[#allocation43_spill] sm:$0xff]  ;;  %v10058_v29 = vld [vmem:[#allocation145_spill] sm:$0xff] }
 0x691   :  { %v2865_v34 = vsel %vm10056_vm15, %v2864_v63, %v2863_v59  ;;  %v2876_v52 = vsel %vm1576_vm0, %v2875_v24, %v2874_v5  ;;  %v2968_v3 = vperm.slane %v7724_v27, %v6407_v28  ;;  %v2937_v22 = vperm.slane %v10058_v29, %v6407_v28  ;;  %v10059_v27 = vld [vmem:[#allocation50_spill] sm:$0xff] }
 0x692   :  { %v2878_v25 = vsel %vm1580_vm1, %v2877_v17, %v2876_v52  ;;  %v2970_v44 = vperm.slane %v7740_v10, %v6410_v12  ;;  %v2967_v59 = vperm.slane %v7710_v8, %v6398_v9  ;;  %v2909_v5 = vsel %vm1580_vm1, %v2908_v42, %v2907_v2  ;;  %v10061_v17 = vld [vmem:[#allocation169_spill] sm:$0xff]  ;;  %v10062_v42 = vld [vmem:[#allocation99_spill] sm:$0xff] }
 0x693   :  { %v2912_v24 = vperm.slane %v10059_v27, %v6431_v31  ;;  %v2939_v63 = vperm.slane %v7690_v48, %v6410_v12  ;;  %vm10060_vm8 = vcmask 851712   ;;  %v2910_v52 = vperm.slane %v10061_v17, %v6425_v61  ;;  %v10063_v48 = vld [vmem:[#allocation144_spill] sm:$0xff] }
 0x694   :  { %v7830_v43 = vpop.permute.xlu0 %2725  ;;  %v2867_v29 = vsel %vm10060_vm8, %v2866_v14, %v2865_v34  ;;  %v2938_v10 = vsel %vm1576_vm0, %v2937_v22, %v2936_v60  ;;  %v2941_v32 = vperm.slane %v7702_v47, %v6425_v61  ;;  %v2870_v2 = vperm.slane %v10062_v42, %v10029_v45  ;;  %v10064_v14 = vld [vmem:[#allocation137_spill] sm:$0xff] }
 0x695   :  { %v7838_v38 = vpop.permute.xlu1 %2719  ;;  %v2880_v27 = vsel %vm1584_vm2, %v2879_v7, %v2878_v25  ;;  %v2883_v18 = vperm.slane %v10063_v48, %v6440_v62  ;;  %v2969_v34 = vsel %vm1576_vm0, %v2968_v3, %v2967_v59  ;;  %v2881_v17 = vperm.slane %v10064_v14, %v6431_v31  ;;  %v10065_v3 = vld [vmem:[#allocation54_spill] sm:$0xff] }
 0x696   :  { %v7947_v8 = vpop.permute.xlu2 %2749  ;;  %v2911_v22 = vsel %vm1584_vm2, %v2910_v52, %v2909_v5  ;;  %v2971_v60 = vsel %vm1580_vm1, %v2970_v44, %v2969_v34  ;;  %v7961_v37 = vsel %vm1624_vm12, %v2868_v51, %v2867_v29  ;;  %v2972_v7 = vperm.slane %v7716_v55, %v6425_v61  ;;  %v10066_v51 = vld [vmem:[#allocation34_spill] sm:$0xff]  ;;  %v10067_v52 = vld [vmem:[#allocation184_spill] sm:$0xff] }
 0x697   :  { %v2913_v25 = vsel %vm9359_vm3, %v2912_v24, %v2911_v22  ;;  %v2940_v48 = vsel %vm1580_vm1, %v2939_v63, %v2938_v10  ;;  %v2943_v59 = vperm.slane %v10065_v3, %v6431_v31  ;;  %v2882_v14 = vsel %vm9359_vm3, %v2881_v17, %v2880_v27  ;;  %v10069_v17 = vld [vmem:[#allocation174_spill] sm:$0xff] }
 0x698   :  { %v2942_v5 = vsel %vm1584_vm2, %v2941_v32, %v2940_v48  ;;  %v2887_v44 = vperm.slane %v10066_v51, %v6462_v49  ;;  %v2884_v29 = vsel %vm9358_vm4, %v2883_v18, %v2882_v14  ;;  %v2973_v55 = vsel %vm1584_vm2, %v2972_v7, %v2971_v60  ;;  %v10068_v32 = vld [vmem:[#allocation207_spill] sm:$0xff]  ;;  %v10073_v14 = vld [vmem:[#allocation165_spill] sm:$0xff] }
 0x699   :  { %v2976_v24 = vperm.slane %v7765_v23, %v6440_v62  ;;  %v2915_v63 = vsel %vm9358_vm4, %v2914_v39, %v2913_v25  ;;  %v2918_v10 = vperm.slane %v10067_v52, %v6462_v49  ;;  %v2974_v27 = vperm.slane %v10068_v32, %v6431_v31  ;;  %v10070_v23 = vld [vmem:[#allocation183_spill] sm:$0xff] }
 0x69a   :  { %v2916_v22 = vperm.slane %v10069_v17, %v6448_v57  ;;  %v3001_v18 = vperm.slane %v7867_v54, %v6410_v12  ;;  %v2944_v60 = vsel %vm9359_vm3, %v2943_v59, %v2942_v5  ;;  %v2947_v39 = vperm.slane %v10070_v23, %v6448_v57 }
 0x69b   :  { %v10071_v25 = vperm.slane %v10044_v13, %v6448_v57  ;;  %v2975_v51 = vsel %vm9359_vm3, %v2974_v27, %v2973_v55  ;;  %v10074_v13 = vld [vmem:[#allocation185_spill] sm:$0xff]  ;;  %v10075_v55 = vld [vmem:[#allocation159_spill] sm:$0xff]  ;;  %vm10082_vm11 = vcmask 654912   ;;  %vm10087_vm8 = vcmask 720512  }
 0x69c   :  { %v7869_v46 = vpop.permute.xlu0 %2734  ;;  %v2917_v54 = vsel %vm1596_vm5, %v2916_v22, %v2915_v63  ;;  %v2977_v59 = vsel %vm9358_vm4, %v2976_v24, %v2975_v51  ;;  %v2978_v32 = vperm.slane %v10074_v13, %v6448_v57  ;;  %v2949_v63 = vperm.slane %v10075_v55, %v6462_v49  ;;  %v10076_v24 = vld [vmem:[#allocation125_spill] sm:$0xff]  ;;  %vm10085_vm15 = vmmov %vm10082_vm11 }
 0x69d   :  { %v7879_v30 = vpop.permute.xlu1 %2728  ;;  %v2886_v48 = vsel %vm1596_vm5, %v10071_v25, %v2884_v29  ;;  %v2919_v29 = vsel %vm1600_vm6, %v2918_v10, %v2917_v54  ;;  %v2893_v27 = vperm.slane %v10076_v24, %v6505_v11 }
 0x69e   :  { %v2759_v23 = vpop.permute.xlu2 %2758  ;;  %v2979_v10 = vsel %vm1596_vm5, %v2978_v32, %v2977_v59  ;;  %v10084_v32 = vld [vmem:[#allocation170_spill] sm:$0xff] }
 0x6a4   :  { %v7932_v33 = vpop.permute.xlu0 %2743 }
 0x6a5   :  { %v2738_v58 = vpop.permute.xlu1 %2737  ;;  %v3003_v25 = vperm.slane %v7932_v33, %v6425_v61  ;;  %v10077_v33 = vperm.slane %v10055_v36, %v6465_v40  ;;  %v10080_v36 = vld [vmem:[#allocation187_spill] sm:$0xff] }
 0x6a6   :  { %v2999_v47 = vperm.slane %v2738_v58, %v6407_v28  ;;  %v2998_v58 = vperm.slane %v7869_v46, %v6398_v9  ;;  %v2953_v54 = vperm.slane %v10080_v36, %v6493_v1 }
 0x6a8   :  { %v3000_v46 = vsel %vm1576_vm0, %v2999_v47, %v2998_v58  ;;  %v10072_v47 = vld [vmem:[#allocation148_spill] sm:$0xff]  ;;  %v2945_v58 = vperm.slane %v10073_v14, %v6440_v62  ;;  %v10078_v14 = vld [vmem:[#allocation154_spill] sm:$0xff] }
 0x6a9   :  { %v2889_v3 = vperm.slane %v10072_v47, %v6465_v40  ;;  %v3002_v5 = vsel %vm1580_vm1, %v3001_v18, %v3000_v46  ;;  %v2888_v46 = vsel %vm1600_vm6, %v2887_v44, %v2886_v48  ;;  %v2921_v47 = vsel %vm1604_vm7, %v10077_v33, %v2919_v29  ;;  %v10079_v48 = vld [vmem:[#allocation147_spill] sm:$0xff] }
 0x6aa   :  { %v2946_v17 = vsel %vm9358_vm4, %v2945_v58, %v2944_v60  ;;  %v2982_v60 = vperm.slane %v7801_v53, %v6465_v40  ;;  %v2924_v58 = vperm.slane %v10078_v14, %v6505_v11  ;;  %v2980_v44 = vperm.slane %v7761_v50, %v6462_v49  ;;  %v10083_v50 = vld [vmem:[#allocation155_spill] sm:$0xff] }
 0x6ab   :  { %v2948_v22 = vsel %vm1596_vm5, %v2947_v39, %v2946_v17  ;;  %v2890_v18 = vsel %vm1604_vm7, %v2889_v3, %v2888_v46  ;;  %v2922_v3 = vperm.slane %v10079_v48, %v6493_v1  ;;  %v3007_v53 = vperm.slane %v7947_v8, %v6440_v62 }
 0x6ac   :  { %v2753_v34 = vpop.permute.xlu0 %2752  ;;  %v2950_v51 = vsel %vm1600_vm6, %v2949_v63, %v2948_v22  ;;  %v2951_v29 = vperm.slane %v10084_v32, %v6465_v40  ;;  %v2981_v17 = vsel %vm1600_vm6, %v2980_v44, %v2979_v10  ;;  %v10088_v10 = vld [vmem:[#allocation139_spill] sm:$0xff]  ;;  %v10098_v32 = vld [vmem:[#allocation190_spill] sm:$0xff] }
 0x6ad   :  { %v2747_v7 = vpop.permute.xlu1 %2746  ;;  %v2983_v55 = vsel %vm1604_vm7, %v2982_v60, %v2981_v17  ;;  %v2932_v33 = vperm.slane %v10088_v10, %v10029_v45 }
 0x6ae   :  { %v3005_v52 = vperm.slane %v2747_v7, %v6431_v31  ;;  %v3004_v7 = vsel %vm1584_vm2, %v3003_v25, %v3002_v5  ;;  %v10081_v5 = vperm.slane %v10045_v26, %v6493_v1  ;;  %v2923_v25 = vsel %vm10085_vm15, %v2922_v3, %v2921_v47  ;;  %v10086_v26 = vld [vmem:[#allocation208_spill] sm:$0xff]  ;;  %v10089_v47 = vld [vmem:[#allocation167_spill] sm:$0xff] }
 0x6af   :  { %v2984_v46 = vperm.slane %v10086_v26, %v6493_v1  ;;  %v2925_v22 = vsel %vm10087_vm8, %v2924_v58, %v2923_v25  ;;  %v2955_v14 = vperm.slane %v10089_v47, %v6505_v11  ;;  %v2988_v58 = vperm.slane %v7838_v38, %v6509_v0  ;;  %v10102_v25 = vld [vmem:[#allocation175_spill] sm:$0xff] }
 0x6b0   :  { %v3006_v39 = vsel %vm9359_vm3, %v3005_v52, %v3004_v7  ;;  %v2892_v13 = vsel %vm10082_vm11, %v10081_v5, %v2890_v18  ;;  %v2895_v52 = vperm.slane %v10083_v50, %v6509_v0  ;;  %v2952_v18 = vsel %vm1604_vm7, %v2951_v29, %v2950_v51  ;;  %vm10090_vm11 = vmmov %vm10087_vm8 }
 0x6b1   :  { %v3008_v63 = vsel %vm9358_vm4, %v3007_v53, %v3006_v39  ;;  %v3009_v7 = vperm.slane %v2753_v34, %v6448_v57  ;;  %v2894_v60 = vsel %vm10090_vm11, %v2893_v27, %v2892_v13  ;;  %v2954_v44 = vsel %vm10085_vm15, %v2953_v54, %v2952_v18  ;;  %vm10092_vm3 = vmmov %vm10085_vm15  ;;  %v10093_v34 = vld [vmem:[#allocation56_spill] sm:$0xff]  ;;  %v2768_v27 = vpop.permute.xlu2 %2767  ;;  %v10096_v13 = vld [vmem:[#allocation63_spill] sm:$0xff] }
 0x6b2   :  { %vm10091_vm4 = vcmask 786112   ;;  %v2985_v48 = vsel %vm10092_vm3, %v2984_v46, %v2983_v55  ;;  %v2928_v53 = vperm.slane %v10093_v34, %v6531_v15  ;;  %v10094_v51 = vperm.slane %v10057_v35, %v6509_v0  ;;  %vm10097_vm3 = vmmov %vm10090_vm11  ;;  %v10099_v35 = vld [vmem:[#allocation131_spill] sm:$0xff] }
 0x6b3   :  { %v2896_v39 = vsel %vm10091_vm4, %v2895_v52, %v2894_v60  ;;  %v3010_v3 = vsel %vm1596_vm5, %v3009_v7, %v3008_v63  ;;  %vm10095_vm8 = vmmov %vm10091_vm4  ;;  %v2986_v54 = vperm.slane %v7795_v6, %v6505_v11  ;;  %v2930_v50 = vperm.slane %v10096_v13, %v6545_v20  ;;  %v10107_v60 = vld [vmem:[#allocation19_spill] sm:$0xff] }
 0x6b4   :  { %v2762_v59 = vpop.permute.xlu0 %2761  ;;  %v2927_v36 = vsel %vm10095_vm8, %v10094_v51, %v2925_v22  ;;  %v3013_v38 = vperm.slane %v2759_v23, %v6465_v40  ;;  %v2956_v52 = vsel %vm10097_vm3, %v2955_v14, %v2954_v44  ;;  %v2959_v29 = vperm.slane %v10098_v32, %v6531_v15  ;;  %vm10103_vm11 = vmmov %vm10097_vm3  ;;  %v10104_v23 = vld [vmem:[#allocation135_spill] sm:$0xff]  ;;  %v10114_v32 = vld [vmem:[#allocation180_spill] sm:$0xff] }
 0x6b5   :  { %v2756_v8 = vpop.permute.xlu1 %2755  ;;  %v2899_v17 = vperm.slane %v10099_v35, %v6545_v20  ;;  %vm10101_vm4 = vcmask 851712   ;;  %v2957_v55 = vperm.slane %v10102_v25, %v6509_v0  ;;  %v2987_v63 = vsel %vm10103_vm11, %v2986_v54, %v2985_v48  ;;  %vm10106_vm3 = vmmov %vm10095_vm8  ;;  %v10118_v25 = vld [vmem:[#allocation209_spill] sm:$0xff] }
 0x6b6   :  { %v3011_v24 = vperm.slane %v2756_v8, %v6462_v49  ;;  %v10100_v8 = vperm.slane %v10047_v41, %v6531_v15  ;;  %v2901_v26 = vperm.slane %v10104_v23, %v10029_v45  ;;  %vm10105_vm15 = vmmov %vm10101_vm4  ;;  %v2989_v22 = vsel %vm10095_vm8, %v2988_v58, %v2987_v63 }
 0x6b7   :  { %v2929_v46 = vsel %vm10105_vm15, %v2928_v53, %v2927_v36  ;;  %v2990_v41 = vperm.slane %v7775_v16, %v6531_v15  ;;  %v2958_v10 = vsel %vm10106_vm3, %v2957_v55, %v2956_v52  ;;  %v3015_v47 = vperm.slane %v2762_v59, %v6493_v1  ;;  %vm10109_vm11 = vmmov %vm10101_vm4 }
 0x6b8   :  { %v3012_v5 = vsel %vm1600_vm6, %v3011_v24, %v3010_v3  ;;  %v2898_v6 = vsel %vm10101_vm4, %v10100_v8, %v2896_v39  ;;  %v2872_v44 = vperm.slane %v10107_v60, %v10033_v19  ;;  %v2931_v48 = vsel %vm1624_vm12, %v2930_v50, %v2929_v46  ;;  %v10108_v3 = vld [vmem:[#allocation177_spill] sm:$0xff] }
 0x6b9   :  { %v3014_v18 = vsel %vm1604_vm7, %v3013_v38, %v3012_v5  ;;  %v2900_v39 = vsel %vm1624_vm12, %v2899_v17, %v2898_v6  ;;  %v2960_v58 = vsel %vm10101_vm4, %v2959_v29, %v2958_v10  ;;  %v2961_v34 = vperm.slane %v10108_v3, %v6545_v20  ;;  %v10112_v38 = vld [vmem:[#allocation194_spill] sm:$0xff]  ;;  %v2777_v17 = vpop.permute.xlu2 %2776 }
 0x6ba   :  { %v2991_v16 = vsel %vm10109_vm11, %v2990_v41, %v2989_v22  ;;  %v2994_v53 = vperm.slane %v7879_v30, %v10029_v45  ;;  %vm10110_vm15 = vcmask 654912   ;;  %v2871_v51 = vsel %vm1628_vm13, %v2870_v2, %v7961_v37  ;;  %v10113_v37 = vld [vmem:[#allocation196_spill] sm:$0xff] }
 0x6bb   :  { %v3016_v59 = vsel %vm10110_vm15, %v3015_v47, %v3014_v18  ;;  %v2902_v36 = vsel %vm1628_vm13, %v2901_v26, %v2900_v39  ;;  %v2992_v54 = vperm.slane %v7830_v43, %v6545_v20  ;;  %vm10111_vm8 = vcmask 720512  }
 0x6bc   :  { %v2771_v24 = vpop.permute.xlu0 %2770  ;;  %v2933_v13 = vsel %vm1628_vm13, %v2932_v33, %v2931_v48  ;;  %v3019_v50 = vperm.slane %v2768_v27, %v6509_v0  ;;  %v2962_v30 = vsel %vm1624_vm12, %v2961_v34, %v2960_v58  ;;  %v2965_v52 = vperm.slane %v10112_v38, %v10033_v19 }
 0x6bd   :  { %v2765_v7 = vpop.permute.xlu1 %2764  ;;  %v2873_v42 = vsel %vm1632_vm14, %v2872_v44, %v2871_v51  ;;  %v2934_v2 = vperm.slane %v10113_v37, %v10033_v19  ;;  %v2963_v29 = vperm.slane %v10114_v32, %v10029_v45  ;;  %v2993_v43 = vsel %vm1624_vm12, %v2992_v54, %v2991_v16 }
 0x6be   :  { %v3017_v14 = vperm.slane %v2765_v7, %v6505_v11  ;;  %vm10115_vm3 = vcmask 1041409   ;;  %v10116_v27 = vperm.slane %v10050_v56, %v10033_v19  ;;  %v2995_v8 = vsel %vm1628_vm13, %v2994_v53, %v2993_v43 }
 0x6bf   :  { %v3029_v33 = vsel %vm10115_vm3, %v7904_v4, %v7876_v21  ;;  %vm10117_vm4 = vcmask 786112   ;;  %v2996_v55 = vperm.slane %v10118_v25, %v10033_v19  ;;  %v2964_v63 = vsel %vm1628_vm13, %v2963_v29, %v2962_v30 }
 0x6c0   :  { %v3018_v5 = vsel %vm10111_vm8, %v3017_v14, %v3016_v59  ;;  %v2904_v35 = vsel %vm1632_vm14, %v10116_v27, %v2902_v36  ;;  %v3021_v23 = vperm.slane %v2771_v24, %v6531_v15  ;;  %v2935_v21 = vsel %vm1632_vm14, %v2934_v2, %v2933_v13 }
 0x6c1   :  { %v3020_v6 = vsel %vm10117_vm4, %v3019_v50, %v3018_v5  ;;  %vm10119_vm11 = vcmask 1042434   ;;  %v2966_v56 = vsel %vm1632_vm14, %v2965_v52, %v2964_v63  ;;  %v3025_v18 = vperm.slane %v2777_v17, %v10029_v45 }
 0x6c2   :  { %v3030_v4 = vsel %vm10119_vm11, %v2873_v42, %v3029_v33  ;;  %vm10120_vm15 = vcmask 851712   ;;  %v2997_v41 = vsel %vm1632_vm14, %v2996_v55, %v2995_v8  ;;  %vm10121_vm8 = vcmask 1045509   ;;  %v10124_v33 = vld [vmem:[#allocation39_spill] sm:$0xff]  ;;  %v10126_v8 = vld [vmem:[#allocation102_spill] sm:$0xff] }
 0x6c3   :  { %v3022_v7 = vsel %vm10120_vm15, %v3021_v23, %v3020_v6  ;;  %v3031_v10 = vsel %vm9361_vm9, %v2904_v35, %v3030_v4  ;;  %vm10122_vm3 = vcmask 1046534   ;;  %vm10123_vm4 = vcmask 1047559   ;;  %v10125_v35 = vld [vmem:[#allocation120_spill] sm:$0xff]  ;;  %v10127_v23 = vld [vmem:[#allocation129_spill] sm:$0xff]  ;;  %v10129_v4 = vld [vmem:[#allocation107_spill] sm:$0xff] }
 0x6c4   :  { %v2780_v26 = vpop.permute.xlu0 %2779  ;;  %v3032_v14 = vsel %vm9360_vm10, %v2935_v21, %v3031_v10 }
 0x6c5   :  { %v2774_v46 = vpop.permute.xlu1 %2773  ;;  %v3027_v24 = vperm.slane %v2780_v26, %v10033_v19  ;;  %v3033_v44 = vsel %vm10121_vm8, %v2966_v56, %v3032_v14 }
 0x6c6   :  { %v3023_v22 = vperm.slane %v2774_v46, %v6545_v20  ;;  %v3034_v48 = vsel %vm10122_vm3, %v2997_v41, %v3033_v44  ;;  %v10128_v46 = vld [vmem:[#allocation25_spill] sm:$0xff]  ;;  %v10131_v41 = vld [vmem:[#allocation42_spill] sm:$0xff] }
 0x6c8   :  { %v3024_v47 = vsel %vm1624_vm12, %v3023_v22, %v3022_v7 }
 0x6c9   :  { %v3026_v60 = vsel %vm1628_vm13, %v3025_v18, %v3024_v47  ;;  %v10130_v18 = vld [vmem:[#allocation118_spill] sm:$0xff] }
 0x6ca   :  { %v3028_v39 = vsel %vm1632_vm14, %v3027_v24, %v3026_v60  ;;  %v10132_v24 = vld [vmem:[#allocation122_spill] sm:$0xff]  ;;  %v10133_v60 = vld [vmem:[#allocation24_spill] sm:$0xff] }
 0x6cb   :  { %v3035_v58 = vsel %vm10123_vm4, %v3028_v39, %v3034_v48  ;;  %v10134_v39 = vld [vmem:[#allocation28_spill] sm:$0xff] }
 0x6cc   :  { %3037 = vadd.xlane.f32.xlu1 %v3035_v58  ;;  %v10135_v58 = vld [vmem:[#allocation110_spill] sm:$0xff] }
 0x73f   :  { %v8161_v3 = vpop.xlane.xlu1 %3037 }
 0x740   :  { %v3040_v34 = vperm.slane %v8161_v3, 0  ;;  %v3041_v16 = vperm.slane %v8161_v3, 1  ;;  %v3042_v22 = vperm.slane %v8161_v3, 2 }
 0x742   :  { %4811 = vrcp.f32 %v3040_v34  ;;  %v3067_v30 = vand.u32 2147483648, %v3040_v34  ;;  %vm3061_vm15 = vweird.f32 %v3040_v34  ;;  %v3065_v38 = vand.u32 2147483647, %v3040_v34 }
 0x743   :  { %4813 = vrcp.f32 %v3041_v16  ;;  %v3097_v29 = vand.u32 2147483648, %v3041_v16  ;;  %vm3091_vm10 = vweird.f32 %v3041_v16  ;;  %v3095_v43 = vand.u32 2147483647, %v3041_v16 }
 0x744   :  { %v3068_v37 = vor.u32 1.1754944e-38, %v3067_v30  ;;  %vm3066_vm3 = vcmp.eq.f32.partialorder %v3065_v38, 8.507059e+37  ;;  %4815 = vrcp.f32 %v3042_v22  ;;  %v3127_v38 = vand.u32 2147483648, %v3042_v22 }
 0x745   :  { %v3098_v55 = vor.u32 1.1754944e-38, %v3097_v29 }
 0x748   :  { %v4812_v53 = vpop.eup %4811 }
 0x749   :  { %v4814_v59 = vpop.eup %4813  ;;  %v3057_v51 = vmul.f32 %v4812_v53, %v3040_v34  ;;  %vm3062_vm11 = vweird.f32 %v4812_v53 }
 0x74a   :  { %v3087_v36 = vmul.f32 %v4814_v59, %v3041_v16  ;;  %vm3063_vm8 = vmor %vm3061_vm15, %vm3062_vm11  ;;  %vm3092_vm4 = vweird.f32 %v4814_v59  ;;  %vm3096_vm11 = vcmp.eq.f32.partialorder %v3095_v43, 8.507059e+37  ;;  %v4816_v14 = vpop.eup %4815  ;;  %v10141_v43 = vld [vmem:[#allocation140_spill] sm:$0xff] }
 0x74b   :  { %v3058_v54 = vsub.f32 1.0, %v3057_v51  ;;  %vm3093_vm9 = vmor %vm3091_vm10, %vm3092_vm4  ;;  %v3117_v16 = vmul.f32 %v4816_v14, %v3042_v22  ;;  %vm3121_vm10 = vweird.f32 %v3042_v22 }
 0x74c   :  { %v3088_v13 = vsub.f32 1.0, %v3087_v36  ;;  %v10137_v36 = vld [vmem:[#allocation45_spill] sm:$0xff] }
 0x74d   :  { %v3059_v5 = vmul.f32 %v4812_v53, %v3058_v54 }
 0x74e   :  { %v3089_v42 = vmul.f32 %v4814_v59, %v3088_v13 }
 0x74f   :  { %v3060_v50 = vadd.f32 %v4812_v53, %v3059_v5  ;;  %v10138_v5 = vld [vmem:[#allocation124_spill] sm:$0xff] }
 0x750   :  { %v3090_v32 = vadd.f32 %v4814_v59, %v3089_v42  ;;  %v10139_v42 = vld [vmem:[#allocation27_spill] sm:$0xff] }
 0x751   :  { %v3064_v52 = vsel %vm3063_vm8, %v4812_v53, %v3060_v50  ;;  %v3118_v53 = vsub.f32 1.0, %v3117_v16 }
 0x752   :  { %v8165_v2 = vsel %vm3066_vm3, %v3068_v37, %v3064_v52  ;;  %v3094_v25 = vsel %vm3093_vm9, %v4814_v59, %v3090_v32  ;;  %v10136_v59 = vld [vmem:[#allocation41_spill] sm:$0xff]  ;;  %vm3122_vm9 = vweird.f32 %v4816_v14  ;;  %v3125_v52 = vand.u32 2147483647, %v3042_v22 }
 0x753   :  { %v3081_v27 = vmul.f32 %v10124_v33, %v8165_v2  ;;  %v3071_v17 = vmul.f32 %v10125_v35, %v8165_v2  ;;  %v3070_v6 = vmul.f32 %v10126_v8, %v8165_v2  ;;  %v8173_v63 = vsel %vm3096_vm11, %v3098_v55, %v3094_v25  ;;  %vm3123_vm15 = vmor %vm3121_vm10, %vm3122_vm9  ;;  %v10140_v32 = vld [vmem:[#allocation133_spill] sm:$0xff]  ;;  %v10142_v8 = vld [vmem:[#allocation112_spill] sm:$0xff] }
 0x754   :  { %v3102_v26 = vmul.f32 %v10127_v23, %v8173_v63  ;;  %v3073_v21 = vmul.f32 %v10128_v46, %v8165_v2  ;;  %v3072_v56 = vmul.f32 %v10129_v4, %v8165_v2  ;;  %v3105_v7 = vmul.f32 %v10130_v18, %v8173_v63  ;;  %v10143_v25 = vld [vmem:[#allocation31_spill] sm:$0xff]  ;;  %v10144_v23 = vld [vmem:[#allocation44_spill] sm:$0xff] }
 0x755   :  { %3458 = vperm.xlu1 %4553, %v3081_v27   ;;  %3428 = vperm.xlu0 %4552, %v3071_v17   ;;  %v3075_v10 = vmul.f32 %v10131_v41, %v8165_v2  ;;  %v3074_v47 = vmul.f32 %v10132_v24, %v8165_v2  ;;  %v3108_v44 = vmul.f32 %v10133_v60, %v8173_v63  ;;  %v3128_v35 = vor.u32 1.1754944e-38, %v3127_v38  ;;  %v10147_v18 = vld [vmem:[#allocation143_spill] sm:$0xff]  ;;  %v10150_v60 = vld [vmem:[#allocation20_spill] sm:$0xff] }
 0x756   :  { %3425 = vperm.xlu2 %4554, %v3070_v6   ;;  %v3077_v48 = vmul.f32 %v10134_v39, %v8165_v2  ;;  %v3076_v34 = vmul.f32 %v10135_v58, %v8165_v2  ;;  %v3111_v51 = vmul.f32 %v10136_v59, %v8173_v63  ;;  %v3079_v54 = vmul.f32 %v10137_v36, %v8165_v2 }
 0x757   :  { %v3078_v13 = vmul.f32 %v10138_v5, %v8165_v2  ;;  %v3119_v50 = vmul.f32 %v4816_v14, %v3118_v53  ;;  %v3114_v37 = vmul.f32 %v10139_v42, %v8173_v63  ;;  %v3082_v29 = vmul.f32 %v10140_v32, %v8165_v2  ;;  %v10153_v53 = vld [vmem:[#allocation204_spill] sm:$0xff] }
 0x758   :  { %v3080_v33 = vmul.f32 %v10141_v43, %v8165_v2  ;;  %vm3126_vm8 = vcmp.eq.f32.partialorder %v3125_v52, 8.507059e+37  ;;  %v3084_v55 = vmul.f32 %v10143_v25, %v8165_v2  ;;  %v3043_v46 = vperm.slane %v8161_v3, 3  ;;  %v10156_v52 = vld [vmem:[#allocation191_spill] sm:$0xff] }
 0x759   :  { %v3120_v30 = vadd.f32 %v4816_v14, %v3119_v50  ;;  %v3104_v59 = vmul.f32 %v10153_v53, %v8173_v63  ;;  %v3107_v42 = vmul.f32 %v10156_v52, %v8173_v63  ;;  %v10157_v43 = vld [vmem:[#allocation203_spill] sm:$0xff]  ;;  %v4829_v52 = vld [vmem:[#allocation5 + $0x10] sm:$0xff] }
 0x75a   :  { %4817 = vrcp.f32 %v3043_v46  ;;  %vm3151_vm4 = vweird.f32 %v3043_v46  ;;  %v3155_v5 = vand.u32 2147483647, %v3043_v46 }
 0x75b   :  { %v3124_v27 = vsel %vm3123_vm15, %v4816_v14, %v3120_v30  ;;  %v10155_v30 = vld [vmem:[#allocation153_spill] sm:$0xff] }
 0x75c   :  { %v8206_v17 = vsel %vm3126_vm8, %v3128_v35, %v3124_v27  ;;  %v3109_v38 = vmul.f32 %v10155_v30, %v8173_v63  ;;  %vm3156_vm9 = vcmp.eq.f32.partialorder %v3155_v5, 8.507059e+37  ;;  %v10158_v27 = vld [vmem:[#allocation168_spill] sm:$0xff] }
 0x75d   :  { %3479 = vperm.xlu1 %4553, %v3102_v26   ;;  %3434 = vperm.xlu0 %4552, %v3073_v21   ;;  %v3131_v6 = vmul.f32 %v10142_v8, %v8206_v17  ;;  %v3083_v26 = vmul.f32 %v10144_v23, %v8165_v2  ;;  %v10145_v21 = vld [vmem:[#allocation138_spill] sm:$0xff]  ;;  %v3112_v35 = vmul.f32 %v10158_v27, %v8173_v63  ;;  %v10159_v8 = vld [vmem:[#allocation201_spill] sm:$0xff] }
 0x75e   :  { %3431 = vperm.xlu2 %4554, %v3072_v56   ;;  %v3134_v4 = vmul.f32 %v10145_v21, %v8206_v17  ;;  %v10146_v56 = vld [vmem:[#allocation136_spill] sm:$0xff]  ;;  %v10162_v21 = vld [vmem:[#allocation162_spill] sm:$0xff] }
 0x75f   :  { %v3100_v22 = vmul.f32 %v10146_v56, %v8173_v63  ;;  %v8254_v56 = vperm.slane %v8161_v3, 4  ;;  %v10170_v27 = vld [vmem:[#allocation202_spill] sm:$0xff] }
 0x760   :  { %v4818_v41 = vpop.eup %4817 }
 0x761   :  { %v3147_v39 = vmul.f32 %v4818_v41, %v3043_v46  ;;  %vm3152_vm3 = vweird.f32 %v4818_v41  ;;  %4819 = vrcp.f32 %v8254_v56  ;;  %vm3181_vm15 = vweird.f32 %v8254_v56 }
 0x762   :  { %vm3153_vm11 = vmor %vm3151_vm4, %vm3152_vm3  ;;  %vm10175_vm3 = vcmask 326912  }
 0x765   :  { %3488 = vperm.xlu1 %4553, %v3105_v7   ;;  %3440 = vperm.xlu0 %4552, %v3075_v10   ;;  %v3085_v7 = vmul.f32 %v10147_v18, %v8165_v2  ;;  %v10148_v10 = vld [vmem:[#allocation142_spill] sm:$0xff]  ;;  %v10163_v18 = vld [vmem:[#allocation205_spill] sm:$0xff] }
 0x766   :  { %3437 = vperm.xlu2 %4554, %v3074_v47   ;;  %v3137_v24 = vmul.f32 %v10148_v10, %v8206_v17  ;;  %v10149_v47 = vld [vmem:[#allocation193_spill] sm:$0xff]  ;;  %v10151_v2 = vld [vmem:[#allocation158_spill] sm:$0xff] }
 0x767   :  { %v3103_v14 = vmul.f32 %v10149_v47, %v8173_v63  ;;  %v3140_v58 = vmul.f32 %v10151_v2, %v8206_v17 }
 0x76d   :  { %3497 = vperm.xlu1 %4553, %v3108_v44   ;;  %3446 = vperm.xlu0 %4552, %v3077_v48   ;;  %v3101_v44 = vmul.f32 %v10150_v60, %v8173_v63  ;;  %v3148_v48 = vsub.f32 1.0, %v3147_v39  ;;  %v10166_v60 = vld [vmem:[#allocation151_spill] sm:$0xff] }
 0x76e   :  { %3443 = vperm.xlu2 %4554, %v3076_v34   ;;  %v10152_v34 = vld [vmem:[#allocation182_spill] sm:$0xff] }
 0x76f   :  { %v3106_v16 = vmul.f32 %v10152_v34, %v8173_v63 }
 0x775   :  { %3506 = vperm.xlu1 %4553, %v3111_v51   ;;  %3452 = vperm.xlu0 %4552, %v3079_v54   ;;  %v3149_v51 = vmul.f32 %v4818_v41, %v3148_v48  ;;  %v3157_v54 = vand.u32 2147483648, %v3043_v46  ;;  %v10167_v48 = vld [vmem:[#allocation195_spill] sm:$0xff] }
 0x776   :  { %3449 = vperm.xlu2 %4554, %v3078_v13   ;;  %v10154_v13 = vld [vmem:[#allocation171_spill] sm:$0xff]  ;;  %v3135_v2 = vmul.f32 %v10167_v48, %v8206_v17 }
 0x777   :  { %v3150_v36 = vadd.f32 %v4818_v41, %v3149_v51  ;;  %v3143_v50 = vmul.f32 %v10154_v13, %v8206_v17  ;;  %v3158_v32 = vor.u32 1.1754944e-38, %v3157_v54  ;;  %v4827_v54 = vld [vmem:[#allocation5] sm:$0xff]  ;;  %v10172_v48 = vld [vmem:[#allocation199_spill] sm:$0xff] }
 0x77d   :  { %3515 = vperm.xlu1 %4553, %v3114_v37   ;;  %3461 = vperm.xlu0 %4552, %v3082_v29   ;;  %v3154_v37 = vsel %vm3153_vm11, %v4818_v41, %v3150_v36  ;;  %v10164_v41 = vld [vmem:[#allocation186_spill] sm:$0xff]  ;;  %vm10176_vm11 = vcmask 392512  }
 0x77e   :  { %3455 = vperm.xlu2 %4554, %v3080_v33   ;;  %v8239_v29 = vsel %vm3156_vm9, %v3158_v32, %v3154_v37  ;;  %v3132_v10 = vmul.f32 %v10164_v41, %v8206_v17  ;;  %v3185_v41 = vand.u32 2147483647, %v8254_v56  ;;  %vm10184_vm9 = vcmask 654912  }
 0x77f   :  { %v3160_v33 = vmul.f32 %v10157_v43, %v8239_v29  ;;  %v10169_v43 = vld [vmem:[#allocation173_spill] sm:$0xff] }
 0x780   :  { %vm3186_vm4 = vcmp.eq.f32.partialorder %v3185_v41, 8.507059e+37  ;;  %v4834_v41 = vld [vmem:[#allocation5 + $0x38] sm:$0xff] }
 0x785   :  { %3524 = vperm.xlu1 %4553, %v3131_v6   ;;  %3467 = vperm.xlu0 %4552, %v3084_v55   ;;  %v3110_v6 = vmul.f32 %v10159_v8, %v8173_v63  ;;  %v10160_v55 = vld [vmem:[#allocation197_spill] sm:$0xff] }
 0x786   :  { %3464 = vperm.xlu2 %4554, %v3083_v26   ;;  %v3163_v23 = vmul.f32 %v10160_v55, %v8239_v29  ;;  %v10161_v26 = vld [vmem:[#allocation116_spill] sm:$0xff]  ;;  %v10171_v8 = vld [vmem:[#allocation105_spill] sm:$0xff] }
 0x787   :  { %v3115_v46 = vmul.f32 %v10161_v26, %v8173_v63 }
 0x78d   :  { %3533 = vperm.xlu1 %4553, %v3134_v4   ;;  %3473 = vperm.xlu0 %4552, %v3100_v22   ;;  %v3113_v4 = vmul.f32 %v10162_v21, %v8173_v63 }
 0x78e   :  { %3470 = vperm.xlu2 %4554, %v3085_v7   ;;  %v3166_v7 = vmul.f32 %v10163_v18, %v8239_v29  ;;  %v4830_v18 = vld [vmem:[#allocation5 + $0x18] sm:$0xff] }
 0x795   :  { %3542 = vperm.xlu1 %4553, %v3137_v24   ;;  %3482 = vperm.xlu0 %4552, %v3103_v14   ;;  %v10165_v24 = vld [vmem:[#allocation176_spill] sm:$0xff]  ;;  %v8263_v14 = vpop.eup %4819 }
 0x796   :  { %3476 = vperm.xlu2 %4554, %v3101_v44   ;;  %v3130_v47 = vmul.f32 %v10165_v24, %v8206_v17  ;;  %v3169_v44 = vmul.f32 %v10166_v60, %v8239_v29  ;;  %v3177_v39 = vmul.f32 %v8263_v14, %v8254_v56  ;;  %vm3182_vm10 = vweird.f32 %v8263_v14 }
 0x797   :  { %vm3183_vm8 = vmor %vm3181_vm15, %vm3182_vm10  ;;  %vm10185_vm10 = vcmask 720512   ;;  %vm10188_vm15 = vcmask 786112  }
 0x798   :  { %v3178_v53 = vsub.f32 1.0, %v3177_v39 }
 0x79a   :  { %v3179_v55 = vmul.f32 %v8263_v14, %v3178_v53  ;;  %v10174_v53 = vld [vmem:[#allocation181_spill] sm:$0xff] }
 0x79d   :  { %3551 = vperm.xlu1 %4553, %v3140_v58   ;;  %3491 = vperm.xlu0 %4552, %v3106_v16   ;;  %v10168_v58 = vld [vmem:[#allocation206_spill] sm:$0xff] }
 0x79e   :  { %3485 = vperm.xlu2 %4554, %v3104_v59   ;;  %v3133_v34 = vmul.f32 %v10168_v58, %v8206_v17  ;;  %v10173_v58 = vld [vmem:[#allocation127_spill] sm:$0xff] }
 0x7a5   :  { %3560 = vperm.xlu1 %4553, %v3143_v50   ;;  %3500 = vperm.xlu0 %4552, %v3109_v38   ;;  %v4828_v50 = vld [vmem:[#allocation5 + $0x8] sm:$0xff] }
 0x7a6   :  { %3494 = vperm.xlu2 %4554, %v3107_v42  }
 0x7ad   :  { %3569 = vperm.xlu1 %4553, %v3160_v33   ;;  %3509 = vperm.xlu0 %4552, %v3112_v35   ;;  %v3172_v33 = vmul.f32 %v10169_v43, %v8239_v29  ;;  %v3138_v35 = vmul.f32 %v10170_v27, %v8206_v17  ;;  %v10177_v27 = vld [vmem:[#allocation189_spill] sm:$0xff] }
 0x7ae   :  { %3503 = vperm.xlu2 %4554, %v3110_v6   ;;  %v3136_v6 = vmul.f32 %v10171_v8, %v8206_v17  ;;  %v10178_v8 = vld [vmem:[#allocation157_spill] sm:$0xff] }
 0x7b0   :  { %v3426_v25 = vpop.permute.xlu2 %3425 }
 0x7b1   :  { %v3808_v36 = vperm.slane %v3426_v25, %v6398_v9  ;;  %v4193_v5 = vmul.f32 %v4827_v54, %v3426_v25 }
 0x7b5   :  { %3578 = vperm.xlu1 %4553, %v3163_v23   ;;  %3518 = vperm.xlu0 %4552, %v3115_v46  }
 0x7b6   :  { %3512 = vperm.xlu2 %4554, %v3113_v4   ;;  %v3180_v4 = vadd.f32 %v8263_v14, %v3179_v55 }
 0x7b8   :  { %v3432_v22 = vpop.permute.xlu2 %3431 }
 0x7b9   :  { %v3811_v38 = vperm.slane %v3432_v22, %v6410_v12  ;;  %v4195_v42 = vmul.f32 %v4829_v52, %v3432_v22  ;;  %v4832_v52 = vld [vmem:[#allocation5 + $0x28] sm:$0xff] }
 0x7bd   :  { %3587 = vperm.xlu1 %4553, %v3166_v7   ;;  %3527 = vperm.xlu0 %4552, %v3132_v10   ;;  %v3187_v10 = vand.u32 2147483648, %v8254_v56  ;;  %v3184_v56 = vsel %vm3183_vm8, %v8263_v14, %v3180_v4  ;;  %v4833_v14 = vld [vmem:[#allocation5 + $0x30] sm:$0xff]  ;;  %vm10189_vm8 = vcmask 851712  }
 0x7be   :  { %3521 = vperm.xlu2 %4554, %v3130_v47   ;;  %v4831_v47 = vld [vmem:[#allocation5 + $0x20] sm:$0xff] }
 0x7c0   :  { %v3438_v63 = vpop.permute.xlu2 %3437 }
 0x7c1   :  { %v3815_v24 = vperm.slane %v3438_v63, %v6431_v31  ;;  %v4197_v60 = vmul.f32 %v4831_v47, %v3438_v63  ;;  %v3188_v63 = vor.u32 1.1754944e-38, %v3187_v10  ;;  %v4835_v47 = vld [vmem:[#allocation5 + $0x40] sm:$0xff] }
 0x7c5   :  { %3596 = vperm.xlu1 %4553, %v3169_v44   ;;  %3536 = vperm.xlu0 %4552, %v3135_v2   ;;  %v3175_v2 = vmul.f32 %v10172_v48, %v8239_v29  ;;  %v10180_v48 = vld [vmem:[#allocation198_spill] sm:$0xff] }
 0x7c6   :  { %3530 = vperm.xlu2 %4554, %v3133_v34   ;;  %v3141_v34 = vmul.f32 %v10173_v58, %v8206_v17  ;;  %v10181_v58 = vld [vmem:[#allocation100_spill] sm:$0xff] }
 0x7c7   :  { %v8273_v16 = vpop.permute.xlu1 %3458  ;;  %v3429_v59 = vpop.permute.xlu0 %3428 }
 0x7c8   :  { %v8275_v51 = vpop.permute.xlu2 %3443  ;;  %v3809_v13 = vperm.slane %v3429_v59, %v6407_v28  ;;  %v4194_v30 = vmul.f32 %v4828_v50, %v3429_v59  ;;  %v3139_v59 = vmul.f32 %v10174_v53, %v8206_v17  ;;  %v10182_v53 = vld [vmem:[#allocation178_spill] sm:$0xff] }
 0x7ca   :  { %v3810_v37 = vsel %vm1576_vm0, %v3809_v13, %v3808_v36  ;;  %v4321_v32 = vadd.f32 %v4194_v30, %v4193_v5  ;;  %v8311_v13 = vsel %vm3186_vm4, %v3188_v63, %v3184_v56 }
 0x7cb   :  { %v3812_v25 = vsel %vm1580_vm1, %v3811_v38, %v3810_v37  ;;  %v3819_v37 = vperm.slane %v8275_v51, %v6448_v57 }
 0x7cc   :  { %v4322_v23 = vadd.f32 %v4321_v32, %v4195_v42  ;;  %v4199_v32 = vmul.f32 %v4833_v14, %v8275_v51  ;;  %v8328_v51 = vperm.slane %v8161_v3, 5 }
 0x7cd   :  { %3605 = vperm.xlu1 %4553, %v3172_v33   ;;  %3545 = vperm.xlu0 %4552, %v3138_v35   ;;  %v3192_v35 = vmul.f32 %v10177_v27, %v8311_v13 }
 0x7ce   :  { %3539 = vperm.xlu2 %4554, %v3136_v6   ;;  %v3144_v6 = vmul.f32 %v10178_v8, %v8206_v17  ;;  %4821 = vrcp.f32 %v8328_v51  ;;  %vm3211_vm4 = vweird.f32 %v8328_v51 }
 0x7cf   :  { %v8289_v26 = vpop.permute.xlu1 %3479  ;;  %v3435_v46 = vpop.permute.xlu0 %3434 }
 0x7d0   :  { %v8291_v21 = vpop.permute.xlu2 %3449  ;;  %v3813_v22 = vperm.slane %v3435_v46, %v6425_v61  ;;  %v4196_v7 = vmul.f32 %v4830_v18, %v3435_v46 }
 0x7d2   :  { %v3814_v44 = vsel %vm1584_vm2, %v3813_v22, %v3812_v25  ;;  %v4323_v39 = vadd.f32 %v4322_v23, %v4196_v7  ;;  %v10179_v25 = vld [vmem:[#allocation166_spill] sm:$0xff] }
 0x7d3   :  { %v3816_v36 = vsel %vm10175_vm3, %v3815_v24, %v3814_v44  ;;  %v3142_v55 = vmul.f32 %v10179_v25, %v8206_v17  ;;  %v3823_v24 = vperm.slane %v8291_v21, %v6465_v40 }
 0x7d4   :  { %v4324_v54 = vadd.f32 %v4323_v39, %v4197_v60  ;;  %v4201_v60 = vmul.f32 %v4835_v47, %v8291_v21 }
 0x7d5   :  { %3614 = vperm.xlu1 %4553, %v3175_v2   ;;  %3554 = vperm.xlu0 %4552, %v3141_v34   ;;  %v3195_v2 = vmul.f32 %v10180_v48, %v8311_v13  ;;  %v3161_v34 = vmul.f32 %v10181_v58, %v8239_v29  ;;  %v4839_v48 = vld [vmem:[#allocation5 + $0x60] sm:$0xff] }
 0x7d6   :  { %3548 = vperm.xlu2 %4554, %v3139_v59   ;;  %v3145_v59 = vmul.f32 %v10182_v53, %v8206_v17  ;;  %v10183_v17 = vld [vmem:[#allocation47_spill] sm:$0xff] }
 0x7d7   :  { %v8309_v5 = vpop.permute.xlu1 %3488  ;;  %v3441_v50 = vpop.permute.xlu0 %3440  ;;  %v3198_v14 = vmul.f32 %v10183_v17, %v8311_v13 }
 0x7d8   :  { %v3456_v30 = vpop.permute.xlu2 %3455  ;;  %v3817_v38 = vperm.slane %v3441_v50, %v6440_v62  ;;  %v4198_v42 = vmul.f32 %v4832_v52, %v3441_v50 }
 0x7da   :  { %v3818_v43 = vsel %vm10176_vm11, %v3817_v38, %v3816_v36  ;;  %v4325_v33 = vadd.f32 %v4324_v54, %v4198_v42  ;;  %v4836_v38 = vld [vmem:[#allocation5 + $0x48] sm:$0xff]  ;;  %v8348_v42 = vpop.eup %4821 }
 0x7db   :  { %v3820_v23 = vsel %vm1596_vm5, %v3819_v37, %v3818_v43  ;;  %v3827_v37 = vperm.slane %v3456_v30, %v6505_v11  ;;  %v4837_v43 = vld [vmem:[#allocation5 + $0x50] sm:$0xff]  ;;  %vm3212_vm3 = vweird.f32 %v8348_v42 }
 0x7dc   :  { %v4326_v46 = vadd.f32 %v4325_v33, %v4199_v32  ;;  %v3829_v32 = vperm.slane %v8273_v16, %v6509_v0  ;;  %v4203_v33 = vmul.f32 %v4837_v43, %v3456_v30  ;;  %vm3213_vm11 = vmor %vm3211_vm4, %vm3212_vm3  ;;  %vm10209_vm3 = vcmask 720512  }
 0x7dd   :  { %3623 = vperm.xlu1 %4553, %v3192_v35   ;;  %3563 = vperm.xlu0 %4552, %v3144_v6   ;;  %v10186_v6 = vld [vmem:[#allocation70_spill] sm:$0xff]  ;;  %vm10212_vm4 = vcmask 786112  }
 0x7de   :  { %3557 = vperm.xlu2 %4554, %v3142_v55   ;;  %v3164_v25 = vmul.f32 %v10186_v6, %v8239_v29  ;;  %v10187_v55 = vld [vmem:[#allocation58_spill] sm:$0xff]  ;;  %v3215_v6 = vand.u32 2147483647, %v8328_v51 }
 0x7df   :  { %v8325_v4 = vpop.permute.xlu1 %3497  ;;  %v3447_v22 = vpop.permute.xlu0 %3446 }
 0x7e0   :  { %v3465_v18 = vpop.permute.xlu2 %3464  ;;  %v3821_v7 = vperm.slane %v3447_v22, %v6462_v49  ;;  %v4200_v10 = vmul.f32 %v4834_v41, %v3447_v22  ;;  %v4838_v22 = vld [vmem:[#allocation5 + $0x58] sm:$0xff] }
 0x7e1   :  { %v3833_v58 = vperm.slane %v3465_v18, %v6545_v20 }
 0x7e2   :  { %v3822_v44 = vsel %vm1600_vm6, %v3821_v7, %v3820_v23  ;;  %v4327_v39 = vadd.f32 %v4326_v46, %v4200_v10  ;;  %v3162_v23 = vmul.f32 %v10187_v55, %v8239_v29  ;;  %v3207_v46 = vmul.f32 %v8348_v42, %v8328_v51 }
 0x7e3   :  { %v3824_v36 = vsel %vm1604_vm7, %v3823_v24, %v3822_v44  ;;  %v4204_v7 = vmul.f32 %v4838_v22, %v8273_v16 }
 0x7e4   :  { %v4328_v56 = vadd.f32 %v4327_v39, %v4201_v60  ;;  %v3208_v44 = vsub.f32 1.0, %v3207_v46 }
 0x7e5   :  { %3632 = vperm.xlu1 %4553, %v3195_v2   ;;  %3572 = vperm.xlu0 %4552, %v3161_v34   ;;  %v4840_v34 = vld [vmem:[#allocation5 + $0x68] sm:$0xff] }
 0x7e6   :  { %3566 = vperm.xlu2 %4554, %v3145_v59   ;;  %v4206_v16 = vmul.f32 %v4840_v34, %v3465_v18  ;;  %v3209_v17 = vmul.f32 %v8348_v42, %v3208_v44 }
 0x7e7   :  { %v8343_v21 = vpop.permute.xlu1 %3506  ;;  %v3453_v54 = vpop.permute.xlu0 %3452 }
 0x7e8   :  { %v8345_v63 = vpop.permute.xlu2 %3470  ;;  %v3825_v50 = vperm.slane %v3453_v54, %v6493_v1  ;;  %v4202_v52 = vmul.f32 %v4836_v38, %v3453_v54  ;;  %v10191_v54 = vld [vmem:[#allocation60_spill] sm:$0xff]  ;;  %v10192_v38 = vld [vmem:[#allocation57_spill] sm:$0xff] }
 0x7e9   :  { %v3837_v55 = vperm.slane %v8345_v63, %v10033_v19 }
 0x7ea   :  { %v3826_v27 = vsel %vm10184_vm9, %v3825_v50, %v3824_v36  ;;  %v4329_v35 = vadd.f32 %v4328_v56, %v4202_v52  ;;  %v10190_v36 = vld [vmem:[#allocation77_spill] sm:$0xff]  ;;  %v3167_v50 = vmul.f32 %v10191_v54, %v8239_v29  ;;  %v3165_v52 = vmul.f32 %v10192_v38, %v8239_v29  ;;  %v4844_v54 = vld [vmem:[#allocation5 + $0x80] sm:$0xff] }
 0x7eb   :  { %v3828_v8 = vsel %vm10185_vm10, %v3827_v37, %v3826_v27  ;;  %v3201_v56 = vmul.f32 %v10190_v36, %v8311_v13  ;;  %vm3216_vm9 = vcmp.eq.f32.partialorder %v3215_v6, 8.507059e+37  ;;  %v4843_v36 = vld [vmem:[#allocation5 + $0x88] sm:$0xff]  ;;  %v3842_v38 = vperm.slane %v8289_v26, %v6410_v12 }
 0x7ec   :  { %v4330_v41 = vadd.f32 %v4329_v35, %v4203_v33  ;;  %v3830_v30 = vsel %vm10188_vm15, %v3829_v32, %v3828_v8  ;;  %v3210_v33 = vadd.f32 %v8348_v42, %v3209_v17  ;;  %v4841_v35 = vld [vmem:[#allocation5 + $0x70] sm:$0xff]  ;;  %vm10200_vm10 = vcmask 326912  }
 0x7ed   :  { %3641 = vperm.xlu1 %4553, %v3198_v14   ;;  %3581 = vperm.xlu0 %4552, %v3164_v25   ;;  %v3217_v25 = vand.u32 2147483648, %v8328_v51  ;;  %v10195_v51 = vld [vmem:[#allocation83_spill] sm:$0xff]  ;;  %vm10203_vm15 = vcmask 392512  }
 0x7ee   :  { %3575 = vperm.xlu2 %4554, %v3162_v23   ;;  %v4331_v24 = vadd.f32 %v4330_v41, %v4204_v7  ;;  %v4842_v23 = vld [vmem:[#allocation5 + $0x78] sm:$0xff]  ;;  %v10193_v41 = vld [vmem:[#allocation64_spill] sm:$0xff] }
 0x7ef   :  { %v8365_v10 = vpop.permute.xlu1 %3515  ;;  %v3462_v47 = vpop.permute.xlu0 %3461  ;;  %v4208_v46 = vmul.f32 %v4842_v23, %v8345_v63  ;;  %v3218_v63 = vor.u32 1.1754944e-38, %v3217_v25 }
 0x7f0   :  { %v3477_v60 = vpop.permute.xlu2 %3476  ;;  %v3831_v39 = vperm.slane %v3462_v47, %v6531_v15  ;;  %v4205_v2 = vmul.f32 %v4839_v48, %v3462_v47  ;;  %v10194_v47 = vld [vmem:[#allocation61_spill] sm:$0xff]  ;;  %v3214_v48 = vsel %vm3213_vm11, %v8348_v42, %v3210_v33 }
 0x7f1   :  { %v3170_v44 = vmul.f32 %v10194_v47, %v8239_v29  ;;  %v8406_v34 = vsel %vm3216_vm9, %v3218_v63, %v3214_v48  ;;  %v10199_v47 = vld [vmem:[#allocation89_spill] sm:$0xff] }
 0x7f2   :  { %v3832_v53 = vsel %vm10189_vm8, %v3831_v39, %v3830_v30  ;;  %v4332_v59 = vadd.f32 %v4331_v24, %v4205_v2  ;;  %v3204_v30 = vmul.f32 %v10193_v41, %v8311_v13  ;;  %v3168_v39 = vmul.f32 %v10195_v51, %v8239_v29 }
 0x7f3   :  { %v3834_v37 = vsel %vm1624_vm12, %v3833_v58, %v3832_v53  ;;  %v3848_v51 = vperm.slane %v8309_v5, %v6440_v62  ;;  %vm10208_vm8 = vcmask 654912  }
 0x7f4   :  { %v4333_v14 = vadd.f32 %v4332_v59, %v4206_v16  ;;  %v3840_v59 = vperm.slane %v3477_v60, %v6407_v28 }
 0x7f5   :  { %3650 = vperm.xlu1 %4553, %v3201_v56   ;;  %3590 = vperm.xlu0 %4552, %v3167_v50   ;;  %v4210_v56 = vmul.f32 %v4843_v36, %v3477_v60  ;;  %v10198_v60 = vld [vmem:[#allocation68_spill] sm:$0xff]  ;;  %v10201_v36 = vld [vmem:[#allocation71_spill] sm:$0xff] }
 0x7f6   :  { %3584 = vperm.xlu2 %4554, %v3165_v52   ;;  %v4845_v52 = vld [vmem:[#allocation5 + $0x90] sm:$0xff] }
 0x7f7   :  { %v8378_v18 = vpop.permute.xlu1 %3524  ;;  %v3468_v32 = vpop.permute.xlu0 %3467 }
 0x7f8   :  { %v8380_v43 = vpop.permute.xlu2 %3485  ;;  %v3835_v27 = vperm.slane %v3468_v32, %v10029_v45  ;;  %v4207_v8 = vmul.f32 %v4841_v35, %v3468_v32  ;;  %v10196_v32 = vld [vmem:[#allocation65_spill] sm:$0xff] }
 0x7f9   :  { %v3221_v33 = vmul.f32 %v10196_v32, %v8406_v34 }
 0x7fa   :  { %v3836_v22 = vsel %vm1628_vm13, %v3835_v27, %v3834_v37  ;;  %v4334_v7 = vadd.f32 %v4333_v14, %v4207_v8  ;;  %v4211_v37 = vmul.f32 %v4845_v52, %v8289_v26  ;;  %v10197_v27 = vld [vmem:[#allocation86_spill] sm:$0xff]  ;;  %v3171_v8 = vmul.f32 %v10198_v60, %v8239_v29  ;;  %v10204_v60 = vld [vmem:[#allocation73_spill] sm:$0xff] }
 0x7fb   :  { %v8395_v24 = vsel %vm1632_vm14, %v3837_v55, %v3836_v22  ;;  %v3173_v35 = vmul.f32 %v10197_v27, %v8239_v29  ;;  %v8424_v55 = vperm.slane %v8161_v3, 6 }
 0x7fc   :  { %v8402_v2 = vadd.f32 %v4334_v7, %v4208_v46  ;;  %v4846_v7 = vld [vmem:[#allocation5 + $0x98] sm:$0xff] }
 0x7fd   :  { %3659 = vperm.xlu1 %4553, %v3204_v30   ;;  %3599 = vperm.xlu0 %4552, %v3170_v44   ;;  %4823 = vrcp.f32 %v8424_v55  ;;  %v3846_v30 = vperm.slane %v8380_v43, %v6431_v31  ;;  %v3224_v44 = vmul.f32 %v10199_v47, %v8406_v34  ;;  %v10205_v47 = vld [vmem:[#allocation62_spill] sm:$0xff]  ;;  %vm3241_vm11 = vweird.f32 %v8424_v55 }
 0x7fe   :  { %3593 = vperm.xlu2 %4554, %v3168_v39   ;;  %v4847_v39 = vld [vmem:[#allocation5 + $0xa0] sm:$0xff] }
 0x7ff   :  { %v8404_v58 = vpop.permute.xlu1 %3533  ;;  %v3474_v16 = vpop.permute.xlu0 %3473  ;;  %v4213_v48 = vmul.f32 %v4847_v39, %v8380_v43 }
 0x800   :  { %v8408_v53 = vpop.permute.xlu2 %3494  ;;  %v3839_v42 = vperm.slane %v3474_v16, %v6398_v9  ;;  %v4209_v50 = vmul.f32 %v4844_v54, %v3474_v16 }
 0x802   :  { %v3841_v17 = vsel %vm1576_vm0, %v3840_v59, %v3839_v42  ;;  %v4342_v14 = vadd.f32 %v4210_v56, %v4209_v50  ;;  %v3190_v56 = vmul.f32 %v10201_v36, %v8311_v13  ;;  %v10202_v42 = vld [vmem:[#allocation59_spill] sm:$0xff]  ;;  %v4848_v50 = vld [vmem:[#allocation5 + $0xa8] sm:$0xff] }
 0x803   :  { %v3843_v6 = vsel %vm1580_vm1, %v3842_v38, %v3841_v17  ;;  %v3174_v54 = vmul.f32 %v10202_v42, %v8239_v29  ;;  %v4214_v38 = vmul.f32 %v4848_v50, %v8309_v5  ;;  %v4849_v29 = vld [vmem:[#allocation5 + $0xb0] sm:$0xff]  ;;  %v3852_v5 = vperm.slane %v8408_v53, %v6462_v49 }
 0x804   :  { %v4343_v25 = vadd.f32 %v4342_v14, %v4211_v37  ;;  %v8449_v14 = vpop.eup %4823  ;;  %v3871_v42 = vperm.slane %v8378_v18, %v6407_v28 }
 0x805   :  { %3668 = vperm.xlu1 %4553, %v3221_v33   ;;  %3608 = vperm.xlu0 %4552, %v3173_v35   ;;  %vm3242_vm9 = vweird.f32 %v8449_v14 }
 0x806   :  { %3602 = vperm.xlu2 %4554, %v3171_v8   ;;  %v3227_v8 = vmul.f32 %v10204_v60, %v8406_v34  ;;  %v4855_v60 = vld [vmem:[#allocation5 + $0xd0] sm:$0xff] }
 0x807   :  { %v8426_v26 = vpop.permute.xlu1 %3542  ;;  %v3483_v23 = vpop.permute.xlu0 %3482 }
 0x808   :  { %v8428_v46 = vpop.permute.xlu2 %3503  ;;  %v3844_v22 = vperm.slane %v3483_v23, %v6425_v61  ;;  %v4212_v41 = vmul.f32 %v4846_v7, %v3483_v23 }
 0x80a   :  { %v3845_v63 = vsel %vm1584_vm2, %v3844_v22, %v3843_v6  ;;  %v4344_v16 = vadd.f32 %v4343_v25, %v4212_v41  ;;  %v3854_v6 = vperm.slane %v8325_v4, %v6465_v40  ;;  %v4850_v25 = vld [vmem:[#allocation5 + $0xb8] sm:$0xff]  ;;  %v3237_v41 = vmul.f32 %v8449_v14, %v8424_v55 }
 0x80b   :  { %v3847_v59 = vsel %vm10200_vm10, %v3846_v30, %v3845_v63  ;;  %v4216_v23 = vmul.f32 %v4850_v25, %v8408_v53  ;;  %vm10214_vm10 = vcmask 851712  }
 0x80c   :  { %v4345_v52 = vadd.f32 %v4344_v16, %v4213_v48  ;;  %v3849_v37 = vsel %vm10203_vm15, %v3848_v51, %v3847_v59  ;;  %v10206_v51 = vld [vmem:[#allocation95_spill] sm:$0xff]  ;;  %v4851_v48 = vld [vmem:[#allocation5 + $0xc0] sm:$0xff]  ;;  %vm8520_vm15 = vmor %vm3241_vm11, %vm3242_vm9  ;;  %vm10229_vm9 = vcmask 392512  }
 0x80d   :  { %3677 = vperm.xlu1 %4553, %v3224_v44   ;;  %3617 = vperm.xlu0 %4552, %v3190_v56   ;;  %v3193_v44 = vmul.f32 %v10205_v47, %v8311_v13  ;;  %v3191_v39 = vmul.f32 %v10206_v51, %v8311_v13  ;;  %v4217_v63 = vmul.f32 %v4851_v48, %v8325_v4  ;;  %v3238_v56 = vsub.f32 1.0, %v3237_v41 }
 0x80e   :  { %3611 = vperm.xlu2 %4554, %v3174_v54   ;;  %v4346_v17 = vadd.f32 %v4345_v52, %v4214_v38  ;;  %v4852_v54 = vld [vmem:[#allocation5 + $0x108] sm:$0xff] }
 0x80f   :  { %v8447_v43 = vpop.permute.xlu1 %3551  ;;  %v3492_v32 = vpop.permute.xlu0 %3491  ;;  %v4226_v50 = vmul.f32 %v4852_v54, %v8378_v18  ;;  %v10207_v18 = vld [vmem:[#allocation74_spill] sm:$0xff] }
 0x810   :  { %v8451_v33 = vpop.permute.xlu2 %3512  ;;  %v3850_v27 = vperm.slane %v3492_v32, %v6448_v57  ;;  %v4215_v35 = vmul.f32 %v4849_v29, %v3492_v32 }
 0x812   :  { %v3851_v22 = vsel %vm1596_vm5, %v3850_v27, %v3849_v37  ;;  %v4347_v7 = vadd.f32 %v4346_v17, %v4215_v35  ;;  %v4853_v37 = vld [vmem:[#allocation5 + $0xc8] sm:$0xff]  ;;  %v4854_v27 = vld [vmem:[#allocation5 + $0x100] sm:$0xff]  ;;  %v3860_v35 = vperm.slane %v8343_v21, %v6509_v0 }
 0x813   :  { %v3853_v30 = vsel %vm1600_vm6, %v3852_v5, %v3851_v22  ;;  %v3858_v5 = vperm.slane %v8428_v46, %v6505_v11 }
 0x814   :  { %v4348_v16 = vadd.f32 %v4347_v7, %v4216_v23  ;;  %v3855_v53 = vsel %vm1604_vm7, %v3854_v6, %v3853_v30  ;;  %v3230_v6 = vmul.f32 %v10207_v18, %v8406_v34  ;;  %v10210_v30 = vld [vmem:[#allocation98_spill] sm:$0xff] }
 0x815   :  { %3686 = vperm.xlu1 %4553, %v3227_v8   ;;  %3626 = vperm.xlu0 %4552, %v3193_v44   ;;  %v4219_v8 = vmul.f32 %v4855_v60, %v8428_v46  ;;  %v3196_v47 = vmul.f32 %v10210_v30, %v8311_v13  ;;  %v10211_v44 = vld [vmem:[#allocation69_spill] sm:$0xff]  ;;  %v3239_v46 = vmul.f32 %v8449_v14, %v3238_v56 }
 0x816   :  { %3620 = vperm.xlu2 %4554, %v3191_v39   ;;  %v4349_v36 = vadd.f32 %v4348_v16, %v4217_v63  ;;  %v3194_v51 = vmul.f32 %v10211_v44, %v8311_v13  ;;  %v4856_v39 = vld [vmem:[#allocation5 + $0xd8] sm:$0xff] }
 0x817   :  { %v8471_v59 = vpop.permute.xlu1 %3560  ;;  %v3501_v38 = vpop.permute.xlu0 %3500  ;;  %v4220_v48 = vmul.f32 %v4856_v39, %v8343_v21  ;;  %v3240_v56 = vadd.f32 %v8449_v14, %v3239_v46 }
 0x818   :  { %v3522_v52 = vpop.permute.xlu2 %3521  ;;  %v3856_v4 = vperm.slane %v3501_v38, %v6493_v1  ;;  %v4218_v17 = vmul.f32 %v4853_v37, %v3501_v38  ;;  %v4857_v38 = vld [vmem:[#allocation5 + $0xe0] sm:$0xff]  ;;  %v4336_v37 = vrot.slane %v8402_v2, 4 }
 0x819   :  { %v3870_v32 = vperm.slane %v3522_v52, %v6398_v9  ;;  %v4225_v29 = vmul.f32 %v4854_v27, %v3522_v52 }
 0x81a   :  { %v3857_v25 = vsel %vm10208_vm8, %v3856_v4, %v3855_v53  ;;  %v4350_v23 = vadd.f32 %v4349_v36, %v4218_v17  ;;  %v3247_v4 = vand.u32 2147483648, %v8424_v55  ;;  %v3864_v17 = vperm.slane %v8451_v33, %v6545_v20 }
 0x81b   :  { %v8487_v22 = vsel %vm1576_vm0, %v3871_v42, %v3870_v32  ;;  %v8489_v7 = vadd.f32 %v4226_v50, %v4225_v29  ;;  %v3859_v41 = vsel %vm10209_vm3, %v3858_v5, %v3857_v25  ;;  %v3245_v42 = vand.u32 2147483647, %v8424_v55  ;;  %v10213_v32 = vld [vmem:[#allocation103_spill] sm:$0xff] }
 0x81c   :  { %v4351_v63 = vadd.f32 %v4350_v23, %v4219_v8  ;;  %v3861_v16 = vsel %vm10212_vm4, %v3860_v35, %v3859_v41  ;;  %v3233_v27 = vmul.f32 %v10213_v32, %v8406_v34  ;;  %v3866_v29 = vperm.slane %v8365_v10, %v10029_v45  ;;  %v4858_v35 = vld [vmem:[#allocation5 + $0xe8] sm:$0xff]  ;;  %v10217_v25 = vld [vmem:[#allocation79_spill] sm:$0xff]  ;;  %v10218_v41 = vld [vmem:[#allocation106_spill] sm:$0xff] }
 0x81d   :  { %3695 = vperm.xlu1 %4553, %v3230_v6   ;;  %3635 = vperm.xlu0 %4552, %v3196_v47   ;;  %v4222_v5 = vmul.f32 %v4858_v35, %v8451_v33  ;;  %v3199_v23 = vmul.f32 %v10217_v25, %v8311_v13  ;;  %v3197_v30 = vmul.f32 %v10218_v41, %v8311_v13  ;;  %v4859_v47 = vld [vmem:[#allocation5 + $0xf0] sm:$0xff]  ;;  %v3248_v46 = vor.u32 1.1754944e-38, %v3247_v4  ;;  %v10222_v32 = vld [vmem:[#allocation85_spill] sm:$0xff] }
 0x81e   :  { %3629 = vperm.xlu2 %4554, %v3194_v51   ;;  %v4352_v36 = vadd.f32 %v4351_v63, %v4220_v48  ;;  %v3244_v33 = vsel %vm8520_vm15, %v8449_v14, %v3240_v56  ;;  %v4223_v44 = vmul.f32 %v4859_v47, %v8365_v10  ;;  %v4337_v39 = vadd.f32 %v4336_v37, %v8402_v2  ;;  %v10219_v2 = vld [vmem:[#allocation109_spill] sm:$0xff]  ;;  %v10221_v37 = vld [vmem:[#allocation78_spill] sm:$0xff] }
 0x81f   :  { %v8499_v53 = vpop.permute.xlu1 %3569  ;;  %v3510_v54 = vpop.permute.xlu0 %3509  ;;  %vm3246_vm8 = vcmp.eq.f32.partialorder %v3245_v42, 8.507059e+37  ;;  %vm10220_vm3 = vcmask 1041409   ;;  %v3877_v41 = vperm.slane %v8404_v58, %v6431_v31  ;;  %vm10226_vm4 = vcmask 326912  }
 0x820   :  { %v8503_v50 = vpop.permute.xlu2 %3530  ;;  %v3862_v21 = vperm.slane %v3510_v54, %v6531_v15  ;;  %v4221_v52 = vmul.f32 %v4857_v38, %v3510_v54  ;;  %v8535_v63 = vsel %vm3246_vm8, %v3248_v46, %v3244_v33  ;;  %v4860_v54 = vld [vmem:[#allocation5 + $0xf8] sm:$0xff]  ;;  %v10223_v33 = vld [vmem:[#allocation81_spill] sm:$0xff]  ;;  %vm10227_vm11 = vmmov %vm10220_vm3  ;;  %vm10236_vm15 = vcmask 720512  }
 0x821   :  { %v3250_v4 = vmul.f32 %v10219_v2, %v8535_v63  ;;  %v3253_v47 = vmul.f32 %v10223_v33, %v8535_v63  ;;  %vm10238_vm8 = vcmask 786112  }
 0x822   :  { %v3863_v60 = vsel %vm10214_vm10, %v3862_v21, %v3861_v16  ;;  %v4353_v8 = vadd.f32 %v4352_v36, %v4221_v52  ;;  %v4338_v21 = vrot.slane %v4337_v39, 2  ;;  %vm10233_vm10 = vcmask 654912  }
 0x823   :  { %v3865_v6 = vsel %vm1624_vm12, %v3864_v17, %v3863_v60  ;;  %v3202_v17 = vmul.f32 %v10221_v37, %v8311_v13 }
 0x824   :  { %v4354_v55 = vadd.f32 %v4353_v8, %v4222_v5  ;;  %v3867_v51 = vsel %vm1628_vm13, %v3866_v29, %v3865_v6  ;;  %v4339_v35 = vadd.f32 %v4338_v21, %v4337_v39 }
 0x825   :  { %3704 = vperm.xlu1 %4553, %v3233_v27   ;;  %3644 = vperm.xlu0 %4552, %v3199_v23   ;;  %v3200_v27 = vmul.f32 %v10222_v32, %v8311_v13 }
 0x826   :  { %3638 = vperm.xlu2 %4554, %v3197_v30   ;;  %v4355_v48 = vadd.f32 %v4354_v55, %v4223_v44  ;;  %v4340_v23 = vrot.slane %v4339_v35, 1  ;;  %v3875_v30 = vperm.slane %v8503_v50, %v6425_v61  ;;  %v4862_v44 = vld [vmem:[#allocation5 + $0x118] sm:$0xff] }
 0x827   :  { %v3519_v16 = vpop.permute.xlu0 %3518  ;;  %v8539_v14 = vpop.permute.xlu1 %3578  ;;  %v4228_v55 = vmul.f32 %v4862_v44, %v8503_v50 }
 0x828   :  { %v8537_v36 = vpop.permute.xlu2 %3539  ;;  %v3868_v10 = vperm.slane %v3519_v16, %v10033_v19  ;;  %v4224_v56 = vmul.f32 %v4860_v54, %v3519_v16 }
 0x82a   :  { %v3869_v38 = vsel %vm1632_vm14, %v3868_v10, %v3867_v51  ;;  %v4356_v52 = vadd.f32 %v4355_v48, %v4224_v56  ;;  %v10224_v10 = vld [vmem:[#allocation88_spill] sm:$0xff]  ;;  %v10225_v56 = vld [vmem:[#allocation33_spill] sm:$0xff] }
 0x82b   :  { %v8547_v42 = vsel %vm10220_vm3, %v3869_v38, %v8395_v24  ;;  %v4861_v24 = vld [vmem:[#allocation5 + $0x110] sm:$0xff]  ;;  %v3205_v54 = vmul.f32 %v10224_v10, %v8311_v13  ;;  %v3203_v21 = vmul.f32 %v10225_v56, %v8311_v13  ;;  %v4863_v38 = vld [vmem:[#allocation5 + $0x120] sm:$0xff]  ;;  %vm10239_vm3 = vcmask 851712  }
 0x82c   :  { %v4357_v29 = vrot.slane %v4356_v52, 4 }
 0x82d   :  { %3713 = vperm.xlu1 %4553, %v3250_v4   ;;  %3653 = vperm.xlu0 %4552, %v3202_v17  }
 0x82e   :  { %3647 = vperm.xlu2 %4554, %v3200_v27   ;;  %v4358_v5 = vadd.f32 %v4357_v29, %v4356_v52  ;;  %v4229_v52 = vmul.f32 %v4863_v38, %v8404_v58  ;;  %v4864_v29 = vld [vmem:[#allocation5 + $0x128] sm:$0xff]  ;;  %v4867_v38 = vld [vmem:[#allocation5 + $0x140] sm:$0xff] }
 0x82f   :  { %v3528_v60 = vpop.permute.xlu0 %3527  ;;  %v8563_v46 = vpop.permute.xlu1 %3587 }
 0x830   :  { %v8553_v8 = vpop.permute.xlu2 %3548  ;;  %v4359_v18 = vrot.slane %v4358_v5, 2  ;;  %v3873_v6 = vperm.slane %v3528_v60, %v6410_v12  ;;  %v4227_v25 = vmul.f32 %v4861_v24, %v3528_v60  ;;  %v10228_v60 = vld [vmem:[#allocation91_spill] sm:$0xff] }
 0x832   :  { %v4360_v51 = vadd.f32 %v4359_v18, %v4358_v5  ;;  %v3874_v39 = vsel %vm1580_vm1, %v3873_v6, %v8487_v22  ;;  %v4364_v48 = vadd.f32 %v8489_v7, %v4227_v25  ;;  %v8576_v22 = vperm.slane %v8161_v3, 7  ;;  %v4865_v6 = vld [vmem:[#allocation5 + $0x130] sm:$0xff] }
 0x833   :  { %v3876_v16 = vsel %vm1584_vm2, %v3875_v30, %v3874_v39  ;;  %v4341_v7 = vadd.f32 %v4340_v23, %v4339_v35  ;;  %v3881_v3 = vperm.slane %v8537_v36, %v6448_v57  ;;  %v3256_v35 = vmul.f32 %v10228_v60, %v8535_v63  ;;  %v10230_v30 = vld [vmem:[#allocation115_spill] sm:$0xff]  ;;  %v10235_v60 = vld [vmem:[#allocation121_spill] sm:$0xff] }
 0x834   :  { %v4361_v50 = vrot.slane %v4360_v51, 1  ;;  %v4365_v2 = vadd.f32 %v4364_v48, %v4228_v55  ;;  %v3878_v4 = vsel %vm10226_vm4, %v3877_v41, %v3876_v16  ;;  %4825 = vrcp.f32 %v8576_v22  ;;  %v4866_v55 = vld [vmem:[#allocation5 + $0x138] sm:$0xff] }
 0x835   :  { %3722 = vperm.xlu1 %4553, %v3253_v47   ;;  %3662 = vperm.xlu0 %4552, %v3205_v54   ;;  %v3883_v18 = vperm.slane %v8426_v26, %v6462_v49  ;;  %v4231_v24 = vmul.f32 %v4865_v6, %v8537_v36  ;;  %v3222_v33 = vmul.f32 %v10230_v30, %v8406_v34  ;;  %v10231_v47 = vld [vmem:[#allocation87_spill] sm:$0xff] }
 0x836   :  { %3656 = vperm.xlu2 %4554, %v3203_v21   ;;  %v4362_v37 = vadd.f32 %v4361_v50, %v4360_v51  ;;  %v4366_v17 = vadd.f32 %v4365_v2, %v4229_v52  ;;  %v3220_v44 = vmul.f32 %v10231_v47, %v8406_v34  ;;  %v4232_v51 = vmul.f32 %v4866_v55, %v8426_v26  ;;  %v10232_v50 = vld [vmem:[#allocation90_spill] sm:$0xff] }
 0x837   :  { %v3537_v32 = vpop.permute.xlu0 %3536  ;;  %v8599_v39 = vpop.permute.xlu1 %3596  ;;  %v3887_v26 = vperm.slane %v8553_v8, %v6493_v1  ;;  %v3259_v2 = vmul.f32 %v10232_v50, %v8535_v63  ;;  %v10240_v50 = vld [vmem:[#allocation18_spill] sm:$0xff] }
 0x838   :  { %v8578_v27 = vpop.permute.xlu2 %3557  ;;  %v8581_v13 = vsel %vm10227_vm11, %v4362_v37, %v4341_v7  ;;  %v3879_v58 = vperm.slane %v3537_v32, %v6440_v62  ;;  %v4230_v5 = vmul.f32 %v4864_v29, %v3537_v32  ;;  %v4868_v7 = vld [vmem:[#allocation5 + $0x148] sm:$0xff]  ;;  %vm3271_vm11 = vweird.f32 %v8576_v22 }
 0x839   :  { %v4234_v37 = vmul.f32 %v4868_v7, %v8553_v8 }
 0x83a   :  { %v3880_v25 = vsel %vm10229_vm9, %v3879_v58, %v3878_v4  ;;  %v4367_v23 = vadd.f32 %v4366_v17, %v4230_v5  ;;  %v8602_v10 = vpop.eup %4825  ;;  %v3889_v4 = vperm.slane %v8447_v43, %v6505_v11  ;;  %v10234_v5 = vld [vmem:[#allocation97_spill] sm:$0xff] }
 0x83b   :  { %v3882_v41 = vsel %vm1596_vm5, %v3881_v3, %v3880_v25  ;;  %v3267_v58 = vmul.f32 %v8602_v10, %v8576_v22  ;;  %v3225_v3 = vmul.f32 %v10234_v5, %v8406_v34  ;;  %vm3272_vm4 = vweird.f32 %v8602_v10 }
 0x83c   :  { %v4368_v48 = vadd.f32 %v4367_v23, %v4231_v24  ;;  %v3884_v36 = vsel %vm1600_vm6, %v3883_v18, %v3882_v41  ;;  %v4869_v18 = vld [vmem:[#allocation5 + $0x150] sm:$0xff]  ;;  %vm8657_vm9 = vmor %vm3271_vm11, %vm3272_vm4  ;;  %vm10259_vm4 = vcmask 654912   ;;  %vm10261_vm11 = vcmask 720512  }
 0x83d   :  { %3731 = vperm.xlu1 %4553, %v3256_v35   ;;  %3671 = vperm.xlu0 %4552, %v3222_v33   ;;  %v3223_v35 = vmul.f32 %v10235_v60, %v8406_v34  ;;  %v4235_v6 = vmul.f32 %v4869_v18, %v8447_v43  ;;  %v3268_v41 = vsub.f32 1.0, %v3267_v58  ;;  %v3893_v43 = vperm.slane %v8578_v27, %v6531_v15  ;;  %v4873_v18 = vld [vmem:[#allocation5 + $0x170] sm:$0xff] }
 0x83e   :  { %3665 = vperm.xlu2 %4554, %v3220_v44   ;;  %v4369_v16 = vadd.f32 %v4368_v48, %v4232_v51  ;;  %v4870_v44 = vld [vmem:[#allocation5 + $0x158] sm:$0xff]  ;;  %v3277_v60 = vand.u32 2147483648, %v8576_v22 }
 0x83f   :  { %v3546_v54 = vpop.permute.xlu0 %3545  ;;  %v8624_v25 = vpop.permute.xlu1 %3605  ;;  %v10237_v51 = vld [vmem:[#allocation123_spill] sm:$0xff] }
 0x840   :  { %v8604_v56 = vpop.permute.xlu2 %3566  ;;  %v3885_v21 = vperm.slane %v3546_v54, %v6465_v40  ;;  %v4233_v52 = vmul.f32 %v4867_v38, %v3546_v54  ;;  %v3262_v48 = vmul.f32 %v10237_v51, %v8535_v63 }
 0x842   :  { %v3886_v17 = vsel %vm1604_vm7, %v3885_v21, %v3884_v36  ;;  %v4370_v32 = vadd.f32 %v4369_v16, %v4233_v52  ;;  %v3895_v36 = vperm.slane %v8471_v59, %v6545_v20  ;;  %v4871_v16 = vld [vmem:[#allocation5 + $0x160] sm:$0xff]  ;;  %v3269_v52 = vmul.f32 %v8602_v10, %v3268_v41  ;;  %v4874_v41 = vld [vmem:[#allocation5 + $0x178] sm:$0xff] }
 0x843   :  { %v3888_v29 = vsel %vm10233_vm10, %v3887_v26, %v3886_v17  ;;  %v4237_v54 = vmul.f32 %v4871_v16, %v8578_v27  ;;  %v10246_v16 = vld [vmem:[#allocation111_spill] sm:$0xff]  ;;  %vm10247_vm10 = vcmask 1042434  }
 0x844   :  { %v4371_v24 = vadd.f32 %v4370_v32, %v4234_v37  ;;  %v3890_v8 = vsel %vm10236_vm15, %v3889_v4, %v3888_v29  ;;  %v10241_v4 = vld [vmem:[#allocation126_spill] sm:$0xff]  ;;  %v4872_v37 = vld [vmem:[#allocation5 + $0x168] sm:$0xff]  ;;  %v3270_v29 = vadd.f32 %v8602_v10, %v3269_v52 }
 0x845   :  { %3740 = vperm.xlu1 %4553, %v3259_v2   ;;  %3680 = vperm.xlu0 %4552, %v3225_v3   ;;  %v3228_v2 = vmul.f32 %v10240_v50, %v8406_v34  ;;  %v3226_v7 = vmul.f32 %v10241_v4, %v8406_v34  ;;  %v4238_v17 = vmul.f32 %v4872_v37, %v8471_v59 }
 0x846   :  { %3674 = vperm.xlu2 %4554, %v3223_v35   ;;  %v4372_v23 = vadd.f32 %v4371_v24, %v4235_v6  ;;  %v3275_v24 = vand.u32 2147483647, %v8576_v22  ;;  %v3274_v22 = vsel %vm8657_vm9, %v8602_v10, %v3270_v29  ;;  %v3901_v50 = vperm.slane %v8499_v53, %v6398_v9  ;;  %v4877_v29 = vld [vmem:[#allocation5 + $0x190] sm:$0xff] }
 0x847   :  { %v3555_v30 = vpop.permute.xlu0 %3554  ;;  %v8650_v35 = vpop.permute.xlu1 %3614  ;;  %vm10262_vm9 = vcmask 786112  }
 0x848   :  { %v8626_v33 = vpop.permute.xlu2 %3575  ;;  %v3891_v47 = vperm.slane %v3555_v30, %v6509_v0  ;;  %v4236_v55 = vmul.f32 %v4870_v44, %v3555_v30  ;;  %v4240_v30 = vmul.f32 %v4874_v41, %v8604_v56  ;;  %vm3276_vm15 = vcmp.eq.f32.partialorder %v3275_v24, 8.507059e+37  ;;  %v4878_v41 = vld [vmem:[#allocation5 + $0x198] sm:$0xff] }
 0x84a   :  { %v3892_v21 = vsel %vm10238_vm8, %v3891_v47, %v3890_v8  ;;  %v4373_v38 = vadd.f32 %v4372_v23, %v4236_v55  ;;  %v3899_v8 = vperm.slane %v8604_v56, %v10033_v19  ;;  %v10244_v55 = vld [vmem:[#allocation130_spill] sm:$0xff]  ;;  %vm10252_vm8 = vcmask 326912  }
 0x84b   :  { %v3894_v26 = vsel %vm10239_vm3, %v3893_v43, %v3892_v21  ;;  %v3265_v43 = vmul.f32 %v10244_v55, %v8535_v63  ;;  %v3278_v21 = vor.u32 1.1754944e-38, %v3277_v60  ;;  %vm10253_vm3 = vcmask 392512  }
 0x84c   :  { %v4374_v32 = vadd.f32 %v4373_v38, %v4237_v54  ;;  %v3896_v27 = vsel %vm1624_vm12, %v3895_v36, %v3894_v26  ;;  %v3229_v54 = vmul.f32 %v10246_v16, %v8406_v34  ;;  %v10251_v16 = vld [vmem:[#allocation117_spill] sm:$0xff] }
 0x84d   :  { %3749 = vperm.xlu1 %4553, %v3262_v48   ;;  %3689 = vperm.xlu0 %4552, %v3228_v2   ;;  %v10245_v48 = vld [vmem:[#allocation104_spill] sm:$0xff]  ;;  %v8679_v10 = vsel %vm3276_vm15, %v3278_v21, %v3274_v22  ;;  %v4880_v21 = vld [vmem:[#allocation5 + $0x1a8] sm:$0xff]  ;;  %vm10271_vm15 = vcmask 1043459  }
 0x84e   :  { %3683 = vperm.xlu2 %4554, %v3226_v7   ;;  %v4375_v58 = vadd.f32 %v4374_v32, %v4238_v17  ;;  %v3231_v36 = vmul.f32 %v10245_v48, %v8406_v34  ;;  %v4875_v2 = vld [vmem:[#allocation5 + $0x180] sm:$0xff]  ;;  %v4876_v7 = vld [vmem:[#allocation5 + $0x188] sm:$0xff]  ;;  %v3904_v17 = vperm.slane %v8626_v33, %v6410_v12 }
 0x84f   :  { %v3564_v5 = vpop.permute.xlu0 %3563  ;;  %v4241_v4 = vmul.f32 %v4875_v2, %v8499_v53  ;;  %v10248_v32 = vld [vmem:[#allocation113_spill] sm:$0xff]  ;;  %v8694_v60 = vpop.permute.xlu1 %3623 }
 0x850   :  { %v8647_v3 = vpop.permute.xlu2 %3584  ;;  %v3897_v59 = vperm.slane %v3564_v5, %v10029_v45  ;;  %v4239_v6 = vmul.f32 %v4873_v18, %v3564_v5  ;;  %v4243_v5 = vmul.f32 %v4877_v29, %v8626_v33 }
 0x852   :  { %v3898_v47 = vsel %vm1628_vm13, %v3897_v59, %v3896_v27  ;;  %v4376_v44 = vadd.f32 %v4375_v58, %v4239_v6  ;;  %v3282_v27 = vmul.f32 %v10248_v32, %v8679_v10  ;;  %v3906_v58 = vperm.slane %v8539_v14, %v6425_v61  ;;  %v10249_v6 = vld [vmem:[#allocation134_spill] sm:$0xff] }
 0x853   :  { %v3900_v51 = vsel %vm1632_vm14, %v3899_v8, %v3898_v47  ;;  %v3234_v24 = vmul.f32 %v10249_v6, %v8406_v34  ;;  %v10250_v8 = vld [vmem:[#allocation21_spill] sm:$0xff]  ;;  %v4881_v32 = vld [vmem:[#allocation5 + $0x1b0] sm:$0xff]  ;;  %v4882_v6 = vld [vmem:[#allocation5 + $0x1b8] sm:$0xff] }
 0x854   :  { %v8675_v56 = vsel %vm10247_vm10, %v3900_v51, %v8547_v42  ;;  %v8677_v38 = vadd.f32 %v4376_v44, %v4240_v30  ;;  %v3232_v23 = vmul.f32 %v10250_v8, %v8406_v34  ;;  %v4244_v30 = vmul.f32 %v4878_v41, %v8539_v14  ;;  %v4879_v51 = vld [vmem:[#allocation5 + $0x1a0] sm:$0xff] }
 0x855   :  { %3758 = vperm.xlu1 %4553, %v3265_v43   ;;  %3698 = vperm.xlu0 %4552, %v3231_v36   ;;  %v3910_v36 = vperm.slane %v8647_v3, %v6440_v62  ;;  %v3912_v14 = vperm.slane %v8563_v46, %v6448_v57  ;;  %v4883_v41 = vld [vmem:[#allocation5 + $0x1c0] sm:$0xff]  ;;  %vm10265_vm10 = vcmask 851712  }
 0x856   :  { %3692 = vperm.xlu2 %4554, %v3229_v54   ;;  %v3285_v54 = vmul.f32 %v10251_v16, %v8679_v10 }
 0x857   :  { %v3573_v52 = vpop.permute.xlu0 %3572 }
 0x858   :  { %v8681_v26 = vpop.permute.xlu2 %3593  ;;  %v3902_v42 = vperm.slane %v3573_v52, %v6407_v28  ;;  %v4242_v37 = vmul.f32 %v4876_v7, %v3573_v52  ;;  %v4246_v52 = vmul.f32 %v4880_v21, %v8647_v3 }
 0x85a   :  { %v3903_v53 = vsel %vm1576_vm0, %v3902_v42, %v3901_v50  ;;  %v4384_v59 = vadd.f32 %v4242_v37, %v4241_v4  ;;  %v10254_v42 = vld [vmem:[#allocation141_spill] sm:$0xff]  ;;  %v10255_v37 = vld [vmem:[#allocation26_spill] sm:$0xff] }
 0x85b   :  { %v3905_v18 = vsel %vm1580_vm1, %v3904_v17, %v3903_v53  ;;  %v3251_v7 = vmul.f32 %v10254_v42, %v8535_v63  ;;  %v3235_v17 = vmul.f32 %v10255_v37, %v8406_v34  ;;  %v3916_v34 = vperm.slane %v8681_v26, %v6465_v40  ;;  %v10260_v37 = vld [vmem:[#allocation35_spill] sm:$0xff] }
 0x85c   :  { %v4385_v47 = vadd.f32 %v4384_v59, %v4243_v5  ;;  %v3907_v33 = vsel %vm1584_vm2, %v3906_v58, %v3905_v18  ;;  %v8719_v58 = vpop.permute.xlu1 %3632 }
 0x85d   :  { %3767 = vperm.xlu1 %4553, %v3282_v27   ;;  %3707 = vperm.xlu0 %4552, %v3234_v24   ;;  %v4247_v27 = vmul.f32 %v4881_v32, %v8563_v46  ;;  %v10256_v46 = vld [vmem:[#allocation37_spill] sm:$0xff]  ;;  %v4886_v32 = vld [vmem:[#allocation5 + $0x1d8] sm:$0xff] }
 0x85e   :  { %3701 = vperm.xlu2 %4554, %v3232_v23   ;;  %v4386_v44 = vadd.f32 %v4385_v47, %v4244_v30  ;;  %v3288_v8 = vmul.f32 %v10256_v46, %v8679_v10  ;;  %v3918_v23 = vperm.slane %v8599_v39, %v6493_v1  ;;  %v4249_v30 = vmul.f32 %v4883_v41, %v8681_v26 }
 0x85f   :  { %v3582_v55 = vpop.permute.xlu0 %3581 }
 0x860   :  { %v3603_v43 = vpop.permute.xlu2 %3602  ;;  %v3908_v22 = vperm.slane %v3582_v55, %v6431_v31  ;;  %v4245_v48 = vmul.f32 %v4879_v51, %v3582_v55  ;;  %v10257_v55 = vld [vmem:[#allocation146_spill] sm:$0xff]  ;;  %v10258_v51 = vld [vmem:[#allocation32_spill] sm:$0xff] }
 0x862   :  { %v3909_v50 = vsel %vm10252_vm8, %v3908_v22, %v3907_v33  ;;  %v4387_v2 = vadd.f32 %v4386_v44, %v4245_v48  ;;  %v3254_v22 = vmul.f32 %v10257_v55, %v8535_v63  ;;  %v3252_v48 = vmul.f32 %v10258_v51, %v8535_v63  ;;  %v10266_v51 = vld [vmem:[#allocation40_spill] sm:$0xff] }
 0x863   :  { %v3911_v4 = vsel %vm10253_vm3, %v3910_v36, %v3909_v50  ;;  %v4884_v36 = vld [vmem:[#allocation5 + $0x1c8] sm:$0xff] }
 0x864   :  { %v4388_v29 = vadd.f32 %v4387_v2, %v4246_v52  ;;  %v3913_v3 = vsel %vm1596_vm5, %v3912_v14, %v3911_v4  ;;  %v4250_v16 = vmul.f32 %v4884_v36, %v8599_v39  ;;  %v8738_v26 = vpop.permute.xlu1 %3641  ;;  %v4885_v4 = vld [vmem:[#allocation5 + $0x1d0] sm:$0xff]  ;;  %v3291_v39 = vmul.f32 %v10260_v37, %v8679_v10 }
 0x865   :  { %3776 = vperm.xlu1 %4553, %v3285_v54   ;;  %3716 = vperm.xlu0 %4552, %v3251_v7   ;;  %v3922_v7 = vperm.slane %v3603_v43, %v6509_v0  ;;  %v4889_v36 = vld [vmem:[#allocation5 + $0x1f0] sm:$0xff] }
 0x866   :  { %3710 = vperm.xlu2 %4554, %v3235_v17   ;;  %v4389_v5 = vadd.f32 %v4388_v29, %v4247_v27  ;;  %v3924_v17 = vperm.slane %v8624_v25, %v6531_v15  ;;  %v4252_v27 = vmul.f32 %v4886_v32, %v3603_v43 }
 0x867   :  { %v3591_v53 = vpop.permute.xlu0 %3590 }
 0x868   :  { %v3612_v59 = vpop.permute.xlu2 %3611  ;;  %v3914_v18 = vperm.slane %v3591_v53, %v6462_v49  ;;  %v4248_v24 = vmul.f32 %v4882_v6, %v3591_v53  ;;  %v10263_v53 = vld [vmem:[#allocation152_spill] sm:$0xff]  ;;  %v10264_v6 = vld [vmem:[#allocation38_spill] sm:$0xff] }
 0x86a   :  { %v3915_v47 = vsel %vm1600_vm6, %v3914_v18, %v3913_v3  ;;  %v4390_v33 = vadd.f32 %v4389_v5, %v4248_v24  ;;  %v3257_v18 = vmul.f32 %v10263_v53, %v8535_v63  ;;  %v3255_v24 = vmul.f32 %v10264_v6, %v8535_v63 }
 0x86b   :  { %v3917_v44 = vsel %vm1604_vm7, %v3916_v34, %v3915_v47  ;;  %v4887_v34 = vld [vmem:[#allocation5 + $0x1e0] sm:$0xff] }
 0x86c   :  { %v4391_v54 = vadd.f32 %v4390_v33, %v4249_v30  ;;  %v3919_v14 = vsel %vm10259_vm4, %v3918_v23, %v3917_v44  ;;  %v4253_v46 = vmul.f32 %v4887_v34, %v8624_v25  ;;  %v8754_v47 = vpop.permute.xlu1 %3650  ;;  %v4888_v44 = vld [vmem:[#allocation5 + $0x1e8] sm:$0xff]  ;;  %v3294_v25 = vmul.f32 %v10266_v51, %v8679_v10 }
 0x86d   :  { %3785 = vperm.xlu1 %4553, %v3288_v8   ;;  %3725 = vperm.xlu0 %4552, %v3254_v22   ;;  %v3928_v22 = vperm.slane %v3612_v59, %v10029_v45 }
 0x86e   :  { %3719 = vperm.xlu2 %4554, %v3252_v48   ;;  %v4392_v21 = vadd.f32 %v4391_v54, %v4250_v16  ;;  %v3930_v48 = vperm.slane %v8650_v35, %v10033_v19  ;;  %v4255_v16 = vmul.f32 %v4889_v36, %v3612_v59  ;;  %v3941_v36 = vperm.slane %v8719_v58, %v6440_v62 }
 0x86f   :  { %v3600_v52 = vpop.permute.xlu0 %3599 }
 0x870   :  { %v3621_v50 = vpop.permute.xlu2 %3620  ;;  %v3920_v2 = vperm.slane %v3600_v52, %v6505_v11  ;;  %v4251_v42 = vmul.f32 %v4885_v4, %v3600_v52  ;;  %v10267_v52 = vld [vmem:[#allocation48_spill] sm:$0xff] }
 0x871   :  { %v10268_v4 = vld [vmem:[#allocation160_spill] sm:$0xff] }
 0x872   :  { %v3921_v29 = vsel %vm10261_vm11, %v3920_v2, %v3919_v14  ;;  %v4393_v3 = vadd.f32 %v4392_v21, %v4251_v42  ;;  %v3260_v2 = vmul.f32 %v10267_v52, %v8535_v63  ;;  %v3258_v42 = vmul.f32 %v10268_v4, %v8535_v63 }
 0x873   :  { %v3923_v5 = vsel %vm10262_vm9, %v3922_v7, %v3921_v29  ;;  %v4890_v7 = vld [vmem:[#allocation5 + $0x1f8] sm:$0xff]  ;;  %v3933_v29 = vperm.slane %v3621_v50, %v6407_v28 }
 0x874   :  { %v4394_v8 = vadd.f32 %v4393_v3, %v4252_v27  ;;  %v3925_v23 = vsel %vm10265_vm10, %v3924_v17, %v3923_v5  ;;  %v4256_v37 = vmul.f32 %v4890_v7, %v8650_v35  ;;  %v4891_v3 = vld [vmem:[#allocation5 + $0x208] sm:$0xff]  ;;  %v3935_v35 = vperm.slane %v8694_v60, %v6410_v12 }
 0x875   :  { %3794 = vperm.xlu1 %4553, %v3291_v39   ;;  %3734 = vperm.xlu0 %4552, %v3257_v18   ;;  %v4258_v5 = vmul.f32 %v4891_v3, %v3621_v50  ;;  %v4892_v18 = vld [vmem:[#allocation5 + $0x200] sm:$0xff]  ;;  %v10270_v50 = vld [vmem:[#allocation46_spill] sm:$0xff] }
 0x876   :  { %3728 = vperm.xlu2 %4554, %v3255_v24   ;;  %v4395_v43 = vadd.f32 %v4394_v8, %v4253_v46  ;;  %v4893_v24 = vld [vmem:[#allocation5 + $0x210] sm:$0xff]  ;;  %v8777_v46 = vpop.permute.xlu1 %3659 }
 0x877   :  { %v3609_v41 = vpop.permute.xlu0 %3608  ;;  %v4259_v34 = vmul.f32 %v4893_v24, %v8694_v60 }
 0x878   :  { %v3630_v30 = vpop.permute.xlu2 %3629  ;;  %v3926_v33 = vperm.slane %v3609_v41, %v6545_v20  ;;  %v4254_v55 = vmul.f32 %v4888_v44, %v3609_v41 }
 0x87a   :  { %v3927_v54 = vsel %vm1624_vm12, %v3926_v33, %v3925_v23  ;;  %v4396_v14 = vadd.f32 %v4395_v43, %v4254_v55  ;;  %v10269_v43 = vld [vmem:[#allocation164_spill] sm:$0xff]  ;;  %v3261_v33 = vmul.f32 %v10270_v50, %v8535_v63 }
 0x87b   :  { %v3929_v21 = vsel %vm1628_vm13, %v3928_v22, %v3927_v54  ;;  %v3263_v41 = vmul.f32 %v10269_v43, %v8535_v63  ;;  %v4895_v54 = vld [vmem:[#allocation5 + $0x220] sm:$0xff] }
 0x87c   :  { %v3931_v39 = vsel %vm1632_vm14, %v3930_v48, %v3929_v21  ;;  %v4397_v17 = vadd.f32 %v4396_v14, %v4255_v16  ;;  %v3939_v16 = vperm.slane %v3630_v30, %v6431_v31  ;;  %v4261_v14 = vmul.f32 %v4895_v54, %v3630_v30 }
 0x87d   :  { %3803 = vperm.xlu1 %4553, %v3294_v25   ;;  %3743 = vperm.xlu0 %4552, %v3260_v2   ;;  %v4894_v25 = vld [vmem:[#allocation5 + $0x218] sm:$0xff]  ;;  %v8794_v2 = vsel %vm10271_vm15, %v3931_v39, %v8675_v56  ;;  %vm10280_vm15 = vcmask 1044484  }
 0x87e   :  { %3737 = vperm.xlu2 %4554, %v3258_v42   ;;  %v8770_v59 = vadd.f32 %v4397_v17, %v4256_v37  ;;  %v10272_v42 = vld [vmem:[#allocation49_spill] sm:$0xff]  ;;  %v3669_v3 = vpop.permute.xlu1 %3668 }
 0x87f   :  { %v3618_v32 = vpop.permute.xlu0 %3617  ;;  %v3280_v7 = vmul.f32 %v10272_v42, %v8679_v10  ;;  %v10273_v37 = vld [vmem:[#allocation53_spill] sm:$0xff] }
 0x880   :  { %v3639_v27 = vpop.permute.xlu2 %3638  ;;  %v3932_v53 = vperm.slane %v3618_v32, %v6398_v9  ;;  %v4257_v6 = vmul.f32 %v4892_v18, %v3618_v32  ;;  %v3264_v17 = vmul.f32 %v10273_v37, %v8535_v63  ;;  %v4896_v32 = vld [vmem:[#allocation5 + $0x228] sm:$0xff]  ;;  %v3947_v63 = vperm.slane %v8738_v26, %v6465_v40 }
 0x881   :  { %v3945_v24 = vperm.slane %v3639_v27, %v6462_v49 }
 0x882   :  { %v3934_v8 = vsel %vm1576_vm0, %v3933_v29, %v3932_v53  ;;  %v4405_v23 = vadd.f32 %v4258_v5, %v4257_v6  ;;  %v4262_v29 = vmul.f32 %v4896_v32, %v8719_v58  ;;  %v4897_v6 = vld [vmem:[#allocation5 + $0x230] sm:$0xff]  ;;  %v4898_v58 = vld [vmem:[#allocation5 + $0x238] sm:$0xff] }
 0x883   :  { %v3936_v44 = vsel %vm1580_vm1, %v3935_v35, %v3934_v8 }
 0x884   :  { %v4406_v55 = vadd.f32 %v4405_v23, %v4259_v34  ;;  %v4264_v34 = vmul.f32 %v4898_v58, %v3639_v27  ;;  %v4904_v58 = vld [vmem:[#allocation5 + $0x258] sm:$0xff] }
 0x885   :  { %3752 = vperm.xlu0 %4552, %v3263_v41   ;;  %v10274_v41 = vld [vmem:[#allocation179_spill] sm:$0xff] }
 0x886   :  { %3746 = vperm.xlu2 %4554, %v3261_v33   ;;  %v3283_v50 = vmul.f32 %v10274_v41, %v8679_v10  ;;  %v10275_v33 = vld [vmem:[#allocation51_spill] sm:$0xff]  ;;  %v8817_v27 = vpop.permute.xlu1 %3677 }
 0x887   :  { %v3627_v22 = vpop.permute.xlu0 %3626 }
 0x888   :  { %v8785_v51 = vpop.permute.xlu2 %3647  ;;  %v3937_v60 = vperm.slane %v3627_v22, %v6425_v61  ;;  %v4260_v48 = vmul.f32 %v4894_v25, %v3627_v22 }
 0x889   :  { %v3951_v32 = vperm.slane %v8785_v51, %v6505_v11 }
 0x88a   :  { %v3938_v21 = vsel %vm1584_vm2, %v3937_v60, %v3936_v44  ;;  %v4407_v52 = vadd.f32 %v4406_v55, %v4260_v48  ;;  %v3281_v44 = vmul.f32 %v10275_v33, %v8679_v10  ;;  %v4899_v55 = vld [vmem:[#allocation5 + $0x240] sm:$0xff] }
 0x88b   :  { %v3940_v4 = vsel %vm10252_vm8, %v3939_v16, %v3938_v21  ;;  %v4265_v22 = vmul.f32 %v4899_v55, %v8738_v26  ;;  %v4900_v16 = vld [vmem:[#allocation5 + $0x288] sm:$0xff] }
 0x88c   :  { %v4408_v30 = vadd.f32 %v4407_v52, %v4261_v14  ;;  %v3942_v5 = vsel %vm10253_vm3, %v3941_v36, %v3940_v4  ;;  %v3964_v36 = vperm.slane %v3669_v3, %v6407_v28  ;;  %v4274_v54 = vmul.f32 %v4900_v16, %v3669_v3  ;;  %v4901_v4 = vld [vmem:[#allocation5 + $0x248] sm:$0xff] }
 0x88d   :  { %3761 = vperm.xlu0 %4552, %v3280_v7   ;;  %v4902_v7 = vld [vmem:[#allocation5 + $0x280] sm:$0xff]  ;;  %vm10285_vm3 = vcmask 1042434  }
 0x88e   :  { %3755 = vperm.xlu2 %4554, %v3264_v17   ;;  %v4409_v53 = vadd.f32 %v4408_v30, %v4262_v29  ;;  %v3953_v17 = vperm.slane %v8754_v47, %v6509_v0  ;;  %v4903_v29 = vld [vmem:[#allocation5 + $0x250] sm:$0xff] }
 0x88f   :  { %v3636_v56 = vpop.permute.xlu0 %3635  ;;  %v4267_v30 = vmul.f32 %v4903_v29, %v8785_v51 }
 0x890   :  { %v8803_v39 = vpop.permute.xlu2 %3656  ;;  %v3943_v18 = vperm.slane %v3636_v56, %v6448_v57  ;;  %v4263_v35 = vmul.f32 %v4897_v6, %v3636_v56  ;;  %v10276_v6 = vld [vmem:[#allocation150_spill] sm:$0xff] }
 0x892   :  { %v3944_v8 = vsel %vm1596_vm5, %v3943_v18, %v3942_v5  ;;  %v4410_v23 = vadd.f32 %v4409_v53, %v4263_v35  ;;  %v3286_v35 = vmul.f32 %v10276_v6, %v8679_v10 }
 0x893   :  { %v3946_v43 = vsel %vm1600_vm6, %v3945_v24, %v3944_v8  ;;  %v10277_v24 = vld [vmem:[#allocation188_spill] sm:$0xff] }
 0x894   :  { %v4411_v60 = vadd.f32 %v4410_v23, %v4264_v34  ;;  %v3948_v25 = vsel %vm1604_vm7, %v3947_v63, %v3946_v43  ;;  %v3284_v63 = vmul.f32 %v10277_v24, %v8679_v10  ;;  %v4268_v34 = vmul.f32 %v4904_v58, %v8754_v47  ;;  %v10282_v58 = vld [vmem:[#allocation156_spill] sm:$0xff] }
 0x895   :  { %3770 = vperm.xlu0 %4552, %v3283_v50   ;;  %v8836_v50 = vpop.permute.xlu1 %3686  ;;  %v3959_v47 = vperm.slane %v8777_v46, %v10029_v45 }
 0x896   :  { %3764 = vperm.xlu2 %4554, %v3281_v44   ;;  %v4412_v48 = vadd.f32 %v4411_v60, %v4265_v22  ;;  %v4905_v44 = vld [vmem:[#allocation5 + $0x260] sm:$0xff]  ;;  %v4378_v22 = vrot.slane %v8677_v38, 4  ;;  %v3957_v60 = vperm.slane %v8803_v39, %v6545_v20 }
 0x897   :  { %v3645_v14 = vpop.permute.xlu0 %3644 }
 0x898   :  { %v3666_v21 = vpop.permute.xlu2 %3665  ;;  %v3949_v52 = vperm.slane %v3645_v14, %v6493_v1  ;;  %v4266_v42 = vmul.f32 %v4901_v4, %v3645_v14  ;;  %v10278_v14 = vld [vmem:[#allocation192_spill] sm:$0xff] }
 0x899   :  { %v3963_v26 = vperm.slane %v3666_v21, %v6398_v9  ;;  %v4273_v37 = vmul.f32 %v4902_v7, %v3666_v21  ;;  %v3289_v21 = vmul.f32 %v10278_v14, %v8679_v10  ;;  %v10284_v14 = vld [vmem:[#allocation172_spill] sm:$0xff] }
 0x89a   :  { %v3950_v3 = vsel %vm10259_vm4, %v3949_v52, %v3948_v25  ;;  %v4413_v5 = vadd.f32 %v4412_v48, %v4266_v42  ;;  %v4906_v25 = vld [vmem:[#allocation5 + $0x268] sm:$0xff]  ;;  %v4907_v42 = vld [vmem:[#allocation5 + $0x270] sm:$0xff]  ;;  %vm10286_vm4 = vcmask 392512  }
 0x89b   :  { %v3965_v53 = vsel %vm1576_vm0, %v3964_v36, %v3963_v26  ;;  %v4426_v56 = vadd.f32 %v4274_v54, %v4273_v37  ;;  %v3952_v18 = vsel %vm10261_vm11, %v3951_v32, %v3950_v3  ;;  %v4270_v48 = vmul.f32 %v4906_v25, %v8803_v39  ;;  %v10279_v52 = vld [vmem:[#allocation149_spill] sm:$0xff]  ;;  %v4908_v3 = vld [vmem:[#allocation5 + $0x278] sm:$0xff] }
 0x89c   :  { %v4414_v8 = vadd.f32 %v4413_v5, %v4267_v30  ;;  %v3954_v51 = vsel %vm10262_vm9, %v3953_v17, %v3952_v18  ;;  %v3287_v4 = vmul.f32 %v10279_v52, %v8679_v10  ;;  %v4271_v26 = vmul.f32 %v4907_v42, %v8777_v46  ;;  %v4911_v52 = vld [vmem:[#allocation5 + $0x2a0] sm:$0xff] }
 0x89d   :  { %3779 = vperm.xlu0 %4552, %v3286_v35   ;;  %v4379_v17 = vadd.f32 %v4378_v22, %v8677_v38  ;;  %v8855_v6 = vpop.permute.xlu1 %3695  ;;  %v10281_v38 = vld [vmem:[#allocation163_spill] sm:$0xff]  ;;  %vm10287_vm11 = vcmask 654912   ;;  %vm10288_vm9 = vcmask 720512  }
 0x89e   :  { %3773 = vperm.xlu2 %4554, %v3284_v63   ;;  %v4415_v23 = vadd.f32 %v4414_v8, %v4268_v34  ;;  %v3292_v63 = vmul.f32 %v10281_v38, %v8679_v10  ;;  %v3290_v34 = vmul.f32 %v10282_v58, %v8679_v10 }
 0x89f   :  { %v3654_v43 = vpop.permute.xlu0 %3653  ;;  %v4380_v18 = vrot.slane %v4379_v17, 2 }
 0x8a0   :  { %v3675_v41 = vpop.permute.xlu2 %3674  ;;  %v3955_v33 = vperm.slane %v3654_v43, %v6531_v15  ;;  %v4269_v55 = vmul.f32 %v4905_v44, %v3654_v43 }
 0x8a1   :  { %v4381_v8 = vadd.f32 %v4380_v18, %v4379_v17  ;;  %v3968_v22 = vperm.slane %v3675_v41, %v6425_v61 }
 0x8a2   :  { %v3956_v36 = vsel %vm10265_vm10, %v3955_v33, %v3954_v51  ;;  %v4416_v16 = vadd.f32 %v4415_v23, %v4269_v55  ;;  %v4909_v33 = vld [vmem:[#allocation5 + $0x290] sm:$0xff]  ;;  %vm10289_vm10 = vcmask 786112  }
 0x8a3   :  { %v3958_v54 = vsel %vm1624_vm12, %v3957_v60, %v3956_v36  ;;  %v4382_v55 = vrot.slane %v4381_v8, 1  ;;  %v4910_v60 = vld [vmem:[#allocation5 + $0x298] sm:$0xff] }
 0x8a4   :  { %v4417_v7 = vadd.f32 %v4416_v16, %v4270_v48  ;;  %v3960_v37 = vsel %vm1628_vm13, %v3959_v47, %v3958_v54  ;;  %v4276_v47 = vmul.f32 %v4910_v60, %v3675_v41  ;;  %v10283_v16 = vld [vmem:[#allocation161_spill] sm:$0xff] }
 0x8a5   :  { %3788 = vperm.xlu0 %4552, %v3289_v21   ;;  %v3295_v54 = vmul.f32 %v10283_v16, %v8679_v10  ;;  %v3293_v21 = vmul.f32 %v10284_v14, %v8679_v10  ;;  %v3705_v42 = vpop.permute.xlu1 %3704  ;;  %v4916_v60 = vld [vmem:[#allocation5 + $0x2c8] sm:$0xff] }
 0x8a6   :  { %3782 = vperm.xlu2 %4554, %v3287_v4   ;;  %v4418_v39 = vadd.f32 %v4417_v7, %v4271_v26  ;;  %v4277_v4 = vmul.f32 %v4911_v52, %v8817_v27 }
 0x8a7   :  { %v3663_v32 = vpop.permute.xlu0 %3662 }
 0x8a8   :  { %v3684_v29 = vpop.permute.xlu2 %3683  ;;  %v3961_v30 = vperm.slane %v3663_v32, %v10033_v19  ;;  %v4272_v5 = vmul.f32 %v4908_v3, %v3663_v32  ;;  %v4913_v3 = vld [vmem:[#allocation5 + $0x2b0] sm:$0xff] }
 0x8aa   :  { %v3962_v35 = vsel %vm1632_vm14, %v3961_v30, %v3960_v37  ;;  %v8858_v46 = vadd.f32 %v4418_v39, %v4272_v5  ;;  %v4383_v37 = vadd.f32 %v4382_v55, %v4381_v8  ;;  %v4912_v39 = vld [vmem:[#allocation5 + $0x2a8] sm:$0xff]  ;;  %v3974_v30 = vperm.slane %v3684_v29, %v6448_v57  ;;  %v4915_v55 = vld [vmem:[#allocation5 + $0x2c0] sm:$0xff] }
 0x8ab   :  { %v8862_v24 = vsel %vm10280_vm15, %v3962_v35, %v8794_v2  ;;  %v3970_v2 = vperm.slane %v8817_v27, %v6431_v31  ;;  %v3976_v27 = vperm.slane %v8836_v50, %v6462_v49  ;;  %v4279_v5 = vmul.f32 %v4913_v3, %v3684_v29  ;;  %v4920_v3 = vld [vmem:[#allocation5 + $0x2e8] sm:$0xff] }
 0x8ac   :  { %v8884_v10 = vsel %vm10285_vm3, %v4383_v37, %v8581_v13  ;;  %vm10290_vm15 = vcmask 851712   ;;  %vm10292_vm3 = vcmask 326912  }
 0x8ad   :  { %3797 = vperm.xlu0 %4552, %v3292_v63   ;;  %v4914_v63 = vld [vmem:[#allocation5 + $0x2b8] sm:$0xff] }
 0x8ae   :  { %3791 = vperm.xlu2 %4554, %v3290_v34   ;;  %v4280_v58 = vmul.f32 %v4914_v63, %v8836_v50 }
 0x8af   :  { %v3672_v51 = vpop.permute.xlu0 %3671 }
 0x8b0   :  { %v3693_v23 = vpop.permute.xlu2 %3692  ;;  %v3966_v43 = vperm.slane %v3672_v51, %v6410_v12  ;;  %v4275_v44 = vmul.f32 %v4909_v33, %v3672_v51  ;;  %v8892_v51 = vpop.permute.xlu1 %3713 }
 0x8b2   :  { %v3967_v25 = vsel %vm1580_vm1, %v3966_v43, %v3965_v53  ;;  %v4427_v48 = vadd.f32 %v4426_v56, %v4275_v44 }
 0x8b3   :  { %v3969_v36 = vsel %vm1584_vm2, %v3968_v22, %v3967_v25  ;;  %v3980_v22 = vperm.slane %v3693_v23, %v6493_v1 }
 0x8b4   :  { %v4428_v26 = vadd.f32 %v4427_v48, %v4276_v47  ;;  %v3971_v7 = vsel %vm10252_vm8, %v3970_v2, %v3969_v36  ;;  %v3982_v2 = vperm.slane %v8855_v6, %v6505_v11  ;;  %v4282_v47 = vmul.f32 %v4916_v60, %v3693_v23  ;;  %v4917_v36 = vld [vmem:[#allocation5 + $0x2d0] sm:$0xff] }
 0x8b5   :  { %3806 = vperm.xlu0 %4552, %v3295_v54   ;;  %v4283_v16 = vmul.f32 %v4917_v36, %v8855_v6  ;;  %vm10291_vm8 = vcmask 1043459  }
 0x8b6   :  { %3800 = vperm.xlu2 %4554, %v3293_v21   ;;  %v4429_v53 = vadd.f32 %v4428_v26, %v4277_v4 }
 0x8b7   :  { %v3681_v56 = vpop.permute.xlu0 %3680 }
 0x8b8   :  { %v3702_v41 = vpop.permute.xlu2 %3701  ;;  %v3972_v17 = vperm.slane %v3681_v56, %v6440_v62  ;;  %v4278_v32 = vmul.f32 %v4912_v39, %v3681_v56  ;;  %v8905_v23 = vpop.permute.xlu1 %3722  ;;  %v3988_v56 = vperm.slane %v3705_v42, %v6545_v20 }
 0x8ba   :  { %v3973_v18 = vsel %vm10286_vm4, %v3972_v17, %v3971_v7  ;;  %v4430_v35 = vadd.f32 %v4429_v53, %v4278_v32  ;;  %v4918_v7 = vld [vmem:[#allocation5 + $0x2d8] sm:$0xff]  ;;  %v3986_v53 = vperm.slane %v3702_v41, %v6531_v15  ;;  %v4919_v17 = vld [vmem:[#allocation5 + $0x2e0] sm:$0xff] }
 0x8bb   :  { %v3975_v38 = vsel %vm1596_vm5, %v3974_v30, %v3973_v18  ;;  %v4285_v39 = vmul.f32 %v4919_v17, %v3702_v41  ;;  %v4399_v30 = vrot.slane %v8770_v59, 4  ;;  %v4924_v17 = vld [vmem:[#allocation5 + $0x300] sm:$0xff] }
 0x8bc   :  { %v4431_v34 = vadd.f32 %v4430_v35, %v4279_v5  ;;  %v3977_v8 = vsel %vm1600_vm6, %v3976_v27, %v3975_v38  ;;  %v4286_v5 = vmul.f32 %v4920_v3, %v3705_v42 }
 0x8bd   :  { %v4400_v63 = vadd.f32 %v4399_v30, %v8770_v59 }
 0x8be   :  { %v4432_v13 = vadd.f32 %v4431_v34, %v4280_v58 }
 0x8bf   :  { %v3690_v43 = vpop.permute.xlu0 %3689 }
 0x8c0   :  { %v3711_v33 = vpop.permute.xlu2 %3710  ;;  %v3978_v44 = vperm.slane %v3690_v43, %v6465_v40  ;;  %v4281_v29 = vmul.f32 %v4915_v55, %v3690_v43 }
 0x8c1   :  { %v3992_v43 = vperm.slane %v3711_v33, %v10033_v19 }
 0x8c2   :  { %v3979_v50 = vsel %vm1604_vm7, %v3978_v44, %v3977_v8  ;;  %v4433_v25 = vadd.f32 %v4432_v13, %v4281_v29  ;;  %v4921_v8 = vld [vmem:[#allocation5 + $0x2f0] sm:$0xff]  ;;  %v4922_v44 = vld [vmem:[#allocation5 + $0x2f8] sm:$0xff] }
 0x8c3   :  { %v3981_v48 = vsel %vm10287_vm11, %v3980_v22, %v3979_v50  ;;  %v4288_v55 = vmul.f32 %v4922_v44, %v3711_v33  ;;  %v4401_v22 = vrot.slane %v4400_v63, 2 }
 0x8c4   :  { %v4434_v54 = vadd.f32 %v4433_v25, %v4282_v47  ;;  %v3983_v14 = vsel %vm10288_vm9, %v3982_v2, %v3981_v48  ;;  %v8919_v2 = vpop.permute.xlu1 %3731  ;;  %v3994_v25 = vperm.slane %v8892_v51, %v6398_v9 }
 0x8c5   :  { %v4402_v47 = vadd.f32 %v4401_v22, %v4400_v63  ;;  %v4929_v22 = vld [vmem:[#allocation5 + $0x330] sm:$0xff] }
 0x8c6   :  { %v4435_v21 = vadd.f32 %v4434_v54, %v4283_v16 }
 0x8c7   :  { %v3699_v52 = vpop.permute.xlu0 %3698  ;;  %v4403_v16 = vrot.slane %v4402_v47, 1 }
 0x8c8   :  { %v8902_v4 = vpop.permute.xlu2 %3719  ;;  %v3984_v26 = vperm.slane %v3699_v52, %v6509_v0  ;;  %v4284_v37 = vmul.f32 %v4918_v7, %v3699_v52 }
 0x8ca   :  { %v3985_v6 = vsel %vm10289_vm10, %v3984_v26, %v3983_v14  ;;  %v4436_v32 = vadd.f32 %v4435_v21, %v4284_v37  ;;  %v4404_v14 = vadd.f32 %v4403_v16, %v4402_v47  ;;  %v4923_v37 = vld [vmem:[#allocation5 + $0x308] sm:$0xff]  ;;  %v4295_v47 = vmul.f32 %v4929_v22, %v8919_v2  ;;  %v4930_v16 = vld [vmem:[#allocation5 + $0x338] sm:$0xff] }
 0x8cb   :  { %v3987_v27 = vsel %vm10290_vm15, %v3986_v53, %v3985_v6 }
 0x8cc   :  { %v4437_v18 = vadd.f32 %v4436_v32, %v4285_v39  ;;  %v3989_v35 = vsel %vm1624_vm12, %v3988_v56, %v3987_v27  ;;  %v8930_v54 = vpop.permute.xlu1 %3740  ;;  %v8936_v26 = vsel %vm10291_vm8, %v4404_v14, %v8884_v10  ;;  %v4289_v39 = vmul.f32 %v4924_v17, %v8892_v51  ;;  %v4925_v32 = vld [vmem:[#allocation5 + $0x310] sm:$0xff]  ;;  %v4926_v10 = vld [vmem:[#allocation5 + $0x318] sm:$0xff] }
 0x8cd   :  { %v4291_v30 = vmul.f32 %v4925_v32, %v8902_v4  ;;  %v4420_v51 = vrot.slane %v8858_v46, 4  ;;  %vm10298_vm8 = vcmask 1045509  }
 0x8ce   :  { %v4438_v38 = vadd.f32 %v4437_v18, %v4286_v5  ;;  %v4292_v18 = vmul.f32 %v4926_v10, %v8905_v23  ;;  %v4932_v10 = vld [vmem:[#allocation5 + $0x340] sm:$0xff] }
 0x8cf   :  { %v3708_v58 = vpop.permute.xlu0 %3707 }
 0x8d0   :  { %v8914_v34 = vpop.permute.xlu2 %3728  ;;  %v3990_v41 = vperm.slane %v3708_v58, %v10029_v45  ;;  %v4287_v13 = vmul.f32 %v4921_v8, %v3708_v58  ;;  %v4928_v8 = vld [vmem:[#allocation5 + $0x328] sm:$0xff] }
 0x8d2   :  { %v3991_v29 = vsel %vm1628_vm13, %v3990_v41, %v3989_v35  ;;  %v4439_v42 = vadd.f32 %v4438_v38, %v4287_v13  ;;  %v4927_v38 = vld [vmem:[#allocation5 + $0x320] sm:$0xff]  ;;  %v4294_v13 = vmul.f32 %v4928_v8, %v8914_v34 }
 0x8d3   :  { %v8922_v60 = vsel %vm1632_vm14, %v3992_v43, %v3991_v29 }
 0x8d4   :  { %v4440_v59 = vadd.f32 %v4439_v42, %v4288_v55  ;;  %v8938_v7 = vpop.permute.xlu1 %3749  ;;  %v3997_v55 = vperm.slane %v8902_v4, %v6410_v12  ;;  %v4421_v42 = vadd.f32 %v4420_v51, %v8858_v46 }
 0x8d6   :  { %v4422_v46 = vrot.slane %v4421_v42, 2 }
 0x8d7   :  { %v3717_v50 = vpop.permute.xlu0 %3716 }
 0x8d8   :  { %v3995_v48 = vperm.slane %v3717_v50, %v6407_v28  ;;  %v8927_v36 = vpop.permute.xlu2 %3737  ;;  %v4290_v53 = vmul.f32 %v4923_v37, %v3717_v50  ;;  %v3999_v37 = vperm.slane %v8905_v23, %v6425_v61  ;;  %v4423_v51 = vadd.f32 %v4422_v46, %v4421_v42 }
 0x8da   :  { %v3996_v33 = vsel %vm1576_vm0, %v3995_v48, %v3994_v25  ;;  %v4447_v6 = vadd.f32 %v4290_v53, %v4289_v39  ;;  %v4441_v53 = vrot.slane %v4440_v59, 4 }
 0x8db   :  { %v3998_v25 = vsel %vm1580_vm1, %v3997_v55, %v3996_v33  ;;  %v4003_v33 = vperm.slane %v8914_v34, %v6440_v62  ;;  %v4005_v34 = vperm.slane %v8919_v2, %v6448_v57 }
 0x8dc   :  { %v4448_v3 = vadd.f32 %v4447_v6, %v4291_v30  ;;  %v8949_v35 = vpop.permute.xlu1 %3758  ;;  %v4000_v17 = vsel %vm1584_vm2, %v3999_v37, %v3998_v25  ;;  %v4931_v30 = vld [vmem:[#allocation5 + $0x380] sm:$0xff]  ;;  %v4935_v25 = vld [vmem:[#allocation5 + $0x350] sm:$0xff]  ;;  %v4009_v37 = vperm.slane %v8927_v36, %v6465_v40 }
 0x8de   :  { %v4449_v58 = vadd.f32 %v4448_v3, %v4292_v18  ;;  %v4442_v3 = vadd.f32 %v4441_v53, %v4440_v59  ;;  %v4297_v18 = vmul.f32 %v4932_v10, %v8927_v36  ;;  %v4934_v59 = vld [vmem:[#allocation5 + $0x348] sm:$0xff]  ;;  %v4938_v10 = vld [vmem:[#allocation5 + $0x3a0] sm:$0xff] }
 0x8df   :  { %v3726_v21 = vpop.permute.xlu0 %3725  ;;  %v4298_v55 = vmul.f32 %v4934_v59, %v8930_v54 }
 0x8e0   :  { %v8932_v52 = vpop.permute.xlu2 %3746  ;;  %v4293_v63 = vmul.f32 %v4927_v38, %v3726_v21  ;;  %v4001_v48 = vperm.slane %v3726_v21, %v6431_v31 }
 0x8e2   :  { %v4450_v41 = vadd.f32 %v4449_v58, %v4293_v63  ;;  %v4002_v39 = vsel %vm10292_vm3, %v4001_v48, %v4000_v17  ;;  %v4933_v58 = vld [vmem:[#allocation5 + $0x388] sm:$0xff]  ;;  %v4936_v48 = vld [vmem:[#allocation5 + $0x390] sm:$0xff]  ;;  %v4011_v17 = vperm.slane %v8930_v54, %v6493_v1 }
 0x8e3   :  { %v4004_v23 = vsel %vm10286_vm4, %v4003_v33, %v4002_v39  ;;  %v4937_v39 = vld [vmem:[#allocation5 + $0x398] sm:$0xff] }
 0x8e4   :  { %v4451_v29 = vadd.f32 %v4450_v41, %v4294_v13  ;;  %v8961_v50 = vpop.permute.xlu1 %3767 }
 0x8e6   :  { %v4452_v4 = vadd.f32 %v4451_v29, %v4295_v47  ;;  %v4443_v29 = vrot.slane %v4442_v3, 2  ;;  %v4006_v47 = vsel %vm1596_vm5, %v4005_v34, %v4004_v23 }
 0x8e7   :  { %v8940_v56 = vpop.permute.xlu0 %3734 }
 0x8e8   :  { %v8944_v27 = vpop.permute.xlu2 %3755  ;;  %v4296_v14 = vmul.f32 %v4930_v16, %v8940_v56  ;;  %v4007_v63 = vperm.slane %v8940_v56, %v6462_v49  ;;  %v4307_v16 = vmul.f32 %v4936_v48, %v8961_v50 }
 0x8ea   :  { %v4453_v6 = vadd.f32 %v4452_v4, %v4296_v14  ;;  %v4008_v42 = vsel %vm1600_vm6, %v4007_v63, %v4006_v47  ;;  %v4424_v14 = vrot.slane %v4423_v51, 1 }
 0x8ec   :  { %v4454_v8 = vadd.f32 %v4453_v6, %v4297_v18  ;;  %v8982_v22 = vpop.permute.xlu1 %3776  ;;  %v4425_v63 = vadd.f32 %v4424_v14, %v4423_v51  ;;  %v4015_v51 = vperm.slane %v8932_v52, %v6509_v0  ;;  %v4943_v14 = vld [vmem:[#allocation5 + $0x3b0] sm:$0xff] }
 0x8ee   :  { %v4455_v53 = vadd.f32 %v4454_v8, %v4298_v55  ;;  %v4940_v55 = vld [vmem:[#allocation5 + $0x3a8] sm:$0xff] }
 0x8ef   :  { %v8946_v5 = vpop.permute.xlu0 %3743 }
 0x8f0   :  { %v8953_v43 = vpop.permute.xlu2 %3764  ;;  %v4299_v56 = vmul.f32 %v4935_v25, %v8946_v5  ;;  %v4942_v25 = vld [vmem:[#allocation5 + $0x368] sm:$0xff] }
 0x8f1   :  { %v4306_v41 = vmul.f32 %v4933_v58, %v8953_v43  ;;  %v4026_v46 = vperm.slane %v8953_v43, %v6407_v28  ;;  %v4028_v28 = vperm.slane %v8961_v50, %v6410_v12  ;;  %v4939_v43 = vld [vmem:[#allocation5 + $0x358] sm:$0xff]  ;;  %v4941_v50 = vld [vmem:[#allocation5 + $0x360] sm:$0xff] }
 0x8f4   :  { %v3786_v47 = vpop.permute.xlu1 %3785 }
 0x8f7   :  { %v8955_v44 = vpop.permute.xlu0 %3752 }
 0x8f8   :  { %v8973_v38 = vpop.permute.xlu2 %3773 }
 0x8f9   :  { %v4309_v36 = vmul.f32 %v4938_v10, %v8973_v38  ;;  %v4032_v48 = vperm.slane %v8973_v38, %v6431_v31  ;;  %v4021_v10 = vperm.slane %v8944_v27, %v10029_v45 }
 0x8ff   :  { %v3762_v32 = vpop.permute.xlu0 %3761 }
 0x900   :  { %v4305_v21 = vmul.f32 %v4931_v30, %v3762_v32  ;;  %v4025_v2 = vperm.slane %v3762_v32, %v6398_v9  ;;  %v4444_v30 = vadd.f32 %v4443_v29, %v4442_v3  ;;  %v4013_v9 = vperm.slane %v8946_v5, %v6505_v11  ;;  %v3783_v58 = vpop.permute.xlu2 %3782 }
 0x901   :  { %v4456_v32 = vadd.f32 %v4455_v53, %v4299_v56  ;;  %v4300_v3 = vmul.f32 %v4939_v43, %v8932_v52  ;;  %v4301_v29 = vmul.f32 %v4941_v50, %v8938_v7  ;;  %v4302_v56 = vmul.f32 %v4942_v25, %v8955_v44 }
 0x902   :  { %v4468_v13 = vadd.f32 %v4306_v41, %v4305_v21  ;;  %v4010_v21 = vsel %vm1604_vm7, %v4009_v37, %v4008_v42  ;;  %v4027_v18 = vsel %vm1576_vm0, %v4026_v46, %v4025_v2  ;;  %v4445_v59 = vrot.slane %v4444_v30, 1 }
 0x903   :  { %v4012_v41 = vsel %vm10287_vm11, %v4011_v17, %v4010_v21  ;;  %v4457_v8 = vadd.f32 %v4456_v32, %v4300_v3  ;;  %vm10293_vm0 = vcmask 1044484   ;;  %v4019_v52 = vperm.slane %v8955_v44, %v6545_v20 }
 0x904   :  { %v4469_v33 = vadd.f32 %v4468_v13, %v4307_v16  ;;  %v4014_v34 = vsel %vm10288_vm9, %v4013_v9, %v4012_v41  ;;  %v4029_v13 = vsel %vm1580_vm1, %v4028_v28, %v4027_v18  ;;  %v4500_v42 = vsel %vm10293_vm0, %v4425_v63, %v8936_v26  ;;  %vm10294_vm1 = vmmov %vm10289_vm10 }
 0x905   :  { %v4016_v2 = vsel %vm10294_vm1, %v4015_v51, %v4014_v34  ;;  %v4458_v17 = vadd.f32 %v4457_v8, %v4301_v29  ;;  %v4446_v38 = vadd.f32 %v4445_v59, %v4444_v30  ;;  %v4034_v26 = vperm.slane %v8982_v22, %v6440_v62  ;;  %vm10296_vm10 = vmmov %vm10290_vm15  ;;  %v3795_v59 = vpop.permute.xlu1 %3794 }
 0x906   :  { %vm10297_vm15 = vmmov %vm10286_vm4  ;;  %v4023_v63 = vperm.slane %v8949_v35, %v10033_v19 }
 0x907   :  { %v3771_v4 = vpop.permute.xlu0 %3770  ;;  %v4459_v21 = vadd.f32 %v4458_v17, %v4302_v56  ;;  %vm10302_vm4 = vmmov %vm10288_vm9 }
 0x908   :  { %v4308_v6 = vmul.f32 %v4937_v39, %v3771_v4  ;;  %v4030_v54 = vperm.slane %v3771_v4, %v6425_v61  ;;  %v4310_v61 = vmul.f32 %v4940_v55, %v8982_v22  ;;  %v4017_v4 = vperm.slane %v8938_v7, %v6531_v15  ;;  %v4944_v39 = vld [vmem:[#allocation5 + $0x3b8] sm:$0xff]  ;;  %v3792_v30 = vpop.permute.xlu2 %3791  ;;  %v4946_v22 = vld [vmem:[#allocation5 + $0x3c0] sm:$0xff]  ;;  %v4949_v55 = vld [vmem:[#allocation5 + $0x3d0] sm:$0xff] }
 0x909   :  { %v4313_v18 = vmul.f32 %v4946_v22, %v3786_v47 }
 0x90a   :  { %v4470_v23 = vadd.f32 %v4469_v33, %v4308_v6  ;;  %v4031_v12 = vsel %vm1584_vm2, %v4030_v54, %v4029_v13  ;;  %vm10295_vm2 = vmmov %vm10292_vm3  ;;  %v4312_v6 = vmul.f32 %v4944_v39, %v3783_v58  ;;  %v4018_v44 = vsel %vm10296_vm10, %v4017_v4, %v4016_v2  ;;  %v4948_v13 = vld [vmem:[#allocation5 + $0x378] sm:$0xff]  ;;  %v4952_v4 = vld [vmem:[#allocation5 + $0x3e8] sm:$0xff] }
 0x90b   :  { %v4033_v46 = vsel %vm10295_vm2, %v4032_v48, %v4031_v12  ;;  %v4020_v9 = vsel %vm1624_vm12, %v4019_v52, %v4018_v44  ;;  %v4038_v54 = vperm.slane %v3783_v58, %v6462_v49  ;;  %v4304_v49 = vmul.f32 %v4948_v13, %v8949_v35 }
 0x90c   :  { %v4471_v5 = vadd.f32 %v4470_v23, %v4309_v36  ;;  %v4035_v32 = vsel %vm10297_vm15, %v4034_v26, %v4033_v46  ;;  %v4945_v36 = vld [vmem:[#allocation5 + $0x370] sm:$0xff]  ;;  %v9035_v23 = vsel %vm10298_vm8, %v4446_v38, %v4500_v42  ;;  %v4022_v28 = vsel %vm1628_vm13, %v4021_v10, %v4020_v9 }
 0x90d   :  { %v4040_v58 = vperm.slane %v3786_v47, %v6465_v40  ;;  %v4024_v12 = vsel %vm1632_vm14, %v4023_v63, %v4022_v28  ;;  %vm10301_vm3 = vcmask 1046534   ;;  %v4044_v40 = vperm.slane %v3792_v30, %v6505_v11  ;;  %v4950_v47 = vld [vmem:[#allocation5 + $0x3d8] sm:$0xff]  ;;  %v3804_v11 = vpop.permute.xlu1 %3803 }
 0x90e   :  { %v4472_v53 = vadd.f32 %v4471_v5, %v4310_v61  ;;  %v4947_v5 = vld [vmem:[#allocation5 + $0x3c8] sm:$0xff]  ;;  %v4315_v61 = vmul.f32 %v4949_v55, %v3792_v30  ;;  %v4316_v48 = vmul.f32 %v4950_v47, %v3795_v59 }
 0x90f   :  { %v3780_v16 = vpop.permute.xlu0 %3779 }
 0x910   :  { %v4311_v37 = vmul.f32 %v4943_v14, %v3780_v16  ;;  %v4036_v31 = vperm.slane %v3780_v16, %v6448_v57  ;;  %v4303_v57 = vmul.f32 %v4945_v36, %v8944_v27  ;;  %v3801_v42 = vpop.permute.xlu2 %3800  ;;  %v4046_v14 = vperm.slane %v3795_v59, %v6509_v0 }
 0x911   :  { %v4318_v17 = vmul.f32 %v4952_v4, %v3801_v42  ;;  %v4050_v39 = vperm.slane %v3801_v42, %v6545_v20 }
 0x912   :  { %v4473_v33 = vadd.f32 %v4472_v53, %v4311_v37  ;;  %v4037_v62 = vsel %vm1596_vm5, %v4036_v31, %v4035_v32  ;;  %v4460_v43 = vadd.f32 %v4459_v21, %v4303_v57  ;;  %vm10299_vm5 = vmmov %vm10298_vm8  ;;  %v4951_v53 = vld [vmem:[#allocation5 + $0x3e0] sm:$0xff] }
 0x913   :  { %v4039_v41 = vsel %vm1600_vm6, %v4038_v54, %v4037_v62  ;;  %vm10300_vm6 = vmmov %vm10287_vm11 }
 0x914   :  { %v4474_v7 = vadd.f32 %v4473_v33, %v4312_v6  ;;  %v4461_v50 = vadd.f32 %v4460_v43, %v4304_v49  ;;  %v4041_v29 = vsel %vm1604_vm7, %v4040_v58, %v4039_v41  ;;  %vm10303_vm7 = vmmov %vm10294_vm1  ;;  %v4953_v33 = vld [vmem:[#allocation5 + $0x3f0] sm:$0xff] }
 0x915   :  { %vm10304_vm11 = vmmov %vm10296_vm10  ;;  %v4319_v44 = vmul.f32 %v4953_v33, %v3804_v11 }
 0x916   :  { %v4475_v8 = vadd.f32 %v4474_v7, %v4313_v18  ;;  %v4462_v16 = vrot.slane %v4461_v50, 4  ;;  %v4954_v7 = vld [vmem:[#allocation5 + $0x3f8] sm:$0xff] }
 0x917   :  { %v3789_v3 = vpop.permute.xlu0 %3788 }
 0x918   :  { %v4042_v27 = vperm.slane %v3789_v3, %v6493_v1  ;;  %v4314_v34 = vmul.f32 %v4947_v5, %v3789_v3  ;;  %v4060_v1 = vsel %vm10299_vm5, %v8922_v60, %v8862_v24  ;;  %v4463_v38 = vadd.f32 %v4462_v16, %v4461_v50 }
 0x919   :  { %v4061_v35 = vsel %vm10301_vm3, %v4024_v12, %v4060_v1 }
 0x91a   :  { %v4476_v51 = vadd.f32 %v4475_v8, %v4314_v34  ;;  %v4043_v25 = vsel %vm10300_vm6, %v4042_v27, %v4041_v29  ;;  %v4464_v21 = vrot.slane %v4463_v38, 2 }
 0x91b   :  { %v4045_v2 = vsel %vm10302_vm4, %v4044_v40, %v4043_v25 }
 0x91c   :  { %v4477_v56 = vadd.f32 %v4476_v51, %v4315_v61  ;;  %v4047_v46 = vsel %vm10303_vm7, %v4046_v14, %v4045_v2 }
 0x91e   :  { %v4478_v60 = vadd.f32 %v4477_v56, %v4316_v48 }
 0x91f   :  { %v3798_v52 = vpop.permute.xlu0 %3797 }
 0x920   :  { %v4048_v37 = vperm.slane %v3798_v52, %v6531_v15  ;;  %v4317_v24 = vmul.f32 %v4951_v53, %v3798_v52  ;;  %v4052_v15 = vperm.slane %v3804_v11, %v10029_v45  ;;  %v4465_v45 = vadd.f32 %v4464_v21, %v4463_v38 }
 0x922   :  { %v4479_v31 = vadd.f32 %v4478_v60, %v4317_v24  ;;  %v4049_v26 = vsel %vm10304_vm11, %v4048_v37, %v4047_v46  ;;  %v4466_v54 = vrot.slane %v4465_v45, 1 }
 0x923   :  { %v4051_v0 = vsel %vm1624_vm12, %v4050_v39, %v4049_v26  ;;  %vm10305_vm12 = vcmask 1047559  }
 0x924   :  { %v4480_v6 = vadd.f32 %v4479_v31, %v4318_v17  ;;  %v4053_v36 = vsel %vm1628_vm13, %v4052_v15, %v4051_v0  ;;  %v4467_v28 = vadd.f32 %v4466_v54, %v4465_v45  ;;  %vm10306_vm13 = vmmov %vm10301_vm3 }
 0x926   :  { %v4481_v20 = vadd.f32 %v4480_v6, %v4319_v44  ;;  %v4502_v41 = vsel %vm10306_vm13, %v4467_v28, %v9035_v23 }
 0x927   :  { %v3807_v9 = vpop.permute.xlu0 %3806 }
 0x928   :  { %v4054_v32 = vperm.slane %v3807_v9, %v10033_v19  ;;  %v4320_v10 = vmul.f32 %v4954_v7, %v3807_v9 }
 0x92a   :  { %v4055_v57 = vsel %vm1632_vm14, %v4054_v32, %v4053_v36  ;;  %v4482_v30 = vadd.f32 %v4481_v20, %v4320_v10  ;;  %vm10307_vm14 = vmmov %vm10305_vm12 }
 0x92b   :  { %v4062_v62 = vsel %vm10305_vm12, %v4055_v57, %v4061_v35 }
 0x92c   :  { %v4483_v22 = vrot.slane %v4482_v30, 4  ;;  %4064 = vst [vmem:[#allocation11] sm:$0xff] %v4062_v62 }
 0x92d   :  { %4527 = dma.vmem_to_hbm [thread:$0]  %s4523_s5, 128, %s4525_s27, [#allocation12]  }
 0x92e   :  { %v4484_v18 = vadd.f32 %v4483_v22, %v4482_v30 }
 0x930   :  { %v4485_v63 = vrot.slane %v4484_v18, 2 }
 0x932   :  { %v4486_v19 = vadd.f32 %v4485_v63, %v4484_v18 }
 0x934   :  { %v4487_v43 = vrot.slane %v4486_v19, 1 }
 0x936   :  { %v4488_v3 = vadd.f32 %v4487_v43, %v4486_v19 }
 0x938   :  { %v4503_v27 = vsel %vm10307_vm14, %v4488_v3, %v4502_v41 }
 0x939   :  { %4505 = vst [vmem:[#allocation10] sm:$0xff] %v4503_v27 }
 0x93a   :  { %4516 = dma.vmem_to_hbm [thread:$0]  %s4512_s28, 128, %s4514_s8, [#allocation4]  }
 0x93b   :  { %5105 = dma.done.wait [#allocation4], 128  }
 0x93c   :  { %5106 = vsyncadd [#allocation4], 4294967168 }
 0x93d   :  { %5107 = dma.done.wait [#allocation12], 128  }
 0x93e   :  { %5108 = vsyncadd [#allocation12], 4294967168 }
 0x93f   :  { %4536 = vsyncpa [#allocation3], 1 }
 0x940   :  { %4537 = vsyncpa [#allocation6], 1 }
 0x941   :  { %4538 = vsyncpa [#allocation9], 1 }
 0x942   :  { %4539 = vsyncpa [#allocation4], 1 }
 0x943   :  { %4540 = vsyncpa [#allocation12], 1 }

</bundles_post_ra>
